<compile_context>
chip_gen: v6e
topology: v6e:2x2x1
jax: 0.10.0
libtpu: 0.0.40
codegen_flags: <defaults>
</compile_context>

<pallas_src>
import functools
import math

import jax
import jax.numpy as jnp
from jax.experimental import pallas as pl
from jax.experimental.pallas import tpu as pltpu


def _round_up(x, m):
    return (x + m - 1) // m * m


# ------------------------- Pallas kernel -------------------------

def _aspp_kernel(x_ref, w_ref, b_ref, o_ref, *, dilations, pad, H, W):
    """Fused multi-branch dilated 3x3 conv + bias + branch sum.

    x_ref: (1, H+2P, W+2P, tk)  bf16  padded activation tile (one image, one K tile)
    w_ref: (NB, 3, 3, tk, Np)   bf16  stacked branch weights for this K tile
    b_ref: (1, Np)              f32   sum of branch biases
    o_ref: (1, H, W, Np)        f32   logits; resident across the K grid axis
    """
    Np = o_ref.shape[-1]

    @pl.when(pl.program_id(1) == 0)
    def _init():
        o_ref[...] = jnp.broadcast_to(b_ref[...].reshape(1, 1, 1, Np), o_ref.shape)

    acc = jnp.zeros((H * W, Np), jnp.float32)
    for bi, d in enumerate(dilations):
        for ki in range(3):
            r0 = pad - d + ki * d
            for kj in range(3):
                c0 = pad - d + kj * d
                # Shifted window of the resident padded tile -> [H*W, tk]
                xs = x_ref[0, r0:r0 + H, c0:c0 + W, :].reshape(H * W, -1)
                acc += jnp.dot(xs, w_ref[bi, ki, kj],
                               preferred_element_type=jnp.float32)

    o_ref[...] += acc.reshape(1, H, W, Np)


# ------------------------- wrapper -------------------------

def aspp_forward(x_nchw, w_stacked, bias_sum, *, dilations, num_classes):
    """x_nchw: (B, Cin, H, W) f32.  w_stacked: (NB,3,3,Kp,Np) bf16 (pre-padded).
    bias_sum: (1, Np) f32 (sum of the per-branch biases). Returns (B, num_classes, H, W) f32."""
    B, Cin, H, W = x_nchw.shape
    NB, _, _, Kp, Np = w_stacked.shape
    P = max(dilations)
    tk = 256 if (Kp % 256 == 0 and Kp >= 256) else 128   # 256-wide K tiles on big channels
    Hp, Wp = H + 2 * P, W + 2 * P

    x = jnp.transpose(x_nchw, (0, 2, 3, 1)).astype(jnp.float32)            # NCHW -> NHWC
    xp = jnp.pad(x, ((0, 0), (P, P), (P, P), (0, Kp - Cin))).astype(jnp.bfloat16)

    kernel = functools.partial(_aspp_kernel, dilations=tuple(dilations),
                               pad=P, H=H, W=W)
    out = pl.pallas_call(
        kernel,
        out_shape=jax.ShapeDtypeStruct((B, H, W, Np), jnp.float32),
        grid_spec=pltpu.PrefetchScalarGridSpec(
            num_scalar_prefetch=0,
            grid=(B, Kp // tk),                       # K (reduction) innermost
            in_specs=[
                pl.BlockSpec((1, Hp, Wp, tk), lambda b, k: (b, 0, 0, k)),
                pl.BlockSpec((NB, 3, 3, tk, Np), lambda b, k: (0, 0, 0, k, 0)),
                pl.BlockSpec((1, Np), lambda b, k: (0, 0)),
            ],
            out_specs=pl.BlockSpec((1, H, W, Np), lambda b, k: (b, 0, 0, 0)),
        ),
        compiler_params=pltpu.CompilerParams(
            dimension_semantics=("parallel", "arbitrary"),
            vmem_limit_bytes=48 * 1024 * 1024,
        ),
    )(xp, w_stacked, bias_sum)

    logits = out[..., :num_classes]
    return jnp.transpose(logits, (0, 3, 1, 2))        # NHWC -> NCHW


# ------------------------- parameters (matches ClassifierModule init) -------------------------

def make_params(key, inplanes, num_classes, dilations):
    """weight ~ N(0, 0.01) (module init); bias ~ U(-1/sqrt(fan_in), 1/sqrt(fan_in)) (Conv2d default)."""
    NB = len(dilations)
    Kp = _round_up(inplanes, 128)
    Np = _round_up(num_classes, 128)
    keys = jax.random.split(key, 2 * NB)
    ws, bs = [], []
    bound = 1.0 / math.sqrt(inplanes * 9)
    for i in range(NB):
        ws.append(0.01 * jax.random.normal(keys[2 * i], (3, 3, inplanes, num_classes), jnp.float32))
        bs.append(jax.random.uniform(keys[2 * i + 1], (num_classes,), jnp.float32, -bound, bound))
    # Pad channels/classes and cast to bf16 once, outside any per-call path.
    w = jnp.stack(ws, axis=0)                                    # (NB,3,3,Cin,NC) HWIO per branch
    w_stacked = jnp.pad(w, ((0, 0), (0, 0), (0, 0),
                            (0, Kp - inplanes), (0, Np - num_classes))).astype(jnp.bfloat16)
    bias_sum = jnp.pad(sum(bs), (0, Np - num_classes)).reshape(1, Np).astype(jnp.float32)
    return ws, bs, w_stacked, bias_sum


# ------------------------- plain-JAX reference (for validation only) -------------------------

def reference_forward(x_nchw, ws, bs, dilations):
    x = jnp.transpose(x_nchw, (0, 2, 3, 1))
    out = None
    for w, b, d in zip(ws, bs, dilations):
        y = jax.lax.conv_general_dilated(
            x, w, window_strides=(1, 1), padding=((d, d), (d, d)),
            rhs_dilation=(d, d),
            dimension_numbers=("NHWC", "HWIO", "NHWC")) + b
        out = y if out is None else out + y
    return jnp.transpose(out, (0, 3, 1, 2))


if __name__ == "__main__":
    B, INPLANES, NUM_CLASSES, SIZE = 2, 64, 5, 16
    DILATIONS = (6, 12, 18, 24)        # dilation_series == padding_series, as in DeepLabV2

    key = jax.random.PRNGKey(0)
    pkey, xkey = jax.random.split(key)
    ws, bs, w_stacked, bias_sum = make_params(pkey, INPLANES, NUM_CLASSES, DILATIONS)
    x = jax.random.normal(xkey, (B, INPLANES, SIZE, SIZE), jnp.float32)

    fwd = jax.jit(functools.partial(aspp_forward, dilations=DILATIONS,
                                    num_classes=NUM_CLASSES))
    out = fwd(x, w_stacked, bias_sum)
    jax.block_until_ready(out)

    assert out.shape == (B, NUM_CLASSES, SIZE, SIZE)
    ref = reference_forward(x, ws, bs, DILATIONS)
    err = float(jnp.max(jnp.abs(out - ref)))
    assert err < 5e-2, f"max abs err vs reference: {err}"
    print("KERNEL_OK")
</pallas_src>

<mosaic_0001>
module attributes {stable_mosaic.version = 11 : i64} {
  func.func @_aspp_kernel(%arg0: i32, %arg1: i32, %arg2: memref<1x64x64x128xbf16, #tpu.memory_space<vmem>>, %arg3: memref<4x3x3x128x128xbf16, #tpu.memory_space<vmem>>, %arg4: memref<1x128xf32, #tpu.memory_space<vmem>>, %arg5: memref<1x16x16x128xf32, #tpu.memory_space<vmem>>) attributes {dimension_semantics = [#tpu.dimension_semantics<parallel>, #tpu.dimension_semantics<arbitrary>], iteration_bounds = array<i64: 2, 1>, scalar_prefetch = 0 : i64, scratch_operands = 0 : i64, tpu.core_type = #tpu.core_type<tc>, window_params = [{transform_indices = @transform_0, window_bounds = array<i64: 1, 64, 64, 128>}, {transform_indices = @transform_1, window_bounds = array<i64: 4, 3, 3, 128, 128>}, {pipeline_mode = #tpu.pipeline_mode<synchronous>, transform_indices = @transform_2, window_bounds = array<i64: 1, 128>}, {transform_indices = @transform_3, window_bounds = array<i64: 1, 16, 16, 128>}]} {
    %c0_i32 = arith.constant 0 : i32
    %0 = arith.cmpi eq, %arg1, %c0_i32 : i32
    %1 = arith.extui %0 : i1 to i32
    %c0_i32_0 = arith.constant 0 : i32
    %2 = arith.cmpi ne, %1, %c0_i32_0 : i32
    scf.if %2 {
      %c0_357 = arith.constant 0 : index
      %c0_358 = arith.constant 0 : index
      %260 = vector.load %arg4[%c0_357, %c0_358] : memref<1x128xf32, #tpu.memory_space<vmem>>, vector<1x128xf32>
      %261 = vector.shape_cast %260 : vector<1x128xf32> to vector<1x1x1x128xf32>
      %262 = vector.shape_cast %261 : vector<1x1x1x128xf32> to vector<1x1x1x128xf32>
      %263 = vector.broadcast %262 : vector<1x1x1x128xf32> to vector<1x16x16x128xf32>
      %c0_359 = arith.constant 0 : index
      %c0_360 = arith.constant 0 : index
      %c0_361 = arith.constant 0 : index
      %c0_362 = arith.constant 0 : index
      %264 = vector.load %arg5[%c0_359, %c0_360, %c0_361, %c0_362] : memref<1x16x16x128xf32, #tpu.memory_space<vmem>>, vector<1x16x16x128xf32>
      tpu.vector_store %arg5[%c0_359, %c0_360, %c0_361, %c0_362], %263 {strides = array<i32>} : memref<1x16x16x128xf32, #tpu.memory_space<vmem>>, vector<1x16x16x128xf32>,
    } else {
    }
    %cst = arith.constant 0.000000e+00 : f32
    %3 = vector.broadcast %cst : f32 to vector<256x128xf32>
    %c0 = arith.constant 0 : index
    %c18 = arith.constant 18 : index
    %c18_1 = arith.constant 18 : index
    %c0_2 = arith.constant 0 : index
    %4 = vector.load %arg2[%c0, %c18, %c18_1, %c0_2] : memref<1x64x64x128xbf16, #tpu.memory_space<vmem>>, vector<1x16x16x128xbf16>
    %5 = vector.shape_cast %4 : vector<1x16x16x128xbf16> to vector<16x16x128xbf16>
    %6 = vector.shape_cast %5 : vector<16x16x128xbf16> to vector<256x128xbf16>
    %c0_3 = arith.constant 0 : index
    %c0_4 = arith.constant 0 : index
    %c0_5 = arith.constant 0 : index
    %c0_6 = arith.constant 0 : index
    %c0_7 = arith.constant 0 : index
    %7 = vector.load %arg3[%c0_3, %c0_4, %c0_5, %c0_6, %c0_7] : memref<4x3x3x128x128xbf16, #tpu.memory_space<vmem>>, vector<1x1x1x128x128xbf16>
    %8 = vector.shape_cast %7 : vector<1x1x1x128x128xbf16> to vector<128x128xbf16>
    %cst_8 = arith.constant dense<0.000000e+00> : vector<256x128xf32>
    %9 = tpu.matmul %6, %8, %cst_8 {dimension_numbers = #tpu.dot_dimension_numbers<[1], [0], [0], [1], [0, 0, 1, 1], [], []>} : vector<256x128xbf16>, vector<128x128xbf16>, vector<256x128xf32> -> vector<256x128xf32>
    %10 = arith.addf %3, %9 : vector<256x128xf32>
    %c0_9 = arith.constant 0 : index
    %c18_10 = arith.constant 18 : index
    %c24 = arith.constant 24 : index
    %c0_11 = arith.constant 0 : index
    %11 = vector.load %arg2[%c0_9, %c18_10, %c24, %c0_11] : memref<1x64x64x128xbf16, #tpu.memory_space<vmem>>, vector<1x16x16x128xbf16>
    %12 = vector.shape_cast %11 : vector<1x16x16x128xbf16> to vector<16x16x128xbf16>
    %13 = vector.shape_cast %12 : vector<16x16x128xbf16> to vector<256x128xbf16>
    %c0_12 = arith.constant 0 : index
    %c0_13 = arith.constant 0 : index
    %c1 = arith.constant 1 : index
    %c0_14 = arith.constant 0 : index
    %c0_15 = arith.constant 0 : index
    %14 = vector.load %arg3[%c0_12, %c0_13, %c1, %c0_14, %c0_15] : memref<4x3x3x128x128xbf16, #tpu.memory_space<vmem>>, vector<1x1x1x128x128xbf16>
    %15 = vector.shape_cast %14 : vector<1x1x1x128x128xbf16> to vector<128x128xbf16>
    %cst_16 = arith.constant dense<0.000000e+00> : vector<256x128xf32>
    %16 = tpu.matmul %13, %15, %cst_16 {dimension_numbers = #tpu.dot_dimension_numbers<[1], [0], [0], [1], [0, 0, 1, 1], [], []>} : vector<256x128xbf16>, vector<128x128xbf16>, vector<256x128xf32> -> vector<256x128xf32>
    %17 = arith.addf %10, %16 : vector<256x128xf32>
    %c0_17 = arith.constant 0 : index
    %c18_18 = arith.constant 18 : index
    %c30 = arith.constant 30 : index
    %c0_19 = arith.constant 0 : index
    %18 = vector.load %arg2[%c0_17, %c18_18, %c30, %c0_19] : memref<1x64x64x128xbf16, #tpu.memory_space<vmem>>, vector<1x16x16x128xbf16>
    %19 = vector.shape_cast %18 : vector<1x16x16x128xbf16> to vector<16x16x128xbf16>
    %20 = vector.shape_cast %19 : vector<16x16x128xbf16> to vector<256x128xbf16>
    %c0_20 = arith.constant 0 : index
    %c0_21 = arith.constant 0 : index
    %c2 = arith.constant 2 : index
    %c0_22 = arith.constant 0 : index
    %c0_23 = arith.constant 0 : index
    %21 = vector.load %arg3[%c0_20, %c0_21, %c2, %c0_22, %c0_23] : memref<4x3x3x128x128xbf16, #tpu.memory_space<vmem>>, vector<1x1x1x128x128xbf16>
    %22 = vector.shape_cast %21 : vector<1x1x1x128x128xbf16> to vector<128x128xbf16>
    %cst_24 = arith.constant dense<0.000000e+00> : vector<256x128xf32>
    %23 = tpu.matmul %20, %22, %cst_24 {dimension_numbers = #tpu.dot_dimension_numbers<[1], [0], [0], [1], [0, 0, 1, 1], [], []>} : vector<256x128xbf16>, vector<128x128xbf16>, vector<256x128xf32> -> vector<256x128xf32>
    %24 = arith.addf %17, %23 : vector<256x128xf32>
    %c0_25 = arith.constant 0 : index
    %c24_26 = arith.constant 24 : index
    %c18_27 = arith.constant 18 : index
    %c0_28 = arith.constant 0 : index
    %25 = vector.load %arg2[%c0_25, %c24_26, %c18_27, %c0_28] : memref<1x64x64x128xbf16, #tpu.memory_space<vmem>>, vector<1x16x16x128xbf16>
    %26 = vector.shape_cast %25 : vector<1x16x16x128xbf16> to vector<16x16x128xbf16>
    %27 = vector.shape_cast %26 : vector<16x16x128xbf16> to vector<256x128xbf16>
    %c0_29 = arith.constant 0 : index
    %c1_30 = arith.constant 1 : index
    %c0_31 = arith.constant 0 : index
    %c0_32 = arith.constant 0 : index
    %c0_33 = arith.constant 0 : index
    %28 = vector.load %arg3[%c0_29, %c1_30, %c0_31, %c0_32, %c0_33] : memref<4x3x3x128x128xbf16, #tpu.memory_space<vmem>>, vector<1x1x1x128x128xbf16>
    %29 = vector.shape_cast %28 : vector<1x1x1x128x128xbf16> to vector<128x128xbf16>
    %cst_34 = arith.constant dense<0.000000e+00> : vector<256x128xf32>
    %30 = tpu.matmul %27, %29, %cst_34 {dimension_numbers = #tpu.dot_dimension_numbers<[1], [0], [0], [1], [0, 0, 1, 1], [], []>} : vector<256x128xbf16>, vector<128x128xbf16>, vector<256x128xf32> -> vector<256x128xf32>
    %31 = arith.addf %24, %30 : vector<256x128xf32>
    %c0_35 = arith.constant 0 : index
    %c24_36 = arith.constant 24 : index
    %c24_37 = arith.constant 24 : index
    %c0_38 = arith.constant 0 : index
    %32 = vector.load %arg2[%c0_35, %c24_36, %c24_37, %c0_38] : memref<1x64x64x128xbf16, #tpu.memory_space<vmem>>, vector<1x16x16x128xbf16>
    %33 = vector.shape_cast %32 : vector<1x16x16x128xbf16> to vector<16x16x128xbf16>
    %34 = vector.shape_cast %33 : vector<16x16x128xbf16> to vector<256x128xbf16>
    %c0_39 = arith.constant 0 : index
    %c1_40 = arith.constant 1 : index
    %c1_41 = arith.constant 1 : index
    %c0_42 = arith.constant 0 : index
    %c0_43 = arith.constant 0 : index
    %35 = vector.load %arg3[%c0_39, %c1_40, %c1_41, %c0_42, %c0_43] : memref<4x3x3x128x128xbf16, #tpu.memory_space<vmem>>, vector<1x1x1x128x128xbf16>
    %36 = vector.shape_cast %35 : vector<1x1x1x128x128xbf16> to vector<128x128xbf16>
    %cst_44 = arith.constant dense<0.000000e+00> : vector<256x128xf32>
    %37 = tpu.matmul %34, %36, %cst_44 {dimension_numbers = #tpu.dot_dimension_numbers<[1], [0], [0], [1], [0, 0, 1, 1], [], []>} : vector<256x128xbf16>, vector<128x128xbf16>, vector<256x128xf32> -> vector<256x128xf32>
    %38 = arith.addf %31, %37 : vector<256x128xf32>
    %c0_45 = arith.constant 0 : index
    %c24_46 = arith.constant 24 : index
    %c30_47 = arith.constant 30 : index
    %c0_48 = arith.constant 0 : index
    %39 = vector.load %arg2[%c0_45, %c24_46, %c30_47, %c0_48] : memref<1x64x64x128xbf16, #tpu.memory_space<vmem>>, vector<1x16x16x128xbf16>
    %40 = vector.shape_cast %39 : vector<1x16x16x128xbf16> to vector<16x16x128xbf16>
    %41 = vector.shape_cast %40 : vector<16x16x128xbf16> to vector<256x128xbf16>
    %c0_49 = arith.constant 0 : index
    %c1_50 = arith.constant 1 : index
    %c2_51 = arith.constant 2 : index
    %c0_52 = arith.constant 0 : index
    %c0_53 = arith.constant 0 : index
    %42 = vector.load %arg3[%c0_49, %c1_50, %c2_51, %c0_52, %c0_53] : memref<4x3x3x128x128xbf16, #tpu.memory_space<vmem>>, vector<1x1x1x128x128xbf16>
    %43 = vector.shape_cast %42 : vector<1x1x1x128x128xbf16> to vector<128x128xbf16>
    %cst_54 = arith.constant dense<0.000000e+00> : vector<256x128xf32>
    %44 = tpu.matmul %41, %43, %cst_54 {dimension_numbers = #tpu.dot_dimension_numbers<[1], [0], [0], [1], [0, 0, 1, 1], [], []>} : vector<256x128xbf16>, vector<128x128xbf16>, vector<256x128xf32> -> vector<256x128xf32>
    %45 = arith.addf %38, %44 : vector<256x128xf32>
    %c0_55 = arith.constant 0 : index
    %c30_56 = arith.constant 30 : index
    %c18_57 = arith.constant 18 : index
    %c0_58 = arith.constant 0 : index
    %46 = vector.load %arg2[%c0_55, %c30_56, %c18_57, %c0_58] : memref<1x64x64x128xbf16, #tpu.memory_space<vmem>>, vector<1x16x16x128xbf16>
    %47 = vector.shape_cast %46 : vector<1x16x16x128xbf16> to vector<16x16x128xbf16>
    %48 = vector.shape_cast %47 : vector<16x16x128xbf16> to vector<256x128xbf16>
    %c0_59 = arith.constant 0 : index
    %c2_60 = arith.constant 2 : index
    %c0_61 = arith.constant 0 : index
    %c0_62 = arith.constant 0 : index
    %c0_63 = arith.constant 0 : index
    %49 = vector.load %arg3[%c0_59, %c2_60, %c0_61, %c0_62, %c0_63] : memref<4x3x3x128x128xbf16, #tpu.memory_space<vmem>>, vector<1x1x1x128x128xbf16>
    %50 = vector.shape_cast %49 : vector<1x1x1x128x128xbf16> to vector<128x128xbf16>
    %cst_64 = arith.constant dense<0.000000e+00> : vector<256x128xf32>
    %51 = tpu.matmul %48, %50, %cst_64 {dimension_numbers = #tpu.dot_dimension_numbers<[1], [0], [0], [1], [0, 0, 1, 1], [], []>} : vector<256x128xbf16>, vector<128x128xbf16>, vector<256x128xf32> -> vector<256x128xf32>
    %52 = arith.addf %45, %51 : vector<256x128xf32>
    %c0_65 = arith.constant 0 : index
    %c30_66 = arith.constant 30 : index
    %c24_67 = arith.constant 24 : index
    %c0_68 = arith.constant 0 : index
    %53 = vector.load %arg2[%c0_65, %c30_66, %c24_67, %c0_68] : memref<1x64x64x128xbf16, #tpu.memory_space<vmem>>, vector<1x16x16x128xbf16>
    %54 = vector.shape_cast %53 : vector<1x16x16x128xbf16> to vector<16x16x128xbf16>
    %55 = vector.shape_cast %54 : vector<16x16x128xbf16> to vector<256x128xbf16>
    %c0_69 = arith.constant 0 : index
    %c2_70 = arith.constant 2 : index
    %c1_71 = arith.constant 1 : index
    %c0_72 = arith.constant 0 : index
    %c0_73 = arith.constant 0 : index
    %56 = vector.load %arg3[%c0_69, %c2_70, %c1_71, %c0_72, %c0_73] : memref<4x3x3x128x128xbf16, #tpu.memory_space<vmem>>, vector<1x1x1x128x128xbf16>
    %57 = vector.shape_cast %56 : vector<1x1x1x128x128xbf16> to vector<128x128xbf16>
    %cst_74 = arith.constant dense<0.000000e+00> : vector<256x128xf32>
    %58 = tpu.matmul %55, %57, %cst_74 {dimension_numbers = #tpu.dot_dimension_numbers<[1], [0], [0], [1], [0, 0, 1, 1], [], []>} : vector<256x128xbf16>, vector<128x128xbf16>, vector<256x128xf32> -> vector<256x128xf32>
    %59 = arith.addf %52, %58 : vector<256x128xf32>
    %c0_75 = arith.constant 0 : index
    %c30_76 = arith.constant 30 : index
    %c30_77 = arith.constant 30 : index
    %c0_78 = arith.constant 0 : index
    %60 = vector.load %arg2[%c0_75, %c30_76, %c30_77, %c0_78] : memref<1x64x64x128xbf16, #tpu.memory_space<vmem>>, vector<1x16x16x128xbf16>
    %61 = vector.shape_cast %60 : vector<1x16x16x128xbf16> to vector<16x16x128xbf16>
    %62 = vector.shape_cast %61 : vector<16x16x128xbf16> to vector<256x128xbf16>
    %c0_79 = arith.constant 0 : index
    %c2_80 = arith.constant 2 : index
    %c2_81 = arith.constant 2 : index
    %c0_82 = arith.constant 0 : index
    %c0_83 = arith.constant 0 : index
    %63 = vector.load %arg3[%c0_79, %c2_80, %c2_81, %c0_82, %c0_83] : memref<4x3x3x128x128xbf16, #tpu.memory_space<vmem>>, vector<1x1x1x128x128xbf16>
    %64 = vector.shape_cast %63 : vector<1x1x1x128x128xbf16> to vector<128x128xbf16>
    %cst_84 = arith.constant dense<0.000000e+00> : vector<256x128xf32>
    %65 = tpu.matmul %62, %64, %cst_84 {dimension_numbers = #tpu.dot_dimension_numbers<[1], [0], [0], [1], [0, 0, 1, 1], [], []>} : vector<256x128xbf16>, vector<128x128xbf16>, vector<256x128xf32> -> vector<256x128xf32>
    %66 = arith.addf %59, %65 : vector<256x128xf32>
    %c0_85 = arith.constant 0 : index
    %c12 = arith.constant 12 : index
    %c12_86 = arith.constant 12 : index
    %c0_87 = arith.constant 0 : index
    %67 = vector.load %arg2[%c0_85, %c12, %c12_86, %c0_87] : memref<1x64x64x128xbf16, #tpu.memory_space<vmem>>, vector<1x16x16x128xbf16>
    %68 = vector.shape_cast %67 : vector<1x16x16x128xbf16> to vector<16x16x128xbf16>
    %69 = vector.shape_cast %68 : vector<16x16x128xbf16> to vector<256x128xbf16>
    %c1_88 = arith.constant 1 : index
    %c0_89 = arith.constant 0 : index
    %c0_90 = arith.constant 0 : index
    %c0_91 = arith.constant 0 : index
    %c0_92 = arith.constant 0 : index
    %70 = vector.load %arg3[%c1_88, %c0_89, %c0_90, %c0_91, %c0_92] : memref<4x3x3x128x128xbf16, #tpu.memory_space<vmem>>, vector<1x1x1x128x128xbf16>
    %71 = vector.shape_cast %70 : vector<1x1x1x128x128xbf16> to vector<128x128xbf16>
    %cst_93 = arith.constant dense<0.000000e+00> : vector<256x128xf32>
    %72 = tpu.matmul %69, %71, %cst_93 {dimension_numbers = #tpu.dot_dimension_numbers<[1], [0], [0], [1], [0, 0, 1, 1], [], []>} : vector<256x128xbf16>, vector<128x128xbf16>, vector<256x128xf32> -> vector<256x128xf32>
    %73 = arith.addf %66, %72 : vector<256x128xf32>
    %c0_94 = arith.constant 0 : index
    %c12_95 = arith.constant 12 : index
    %c24_96 = arith.constant 24 : index
    %c0_97 = arith.constant 0 : index
    %74 = vector.load %arg2[%c0_94, %c12_95, %c24_96, %c0_97] : memref<1x64x64x128xbf16, #tpu.memory_space<vmem>>, vector<1x16x16x128xbf16>
    %75 = vector.shape_cast %74 : vector<1x16x16x128xbf16> to vector<16x16x128xbf16>
    %76 = vector.shape_cast %75 : vector<16x16x128xbf16> to vector<256x128xbf16>
    %c1_98 = arith.constant 1 : index
    %c0_99 = arith.constant 0 : index
    %c1_100 = arith.constant 1 : index
    %c0_101 = arith.constant 0 : index
    %c0_102 = arith.constant 0 : index
    %77 = vector.load %arg3[%c1_98, %c0_99, %c1_100, %c0_101, %c0_102] : memref<4x3x3x128x128xbf16, #tpu.memory_space<vmem>>, vector<1x1x1x128x128xbf16>
    %78 = vector.shape_cast %77 : vector<1x1x1x128x128xbf16> to vector<128x128xbf16>
    %cst_103 = arith.constant dense<0.000000e+00> : vector<256x128xf32>
    %79 = tpu.matmul %76, %78, %cst_103 {dimension_numbers = #tpu.dot_dimension_numbers<[1], [0], [0], [1], [0, 0, 1, 1], [], []>} : vector<256x128xbf16>, vector<128x128xbf16>, vector<256x128xf32> -> vector<256x128xf32>
    %80 = arith.addf %73, %79 : vector<256x128xf32>
    %c0_104 = arith.constant 0 : index
    %c12_105 = arith.constant 12 : index
    %c36 = arith.constant 36 : index
    %c0_106 = arith.constant 0 : index
    %81 = vector.load %arg2[%c0_104, %c12_105, %c36, %c0_106] : memref<1x64x64x128xbf16, #tpu.memory_space<vmem>>, vector<1x16x16x128xbf16>
    %82 = vector.shape_cast %81 : vector<1x16x16x128xbf16> to vector<16x16x128xbf16>
    %83 = vector.shape_cast %82 : vector<16x16x128xbf16> to vector<256x128xbf16>
    %c1_107 = arith.constant 1 : index
    %c0_108 = arith.constant 0 : index
    %c2_109 = arith.constant 2 : index
    %c0_110 = arith.constant 0 : index
    %c0_111 = arith.constant 0 : index
    %84 = vector.load %arg3[%c1_107, %c0_108, %c2_109, %c0_110, %c0_111] : memref<4x3x3x128x128xbf16, #tpu.memory_space<vmem>>, vector<1x1x1x128x128xbf16>
    %85 = vector.shape_cast %84 : vector<1x1x1x128x128xbf16> to vector<128x128xbf16>
    %cst_112 = arith.constant dense<0.000000e+00> : vector<256x128xf32>
    %86 = tpu.matmul %83, %85, %cst_112 {dimension_numbers = #tpu.dot_dimension_numbers<[1], [0], [0], [1], [0, 0, 1, 1], [], []>} : vector<256x128xbf16>, vector<128x128xbf16>, vector<256x128xf32> -> vector<256x128xf32>
    %87 = arith.addf %80, %86 : vector<256x128xf32>
    %c0_113 = arith.constant 0 : index
    %c24_114 = arith.constant 24 : index
    %c12_115 = arith.constant 12 : index
    %c0_116 = arith.constant 0 : index
    %88 = vector.load %arg2[%c0_113, %c24_114, %c12_115, %c0_116] : memref<1x64x64x128xbf16, #tpu.memory_space<vmem>>, vector<1x16x16x128xbf16>
    %89 = vector.shape_cast %88 : vector<1x16x16x128xbf16> to vector<16x16x128xbf16>
    %90 = vector.shape_cast %89 : vector<16x16x128xbf16> to vector<256x128xbf16>
    %c1_117 = arith.constant 1 : index
    %c1_118 = arith.constant 1 : index
    %c0_119 = arith.constant 0 : index
    %c0_120 = arith.constant 0 : index
    %c0_121 = arith.constant 0 : index
    %91 = vector.load %arg3[%c1_117, %c1_118, %c0_119, %c0_120, %c0_121] : memref<4x3x3x128x128xbf16, #tpu.memory_space<vmem>>, vector<1x1x1x128x128xbf16>
    %92 = vector.shape_cast %91 : vector<1x1x1x128x128xbf16> to vector<128x128xbf16>
    %cst_122 = arith.constant dense<0.000000e+00> : vector<256x128xf32>
    %93 = tpu.matmul %90, %92, %cst_122 {dimension_numbers = #tpu.dot_dimension_numbers<[1], [0], [0], [1], [0, 0, 1, 1], [], []>} : vector<256x128xbf16>, vector<128x128xbf16>, vector<256x128xf32> -> vector<256x128xf32>
    %94 = arith.addf %87, %93 : vector<256x128xf32>
    %c0_123 = arith.constant 0 : index
    %c24_124 = arith.constant 24 : index
    %c24_125 = arith.constant 24 : index
    %c0_126 = arith.constant 0 : index
    %95 = vector.load %arg2[%c0_123, %c24_124, %c24_125, %c0_126] : memref<1x64x64x128xbf16, #tpu.memory_space<vmem>>, vector<1x16x16x128xbf16>
    %96 = vector.shape_cast %95 : vector<1x16x16x128xbf16> to vector<16x16x128xbf16>
    %97 = vector.shape_cast %96 : vector<16x16x128xbf16> to vector<256x128xbf16>
    %c1_127 = arith.constant 1 : index
    %c1_128 = arith.constant 1 : index
    %c1_129 = arith.constant 1 : index
    %c0_130 = arith.constant 0 : index
    %c0_131 = arith.constant 0 : index
    %98 = vector.load %arg3[%c1_127, %c1_128, %c1_129, %c0_130, %c0_131] : memref<4x3x3x128x128xbf16, #tpu.memory_space<vmem>>, vector<1x1x1x128x128xbf16>
    %99 = vector.shape_cast %98 : vector<1x1x1x128x128xbf16> to vector<128x128xbf16>
    %cst_132 = arith.constant dense<0.000000e+00> : vector<256x128xf32>
    %100 = tpu.matmul %97, %99, %cst_132 {dimension_numbers = #tpu.dot_dimension_numbers<[1], [0], [0], [1], [0, 0, 1, 1], [], []>} : vector<256x128xbf16>, vector<128x128xbf16>, vector<256x128xf32> -> vector<256x128xf32>
    %101 = arith.addf %94, %100 : vector<256x128xf32>
    %c0_133 = arith.constant 0 : index
    %c24_134 = arith.constant 24 : index
    %c36_135 = arith.constant 36 : index
    %c0_136 = arith.constant 0 : index
    %102 = vector.load %arg2[%c0_133, %c24_134, %c36_135, %c0_136] : memref<1x64x64x128xbf16, #tpu.memory_space<vmem>>, vector<1x16x16x128xbf16>
    %103 = vector.shape_cast %102 : vector<1x16x16x128xbf16> to vector<16x16x128xbf16>
    %104 = vector.shape_cast %103 : vector<16x16x128xbf16> to vector<256x128xbf16>
    %c1_137 = arith.constant 1 : index
    %c1_138 = arith.constant 1 : index
    %c2_139 = arith.constant 2 : index
    %c0_140 = arith.constant 0 : index
    %c0_141 = arith.constant 0 : index
    %105 = vector.load %arg3[%c1_137, %c1_138, %c2_139, %c0_140, %c0_141] : memref<4x3x3x128x128xbf16, #tpu.memory_space<vmem>>, vector<1x1x1x128x128xbf16>
    %106 = vector.shape_cast %105 : vector<1x1x1x128x128xbf16> to vector<128x128xbf16>
    %cst_142 = arith.constant dense<0.000000e+00> : vector<256x128xf32>
    %107 = tpu.matmul %104, %106, %cst_142 {dimension_numbers = #tpu.dot_dimension_numbers<[1], [0], [0], [1], [0, 0, 1, 1], [], []>} : vector<256x128xbf16>, vector<128x128xbf16>, vector<256x128xf32> -> vector<256x128xf32>
    %108 = arith.addf %101, %107 : vector<256x128xf32>
    %c0_143 = arith.constant 0 : index
    %c36_144 = arith.constant 36 : index
    %c12_145 = arith.constant 12 : index
    %c0_146 = arith.constant 0 : index
    %109 = vector.load %arg2[%c0_143, %c36_144, %c12_145, %c0_146] : memref<1x64x64x128xbf16, #tpu.memory_space<vmem>>, vector<1x16x16x128xbf16>
    %110 = vector.shape_cast %109 : vector<1x16x16x128xbf16> to vector<16x16x128xbf16>
    %111 = vector.shape_cast %110 : vector<16x16x128xbf16> to vector<256x128xbf16>
    %c1_147 = arith.constant 1 : index
    %c2_148 = arith.constant 2 : index
    %c0_149 = arith.constant 0 : index
    %c0_150 = arith.constant 0 : index
    %c0_151 = arith.constant 0 : index
    %112 = vector.load %arg3[%c1_147, %c2_148, %c0_149, %c0_150, %c0_151] : memref<4x3x3x128x128xbf16, #tpu.memory_space<vmem>>, vector<1x1x1x128x128xbf16>
    %113 = vector.shape_cast %112 : vector<1x1x1x128x128xbf16> to vector<128x128xbf16>
    %cst_152 = arith.constant dense<0.000000e+00> : vector<256x128xf32>
    %114 = tpu.matmul %111, %113, %cst_152 {dimension_numbers = #tpu.dot_dimension_numbers<[1], [0], [0], [1], [0, 0, 1, 1], [], []>} : vector<256x128xbf16>, vector<128x128xbf16>, vector<256x128xf32> -> vector<256x128xf32>
    %115 = arith.addf %108, %114 : vector<256x128xf32>
    %c0_153 = arith.constant 0 : index
    %c36_154 = arith.constant 36 : index
    %c24_155 = arith.constant 24 : index
    %c0_156 = arith.constant 0 : index
    %116 = vector.load %arg2[%c0_153, %c36_154, %c24_155, %c0_156] : memref<1x64x64x128xbf16, #tpu.memory_space<vmem>>, vector<1x16x16x128xbf16>
    %117 = vector.shape_cast %116 : vector<1x16x16x128xbf16> to vector<16x16x128xbf16>
    %118 = vector.shape_cast %117 : vector<16x16x128xbf16> to vector<256x128xbf16>
    %c1_157 = arith.constant 1 : index
    %c2_158 = arith.constant 2 : index
    %c1_159 = arith.constant 1 : index
    %c0_160 = arith.constant 0 : index
    %c0_161 = arith.constant 0 : index
    %119 = vector.load %arg3[%c1_157, %c2_158, %c1_159, %c0_160, %c0_161] : memref<4x3x3x128x128xbf16, #tpu.memory_space<vmem>>, vector<1x1x1x128x128xbf16>
    %120 = vector.shape_cast %119 : vector<1x1x1x128x128xbf16> to vector<128x128xbf16>
    %cst_162 = arith.constant dense<0.000000e+00> : vector<256x128xf32>
    %121 = tpu.matmul %118, %120, %cst_162 {dimension_numbers = #tpu.dot_dimension_numbers<[1], [0], [0], [1], [0, 0, 1, 1], [], []>} : vector<256x128xbf16>, vector<128x128xbf16>, vector<256x128xf32> -> vector<256x128xf32>
    %122 = arith.addf %115, %121 : vector<256x128xf32>
    %c0_163 = arith.constant 0 : index
    %c36_164 = arith.constant 36 : index
    %c36_165 = arith.constant 36 : index
    %c0_166 = arith.constant 0 : index
    %123 = vector.load %arg2[%c0_163, %c36_164, %c36_165, %c0_166] : memref<1x64x64x128xbf16, #tpu.memory_space<vmem>>, vector<1x16x16x128xbf16>
    %124 = vector.shape_cast %123 : vector<1x16x16x128xbf16> to vector<16x16x128xbf16>
    %125 = vector.shape_cast %124 : vector<16x16x128xbf16> to vector<256x128xbf16>
    %c1_167 = arith.constant 1 : index
    %c2_168 = arith.constant 2 : index
    %c2_169 = arith.constant 2 : index
    %c0_170 = arith.constant 0 : index
    %c0_171 = arith.constant 0 : index
    %126 = vector.load %arg3[%c1_167, %c2_168, %c2_169, %c0_170, %c0_171] : memref<4x3x3x128x128xbf16, #tpu.memory_space<vmem>>, vector<1x1x1x128x128xbf16>
    %127 = vector.shape_cast %126 : vector<1x1x1x128x128xbf16> to vector<128x128xbf16>
    %cst_172 = arith.constant dense<0.000000e+00> : vector<256x128xf32>
    %128 = tpu.matmul %125, %127, %cst_172 {dimension_numbers = #tpu.dot_dimension_numbers<[1], [0], [0], [1], [0, 0, 1, 1], [], []>} : vector<256x128xbf16>, vector<128x128xbf16>, vector<256x128xf32> -> vector<256x128xf32>
    %129 = arith.addf %122, %128 : vector<256x128xf32>
    %c0_173 = arith.constant 0 : index
    %c6 = arith.constant 6 : index
    %c6_174 = arith.constant 6 : index
    %c0_175 = arith.constant 0 : index
    %130 = vector.load %arg2[%c0_173, %c6, %c6_174, %c0_175] : memref<1x64x64x128xbf16, #tpu.memory_space<vmem>>, vector<1x16x16x128xbf16>
    %131 = vector.shape_cast %130 : vector<1x16x16x128xbf16> to vector<16x16x128xbf16>
    %132 = vector.shape_cast %131 : vector<16x16x128xbf16> to vector<256x128xbf16>
    %c2_176 = arith.constant 2 : index
    %c0_177 = arith.constant 0 : index
    %c0_178 = arith.constant 0 : index
    %c0_179 = arith.constant 0 : index
    %c0_180 = arith.constant 0 : index
    %133 = vector.load %arg3[%c2_176, %c0_177, %c0_178, %c0_179, %c0_180] : memref<4x3x3x128x128xbf16, #tpu.memory_space<vmem>>, vector<1x1x1x128x128xbf16>
    %134 = vector.shape_cast %133 : vector<1x1x1x128x128xbf16> to vector<128x128xbf16>
    %cst_181 = arith.constant dense<0.000000e+00> : vector<256x128xf32>
    %135 = tpu.matmul %132, %134, %cst_181 {dimension_numbers = #tpu.dot_dimension_numbers<[1], [0], [0], [1], [0, 0, 1, 1], [], []>} : vector<256x128xbf16>, vector<128x128xbf16>, vector<256x128xf32> -> vector<256x128xf32>
    %136 = arith.addf %129, %135 : vector<256x128xf32>
    %c0_182 = arith.constant 0 : index
    %c6_183 = arith.constant 6 : index
    %c24_184 = arith.constant 24 : index
    %c0_185 = arith.constant 0 : index
    %137 = vector.load %arg2[%c0_182, %c6_183, %c24_184, %c0_185] : memref<1x64x64x128xbf16, #tpu.memory_space<vmem>>, vector<1x16x16x128xbf16>
    %138 = vector.shape_cast %137 : vector<1x16x16x128xbf16> to vector<16x16x128xbf16>
    %139 = vector.shape_cast %138 : vector<16x16x128xbf16> to vector<256x128xbf16>
    %c2_186 = arith.constant 2 : index
    %c0_187 = arith.constant 0 : index
    %c1_188 = arith.constant 1 : index
    %c0_189 = arith.constant 0 : index
    %c0_190 = arith.constant 0 : index
    %140 = vector.load %arg3[%c2_186, %c0_187, %c1_188, %c0_189, %c0_190] : memref<4x3x3x128x128xbf16, #tpu.memory_space<vmem>>, vector<1x1x1x128x128xbf16>
    %141 = vector.shape_cast %140 : vector<1x1x1x128x128xbf16> to vector<128x128xbf16>
    %cst_191 = arith.constant dense<0.000000e+00> : vector<256x128xf32>
    %142 = tpu.matmul %139, %141, %cst_191 {dimension_numbers = #tpu.dot_dimension_numbers<[1], [0], [0], [1], [0, 0, 1, 1], [], []>} : vector<256x128xbf16>, vector<128x128xbf16>, vector<256x128xf32> -> vector<256x128xf32>
    %143 = arith.addf %136, %142 : vector<256x128xf32>
    %c0_192 = arith.constant 0 : index
    %c6_193 = arith.constant 6 : index
    %c42 = arith.constant 42 : index
    %c0_194 = arith.constant 0 : index
    %144 = vector.load %arg2[%c0_192, %c6_193, %c42, %c0_194] : memref<1x64x64x128xbf16, #tpu.memory_space<vmem>>, vector<1x16x16x128xbf16>
    %145 = vector.shape_cast %144 : vector<1x16x16x128xbf16> to vector<16x16x128xbf16>
    %146 = vector.shape_cast %145 : vector<16x16x128xbf16> to vector<256x128xbf16>
    %c2_195 = arith.constant 2 : index
    %c0_196 = arith.constant 0 : index
    %c2_197 = arith.constant 2 : index
    %c0_198 = arith.constant 0 : index
    %c0_199 = arith.constant 0 : index
    %147 = vector.load %arg3[%c2_195, %c0_196, %c2_197, %c0_198, %c0_199] : memref<4x3x3x128x128xbf16, #tpu.memory_space<vmem>>, vector<1x1x1x128x128xbf16>
    %148 = vector.shape_cast %147 : vector<1x1x1x128x128xbf16> to vector<128x128xbf16>
    %cst_200 = arith.constant dense<0.000000e+00> : vector<256x128xf32>
    %149 = tpu.matmul %146, %148, %cst_200 {dimension_numbers = #tpu.dot_dimension_numbers<[1], [0], [0], [1], [0, 0, 1, 1], [], []>} : vector<256x128xbf16>, vector<128x128xbf16>, vector<256x128xf32> -> vector<256x128xf32>
    %150 = arith.addf %143, %149 : vector<256x128xf32>
    %c0_201 = arith.constant 0 : index
    %c24_202 = arith.constant 24 : index
    %c6_203 = arith.constant 6 : index
    %c0_204 = arith.constant 0 : index
    %151 = vector.load %arg2[%c0_201, %c24_202, %c6_203, %c0_204] : memref<1x64x64x128xbf16, #tpu.memory_space<vmem>>, vector<1x16x16x128xbf16>
    %152 = vector.shape_cast %151 : vector<1x16x16x128xbf16> to vector<16x16x128xbf16>
    %153 = vector.shape_cast %152 : vector<16x16x128xbf16> to vector<256x128xbf16>
    %c2_205 = arith.constant 2 : index
    %c1_206 = arith.constant 1 : index
    %c0_207 = arith.constant 0 : index
    %c0_208 = arith.constant 0 : index
    %c0_209 = arith.constant 0 : index
    %154 = vector.load %arg3[%c2_205, %c1_206, %c0_207, %c0_208, %c0_209] : memref<4x3x3x128x128xbf16, #tpu.memory_space<vmem>>, vector<1x1x1x128x128xbf16>
    %155 = vector.shape_cast %154 : vector<1x1x1x128x128xbf16> to vector<128x128xbf16>
    %cst_210 = arith.constant dense<0.000000e+00> : vector<256x128xf32>
    %156 = tpu.matmul %153, %155, %cst_210 {dimension_numbers = #tpu.dot_dimension_numbers<[1], [0], [0], [1], [0, 0, 1, 1], [], []>} : vector<256x128xbf16>, vector<128x128xbf16>, vector<256x128xf32> -> vector<256x128xf32>
    %157 = arith.addf %150, %156 : vector<256x128xf32>
    %c0_211 = arith.constant 0 : index
    %c24_212 = arith.constant 24 : index
    %c24_213 = arith.constant 24 : index
    %c0_214 = arith.constant 0 : index
    %158 = vector.load %arg2[%c0_211, %c24_212, %c24_213, %c0_214] : memref<1x64x64x128xbf16, #tpu.memory_space<vmem>>, vector<1x16x16x128xbf16>
    %159 = vector.shape_cast %158 : vector<1x16x16x128xbf16> to vector<16x16x128xbf16>
    %160 = vector.shape_cast %159 : vector<16x16x128xbf16> to vector<256x128xbf16>
    %c2_215 = arith.constant 2 : index
    %c1_216 = arith.constant 1 : index
    %c1_217 = arith.constant 1 : index
    %c0_218 = arith.constant 0 : index
    %c0_219 = arith.constant 0 : index
    %161 = vector.load %arg3[%c2_215, %c1_216, %c1_217, %c0_218, %c0_219] : memref<4x3x3x128x128xbf16, #tpu.memory_space<vmem>>, vector<1x1x1x128x128xbf16>
    %162 = vector.shape_cast %161 : vector<1x1x1x128x128xbf16> to vector<128x128xbf16>
    %cst_220 = arith.constant dense<0.000000e+00> : vector<256x128xf32>
    %163 = tpu.matmul %160, %162, %cst_220 {dimension_numbers = #tpu.dot_dimension_numbers<[1], [0], [0], [1], [0, 0, 1, 1], [], []>} : vector<256x128xbf16>, vector<128x128xbf16>, vector<256x128xf32> -> vector<256x128xf32>
    %164 = arith.addf %157, %163 : vector<256x128xf32>
    %c0_221 = arith.constant 0 : index
    %c24_222 = arith.constant 24 : index
    %c42_223 = arith.constant 42 : index
    %c0_224 = arith.constant 0 : index
    %165 = vector.load %arg2[%c0_221, %c24_222, %c42_223, %c0_224] : memref<1x64x64x128xbf16, #tpu.memory_space<vmem>>, vector<1x16x16x128xbf16>
    %166 = vector.shape_cast %165 : vector<1x16x16x128xbf16> to vector<16x16x128xbf16>
    %167 = vector.shape_cast %166 : vector<16x16x128xbf16> to vector<256x128xbf16>
    %c2_225 = arith.constant 2 : index
    %c1_226 = arith.constant 1 : index
    %c2_227 = arith.constant 2 : index
    %c0_228 = arith.constant 0 : index
    %c0_229 = arith.constant 0 : index
    %168 = vector.load %arg3[%c2_225, %c1_226, %c2_227, %c0_228, %c0_229] : memref<4x3x3x128x128xbf16, #tpu.memory_space<vmem>>, vector<1x1x1x128x128xbf16>
    %169 = vector.shape_cast %168 : vector<1x1x1x128x128xbf16> to vector<128x128xbf16>
    %cst_230 = arith.constant dense<0.000000e+00> : vector<256x128xf32>
    %170 = tpu.matmul %167, %169, %cst_230 {dimension_numbers = #tpu.dot_dimension_numbers<[1], [0], [0], [1], [0, 0, 1, 1], [], []>} : vector<256x128xbf16>, vector<128x128xbf16>, vector<256x128xf32> -> vector<256x128xf32>
    %171 = arith.addf %164, %170 : vector<256x128xf32>
    %c0_231 = arith.constant 0 : index
    %c42_232 = arith.constant 42 : index
    %c6_233 = arith.constant 6 : index
    %c0_234 = arith.constant 0 : index
    %172 = vector.load %arg2[%c0_231, %c42_232, %c6_233, %c0_234] : memref<1x64x64x128xbf16, #tpu.memory_space<vmem>>, vector<1x16x16x128xbf16>
    %173 = vector.shape_cast %172 : vector<1x16x16x128xbf16> to vector<16x16x128xbf16>
    %174 = vector.shape_cast %173 : vector<16x16x128xbf16> to vector<256x128xbf16>
    %c2_235 = arith.constant 2 : index
    %c2_236 = arith.constant 2 : index
    %c0_237 = arith.constant 0 : index
    %c0_238 = arith.constant 0 : index
    %c0_239 = arith.constant 0 : index
    %175 = vector.load %arg3[%c2_235, %c2_236, %c0_237, %c0_238, %c0_239] : memref<4x3x3x128x128xbf16, #tpu.memory_space<vmem>>, vector<1x1x1x128x128xbf16>
    %176 = vector.shape_cast %175 : vector<1x1x1x128x128xbf16> to vector<128x128xbf16>
    %cst_240 = arith.constant dense<0.000000e+00> : vector<256x128xf32>
    %177 = tpu.matmul %174, %176, %cst_240 {dimension_numbers = #tpu.dot_dimension_numbers<[1], [0], [0], [1], [0, 0, 1, 1], [], []>} : vector<256x128xbf16>, vector<128x128xbf16>, vector<256x128xf32> -> vector<256x128xf32>
    %178 = arith.addf %171, %177 : vector<256x128xf32>
    %c0_241 = arith.constant 0 : index
    %c42_242 = arith.constant 42 : index
    %c24_243 = arith.constant 24 : index
    %c0_244 = arith.constant 0 : index
    %179 = vector.load %arg2[%c0_241, %c42_242, %c24_243, %c0_244] : memref<1x64x64x128xbf16, #tpu.memory_space<vmem>>, vector<1x16x16x128xbf16>
    %180 = vector.shape_cast %179 : vector<1x16x16x128xbf16> to vector<16x16x128xbf16>
    %181 = vector.shape_cast %180 : vector<16x16x128xbf16> to vector<256x128xbf16>
    %c2_245 = arith.constant 2 : index
    %c2_246 = arith.constant 2 : index
    %c1_247 = arith.constant 1 : index
    %c0_248 = arith.constant 0 : index
    %c0_249 = arith.constant 0 : index
    %182 = vector.load %arg3[%c2_245, %c2_246, %c1_247, %c0_248, %c0_249] : memref<4x3x3x128x128xbf16, #tpu.memory_space<vmem>>, vector<1x1x1x128x128xbf16>
    %183 = vector.shape_cast %182 : vector<1x1x1x128x128xbf16> to vector<128x128xbf16>
    %cst_250 = arith.constant dense<0.000000e+00> : vector<256x128xf32>
    %184 = tpu.matmul %181, %183, %cst_250 {dimension_numbers = #tpu.dot_dimension_numbers<[1], [0], [0], [1], [0, 0, 1, 1], [], []>} : vector<256x128xbf16>, vector<128x128xbf16>, vector<256x128xf32> -> vector<256x128xf32>
    %185 = arith.addf %178, %184 : vector<256x128xf32>
    %c0_251 = arith.constant 0 : index
    %c42_252 = arith.constant 42 : index
    %c42_253 = arith.constant 42 : index
    %c0_254 = arith.constant 0 : index
    %186 = vector.load %arg2[%c0_251, %c42_252, %c42_253, %c0_254] : memref<1x64x64x128xbf16, #tpu.memory_space<vmem>>, vector<1x16x16x128xbf16>
    %187 = vector.shape_cast %186 : vector<1x16x16x128xbf16> to vector<16x16x128xbf16>
    %188 = vector.shape_cast %187 : vector<16x16x128xbf16> to vector<256x128xbf16>
    %c2_255 = arith.constant 2 : index
    %c2_256 = arith.constant 2 : index
    %c2_257 = arith.constant 2 : index
    %c0_258 = arith.constant 0 : index
    %c0_259 = arith.constant 0 : index
    %189 = vector.load %arg3[%c2_255, %c2_256, %c2_257, %c0_258, %c0_259] : memref<4x3x3x128x128xbf16, #tpu.memory_space<vmem>>, vector<1x1x1x128x128xbf16>
    %190 = vector.shape_cast %189 : vector<1x1x1x128x128xbf16> to vector<128x128xbf16>
    %cst_260 = arith.constant dense<0.000000e+00> : vector<256x128xf32>
    %191 = tpu.matmul %188, %190, %cst_260 {dimension_numbers = #tpu.dot_dimension_numbers<[1], [0], [0], [1], [0, 0, 1, 1], [], []>} : vector<256x128xbf16>, vector<128x128xbf16>, vector<256x128xf32> -> vector<256x128xf32>
    %192 = arith.addf %185, %191 : vector<256x128xf32>
    %c0_261 = arith.constant 0 : index
    %c0_262 = arith.constant 0 : index
    %c0_263 = arith.constant 0 : index
    %c0_264 = arith.constant 0 : index
    %193 = vector.load %arg2[%c0_261, %c0_262, %c0_263, %c0_264] : memref<1x64x64x128xbf16, #tpu.memory_space<vmem>>, vector<1x16x16x128xbf16>
    %194 = vector.shape_cast %193 : vector<1x16x16x128xbf16> to vector<16x16x128xbf16>
    %195 = vector.shape_cast %194 : vector<16x16x128xbf16> to vector<256x128xbf16>
    %c3 = arith.constant 3 : index
    %c0_265 = arith.constant 0 : index
    %c0_266 = arith.constant 0 : index
    %c0_267 = arith.constant 0 : index
    %c0_268 = arith.constant 0 : index
    %196 = vector.load %arg3[%c3, %c0_265, %c0_266, %c0_267, %c0_268] : memref<4x3x3x128x128xbf16, #tpu.memory_space<vmem>>, vector<1x1x1x128x128xbf16>
    %197 = vector.shape_cast %196 : vector<1x1x1x128x128xbf16> to vector<128x128xbf16>
    %cst_269 = arith.constant dense<0.000000e+00> : vector<256x128xf32>
    %198 = tpu.matmul %195, %197, %cst_269 {dimension_numbers = #tpu.dot_dimension_numbers<[1], [0], [0], [1], [0, 0, 1, 1], [], []>} : vector<256x128xbf16>, vector<128x128xbf16>, vector<256x128xf32> -> vector<256x128xf32>
    %199 = arith.addf %192, %198 : vector<256x128xf32>
    %c0_270 = arith.constant 0 : index
    %c0_271 = arith.constant 0 : index
    %c24_272 = arith.constant 24 : index
    %c0_273 = arith.constant 0 : index
    %200 = vector.load %arg2[%c0_270, %c0_271, %c24_272, %c0_273] : memref<1x64x64x128xbf16, #tpu.memory_space<vmem>>, vector<1x16x16x128xbf16>
    %201 = vector.shape_cast %200 : vector<1x16x16x128xbf16> to vector<16x16x128xbf16>
    %202 = vector.shape_cast %201 : vector<16x16x128xbf16> to vector<256x128xbf16>
    %c3_274 = arith.constant 3 : index
    %c0_275 = arith.constant 0 : index
    %c1_276 = arith.constant 1 : index
    %c0_277 = arith.constant 0 : index
    %c0_278 = arith.constant 0 : index
    %203 = vector.load %arg3[%c3_274, %c0_275, %c1_276, %c0_277, %c0_278] : memref<4x3x3x128x128xbf16, #tpu.memory_space<vmem>>, vector<1x1x1x128x128xbf16>
    %204 = vector.shape_cast %203 : vector<1x1x1x128x128xbf16> to vector<128x128xbf16>
    %cst_279 = arith.constant dense<0.000000e+00> : vector<256x128xf32>
    %205 = tpu.matmul %202, %204, %cst_279 {dimension_numbers = #tpu.dot_dimension_numbers<[1], [0], [0], [1], [0, 0, 1, 1], [], []>} : vector<256x128xbf16>, vector<128x128xbf16>, vector<256x128xf32> -> vector<256x128xf32>
    %206 = arith.addf %199, %205 : vector<256x128xf32>
    %c0_280 = arith.constant 0 : index
    %c0_281 = arith.constant 0 : index
    %c48 = arith.constant 48 : index
    %c0_282 = arith.constant 0 : index
    %207 = vector.load %arg2[%c0_280, %c0_281, %c48, %c0_282] : memref<1x64x64x128xbf16, #tpu.memory_space<vmem>>, vector<1x16x16x128xbf16>
    %208 = vector.shape_cast %207 : vector<1x16x16x128xbf16> to vector<16x16x128xbf16>
    %209 = vector.shape_cast %208 : vector<16x16x128xbf16> to vector<256x128xbf16>
    %c3_283 = arith.constant 3 : index
    %c0_284 = arith.constant 0 : index
    %c2_285 = arith.constant 2 : index
    %c0_286 = arith.constant 0 : index
    %c0_287 = arith.constant 0 : index
    %210 = vector.load %arg3[%c3_283, %c0_284, %c2_285, %c0_286, %c0_287] : memref<4x3x3x128x128xbf16, #tpu.memory_space<vmem>>, vector<1x1x1x128x128xbf16>
    %211 = vector.shape_cast %210 : vector<1x1x1x128x128xbf16> to vector<128x128xbf16>
    %cst_288 = arith.constant dense<0.000000e+00> : vector<256x128xf32>
    %212 = tpu.matmul %209, %211, %cst_288 {dimension_numbers = #tpu.dot_dimension_numbers<[1], [0], [0], [1], [0, 0, 1, 1], [], []>} : vector<256x128xbf16>, vector<128x128xbf16>, vector<256x128xf32> -> vector<256x128xf32>
    %213 = arith.addf %206, %212 : vector<256x128xf32>
    %c0_289 = arith.constant 0 : index
    %c24_290 = arith.constant 24 : index
    %c0_291 = arith.constant 0 : index
    %c0_292 = arith.constant 0 : index
    %214 = vector.load %arg2[%c0_289, %c24_290, %c0_291, %c0_292] : memref<1x64x64x128xbf16, #tpu.memory_space<vmem>>, vector<1x16x16x128xbf16>
    %215 = vector.shape_cast %214 : vector<1x16x16x128xbf16> to vector<16x16x128xbf16>
    %216 = vector.shape_cast %215 : vector<16x16x128xbf16> to vector<256x128xbf16>
    %c3_293 = arith.constant 3 : index
    %c1_294 = arith.constant 1 : index
    %c0_295 = arith.constant 0 : index
    %c0_296 = arith.constant 0 : index
    %c0_297 = arith.constant 0 : index
    %217 = vector.load %arg3[%c3_293, %c1_294, %c0_295, %c0_296, %c0_297] : memref<4x3x3x128x128xbf16, #tpu.memory_space<vmem>>, vector<1x1x1x128x128xbf16>
    %218 = vector.shape_cast %217 : vector<1x1x1x128x128xbf16> to vector<128x128xbf16>
    %cst_298 = arith.constant dense<0.000000e+00> : vector<256x128xf32>
    %219 = tpu.matmul %216, %218, %cst_298 {dimension_numbers = #tpu.dot_dimension_numbers<[1], [0], [0], [1], [0, 0, 1, 1], [], []>} : vector<256x128xbf16>, vector<128x128xbf16>, vector<256x128xf32> -> vector<256x128xf32>
    %220 = arith.addf %213, %219 : vector<256x128xf32>
    %c0_299 = arith.constant 0 : index
    %c24_300 = arith.constant 24 : index
    %c24_301 = arith.constant 24 : index
    %c0_302 = arith.constant 0 : index
    %221 = vector.load %arg2[%c0_299, %c24_300, %c24_301, %c0_302] : memref<1x64x64x128xbf16, #tpu.memory_space<vmem>>, vector<1x16x16x128xbf16>
    %222 = vector.shape_cast %221 : vector<1x16x16x128xbf16> to vector<16x16x128xbf16>
    %223 = vector.shape_cast %222 : vector<16x16x128xbf16> to vector<256x128xbf16>
    %c3_303 = arith.constant 3 : index
    %c1_304 = arith.constant 1 : index
    %c1_305 = arith.constant 1 : index
    %c0_306 = arith.constant 0 : index
    %c0_307 = arith.constant 0 : index
    %224 = vector.load %arg3[%c3_303, %c1_304, %c1_305, %c0_306, %c0_307] : memref<4x3x3x128x128xbf16, #tpu.memory_space<vmem>>, vector<1x1x1x128x128xbf16>
    %225 = vector.shape_cast %224 : vector<1x1x1x128x128xbf16> to vector<128x128xbf16>
    %cst_308 = arith.constant dense<0.000000e+00> : vector<256x128xf32>
    %226 = tpu.matmul %223, %225, %cst_308 {dimension_numbers = #tpu.dot_dimension_numbers<[1], [0], [0], [1], [0, 0, 1, 1], [], []>} : vector<256x128xbf16>, vector<128x128xbf16>, vector<256x128xf32> -> vector<256x128xf32>
    %227 = arith.addf %220, %226 : vector<256x128xf32>
    %c0_309 = arith.constant 0 : index
    %c24_310 = arith.constant 24 : index
    %c48_311 = arith.constant 48 : index
    %c0_312 = arith.constant 0 : index
    %228 = vector.load %arg2[%c0_309, %c24_310, %c48_311, %c0_312] : memref<1x64x64x128xbf16, #tpu.memory_space<vmem>>, vector<1x16x16x128xbf16>
    %229 = vector.shape_cast %228 : vector<1x16x16x128xbf16> to vector<16x16x128xbf16>
    %230 = vector.shape_cast %229 : vector<16x16x128xbf16> to vector<256x128xbf16>
    %c3_313 = arith.constant 3 : index
    %c1_314 = arith.constant 1 : index
    %c2_315 = arith.constant 2 : index
    %c0_316 = arith.constant 0 : index
    %c0_317 = arith.constant 0 : index
    %231 = vector.load %arg3[%c3_313, %c1_314, %c2_315, %c0_316, %c0_317] : memref<4x3x3x128x128xbf16, #tpu.memory_space<vmem>>, vector<1x1x1x128x128xbf16>
    %232 = vector.shape_cast %231 : vector<1x1x1x128x128xbf16> to vector<128x128xbf16>
    %cst_318 = arith.constant dense<0.000000e+00> : vector<256x128xf32>
    %233 = tpu.matmul %230, %232, %cst_318 {dimension_numbers = #tpu.dot_dimension_numbers<[1], [0], [0], [1], [0, 0, 1, 1], [], []>} : vector<256x128xbf16>, vector<128x128xbf16>, vector<256x128xf32> -> vector<256x128xf32>
    %234 = arith.addf %227, %233 : vector<256x128xf32>
    %c0_319 = arith.constant 0 : index
    %c48_320 = arith.constant 48 : index
    %c0_321 = arith.constant 0 : index
    %c0_322 = arith.constant 0 : index
    %235 = vector.load %arg2[%c0_319, %c48_320, %c0_321, %c0_322] : memref<1x64x64x128xbf16, #tpu.memory_space<vmem>>, vector<1x16x16x128xbf16>
    %236 = vector.shape_cast %235 : vector<1x16x16x128xbf16> to vector<16x16x128xbf16>
    %237 = vector.shape_cast %236 : vector<16x16x128xbf16> to vector<256x128xbf16>
    %c3_323 = arith.constant 3 : index
    %c2_324 = arith.constant 2 : index
    %c0_325 = arith.constant 0 : index
    %c0_326 = arith.constant 0 : index
    %c0_327 = arith.constant 0 : index
    %238 = vector.load %arg3[%c3_323, %c2_324, %c0_325, %c0_326, %c0_327] : memref<4x3x3x128x128xbf16, #tpu.memory_space<vmem>>, vector<1x1x1x128x128xbf16>
    %239 = vector.shape_cast %238 : vector<1x1x1x128x128xbf16> to vector<128x128xbf16>
    %cst_328 = arith.constant dense<0.000000e+00> : vector<256x128xf32>
    %240 = tpu.matmul %237, %239, %cst_328 {dimension_numbers = #tpu.dot_dimension_numbers<[1], [0], [0], [1], [0, 0, 1, 1], [], []>} : vector<256x128xbf16>, vector<128x128xbf16>, vector<256x128xf32> -> vector<256x128xf32>
    %241 = arith.addf %234, %240 : vector<256x128xf32>
    %c0_329 = arith.constant 0 : index
    %c48_330 = arith.constant 48 : index
    %c24_331 = arith.constant 24 : index
    %c0_332 = arith.constant 0 : index
    %242 = vector.load %arg2[%c0_329, %c48_330, %c24_331, %c0_332] : memref<1x64x64x128xbf16, #tpu.memory_space<vmem>>, vector<1x16x16x128xbf16>
    %243 = vector.shape_cast %242 : vector<1x16x16x128xbf16> to vector<16x16x128xbf16>
    %244 = vector.shape_cast %243 : vector<16x16x128xbf16> to vector<256x128xbf16>
    %c3_333 = arith.constant 3 : index
    %c2_334 = arith.constant 2 : index
    %c1_335 = arith.constant 1 : index
    %c0_336 = arith.constant 0 : index
    %c0_337 = arith.constant 0 : index
    %245 = vector.load %arg3[%c3_333, %c2_334, %c1_335, %c0_336, %c0_337] : memref<4x3x3x128x128xbf16, #tpu.memory_space<vmem>>, vector<1x1x1x128x128xbf16>
    %246 = vector.shape_cast %245 : vector<1x1x1x128x128xbf16> to vector<128x128xbf16>
    %cst_338 = arith.constant dense<0.000000e+00> : vector<256x128xf32>
    %247 = tpu.matmul %244, %246, %cst_338 {dimension_numbers = #tpu.dot_dimension_numbers<[1], [0], [0], [1], [0, 0, 1, 1], [], []>} : vector<256x128xbf16>, vector<128x128xbf16>, vector<256x128xf32> -> vector<256x128xf32>
    %248 = arith.addf %241, %247 : vector<256x128xf32>
    %c0_339 = arith.constant 0 : index
    %c48_340 = arith.constant 48 : index
    %c48_341 = arith.constant 48 : index
    %c0_342 = arith.constant 0 : index
    %249 = vector.load %arg2[%c0_339, %c48_340, %c48_341, %c0_342] : memref<1x64x64x128xbf16, #tpu.memory_space<vmem>>, vector<1x16x16x128xbf16>
    %250 = vector.shape_cast %249 : vector<1x16x16x128xbf16> to vector<16x16x128xbf16>
    %251 = vector.shape_cast %250 : vector<16x16x128xbf16> to vector<256x128xbf16>
    %c3_343 = arith.constant 3 : index
    %c2_344 = arith.constant 2 : index
    %c2_345 = arith.constant 2 : index
    %c0_346 = arith.constant 0 : index
    %c0_347 = arith.constant 0 : index
    %252 = vector.load %arg3[%c3_343, %c2_344, %c2_345, %c0_346, %c0_347] : memref<4x3x3x128x128xbf16, #tpu.memory_space<vmem>>, vector<1x1x1x128x128xbf16>
    %253 = vector.shape_cast %252 : vector<1x1x1x128x128xbf16> to vector<128x128xbf16>
    %cst_348 = arith.constant dense<0.000000e+00> : vector<256x128xf32>
    %254 = tpu.matmul %251, %253, %cst_348 {dimension_numbers = #tpu.dot_dimension_numbers<[1], [0], [0], [1], [0, 0, 1, 1], [], []>} : vector<256x128xbf16>, vector<128x128xbf16>, vector<256x128xf32> -> vector<256x128xf32>
    %255 = arith.addf %248, %254 : vector<256x128xf32>
    %c0_349 = arith.constant 0 : index
    %c0_350 = arith.constant 0 : index
    %c0_351 = arith.constant 0 : index
    %c0_352 = arith.constant 0 : index
    %256 = vector.load %arg5[%c0_349, %c0_350, %c0_351, %c0_352] : memref<1x16x16x128xf32, #tpu.memory_space<vmem>>, vector<1x16x16x128xf32>
    %257 = vector.shape_cast %255 : vector<256x128xf32> to vector<1x16x16x128xf32>
    %258 = arith.addf %256, %257 : vector<1x16x16x128xf32>
    %c0_353 = arith.constant 0 : index
    %c0_354 = arith.constant 0 : index
    %c0_355 = arith.constant 0 : index
    %c0_356 = arith.constant 0 : index
    %259 = vector.load %arg5[%c0_353, %c0_354, %c0_355, %c0_356] : memref<1x16x16x128xf32, #tpu.memory_space<vmem>>, vector<1x16x16x128xf32>
    tpu.vector_store %arg5[%c0_353, %c0_354, %c0_355, %c0_356], %258 {strides = array<i32>} : memref<1x16x16x128xf32, #tpu.memory_space<vmem>>, vector<1x16x16x128xf32>,
    return
  }
  func.func @transform_0(%arg0: i32, %arg1: i32) -> (i32, i32, i32, i32) {
    %c0_i32 = arith.constant 0 : i32
    %c0_i32_0 = arith.constant 0 : i32
    %c0_i32_1 = arith.constant 0 : i32
    return %arg0, %c0_i32, %c0_i32_0, %arg1 : i32, i32, i32, i32
  }
  func.func @transform_1(%arg0: i32, %arg1: i32) -> (i32, i32, i32, i32, i32) {
    %c0_i32 = arith.constant 0 : i32
    %c0_i32_0 = arith.constant 0 : i32
    %c0_i32_1 = arith.constant 0 : i32
    %c0_i32_2 = arith.constant 0 : i32
    %c0_i32_3 = arith.constant 0 : i32
    return %c0_i32, %c0_i32_0, %c0_i32_1, %arg1, %c0_i32_2 : i32, i32, i32, i32, i32
  }
  func.func @transform_2(%arg0: i32, %arg1: i32) -> (i32, i32) {
    %c0_i32 = arith.constant 0 : i32
    %c0_i32_0 = arith.constant 0 : i32
    %c0_i32_1 = arith.constant 0 : i32
    return %c0_i32, %c0_i32_0 : i32, i32
  }
  func.func @transform_3(%arg0: i32, %arg1: i32) -> (i32, i32, i32, i32) {
    %c0_i32 = arith.constant 0 : i32
    %c0_i32_0 = arith.constant 0 : i32
    %c0_i32_1 = arith.constant 0 : i32
    %c0_i32_2 = arith.constant 0 : i32
    return %arg0, %c0_i32, %c0_i32_0, %c0_i32_1 : i32, i32, i32, i32
  }
}

</mosaic_0001>

<bundles_post_ra>
// kernel: aspp_forward.1
= control target key start
LH: loop header
LB: loop body
LE: loop exit
PB: predicated region body
PF: predicated region fallthrough
CT: control target
= control target key end

     0   :  { %s22436_s12 = smov 0   ;;  %s22438_s13 = smov 0   ;;  %s30892_s0 = inlined_call_operand.vmem [shape: bf16[2,64,64,128], index: 0, kind: input, shape index: {}]   ;;  %s30893_s1 = inlined_call_operand.vmem [shape: bf16[4,3,3,128,128], index: 1, kind: input, shape index: {}]   ;;  %s30894_s2 = inlined_call_operand.vmem [shape: f32[1,128], index: 2, kind: input, shape index: {}]   ;;  %s30895_s3 = inlined_call_operand.vmem [shape: f32[2,16,16,128], index: 3, kind: output, shape index: {}]  }
   0x1   :  { %s22440_s14 = smov 0  }
   0x2 LB: > { %s25_s15 = sadd.s32 1, %s22410_s13  ;;  %p16374_p0 = scmp.ge.s32.totalorder %s22414_s14, 1  ;;  %s22414_s14 = sphi %s22440_s14, %s13_s14   ;;  %s22410_s13 = sphi %s22438_s13, %s31528_s13   ;;  %s22406_s12 = sphi %s22436_s12, %s31527_s12  }
   0x3   : > { %p27_p1 = scmp.ge.s32.totalorder %s25_s15, 2  ;;  %p165_p2 = scmp.lt.s32.totalorder %s22414_s14, 3 }
   0x5   : > { %s31530_s15 = smov (%p27_p1, %s25_s15), 0  ;;  %p166_p3 = pnand %p16374_p0, %p165_p2 }
   0x7   : > { %169 = sbr.rel (%p166_p3) target bundleno = 1404 (0x57c), region = 32 }
   0xc   : > { %v21848_v0 = vld [vmem:[%s30893_s1 + $0x78] sm:$0xff]   ;;  %v21850_v2 = vld [vmem:[%s30893_s1 + $0x70] sm:$0xff]   ;;  %p197_p4 = scmp.lt.s32.totalorder %s22406_s12, 1  ;;  %v21852_v4 = vld [vmem:[%s30893_s1 + $0x68] sm:$0xff]   ;;  %vm357_vm0 = vcmask 1042432   ;;  %vm358_vm1 = vcmask 1046532  }
   0xd   : > { %v21849_v1 = vld [vmem:[%s30893_s1 + $0x38] sm:$0xff]   ;;  %20096 = vmatprep.subr.bf16.mxu0 %v21848_v0  ;;  %v21851_v3 = vld [vmem:[%s30893_s1 + $0x30] sm:$0xff]   ;;  %v21853_v5 = vld [vmem:[%s30893_s1 + $0x28] sm:$0xff]   ;;  %v30951_v18 = vmov 0  ;;  %vm1179_vm3 = vcmask 1040384   ;;  %vm1180_vm4 = vcmask 1044484  }
   0xe   : > { %20144 = vmatprep.subr.bf16.mxu1 %v21849_v1  ;;  %20097 = vmatpush3.bf16.msra.mxu0 %v21848_v0  ;;  %s31532_s12 = smov (!%p197_p4, %s22406_s12), 1  ;;  %v21854_v6 = vld [vmem:[%s30893_s1 + $0x60] sm:$0xff]   ;;  %v21856_v8 = vld [vmem:[%s30893_s1 + $0x58] sm:$0xff]   ;;  %v21858_v10 = vld [vmem:[%s30893_s1 + $0x50] sm:$0xff]   ;;  %vm4543_vm6 = vcmask 1041408   ;;  %vm4544_vm7 = vcmask 1045508  }
   0xf   : > { %20145 = vmatpush3.bf16.msra.mxu1 %v21849_v1  ;;  %20098 = vmatprep.subr.bf16.mxu0 %v21850_v2  ;;  %v21855_v7 = vld [vmem:[%s30893_s1 + $0x20] sm:$0xff]   ;;  %s19230_s5 = sshll.u32 %s31532_s12, 11  ;;  %v21857_v9 = vld [vmem:[%s30893_s1 + $0x18] sm:$0xff]   ;;  %v21859_v11 = vld [vmem:[%s30893_s1 + $0x10] sm:$0xff]  }
  0x10   : > { %20146 = vmatprep.subr.bf16.mxu1 %v21851_v3  ;;  %s22490_s16 = scalar_lea.vmem %s30892_s0, %s19230_s5  ;;  %vm22502_vm2 = vmor %vm357_vm0, %vm358_vm1  ;;  %v21860_v22 = vld [vmem:[%s30893_s1 + $0x48] sm:$0xff]   ;;  %v21862_v36 = vld [vmem:[%s30893_s1 + $0x40] sm:$0xff]  }
  0x11   : > { %v16381_v12 = vld [vmem:[%s22490_s16 + $0x24c] sm:$0xf]  ;;  %v16444_v13 = vld [vmem:[%s22490_s16 + $0x250] sm:$0xf]  ;;  %v16380_v14 = vld [vmem:[%s22490_s16 + $0x248] sm:$0xe] }
  0x12   : > { %20099 = vmatpush3.bf16.msra.mxu0 %v21850_v2  ;;  %v362_v15 = vrot.slane %v16381_v12, 5  ;;  %v16476_v16 = vcombine.low %v16381_v12, %v16444_v13  ;;  %v16382_v17 = vld [vmem:[%s22490_s16 + $0x250] sm:$0x1]  ;;  %v30952_v18 = vsel %vm22502_vm2, 4294967295, %v30951_v18  ;;  %v16428_v19 = vrot.slane %v16380_v14, 9  ;;  %v21861_v23 = vld [vmem:[%s30893_s1 + $0x8] sm:$0xff]   ;;  %vm22776_vm5 = vmor %vm1179_vm3, %vm1180_vm4 }
  0x13   : > { %20147 = vmatpush3.bf16.msra.mxu1 %v21851_v3  ;;  %20100 = vmatprep.subr.bf16.mxu0 %v21852_v4  ;;  %30953 = vst [vmem:[#allocation2_spill] sm:$0xff] %v30952_v18  ;;  %v22507_v20 = vld [vmem:[%s22490_s16 + $0x26c] sm:$0xf]  ;;  %v365_v21 = vrot.slane %v16382_v17, 5  ;;  %v16383_v27 = vld [vmem:[%s22490_s16 + $0x268] sm:$0xe]  ;;  %vm23942_vm8 = vmor %vm4543_vm6, %vm4544_vm7 }
  0x14   : > { %20148 = vmatprep.subr.bf16.mxu1 %v21853_v5  ;;  %v364_v24 = vrot.slane %v362_v15, 4  ;;  %20112 = vmatprep.mubr.bf16.mxu0 %v16476_v16  ;;  %v363_v25 = vsel %vm22502_vm2, %v16428_v19, %v362_v15  ;;  %v369_v26 = vrot.slane %v22507_v20, 5  ;;  %v16385_v28 = vld [vmem:[%s22490_s16 + $0x270] sm:$0x1]  ;;  %v16387_v30 = vld [vmem:[%s22490_s16 + $0x28c] sm:$0xf] }
  0x15   : > { %v376_v32 = vrot.slane %v16387_v30, 5  ;;  %v16386_v33 = vld [vmem:[%s22490_s16 + $0x288] sm:$0xe]  ;;  %v16388_v34 = vld [vmem:[%s22490_s16 + $0x290] sm:$0x1]  ;;  %v16429_v38 = vrot.slane %v16383_v27, 9 }
  0x16   : > { %20101 = vmatpush3.bf16.msra.mxu0 %v21852_v4  ;;  %v366_v29 = vsel %vm22502_vm2, %v364_v24, %v365_v21  ;;  %v22526_v35 = vld [vmem:[%s22490_s16 + $0x2ac] sm:$0xf]  ;;  %v371_v37 = vrot.slane %v369_v26, 4  ;;  %v372_v39 = vrot.slane %v16385_v28, 5  ;;  %v21863_v40 = vld [vmem:[%s30893_s1] sm:$0xff]   ;;  %v16430_v43 = vrot.slane %v16386_v33, 9 }
  0x17   : > { %20149 = vmatpush3.bf16.msra.mxu1 %v21853_v5  ;;  %20102 = vmatprep.subr.bf16.mxu0 %v21854_v6  ;;  %v16500_v31 = vcombine.low %v363_v25, %v366_v29  ;;  %v16445_v41 = vld [vmem:[%s22490_s16 + $0x270] sm:$0xf]  ;;  %v378_v42 = vrot.slane %v376_v32, 4  ;;  %v379_v44 = vrot.slane %v16388_v34, 5  ;;  %v383_v45 = vrot.slane %v22526_v35, 5  ;;  %v21866_v49 = vld [vmem:[%s30893_s1 + $0xb8] sm:$0xff]  }
  0x18   : > { %20150 = vmatprep.subr.bf16.mxu1 %v21855_v7  ;;  %v22537_v46 = vld [vmem:[%s22490_s16 + $0x2cc] sm:$0xf]  ;;  %v370_v47 = vsel %vm22502_vm2, %v16429_v38, %v369_v26  ;;  %v373_v48 = vsel %vm22502_vm2, %v371_v37, %v372_v39  ;;  %v16446_v50 = vld [vmem:[%s22490_s16 + $0x290] sm:$0xf]  ;;  %v16389_v51 = vld [vmem:[%s22490_s16 + $0x2a8] sm:$0xe]  ;;  %v16477_v56 = vcombine.low %v22507_v20, %v16445_v41  ;;  %v377_v57 = vsel %vm22502_vm2, %v16430_v43, %v376_v32 }
  0x19   : > { %20160 = vmatprep.mubr.bf16.mxu1 %v16500_v31  ;;  %v21867_v52 = vld [vmem:[%s30893_s1 + $0xf8] sm:$0xff]   ;;  %v16391_v53 = vld [vmem:[%s22490_s16 + $0x2b0] sm:$0x1]  ;;  %v390_v54 = vrot.slane %v22537_v46, 5  ;;  %v16392_v55 = vld [vmem:[%s22490_s16 + $0x2c8] sm:$0xe]  ;;  %v380_v58 = vsel %vm22502_vm2, %v378_v42, %v379_v44  ;;  %v16501_v60 = vcombine.low %v370_v47, %v373_v48  ;;  %v16478_v0 = vcombine.low %v16387_v30, %v16446_v50 }
  0x1a   : > { %20103 = vmatpush3.bf16.msra.mxu0 %v21854_v6  ;;  %v16394_v59 = vld [vmem:[%s22490_s16 + $0x2d0] sm:$0x1]  ;;  %v385_v61 = vrot.slane %v383_v45, 4  ;;  %v16431_v62 = vrot.slane %v16389_v51, 9  ;;  %v386_v1 = vrot.slane %v16391_v53, 5  ;;  %v16432_v2 = vrot.slane %v16392_v55, 9 }
  0x1b   : > { %20151 = vmatpush3.bf16.msra.mxu1 %v21855_v7  ;;  %20104 = vmatprep.subr.bf16.mxu0 %v21856_v8  ;;  %v21870_v63 = vld [vmem:[%s30893_s1 + $0xb0] sm:$0xff]   ;;  %v22564_v3 = vld [vmem:[%s22490_s16 + $0x2ec] sm:$0xf]  ;;  %v16502_v4 = vcombine.low %v377_v57, %v380_v58  ;;  %v392_v5 = vrot.slane %v390_v54, 4  ;;  %v393_v6 = vrot.slane %v16394_v59, 5  ;;  %v21879_v39 = vld [vmem:[%s30893_s1 + $0xe0] sm:$0xff]  }
  0x1c   : > { %20152 = vmatprep.subr.bf16.mxu1 %v21857_v9  ;;  %v21871_v7 = vld [vmem:[%s30893_s1 + $0xf0] sm:$0xff]   ;;  %v397_v13 = vrot.slane %v22564_v3, 5  ;;  %v16395_v14 = vld [vmem:[%s22490_s16 + $0x2e8] sm:$0xe]  ;;  %v391_v16 = vsel %vm22502_vm2, %v16432_v2, %v390_v54  ;;  %v22597_v31 = vld [vmem:[%s22490_s16 + $0x32c] sm:$0xf] }
  0x1d   : > { %v16448_v12 = vld [vmem:[%s22490_s16 + $0x2d0] sm:$0xf]  ;;  %v21874_v15 = vld [vmem:[%s30893_s1 + $0xa8] sm:$0xff]   ;;  %v394_v17 = vsel %vm22502_vm2, %v392_v5, %v393_v6  ;;  %v16433_v29 = vrot.slane %v16395_v14, 9 }
  0x1e   : > { %20105 = vmatpush3.bf16.msra.mxu0 %v21856_v8  ;;  %v22570_v8 = vld [vmem:[%s22490_s16 + $0x30c] sm:$0xf]  ;;  %v16397_v19 = vld [vmem:[%s22490_s16 + $0x2f0] sm:$0x1]  ;;  %v16480_v26 = vcombine.low %v22537_v46, %v16448_v12  ;;  %v16504_v27 = vcombine.low %v391_v16, %v394_v17  ;;  %v399_v28 = vrot.slane %v397_v13, 4  ;;  %v21882_v46 = vld [vmem:[%s30893_s1 + $0x98] sm:$0xff]  }
  0x1f   : > { %20153 = vmatpush3.bf16.msra.mxu1 %v21857_v9  ;;  %20106 = vmatprep.subr.bf16.mxu0 %v21858_v10  ;;  %v16447_v9 = vld [vmem:[%s22490_s16 + $0x2b0] sm:$0xf]  ;;  %v21875_v20 = vld [vmem:[%s30893_s1 + $0xe8] sm:$0xff]   ;;  %v404_v21 = vrot.slane %v22570_v8, 5  ;;  %v400_v30 = vrot.slane %v16397_v19, 5  ;;  %v398_v42 = vsel %vm22502_vm2, %v16433_v29, %v397_v13 }
  0x20   : > { %20154 = vmatprep.subr.bf16.mxu1 %v21859_v11  ;;  %v16400_v24 = vld [vmem:[%s22490_s16 + $0x310] sm:$0x1]  ;;  %v16401_v41 = vld [vmem:[%s22490_s16 + $0x328] sm:$0xe]  ;;  %v22675_v29 = vld [vmem:[%s22490_s16 + $0x3cc] sm:$0xf] }
  0x21   : > { %v406_v32 = vrot.slane %v404_v21, 4  ;;  %v407_v34 = vrot.slane %v16400_v24, 5  ;;  %v16449_v37 = vld [vmem:[%s22490_s16 + $0x2f0] sm:$0xf]  ;;  %v401_v43 = vsel %vm22502_vm2, %v399_v28, %v400_v30  ;;  %v16435_v58 = vrot.slane %v16401_v41, 9  ;;  %v21890_v14 = vld [vmem:[%s30893_s1 + $0x88] sm:$0xff]  }
  0x22   : > { %20107 = vmatpush3.bf16.msra.mxu0 %v21858_v10  ;;  %v384_v10 = vsel %vm22502_vm2, %v16431_v62, %v383_v45  ;;  %v16450_v38 = vld [vmem:[%s22490_s16 + $0x310] sm:$0xf]  ;;  %v16481_v50 = vcombine.low %v22564_v3, %v16449_v37  ;;  %v16505_v53 = vcombine.low %v398_v42, %v401_v43  ;;  %v16410_v12 = vld [vmem:[%s22490_s16 + $0x388] sm:$0xe]  ;;  %v21894_v28 = vld [vmem:[%s30893_s1 + $0x80] sm:$0xff]  }
  0x23   : > { %20155 = vmatpush3.bf16.msra.mxu1 %v21859_v11  ;;  %20108 = vmatprep.subr.bf16.mxu0 %v21860_v22  ;;  %v387_v11 = vsel %vm22502_vm2, %v385_v61, %v386_v1  ;;  %v16403_v44 = vld [vmem:[%s22490_s16 + $0x330] sm:$0x1]  ;;  %v408_v48 = vsel %vm22502_vm2, %v406_v32, %v407_v34  ;;  %v16482_v54 = vcombine.low %v22570_v8, %v16450_v38  ;;  %v21891_v17 = vld [vmem:[%s30893_s1 + $0xc8] sm:$0xff]   ;;  %v22698_v42 = vld [vmem:[%s30893_s1 + $0x138] sm:$0xff]  }
  0x24   : > { %20156 = vmatprep.subr.bf16.mxu1 %v21861_v23  ;;  %v16503_v25 = vcombine.low %v384_v10, %v387_v11  ;;  %v16406_v51 = vld [vmem:[%s22490_s16 + $0x350] sm:$0x1]  ;;  %v414_v59 = vrot.slane %v16403_v44, 5  ;;  %v16416_v41 = vld [vmem:[%s22490_s16 + $0x3c8] sm:$0xe] }
  0x25   : > { %v21886_v61 = vld [vmem:[%s30893_s1 + $0x90] sm:$0xff]   ;;  %v22702_v44 = vld [vmem:[%s22490_s16 + $0x3ec] sm:$0xf] }
  0x26   : > { %20109 = vmatpush3.bf16.msra.mxu0 %v21860_v22  ;;  %v16479_v22 = vcombine.low %v22526_v35, %v16447_v9  ;;  %v21878_v35 = vld [vmem:[%s30893_s1 + $0xa0] sm:$0xff]   ;;  %v16451_v1 = vld [vmem:[%s22490_s16 + $0x330] sm:$0xf] }
  0x27   : > { %20157 = vmatpush3.bf16.msra.mxu1 %v21861_v23  ;;  %20110 = vmatprep.subr.bf16.mxu0 %v21862_v36  ;;  %v16398_v23 = vld [vmem:[%s22490_s16 + $0x308] sm:$0xe]  ;;  %v21887_v3 = vld [vmem:[%s30893_s1 + $0xd0] sm:$0xff]  }
  0x28   : > { %20158 = vmatprep.subr.bf16.mxu1 %v21863_v40  ;;  %v16434_v33 = vrot.slane %v16398_v23, 9  ;;  %v16409_v8 = vld [vmem:[%s22490_s16 + $0x370] sm:$0x1]  ;;  %v22669_v23 = vld [vmem:[%s22490_s16 + $0x3ac] sm:$0xf] }
  0x29   : > { %v16412_v13 = vld [vmem:[%s22490_s16 + $0x390] sm:$0x1]  ;;  %v439_v30 = vrot.slane %v22669_v23, 5 }
  0x2a   : > { %20111 = vmatpush3.bf16.msra.mxu0 %v21862_v36  ;;  %v22603_v36 = vld [vmem:[%s22490_s16 + $0x34c] sm:$0xf]  ;;  %v405_v47 = vsel %vm22502_vm2, %v16434_v33, %v404_v21  ;;  %v16453_v32 = vld [vmem:[%s22490_s16 + $0x370] sm:$0xf] }
  0x2b   : > { %20159 = vmatpush3.bf16.msra.mxu1 %v21863_v40  ;;  %20192 = vmatprep.subr.bf16.mxu0 %v21866_v49  ;;  %v411_v40 = vrot.slane %v22597_v31, 5  ;;  %v418_v45 = vrot.slane %v22603_v36, 5  ;;  %v16506_v57 = vcombine.low %v405_v47, %v408_v48  ;;  %v16418_v43 = vld [vmem:[%s22490_s16 + $0x3d0] sm:$0x1]  ;;  %v441_v47 = vrot.slane %v439_v30, 4 }
  0x2c   : > { %20240 = vmatprep.subr.bf16.mxu1 %v21867_v52  ;;  %v22706_v48 = vld [vmem:[%s22490_s16 + $0x40c] sm:$0xf] }
  0x2d   : > { %20113 = vmatmul.mubr.bf16.vlgmr.msra.gmra.mxu0 %v16477_v56  ;;  %v413_v55 = vrot.slane %v411_v40, 4  ;;  %v22633_v56 = vld [vmem:[%s22490_s16 + $0x36c] sm:$0xf]  ;;  %v420_v62 = vrot.slane %v418_v45, 4  ;;  %v412_v5 = vsel %vm22502_vm2, %v16435_v58, %v411_v40  ;;  %v446_v40 = vrot.slane %v22675_v29, 5 }
  0x2e   : > { %20161 = vmatmul.mubr.bf16.vlgmr.msra.gmra.mxu1 %v16501_v60  ;;  %20193 = vmatpush3.bf16.msra.mxu0 %v21866_v49  ;;  %v16404_v49 = vld [vmem:[%s22490_s16 + $0x348] sm:$0xe]  ;;  %v425_v2 = vrot.slane %v22633_v56, 5  ;;  %v460_v58 = vrot.slane %v22706_v48, 5 }
  0x2f   : > { %20241 = vmatpush3.bf16.msra.mxu1 %v21867_v52  ;;  %20116 = vmatprep.mubr.bf16.mxu0 %v16478_v0  ;;  %v21883_v52 = vld [vmem:[%s30893_s1 + $0xd8] sm:$0xff]   ;;  %v16436_v60 = vrot.slane %v16404_v49, 9  ;;  %v22639_v0 = vld [vmem:[%s22490_s16 + $0x38c] sm:$0xf]  ;;  %v415_v6 = vsel %vm22502_vm2, %v413_v55, %v414_v59  ;;  %v16440_v55 = vrot.slane %v16416_v41, 9 }
  0x30   : > { %20164 = vmatprep.mubr.bf16.mxu1 %v16502_v4  ;;  %20194 = vmatprep.subr.bf16.mxu0 %v21870_v63  ;;  %v16452_v4 = vld [vmem:[%s22490_s16 + $0x350] sm:$0xf]  ;;  %v432_v9 = vrot.slane %v22639_v0, 5  ;;  %v427_v16 = vrot.slane %v425_v2, 4  ;;  %v16507_v19 = vcombine.low %v412_v5, %v415_v6  ;;  %v22711_v49 = vld [vmem:[%s30893_s1 + $0x178] sm:$0xff]  }
  0x31   : > { %20242 = vmatprep.subr.bf16.mxu1 %v21871_v7  ;;  %v419_v10 = vsel %vm22502_vm2, %v16436_v60, %v418_v45  ;;  %v16485_v45 = vcombine.low %v22633_v56, %v16453_v32  ;;  %v449_v56 = vrot.slane %v16418_v43, 5  ;;  %v16419_v59 = vld [vmem:[%s22490_s16 + $0x3e8] sm:$0xe]  ;;  %v16421_v60 = vld [vmem:[%s22490_s16 + $0x3f0] sm:$0x1] }
  0x32   : > { %20195 = vmatpush3.bf16.msra.mxu0 %v21870_v63  ;;  %v421_v63 = vrot.slane %v16406_v51, 5  ;;  %v16424_v5 = vld [vmem:[%s22490_s16 + $0x410] sm:$0x1]  ;;  %v22733_v6 = vld [vmem:[%s22490_s16 + $0x42c] sm:$0xf] }
  0x33   : > { %20243 = vmatpush3.bf16.msra.mxu1 %v21871_v7  ;;  %20196 = vmatprep.subr.bf16.mxu0 %v21874_v15  ;;  %v16407_v7 = vld [vmem:[%s22490_s16 + $0x368] sm:$0xe] }
  0x34   : > { %20244 = vmatprep.subr.bf16.mxu1 %v21875_v20  ;;  %v422_v11 = vsel %vm22502_vm2, %v420_v62, %v421_v63  ;;  %v16437_v21 = vrot.slane %v16407_v7, 9  ;;  %v16455_v62 = vld [vmem:[%s22490_s16 + $0x3b0] sm:$0xf]  ;;  %v16441_v7 = vrot.slane %v16419_v59, 9 }
  0x35   : > { %20117 = vmatmul.mubr.bf16.gmra.mxu0 %v16479_v22  ;;  %v428_v22 = vrot.slane %v16409_v8, 5  ;;  %v16508_v24 = vcombine.low %v419_v10, %v422_v11  ;;  %v456_v8 = vrot.slane %v16421_v60, 5  ;;  %v16525_v11 = vld [vmem:[%s22490_s16 + $0x250] sm:$0xf]  ;;  %v22786_v60 = vld [vmem:[%s22490_s16 + $0x34c] sm:$0xf] }
  0x36   : > { %20165 = vmatmul.mubr.bf16.gmra.mxu1 %v16503_v25  ;;  %20120 = vmatprep.mubr.bf16.mxu0 %v16480_v26  ;;  %v434_v25 = vrot.slane %v432_v9, 4  ;;  %v16438_v26 = vrot.slane %v16410_v12, 9  ;;  %v426_v33 = vsel %vm22502_vm2, %v16437_v21, %v425_v2  ;;  %v447_v2 = vsel %vm22502_vm2, %v16440_v55, %v446_v40  ;;  %v16427_v21 = vld [vmem:[%s22490_s16 + $0x430] sm:$0x1]  ;;  %v16631_v55 = vld [vmem:[%s22490_s16 + $0x328] sm:$0xe] }
  0x37   : > { %20168 = vmatprep.mubr.bf16.mxu1 %v16504_v27  ;;  %20197 = vmatpush3.bf16.msra.mxu0 %v21874_v15  ;;  %v16483_v15 = vcombine.low %v22597_v31, %v16451_v1  ;;  %v435_v27 = vrot.slane %v16412_v13, 5  ;;  %v21895_v31 = vld [vmem:[%s30893_s1 + $0xc0] sm:$0xff]   ;;  %v429_v34 = vsel %vm22502_vm2, %v427_v16, %v428_v22  ;;  %v16487_v12 = vcombine.low %v22669_v23, %v16455_v62  ;;  %v22738_v13 = vld [vmem:[%s22490_s16 + $0x30c] sm:$0xf] }
  0x38   : > { %20245 = vmatpush3.bf16.msra.mxu1 %v21875_v20  ;;  %20198 = vmatprep.subr.bf16.mxu0 %v21878_v35  ;;  %v16484_v20 = vcombine.low %v22603_v36, %v16452_v4  ;;  %v16413_v36 = vld [vmem:[%s22490_s16 + $0x3a8] sm:$0xe]  ;;  %v433_v37 = vsel %vm22502_vm2, %v16438_v26, %v432_v9  ;;  %v462_v9 = vrot.slane %v460_v58, 4  ;;  %v463_v16 = vrot.slane %v16424_v5, 5  ;;  %v16524_v22 = vld [vmem:[%s22490_s16 + $0x24c] sm:$0x8] }
  0x39   : > { %20246 = vmatprep.subr.bf16.mxu1 %v21879_v39  ;;  %v436_v38 = vsel %vm22502_vm2, %v434_v25, %v435_v27  ;;  %v1184_v25 = vrot.slane %v16525_v11, 7  ;;  %v22747_v26 = vld [vmem:[%s22490_s16 + $0x308] sm:$0xe]  ;;  %v1715_v23 = vrot.slane %v22738_v13, 5  ;;  %v16457_v27 = vld [vmem:[%s22490_s16 + $0x3f0] sm:$0xf] }
  0x3a   : > { %v16510_v51 = vcombine.low %v433_v37, %v436_v38  ;;  %v22767_v37 = vld [vmem:[%s22490_s16 + $0x32c] sm:$0xf]  ;;  %v16458_v38 = vld [vmem:[%s22490_s16 + $0x410] sm:$0xf]  ;;  %v16676_v43 = vrot.slane %v22747_v26, 9  ;;  %v16677_v11 = vrot.slane %v16631_v55, 9 }
  0x3b   : > { %20199 = vmatpush3.bf16.msra.mxu0 %v21878_v35  ;;  %v16454_v35 = vld [vmem:[%s22490_s16 + $0x390] sm:$0xf]  ;;  %v16490_v59 = vcombine.low %v22706_v48, %v16458_v38  ;;  %v16530_v62 = vld [vmem:[%s22490_s16 + $0x28c] sm:$0x8] }
  0x3c   : > { %20247 = vmatpush3.bf16.msra.mxu1 %v21879_v39  ;;  %20200 = vmatprep.subr.bf16.mxu0 %v21882_v46  ;;  %v16415_v39 = vld [vmem:[%s22490_s16 + $0x3b0] sm:$0x1] }
  0x3d   : > { %20121 = vmatmul.mubr.bf16.gmra.mxu0 %v16481_v50  ;;  %20248 = vmatprep.subr.bf16.mxu1 %v21883_v52  ;;  %v16486_v50 = vcombine.low %v22639_v0, %v16454_v35  ;;  %v16456_v0 = vld [vmem:[%s22490_s16 + $0x3d0] sm:$0xf] }
  0x3e   : > { %20169 = vmatmul.mubr.bf16.gmra.mxu1 %v16505_v53  ;;  %20124 = vmatprep.mubr.bf16.mxu0 %v16482_v54  ;;  %v442_v53 = vrot.slane %v16415_v39, 5  ;;  %v448_v54 = vrot.slane %v446_v40, 4  ;;  %v470_v39 = vrot.slane %v16427_v21, 5  ;;  %v16572_v40 = vrot.slane %v16524_v22, 11  ;;  %v16533_v22 = vld [vmem:[%s22490_s16 + $0x2ac] sm:$0x8] }
  0x3f   : > { %20172 = vmatprep.mubr.bf16.mxu1 %v16506_v57  ;;  %20201 = vmatpush3.bf16.msra.mxu0 %v21882_v46  ;;  %v16509_v46 = vcombine.low %v426_v33, %v429_v34  ;;  %v453_v57 = vrot.slane %v22702_v44, 5  ;;  %v464_v33 = vsel %vm22502_vm2, %v462_v9, %v463_v16  ;;  %v16459_v9 = vld [vmem:[%s22490_s16 + $0x430] sm:$0xf] }
  0x40   : > { %20249 = vmatpush3.bf16.msra.mxu1 %v21883_v52  ;;  %20202 = vmatprep.subr.bf16.mxu0 %v21886_v61  ;;  %v16439_v52 = vrot.slane %v16413_v36, 9  ;;  %v443_v1 = vsel %vm22502_vm2, %v441_v47, %v442_v53  ;;  %v22764_v36 = vld [vmem:[%s22490_s16 + $0x270] sm:$0xf]  ;;  %v30954_v53 = vmov 0  ;;  %v16491_v26 = vcombine.low %v22733_v6, %v16459_v9 }
  0x41   : > { %20250 = vmatprep.subr.bf16.mxu1 %v21887_v3  ;;  %v455_v4 = vrot.slane %v453_v57, 4  ;;  %v30955_v53 = vsel %vm22776_vm5, 4294967295, %v30954_v53 }
  0x42   : > { %v440_v63 = vsel %vm22502_vm2, %v16439_v52, %v439_v30  ;;  %v16630_v30 = vld [vmem:[%s22490_s16 + $0x310] sm:$0x1]  ;;  %v16489_v52 = vcombine.low %v22702_v44, %v16457_v27  ;;  %30956 = vst [vmem:[#allocation3_spill] sm:$0xff] %v30955_v53  ;;  %v17449_v53 = vld [vmem:[%s22490_s16 + $0x388] sm:$0xf] }
  0x43   : > { %20203 = vmatpush3.bf16.msra.mxu0 %v21886_v61  ;;  %v16422_v61 = vld [vmem:[%s22490_s16 + $0x408] sm:$0xe]  ;;  %v1718_v47 = vrot.slane %v16630_v30, 5 }
  0x44   : > { %20251 = vmatpush3.bf16.msra.mxu1 %v21887_v3  ;;  %20204 = vmatprep.subr.bf16.mxu0 %v21890_v14  ;;  %v450_v3 = vsel %vm22502_vm2, %v448_v54, %v449_v56  ;;  %v16442_v10 = vrot.slane %v16422_v61, 9  ;;  %v1191_v54 = vrot.slane %v22764_v36, 7  ;;  %v1722_v56 = vrot.slane %v22767_v37, 5  ;;  %v16633_v61 = vld [vmem:[%s22490_s16 + $0x330] sm:$0x1] }
  0x45   : > { %20125 = vmatmul.mubr.bf16.gmra.mxu0 %v16483_v15  ;;  %20252 = vmatprep.subr.bf16.mxu1 %v21891_v17  ;;  %v16488_v15 = vcombine.low %v22675_v29, %v16456_v0  ;;  %v457_v29 = vsel %vm22502_vm2, %v455_v4, %v456_v8  ;;  %v16636_v4 = vld [vmem:[%s22490_s16 + $0x350] sm:$0x1]  ;;  %v1729_v8 = vrot.slane %v22786_v60, 5  ;;  %v16637_v30 = vld [vmem:[%s22490_s16 + $0x368] sm:$0xe] }
  0x46   : > { %20173 = vmatmul.mubr.bf16.gmra.mxu1 %v16507_v19  ;;  %20128 = vmatprep.mubr.bf16.mxu0 %v16484_v20  ;;  %v16512_v19 = vcombine.low %v447_v2, %v450_v3  ;;  %v16425_v20 = vld [vmem:[%s22490_s16 + $0x428] sm:$0xe]  ;;  %v461_v32 = vsel %vm22502_vm2, %v16442_v10, %v460_v58  ;;  %v16532_v2 = vld [vmem:[%s22490_s16 + $0x294] sm:$0x7]  ;;  %v1193_v10 = vrot.slane %v1191_v54, 4 }
  0x47   : > { %20176 = vmatprep.mubr.bf16.mxu1 %v16508_v24  ;;  %20205 = vmatpush3.bf16.msra.mxu0 %v21890_v14  ;;  %v16511_v14 = vcombine.low %v440_v63, %v443_v1  ;;  %v16526_v24 = vld [vmem:[%s22490_s16 + $0x254] sm:$0x7]  ;;  %v16443_v35 = vrot.slane %v16425_v20, 9  ;;  %v16514_v44 = vcombine.low %v461_v32, %v464_v33  ;;  %v1185_v1 = vsel %vm22776_vm5, %v16572_v40, %v1184_v25  ;;  %v16634_v3 = vld [vmem:[%s22490_s16 + $0x348] sm:$0xe] }
  0x48   : > { %20253 = vmatpush3.bf16.msra.mxu1 %v21891_v17  ;;  %20206 = vmatprep.subr.bf16.mxu0 %v21894_v28  ;;  %v467_v17 = vrot.slane %v22733_v6, 5  ;;  %v1187_v41 = vrot.slane %v16526_v24, 7  ;;  %v1201_v16 = vrot.slane %v16532_v2, 7  ;;  %v1716_v20 = vsel %vm22502_vm2, %v16676_v43, %v1715_v23  ;;  %v16534_v24 = vld [vmem:[%s22490_s16 + $0x2b0] sm:$0xf] }
  0x49   : > { %20254 = vmatprep.subr.bf16.mxu1 %v21895_v31  ;;  %v1205_v38 = vrot.slane %v16534_v24, 7  ;;  %v1723_v40 = vsel %vm22502_vm2, %v16677_v11, %v1722_v56  ;;  %v16536_v43 = vld [vmem:[%s22490_s16 + $0x2cc] sm:$0x8]  ;;  %v21899_v24 = vld [vmem:[%s30893_s1 + $0x170] sm:$0xff]  }
  0x4a   : > { %v469_v34 = vrot.slane %v467_v17, 4  ;;  %v468_v63 = vsel %vm22502_vm2, %v16443_v35, %v467_v17  ;;  %v16678_v17 = vrot.slane %v16634_v3, 9 }
  0x4b   : > { %20207 = vmatpush3.bf16.msra.mxu0 %v21894_v28  ;;  %v454_v28 = vsel %vm22502_vm2, %v16441_v7, %v453_v57  ;;  %v16531_v57 = vld [vmem:[%s22490_s16 + $0x290] sm:$0xf] }
  0x4c   : > { %20255 = vmatpush3.bf16.msra.mxu1 %v21895_v31  ;;  %20288 = vmatprep.subr.bf16.mxu0 %v22698_v42  ;;  %v22757_v31 = vld [vmem:[%s22490_s16 + $0x26c] sm:$0x8]  ;;  %v16513_v58 = vcombine.low %v454_v28, %v457_v29  ;;  %v471_v0 = vsel %vm22502_vm2, %v469_v34, %v470_v39  ;;  %v1198_v7 = vrot.slane %v16531_v57, 7  ;;  %v1731_v28 = vrot.slane %v1729_v8, 4  ;;  %v16535_v29 = vld [vmem:[%s22490_s16 + $0x2b4] sm:$0x7] }
  0x4d   : > { %20129 = vmatmul.mubr.bf16.gmra.mxu0 %v16485_v45  ;;  %20336 = vmatprep.subr.bf16.mxu1 %v22711_v49  ;;  %v1186_v45 = vrot.slane %v1184_v25, 4  ;;  %v22810_v25 = vld [vmem:[%s22490_s16 + $0x36c] sm:$0xf]  ;;  %v16515_v32 = vcombine.low %v468_v63, %v471_v0  ;;  %v16639_v34 = vld [vmem:[%s22490_s16 + $0x370] sm:$0x1]  ;;  %v16576_v0 = vrot.slane %v16536_v43, 11 }
  0x4e   : > { %20177 = vmatmul.mubr.bf16.gmra.mxu1 %v16509_v46  ;;  %20132 = vmatprep.mubr.bf16.mxu0 %v16486_v50  ;;  %v1717_v46 = vrot.slane %v1715_v23, 4  ;;  %v16529_v50 = vld [vmem:[%s22490_s16 + $0x274] sm:$0x7]  ;;  %v1200_v27 = vrot.slane %v1198_v7, 4  ;;  %v22818_v23 = vld [vmem:[%s22490_s16 + $0x38c] sm:$0xf] }
  0x4f   : > { %20180 = vmatprep.mubr.bf16.mxu1 %v16510_v51  ;;  %v16573_v51 = vrot.slane %v22757_v31, 11  ;;  %v1188_v48 = vsel %vm22776_vm5, %v1186_v45, %v1187_v41  ;;  %v1194_v5 = vrot.slane %v16529_v50, 7  ;;  %v16537_v31 = vld [vmem:[%s22490_s16 + $0x2d0] sm:$0xf]  ;;  %v1736_v6 = vrot.slane %v22810_v25, 5 }
  0x50   : > { %v1719_v21 = vsel %vm22502_vm2, %v1717_v46, %v1718_v47  ;;  %v16604_v33 = vcombine.low %v1185_v1, %v1188_v48  ;;  %v16538_v45 = vld [vmem:[%s22490_s16 + $0x2d4] sm:$0x7]  ;;  %v1212_v46 = vrot.slane %v16537_v31, 7  ;;  %v22835_v50 = vsel %vm22502_vm2, %v16678_v17, %v1729_v8  ;;  %v16539_v48 = vld [vmem:[%s22490_s16 + $0x2ec] sm:$0x8] }
  0x51   : > { %v16708_v35 = vcombine.low %v1716_v20, %v1719_v21  ;;  %v1192_v36 = vsel %vm22776_vm5, %v16573_v51, %v1191_v54  ;;  %v1195_v39 = vsel %vm22776_vm5, %v1193_v10, %v1194_v5  ;;  %v16575_v51 = vrot.slane %v16533_v22, 11  ;;  %v16642_v54 = vld [vmem:[%s22490_s16 + $0x390] sm:$0x1]  ;;  %v16541_v8 = vld [vmem:[%s22490_s16 + $0x2f4] sm:$0x7] }
  0x52   : > { %v1743_v55 = vrot.slane %v22818_v23, 5  ;;  %v1739_v63 = vrot.slane %v16639_v34, 5  ;;  %v1214_v1 = vrot.slane %v1212_v46, 4  ;;  %v1215_v2 = vrot.slane %v16538_v45, 7  ;;  %v22851_v10 = vld [vmem:[%s22490_s16 + $0x3ac] sm:$0xf] }
  0x53   : > { %v16605_v5 = vcombine.low %v1192_v36, %v1195_v39  ;;  %v22864_v17 = vld [vmem:[%s22490_s16 + $0x310] sm:$0xf]  ;;  %v1750_v31 = vrot.slane %v22851_v10, 5  ;;  %v16542_v34 = vld [vmem:[%s22490_s16 + $0x30c] sm:$0x8] }
  0x54   : > { %v22905_v39 = vld [vmem:[%s22490_s16 + $0x3c8] sm:$0xe] }
  0x55   : > { %20133 = vmatmul.mubr.bf16.gmra.mxu0 %v16487_v12  ;;  %v1724_v12 = vrot.slane %v1722_v56, 4  ;;  %v1202_v56 = vsel %vm22776_vm5, %v1200_v27, %v1201_v16  ;;  %v22861_v16 = vld [vmem:[%s22490_s16 + $0x3a8] sm:$0xe]  ;;  %v22885_v27 = vsel %vm22776_vm5, %v16576_v0, %v1212_v46 }
  0x56   : > { %20181 = vmatmul.mubr.bf16.gmra.mxu1 %v16511_v14  ;;  %20136 = vmatprep.mubr.bf16.mxu0 %v16488_v15  ;;  %v1725_v14 = vrot.slane %v16633_v61, 5  ;;  %v16574_v15 = vrot.slane %v16530_v62, 11  ;;  %v1207_v61 = vrot.slane %v1205_v38, 4  ;;  %v1738_v62 = vrot.slane %v1736_v6, 4 }
  0x57   : > { %20184 = vmatprep.mubr.bf16.mxu1 %v16512_v19  ;;  %v1732_v19 = vrot.slane %v16636_v4, 5  ;;  %v1746_v4 = vrot.slane %v16642_v54, 5  ;;  %v16681_v46 = vrot.slane %v22861_v16, 9  ;;  %v21901_v54 = vld [vmem:[%s30893_s1 + $0x168] sm:$0xff]   ;;  %v22978_v16 = vld [vmem:[%s22490_s16 + $0x354] sm:$0x7] }
  0x58   : > { %v1726_v41 = vsel %vm22502_vm2, %v1724_v12, %v1725_v14  ;;  %v1199_v47 = vsel %vm22776_vm5, %v16574_v15, %v1198_v7  ;;  %v1745_v7 = vrot.slane %v1743_v55, 4  ;;  %v22855_v14 = vsel %vm22776_vm5, %v16575_v51, %v1205_v38  ;;  %v21898_v15 = vld [vmem:[%s30893_s1 + $0x130] sm:$0xff]  }
  0x59   : > { %v1733_v57 = vsel %vm22502_vm2, %v1731_v28, %v1732_v19  ;;  %v16709_v11 = vcombine.low %v1723_v40, %v1726_v41  ;;  %v16606_v12 = vcombine.low %v1199_v47, %v1202_v56  ;;  %v22875_v22 = vsel %vm22502_vm2, %v1738_v62, %v1739_v63  ;;  %v22908_v40 = vld [vmem:[%s22490_s16 + $0x3d0] sm:$0x1]  ;;  %v21900_v47 = vld [vmem:[%s30893_s1 + $0x128] sm:$0xff]   ;;  %v22947_v62 = vld [vmem:[%s22490_s16 + $0x334] sm:$0x7] }
  0x5a   : > { %v16710_v19 = vcombine.low %v22835_v50, %v1733_v57  ;;  %v22889_v28 = vsel %vm22776_vm5, %v1214_v1, %v1215_v2  ;;  %v1747_v45 = vsel %vm22502_vm2, %v1745_v7, %v1746_v4  ;;  %v22923_v50 = vld [vmem:[%s22490_s16 + $0x330] sm:$0xf]  ;;  %v1752_v51 = vrot.slane %v1750_v31, 4  ;;  %v22953_v2 = vld [vmem:[%s22490_s16 + $0x3e8] sm:$0xe]  ;;  %v21902_v4 = vld [vmem:[%s30893_s1 + $0x120] sm:$0xff]  }
  0x5b   : > { %v16608_v43 = vcombine.low %v22885_v27, %v22889_v28  ;;  %v1233_v1 = vrot.slane %v22923_v50, 7  ;;  %v21903_v7 = vld [vmem:[%s30893_s1 + $0x160] sm:$0xff]  }
  0x5d   : > { %20137 = vmatmul.mubr.bf16.gmra.mxu0 %v16489_v52  ;;  %v16640_v52 = vld [vmem:[%s22490_s16 + $0x388] sm:$0xe] }
  0x5e   : > { %20185 = vmatmul.mubr.bf16.gmra.mxu1 %v16513_v58  ;;  %20140 = vmatprep.mubr.bf16.mxu0 %v16490_v59  ;;  %v1208_v58 = vrot.slane %v16535_v29, 7  ;;  %v16679_v59 = vrot.slane %v16637_v30, 9  ;;  %v16680_v3 = vrot.slane %v16640_v52, 9  ;;  %v16577_v29 = vrot.slane %v16539_v48, 11  ;;  %v22892_v30 = vld [vmem:[%s22490_s16 + $0x3b0] sm:$0x1] }
  0x5f   : > { %20188 = vmatprep.mubr.bf16.mxu1 %v16514_v44  ;;  %v22845_v44 = vld [vmem:[%s22490_s16 + $0x2f0] sm:$0xf]  ;;  %v1753_v52 = vrot.slane %v22892_v30, 5  ;;  %v16683_v30 = vrot.slane %v22953_v2, 9  ;;  %v23051_v2 = vld [vmem:[%s22490_s16 + $0x44c] sm:$0xf] }
  0x60   : > { %v1219_v9 = vrot.slane %v22845_v44, 7  ;;  %v1209_v20 = vsel %vm22776_vm5, %v1207_v61, %v1208_v58  ;;  %v22871_v21 = vsel %vm22502_vm2, %v16679_v59, %v1736_v6  ;;  %v1226_v6 = vrot.slane %v22864_v17, 7  ;;  %v22944_v61 = vld [vmem:[%s22490_s16 + $0x32c] sm:$0x8]  ;;  %v22960_v48 = vld [vmem:[%s22490_s16 + $0x350] sm:$0xf] }
  0x61   : > { %v16607_v36 = vcombine.low %v22855_v14, %v1209_v20  ;;  %v16711_v38 = vcombine.low %v22871_v21, %v22875_v22  ;;  %v16682_v59 = vrot.slane %v22905_v39, 9  ;;  %v1760_v44 = vrot.slane %v22908_v40, 5  ;;  %v16652_v22 = vld [vmem:[%s22490_s16 + $0x408] sm:$0xe]  ;;  %v23013_v39 = vld [vmem:[%s22490_s16 + $0x42c] sm:$0xf] }
  0x62   : > { %v22935_v57 = vsel %vm22776_vm5, %v16577_v29, %v1219_v9  ;;  %v1228_v63 = vrot.slane %v1226_v6, 4  ;;  %v16579_v14 = vrot.slane %v22944_v61, 11  ;;  %v1240_v17 = vrot.slane %v22960_v48, 7  ;;  %v23035_v61 = vld [vmem:[%s22490_s16 + $0x390] sm:$0xf] }
  0x63   : > { %v1236_v21 = vrot.slane %v22947_v62, 7  ;;  %v1235_v29 = vrot.slane %v1233_v1, 4  ;;  %v21907_v62 = vld [vmem:[%s30893_s1 + $0x150] sm:$0xff]  }
  0x64   : > { %v1242_v40 = vrot.slane %v1240_v17, 4 }
  0x65   : > { %20141 = vmatmul.mubr.bf16.gmra.mxu0 %v16491_v26  ;;  %v22881_v26 = vld [vmem:[%s22490_s16 + $0x3cc] sm:$0xf]  ;;  %v1237_v50 = vsel %vm22776_vm5, %v1235_v29, %v1236_v21 }
  0x66   : > { %20189 = vmatmul.mubr.bf16.gmra.mxu1 %v16515_v32  ;;  %20208 = vmatprep.mubr.bf16.mxu0 %v16604_v33  ;;  %v1221_v32 = vrot.slane %v1219_v9, 4  ;;  %v1222_v33 = vrot.slane %v16541_v8, 7  ;;  %v1757_v41 = vrot.slane %v22881_v26, 5  ;;  %v22966_v8 = vld [vmem:[%s22490_s16 + $0x40c] sm:$0xf] }
  0x67   : > { %20256 = vmatprep.mubr.bf16.mxu1 %v16708_v35  ;;  %v22897_v35 = vld [vmem:[%s22490_s16 + $0x314] sm:$0x7]  ;;  %v16651_v9 = vld [vmem:[%s22490_s16 + $0x3f0] sm:$0x1]  ;;  %v1771_v27 = vrot.slane %v22966_v8, 5 }
  0x68   : > { %v1229_v56 = vrot.slane %v22897_v35, 7  ;;  %v22939_v58 = vsel %vm22776_vm5, %v1221_v32, %v1222_v33  ;;  %v1759_v0 = vrot.slane %v1757_v41, 4  ;;  %v22997_v32 = vld [vmem:[%s22490_s16 + $0x36c] sm:$0x8]  ;;  %v21904_v33 = vld [vmem:[%s30893_s1 + $0x118] sm:$0xff]  }
  0x6a   : > { %v1230_v28 = vsel %vm22776_vm5, %v1228_v63, %v1229_v56  ;;  %v1761_v35 = vsel %vm22502_vm2, %v1759_v0, %v1760_v44  ;;  %v21906_v56 = vld [vmem:[%s30893_s1 + $0x110] sm:$0xff]   ;;  %v1778_v44 = vrot.slane %v23013_v39, 5  ;;  %v1234_v63 = vsel %vm22776_vm5, %v16579_v14, %v1233_v1 }
  0x6b   : > { %v23069_v14 = vld [vmem:[%s22490_s16 + $0x450] sm:$0x1]  ;;  %v16611_v21 = vcombine.low %v1234_v63, %v1237_v50  ;;  %v16560_v63 = vld [vmem:[%s22490_s16 + $0x3cc] sm:$0x8] }
  0x6d   : > { %20209 = vmatmul.mubr.bf16.vlgmr.msra.gmra.mxu0 %v16605_v5 }
  0x6e   : > { %20257 = vmatmul.mubr.bf16.vlgmr.msra.gmra.mxu1 %v16709_v11  ;;  %20289 = vmatpush3.bf16.msra.mxu0 %v22698_v42  ;;  %v1744_v42 = vsel %vm22502_vm2, %v16680_v3, %v1743_v55  ;;  %v16578_v55 = vrot.slane %v16542_v34, 11  ;;  %v16609_v11 = vcombine.low %v22935_v57, %v22939_v58  ;;  %v1758_v34 = vsel %vm22502_vm2, %v16682_v59, %v1757_v41  ;;  %v23031_v59 = vld [vmem:[%s22490_s16 + $0x430] sm:$0x1] }
  0x6f   : > { %20337 = vmatpush3.bf16.msra.mxu1 %v22711_v49  ;;  %20212 = vmatprep.mubr.bf16.mxu0 %v16606_v12  ;;  %v22926_v49 = vld [vmem:[%s22490_s16 + $0x3ec] sm:$0xf]  ;;  %v16712_v5 = vcombine.low %v1744_v42, %v1747_v45  ;;  %v1751_v12 = vsel %vm22502_vm2, %v16681_v46, %v1750_v31  ;;  %v16684_v41 = vrot.slane %v16652_v22, 9  ;;  %v21905_v45 = vld [vmem:[%s30893_s1 + $0x158] sm:$0xff]   ;;  %v16714_v57 = vcombine.low %v1758_v34, %v1761_v35 }
  0x70   : > { %20260 = vmatprep.mubr.bf16.mxu1 %v16710_v19  ;;  %20290 = vmatprep.subr.bf16.mxu0 %v21898_v15  ;;  %v1764_v3 = vrot.slane %v22926_v49, 5  ;;  %v1754_v19 = vsel %vm22502_vm2, %v1752_v51, %v1753_v52  ;;  %v1227_v20 = vsel %vm22776_vm5, %v16578_v55, %v1226_v6  ;;  %v23010_v6 = vld [vmem:[%s22490_s16 + $0x370] sm:$0xf]  ;;  %v1773_v51 = vrot.slane %v1771_v27, 4  ;;  %v23020_v52 = vld [vmem:[%s22490_s16 + $0x374] sm:$0x7] }
  0x71   : > { %20338 = vmatprep.subr.bf16.mxu1 %v21899_v24  ;;  %v16713_v46 = vcombine.low %v1751_v12, %v1754_v19  ;;  %v23024_v55 = vld [vmem:[%s22490_s16 + $0x428] sm:$0xe]  ;;  %v1247_v58 = vrot.slane %v23010_v6, 7  ;;  %v1785_v19 = vrot.slane %v23051_v2, 5  ;;  %v1780_v22 = vrot.slane %v1778_v44, 4 }
  0x72   : > { %20291 = vmatpush3.bf16.msra.mxu0 %v21898_v15  ;;  %v22975_v15 = vld [vmem:[%s22490_s16 + $0x34c] sm:$0x8]  ;;  %v1766_v31 = vrot.slane %v1764_v3, 4  ;;  %v23048_v0 = vsel %vm22502_vm2, %v16683_v30, %v1764_v3  ;;  %v16685_v48 = vrot.slane %v23024_v55, 9  ;;  %v16658_v12 = vld [vmem:[%s22490_s16 + $0x448] sm:$0xe] }
  0x73   : > { %20339 = vmatpush3.bf16.msra.mxu1 %v21899_v24  ;;  %20292 = vmatprep.subr.bf16.mxu0 %v21900_v47  ;;  %v16654_v24 = vld [vmem:[%s22490_s16 + $0x410] sm:$0x1]  ;;  %v16554_v3 = vld [vmem:[%s22490_s16 + $0x38c] sm:$0x8] }
  0x74   : > { %20340 = vmatprep.subr.bf16.mxu1 %v21901_v54  ;;  %v1774_v42 = vrot.slane %v16654_v24, 5  ;;  %v1781_v24 = vrot.slane %v23031_v59, 5  ;;  %v16582_v29 = vrot.slane %v16554_v3, 11  ;;  %v21909_v34 = vld [vmem:[%s30893_s1 + $0x148] sm:$0xff]   ;;  %v1779_v59 = vsel %vm22502_vm2, %v16685_v48, %v1778_v44 }
  0x75   : > { %20213 = vmatmul.mubr.bf16.gmra.mxu0 %v16607_v36  ;;  %v1767_v36 = vrot.slane %v16651_v9, 5  ;;  %v1772_v9 = vsel %vm22502_vm2, %v16684_v41, %v1771_v27  ;;  %v23082_v27 = vld [vmem:[%s22490_s16 + $0x3b0] sm:$0xf]  ;;  %v23093_v6 = vld [vmem:[%s22490_s16 + $0x3ac] sm:$0x8]  ;;  %v21910_v41 = vld [vmem:[%s30893_s1 + $0x100] sm:$0xff]  }
  0x76   : > { %20261 = vmatmul.mubr.bf16.gmra.mxu1 %v16711_v38  ;;  %20216 = vmatprep.mubr.bf16.mxu0 %v16608_v43  ;;  %v16580_v38 = vrot.slane %v22975_v15, 11  ;;  %v1243_v43 = vrot.slane %v22978_v16, 7  ;;  %v1775_v15 = vsel %vm22502_vm2, %v1773_v51, %v1774_v42  ;;  %v1249_v16 = vrot.slane %v1247_v58, 4  ;;  %v23107_v51 = vld [vmem:[%s22490_s16 + $0x3d0] sm:$0xf] }
  0x77   : > { %20264 = vmatprep.mubr.bf16.mxu1 %v16712_v5  ;;  %20293 = vmatpush3.bf16.msra.mxu0 %v21900_v47  ;;  %v16610_v47 = vcombine.low %v1227_v20, %v1230_v28  ;;  %v1768_v1 = vsel %vm22502_vm2, %v1766_v31, %v1767_v36  ;;  %v21908_v20 = vld [vmem:[%s30893_s1 + $0x108] sm:$0xff]   ;;  %v16686_v31 = vrot.slane %v16658_v12, 9  ;;  %v1268_v44 = vrot.slane %v23107_v51, 7 }
  0x78   : > { %20341 = vmatpush3.bf16.msra.mxu1 %v21901_v54  ;;  %20294 = vmatprep.subr.bf16.mxu0 %v21902_v4  ;;  %v16581_v54 = vrot.slane %v22997_v32, 11  ;;  %v1241_v5 = vsel %vm22776_vm5, %v16580_v38, %v1240_v17  ;;  %v1254_v17 = vrot.slane %v23035_v61, 7  ;;  %v23085_v28 = vld [vmem:[%s22490_s16 + $0x46c] sm:$0xf]  ;;  %v16715_v35 = vcombine.low %v23048_v0, %v1768_v1  ;;  %v16663_v61 = vld [vmem:[%s22490_s16 + $0x470] sm:$0x1] }
  0x79   : > { %20342 = vmatprep.subr.bf16.mxu1 %v21903_v7  ;;  %v16716_v38 = vcombine.low %v1772_v9, %v1775_v15  ;;  %v1782_v32 = vsel %vm22502_vm2, %v1780_v22, %v1781_v24  ;;  %v16562_v0 = vld [vmem:[%s22490_s16 + $0x3d4] sm:$0x7]  ;;  %v16664_v48 = vld [vmem:[%s22490_s16 + $0x488] sm:$0xe]  ;;  %v1795_v12 = vrot.slane %v16663_v61, 5  ;;  %v23157_v15 = vld [vmem:[%s30893_s1 + $0x1f8] sm:$0xff]  }
  0x7a   : > { %v1256_v42 = vrot.slane %v1254_v17, 4  ;;  %v1248_v55 = vsel %vm22776_vm5, %v16581_v54, %v1247_v58  ;;  %v1255_v54 = vsel %vm22776_vm5, %v16582_v29, %v1254_v17  ;;  %v1786_v58 = vsel %vm22502_vm2, %v16686_v31, %v1785_v19  ;;  %v16563_v31 = vld [vmem:[%s22490_s16 + $0x3ec] sm:$0x8] }
  0x7b   : > { %20295 = vmatpush3.bf16.msra.mxu0 %v21902_v4  ;;  %v1250_v4 = vrot.slane %v23020_v52, 7  ;;  %v21911_v52 = vld [vmem:[%s30893_s1 + $0x140] sm:$0xff]   ;;  %v16584_v17 = vrot.slane %v16560_v63, 11  ;;  %v16717_v22 = vcombine.low %v1779_v59, %v1782_v32  ;;  %v1270_v29 = vrot.slane %v1268_v44, 4 }
  0x7c   : > { %20343 = vmatpush3.bf16.msra.mxu1 %v21903_v7  ;;  %20296 = vmatprep.subr.bf16.mxu0 %v21904_v33  ;;  %v1244_v7 = vsel %vm22776_vm5, %v1242_v40, %v1243_v43  ;;  %v23096_v40 = vld [vmem:[%s22490_s16 + $0x3b4] sm:$0x7]  ;;  %v23099_v43 = vld [vmem:[%s22490_s16 + $0x468] sm:$0xe]  ;;  %v16585_v32 = vrot.slane %v16563_v31, 11 }
  0x7d   : > { %20217 = vmatmul.mubr.bf16.gmra.mxu0 %v16609_v11  ;;  %20344 = vmatprep.subr.bf16.mxu1 %v21905_v45  ;;  %v16556_v11 = vld [vmem:[%s22490_s16 + $0x394] sm:$0x7]  ;;  %v16612_v36 = vcombine.low %v1241_v5, %v1244_v7  ;;  %v1264_v1 = vrot.slane %v23096_v40, 7  ;;  %v23145_v5 = vld [vmem:[%s30893_s1 + $0x1b8] sm:$0xff]  }
  0x7e   : > { %20265 = vmatmul.mubr.bf16.gmra.mxu1 %v16713_v46  ;;  %20220 = vmatprep.mubr.bf16.mxu0 %v16610_v47  ;;  %v1257_v30 = vrot.slane %v16556_v11, 7  ;;  %v1261_v46 = vrot.slane %v23082_v27, 7  ;;  %v1792_v47 = vrot.slane %v23085_v28, 5 }
  0x7f   : > { %20268 = vmatprep.mubr.bf16.mxu1 %v16714_v57  ;;  %20297 = vmatpush3.bf16.msra.mxu0 %v21904_v33  ;;  %v1788_v33 = vrot.slane %v23069_v14, 5  ;;  %v23117_v57 = vld [vmem:[%s22490_s16 + $0x48c] sm:$0xf]  ;;  %v16666_v14 = vld [vmem:[%s22490_s16 + $0x490] sm:$0x1] }
  0x80   : > { %20345 = vmatpush3.bf16.msra.mxu1 %v21905_v45  ;;  %20298 = vmatprep.subr.bf16.mxu0 %v21906_v56  ;;  %v1787_v45 = vrot.slane %v1785_v19, 4  ;;  %v1258_v50 = vsel %vm22776_vm5, %v1256_v42, %v1257_v30  ;;  %v1799_v3 = vrot.slane %v23117_v57, 5  ;;  %v1263_v9 = vrot.slane %v1261_v46, 4 }
  0x81   : > { %20346 = vmatprep.subr.bf16.mxu1 %v21907_v62  ;;  %v1794_v11 = vrot.slane %v1792_v47, 4  ;;  %v1271_v19 = vrot.slane %v16562_v0, 7  ;;  %v16614_v24 = vcombine.low %v1255_v54, %v1258_v50  ;;  %v16688_v30 = vrot.slane %v16664_v48, 9  ;;  %v16670_v48 = vld [vmem:[%s22490_s16 + $0x4c8] sm:$0xe] }
  0x82   : > { %v1789_v7 = vsel %vm22502_vm2, %v1787_v45, %v1788_v33  ;;  %v16565_v33 = vld [vmem:[%s22490_s16 + $0x3f4] sm:$0x7]  ;;  %v1265_v51 = vsel %vm22776_vm5, %v1263_v9, %v1264_v1 }
  0x83   : > { %20299 = vmatpush3.bf16.msra.mxu0 %v21906_v56  ;;  %v1251_v56 = vsel %vm22776_vm5, %v1249_v16, %v1250_v4  ;;  %v16687_v4 = vrot.slane %v23099_v43, 9  ;;  %v16669_v43 = vld [vmem:[%s22490_s16 + $0x4b0] sm:$0x1]  ;;  %v1796_v27 = vsel %vm22502_vm2, %v1794_v11, %v1795_v12  ;;  %v1278_v61 = vrot.slane %v16565_v33, 7 }
  0x84   : > { %20347 = vmatpush3.bf16.msra.mxu1 %v21907_v62  ;;  %20300 = vmatprep.subr.bf16.mxu0 %v21908_v20  ;;  %v16583_v62 = vrot.slane %v23093_v6, 11  ;;  %v16613_v16 = vcombine.low %v1248_v55, %v1251_v56  ;;  %v16567_v6 = vld [vmem:[%s22490_s16 + $0x410] sm:$0xf]  ;;  %v23181_v55 = vld [vmem:[%s22490_s16 + $0x4cc] sm:$0xf]  ;;  %v1809_v0 = vrot.slane %v16669_v43, 5 }
  0x85   : > { %20221 = vmatmul.mubr.bf16.gmra.mxu0 %v16611_v21  ;;  %20348 = vmatprep.subr.bf16.mxu1 %v21909_v34  ;;  %v23161_v21 = vld [vmem:[%s22490_s16 + $0x4ac] sm:$0xf]  ;;  %v1282_v59 = vrot.slane %v16567_v6, 7  ;;  %v16675_v43 = vld [vmem:[%s22490_s16 + $0x4f0] sm:$0x1] }
  0x86   : > { %20269 = vmatmul.mubr.bf16.gmra.mxu1 %v16715_v35  ;;  %20224 = vmatprep.mubr.bf16.mxu0 %v16612_v36  ;;  %v1801_v35 = vrot.slane %v1799_v3, 4  ;;  %v1802_v36 = vrot.slane %v16666_v14, 5  ;;  %v1806_v42 = vrot.slane %v23161_v21, 5  ;;  %v1262_v45 = vsel %vm22776_vm5, %v16583_v62, %v1261_v46  ;;  %v16566_v56 = vld [vmem:[%s22490_s16 + $0x40c] sm:$0x8] }
  0x87   : > { %20272 = vmatprep.mubr.bf16.mxu1 %v16716_v38  ;;  %20301 = vmatpush3.bf16.msra.mxu0 %v21908_v20  ;;  %v16564_v20 = vld [vmem:[%s22490_s16 + $0x3f0] sm:$0xf]  ;;  %v16667_v38 = vld [vmem:[%s22490_s16 + $0x4a8] sm:$0xe]  ;;  %v1269_v46 = vsel %vm22776_vm5, %v16584_v17, %v1268_v44  ;;  %v1813_v44 = vrot.slane %v23181_v55, 5  ;;  %v16615_v50 = vcombine.low %v1262_v45, %v1265_v51  ;;  %v1284_v11 = vrot.slane %v1282_v59, 4 }
  0x88   : > { %20349 = vmatpush3.bf16.msra.mxu1 %v21909_v34  ;;  %20302 = vmatprep.subr.bf16.mxu0 %v21910_v41  ;;  %v16718_v34 = vcombine.low %v1786_v58, %v1789_v7  ;;  %v1275_v40 = vrot.slane %v16564_v20, 7  ;;  %v16689_v54 = vrot.slane %v16667_v38, 9  ;;  %v16568_v58 = vld [vmem:[%s22490_s16 + $0x414] sm:$0x7]  ;;  %v1803_v62 = vsel %vm22502_vm2, %v1801_v35, %v1802_v36  ;;  %v16570_v14 = vld [vmem:[%s22490_s16 + $0x430] sm:$0xf] }
  0x89   : > { %20350 = vmatprep.subr.bf16.mxu1 %v21911_v52  ;;  %v1808_v1 = vrot.slane %v1806_v42, 4  ;;  %v1285_v12 = vrot.slane %v16568_v58, 7  ;;  %v16690_v17 = vrot.slane %v16670_v48, 9  ;;  %v16571_v35 = vld [vmem:[%s22490_s16 + $0x434] sm:$0x7]  ;;  %v1289_v36 = vrot.slane %v16570_v14, 7 }
  0x8a   : > { %v1277_v63 = vrot.slane %v1275_v40, 4  ;;  %v1807_v33 = vsel %vm22502_vm2, %v16689_v54, %v1806_v42  ;;  %v16673_v38 = vld [vmem:[%s22490_s16 + $0x4e8] sm:$0xe]  ;;  %v16788_v51 = vld [vmem:[%s22490_s16 + $0x30c] sm:$0x8] }
  0x8b   : > { %20303 = vmatpush3.bf16.msra.mxu0 %v21910_v41  ;;  %v1793_v41 = vsel %vm22502_vm2, %v16687_v4, %v1792_v47  ;;  %v1272_v47 = vsel %vm22776_vm5, %v1270_v29, %v1271_v19  ;;  %v16586_v4 = vrot.slane %v16566_v56, 11  ;;  %v1815_v19 = vrot.slane %v1813_v44, 4  ;;  %v16569_v29 = vld [vmem:[%s22490_s16 + $0x42c] sm:$0x8]  ;;  %v16795_v48 = vld [vmem:[%s22490_s16 + $0x350] sm:$0xf] }
  0x8c   : > { %20351 = vmatpush3.bf16.msra.mxu1 %v21911_v52  ;;  %20384 = vmatprep.subr.bf16.mxu0 %v23145_v5  ;;  %v1800_v52 = vsel %vm22502_vm2, %v16688_v30, %v1799_v3  ;;  %v16672_v3 = vld [vmem:[%s22490_s16 + $0x4d0] sm:$0x1]  ;;  %v16719_v7 = vcombine.low %v1793_v41, %v1796_v27  ;;  %v16616_v9 = vcombine.low %v1269_v46, %v1272_v47  ;;  %v16790_v27 = vld [vmem:[%s22490_s16 + $0x314] sm:$0x7]  ;;  %v16587_v47 = vrot.slane %v16569_v29, 11 }
  0x8d   : > { %20225 = vmatmul.mubr.bf16.gmra.mxu0 %v16613_v16  ;;  %20432 = vmatprep.subr.bf16.mxu1 %v23157_v15  ;;  %v16720_v16 = vcombine.low %v1800_v52, %v1803_v62  ;;  %v1816_v20 = vrot.slane %v16672_v3, 5  ;;  %v16789_v30 = vld [vmem:[%s22490_s16 + $0x310] sm:$0xf]  ;;  %v1279_v31 = vsel %vm22776_vm5, %v1277_v63, %v1278_v61  ;;  %v1283_v6 = vsel %vm22776_vm5, %v16586_v4, %v1282_v59 }
  0x8e   : > { %20273 = vmatmul.mubr.bf16.gmra.mxu1 %v16717_v22  ;;  %20228 = vmatprep.mubr.bf16.mxu0 %v16614_v24  ;;  %v23201_v22 = vld [vmem:[%s22490_s16 + $0x4ec] sm:$0xf]  ;;  %v1276_v24 = vsel %vm22776_vm5, %v16585_v32, %v1275_v40  ;;  %v1286_v40 = vsel %vm22776_vm5, %v1284_v11, %v1285_v12  ;;  %v1814_v42 = vsel %vm22502_vm2, %v16690_v17, %v1813_v44  ;;  %v2599_v46 = vrot.slane %v16789_v30, 7  ;;  %v16732_v4 = vld [vmem:[%s22490_s16 + $0x310] sm:$0xf] }
  0x8f   : > { %20276 = vmatprep.mubr.bf16.mxu1 %v16718_v34  ;;  %v1810_v34 = vsel %vm22502_vm2, %v1808_v1, %v1809_v0  ;;  %v1820_v45 = vrot.slane %v23201_v22, 5  ;;  %v1817_v41 = vsel %vm22502_vm2, %v1815_v19, %v1816_v20  ;;  %v16617_v52 = vcombine.low %v1276_v24, %v1279_v31  ;;  %v16792_v0 = vld [vmem:[%s22490_s16 + $0x330] sm:$0xf]  ;;  %v16793_v19 = vld [vmem:[%s22490_s16 + $0x334] sm:$0x7] }
  0x90   : > { %v16721_v56 = vcombine.low %v1807_v33, %v1810_v34  ;;  %v16618_v59 = vcombine.low %v1283_v6, %v1286_v40  ;;  %v1291_v32 = vrot.slane %v1289_v36, 4  ;;  %v1292_v61 = vrot.slane %v16571_v35, 7  ;;  %v16794_v20 = vld [vmem:[%s22490_s16 + $0x34c] sm:$0x8]  ;;  %v16796_v30 = vld [vmem:[%s22490_s16 + $0x354] sm:$0x7] }
  0x91   : > { %v16722_v54 = vcombine.low %v1814_v42, %v1817_v41  ;;  %v16691_v58 = vrot.slane %v16673_v38, 9  ;;  %v1822_v62 = vrot.slane %v1820_v45, 4  ;;  %v1823_v63 = vrot.slane %v16675_v43, 5  ;;  %v16798_v40 = vld [vmem:[%s22490_s16 + $0x370] sm:$0xf] }
  0x92   : > { %v16836_v44 = vrot.slane %v16788_v51, 11  ;;  %v2602_v1 = vrot.slane %v16790_v27, 7  ;;  %v1290_v3 = vsel %vm22776_vm5, %v16587_v47, %v1289_v36  ;;  %v2606_v11 = vrot.slane %v16792_v0, 7  ;;  %v16801_v51 = vld [vmem:[%s22490_s16 + $0x390] sm:$0xf] }
  0x93   : > { %v1821_v12 = vsel %vm22502_vm2, %v16691_v58, %v1820_v45  ;;  %v1824_v14 = vsel %vm22502_vm2, %v1822_v62, %v1823_v63  ;;  %v2613_v24 = vrot.slane %v16795_v48, 7  ;;  %v23247_v33 = vcombine.low %v22738_v13, %v16732_v4  ;;  %v16733_v13 = vld [vmem:[%s22490_s16 + $0x330] sm:$0xf]  ;;  %v16802_v58 = vld [vmem:[%s22490_s16 + $0x394] sm:$0x7] }
  0x94   : > { %v16723_v31 = vcombine.low %v1821_v12, %v1824_v14  ;;  %v2608_v36 = vrot.slane %v2606_v11, 4  ;;  %v2609_v38 = vrot.slane %v16793_v19, 7  ;;  %v16838_v6 = vrot.slane %v16794_v20, 11  ;;  %v16736_v12 = vld [vmem:[%s22490_s16 + $0x390] sm:$0xf] }
  0x95   : > { %20229 = vmatmul.mubr.bf16.gmra.mxu0 %v16615_v50  ;;  %v2601_v50 = vrot.slane %v2599_v46, 4  ;;  %30957 = vst [vmem:[#allocation4_spill] sm:$0xff] %v23247_v33  ;;  %v2615_v43 = vrot.slane %v2613_v24, 4  ;;  %v2616_v45 = vrot.slane %v16796_v30, 7  ;;  %v2620_v42 = vrot.slane %v16798_v40, 7  ;;  %v21923_v30 = vld [vmem:[%s30893_s1 + $0x1e8] sm:$0xff]  }
  0x96   : > { %20277 = vmatmul.mubr.bf16.gmra.mxu1 %v16719_v7  ;;  %20232 = vmatprep.mubr.bf16.mxu0 %v16616_v9  ;;  %v1293_v7 = vsel %vm22776_vm5, %v1291_v32, %v1292_v61  ;;  %v16791_v9 = vld [vmem:[%s22490_s16 + $0x32c] sm:$0x8]  ;;  %v2610_v27 = vsel %vm22776_vm5, %v2608_v36, %v2609_v38  ;;  %v23261_v47 = vcombine.low %v22767_v37, %v16733_v13  ;;  %v16805_v19 = vld [vmem:[%s22490_s16 + $0x3b4] sm:$0x7] }
  0x97   : > { %20280 = vmatprep.mubr.bf16.mxu1 %v16720_v16  ;;  %v2600_v16 = vsel %vm22776_vm5, %v16836_v44, %v2599_v46  ;;  %v2603_v17 = vsel %vm22776_vm5, %v2601_v50, %v2602_v1  ;;  %v16619_v29 = vcombine.low %v1290_v3, %v1293_v7  ;;  %v16837_v34 = vrot.slane %v16791_v9, 11  ;;  %v16797_v46 = vld [vmem:[%s22490_s16 + $0x36c] sm:$0x8]  ;;  %v21918_v1 = vld [vmem:[%s30893_s1 + $0x1b0] sm:$0xff]  }
  0x98   : > { %v16868_v35 = vcombine.low %v2600_v16, %v2603_v17  ;;  %30958 = vst [vmem:[#allocation5_spill] sm:$0xff] %v23261_v47  ;;  %v2614_v32 = vsel %vm22776_vm5, %v16838_v6, %v2613_v24  ;;  %v2617_v61 = vsel %vm22776_vm5, %v2615_v43, %v2616_v45  ;;  %v16839_v63 = vrot.slane %v16797_v46, 11  ;;  %v16804_v7 = vld [vmem:[%s22490_s16 + $0x3b0] sm:$0xf]  ;;  %v16803_v14 = vld [vmem:[%s22490_s16 + $0x3ac] sm:$0x8] }
  0x99   : > { %v2607_v41 = vsel %vm22776_vm5, %v16837_v34, %v2606_v11  ;;  %v2622_v0 = vrot.slane %v2620_v42, 4  ;;  %v16870_v37 = vcombine.low %v2614_v32, %v2617_v61  ;;  %v2630_v3 = vrot.slane %v16802_v58, 7  ;;  %v21919_v9 = vld [vmem:[%s30893_s1 + $0x1f0] sm:$0xff]   ;;  %v16806_v24 = vld [vmem:[%s22490_s16 + $0x3cc] sm:$0x8] }
  0x9a   : > { %v16869_v62 = vcombine.low %v2607_v41, %v2610_v27  ;;  %v16807_v11 = vld [vmem:[%s22490_s16 + $0x3d0] sm:$0xf]  ;;  %v2621_v16 = vsel %vm22776_vm5, %v16839_v63, %v2620_v42  ;;  %v2634_v20 = vrot.slane %v16804_v7, 7  ;;  %v23308_v38 = vcombine.low %v22818_v23, %v16736_v12  ;;  %v21926_v41 = vld [vmem:[%s30893_s1 + $0x1a0] sm:$0xff]   ;;  %v16812_v63 = vld [vmem:[%s22490_s16 + $0x40c] sm:$0x8] }
  0x9b   : > { %v2641_v34 = vrot.slane %v16807_v11, 7  ;;  %v16841_v40 = vrot.slane %v16803_v14, 11  ;;  %v2637_v45 = vrot.slane %v16805_v19, 7  ;;  %v21927_v23 = vld [vmem:[%s30893_s1 + $0x1e0] sm:$0xff]   ;;  %v16737_v27 = vld [vmem:[%s22490_s16 + $0x3b0] sm:$0xf] }
  0x9c   : > { %30961 = vst [vmem:[#allocation8_spill] sm:$0xff] %v23308_v38  ;;  %v2636_v43 = vrot.slane %v2634_v20, 4  ;;  %v16738_v46 = vld [vmem:[%s22490_s16 + $0x3d0] sm:$0xf]  ;;  %v16844_v12 = vrot.slane %v16812_v63, 11 }
  0x9d   : > { %20233 = vmatmul.mubr.bf16.gmra.mxu0 %v16617_v52  ;;  %v16799_v52 = vld [vmem:[%s22490_s16 + $0x374] sm:$0x7]  ;;  %v2643_v13 = vrot.slane %v2641_v34, 4  ;;  %v2635_v32 = vsel %vm22776_vm5, %v16841_v40, %v2634_v20  ;;  %v16816_v14 = vld [vmem:[%s22490_s16 + $0x430] sm:$0xf]  ;;  %v21938_v40 = vld [vmem:[%s30893_s1 + $0x188] sm:$0xff]  }
  0x9e   : > { %20281 = vmatmul.mubr.bf16.gmra.mxu1 %v16721_v56  ;;  %20236 = vmatprep.mubr.bf16.mxu0 %v16618_v59  ;;  %v16734_v56 = vld [vmem:[%s22490_s16 + $0x350] sm:$0xf]  ;;  %v2627_v59 = vrot.slane %v16801_v51, 7  ;;  %v2623_v44 = vrot.slane %v16799_v52, 7  ;;  %v2638_v61 = vsel %vm22776_vm5, %v2636_v43, %v2637_v45  ;;  %v16818_v45 = vld [vmem:[%s22490_s16 + $0x44c] sm:$0x8] }
  0x9f   : > { %20284 = vmatprep.mubr.bf16.mxu1 %v16722_v54  ;;  %v16800_v54 = vld [vmem:[%s22490_s16 + $0x38c] sm:$0x8]  ;;  %v23270_v50 = vcombine.low %v22786_v60, %v16734_v56  ;;  %v16735_v60 = vld [vmem:[%s22490_s16 + $0x370] sm:$0xf] }
  0xa0   : > { %v16840_v4 = vrot.slane %v16800_v54, 11  ;;  %v2629_v48 = vrot.slane %v2627_v59, 4  ;;  %v2624_v17 = vsel %vm22776_vm5, %v2622_v0, %v2623_v44  ;;  %v16810_v51 = vld [vmem:[%s22490_s16 + $0x3f0] sm:$0xf]  ;;  %v16809_v56 = vld [vmem:[%s22490_s16 + $0x3ec] sm:$0x8] }
  0xa1   : > { %30959 = vst [vmem:[#allocation6_spill] sm:$0xff] %v23270_v50  ;;  %v16871_v36 = vcombine.low %v2621_v16, %v2624_v17  ;;  %v16813_v52 = vld [vmem:[%s22490_s16 + $0x410] sm:$0xf]  ;;  %v21930_v44 = vld [vmem:[%s30893_s1 + $0x198] sm:$0xff]   ;;  %v16843_v7 = vrot.slane %v16809_v56, 11 }
  0xa2   : > { %v2655_v0 = vrot.slane %v16813_v52, 7  ;;  %v21935_v16 = vld [vmem:[%s30893_s1 + $0x1d0] sm:$0xff]  }
  0xa3   : > { %v16819_v19 = vld [vmem:[%s22490_s16 + $0x450] sm:$0xf] }
  0xa4   : > { %v16739_v20 = vld [vmem:[%s22490_s16 + $0x3f0] sm:$0xf] }
  0xa5   : > { %20237 = vmatmul.mubr.bf16.gmra.mxu0 %v16619_v29  ;;  %v2631_v29 = vsel %vm22776_vm5, %v2629_v48, %v2630_v3  ;;  %v16873_v48 = vcombine.low %v2635_v32, %v2638_v61  ;;  %v23344_v3 = vcombine.low %v22881_v26, %v16738_v46  ;;  %v2657_v26 = vrot.slane %v2655_v0, 4  ;;  %v16825_v32 = vld [vmem:[%s22490_s16 + $0x490] sm:$0xf]  ;;  %v21943_v61 = vld [vmem:[%s30893_s1 + $0x1c0] sm:$0xff]  }
  0xa6   : > { %20285 = vmatmul.mubr.bf16.gmra.mxu1 %v16723_v31  ;;  %20304 = vmatprep.mubr.bf16.mxu0 %v23247_v33  ;;  %v16808_v31 = vld [vmem:[%s22490_s16 + $0x3d4] sm:$0x7]  ;;  %v23372_v43 = vcombine.low %v22926_v49, %v16739_v20  ;;  %v16846_v49 = vrot.slane %v16818_v45, 11 }
  0xa7   : > { %20352 = vmatprep.mubr.bf16.mxu1 %v16868_v35  ;;  %v23305_v35 = vcombine.low %v22810_v25, %v16735_v60  ;;  %v16842_v25 = vrot.slane %v16806_v24, 11  ;;  %v2644_v42 = vrot.slane %v16808_v31, 7  ;;  %30963 = vst [vmem:[#allocation10_spill] sm:$0xff] %v23344_v3  ;;  %v2656_v31 = vsel %vm22776_vm5, %v16844_v12, %v2655_v0  ;;  %v16826_v12 = vld [vmem:[%s22490_s16 + $0x494] sm:$0x7] }
  0xa8   : > { %30964 = vst [vmem:[#allocation11_spill] sm:$0xff] %v23372_v43 }
  0xa9   : > { %30960 = vst [vmem:[#allocation7_spill] sm:$0xff] %v23305_v35  ;;  %v2642_v54 = vsel %vm22776_vm5, %v16842_v25, %v2641_v34  ;;  %v2645_v58 = vsel %vm22776_vm5, %v2643_v13, %v2644_v42  ;;  %v21939_v25 = vld [vmem:[%s30893_s1 + $0x1c8] sm:$0xff]  }
  0xaa   : > { %v16874_v11 = vcombine.low %v2642_v54, %v2645_v58  ;;  %v16741_v54 = vld [vmem:[%s22490_s16 + $0x430] sm:$0xf] }
  0xab   : > { %v16742_v58 = vld [vmem:[%s22490_s16 + $0x450] sm:$0xf] }
  0xad   : > { %20305 = vmatmul.mubr.bf16.vlgmr.msra.gmra.mxu0 %v23261_v47 }
  0xae   : > { %20353 = vmatmul.mubr.bf16.vlgmr.msra.gmra.mxu1 %v16869_v62  ;;  %20385 = vmatpush3.bf16.msra.mxu0 %v23145_v5  ;;  %v21922_v5 = vld [vmem:[%s30893_s1 + $0x1a8] sm:$0xff]   ;;  %v16811_v62 = vld [vmem:[%s22490_s16 + $0x3f4] sm:$0x7] }
  0xaf   : > { %20433 = vmatpush3.bf16.msra.mxu1 %v23157_v15  ;;  %20308 = vmatprep.mubr.bf16.mxu0 %v23270_v50  ;;  %v2628_v15 = vsel %vm22776_vm5, %v16840_v4, %v2627_v59  ;;  %v2648_v59 = vrot.slane %v16810_v51, 7  ;;  %v21931_v4 = vld [vmem:[%s30893_s1 + $0x1d8] sm:$0xff]   ;;  %v2651_v60 = vrot.slane %v16811_v62, 7  ;;  %v16820_v51 = vld [vmem:[%s22490_s16 + $0x454] sm:$0x7] }
  0xb0   : > { %20356 = vmatprep.mubr.bf16.mxu1 %v16870_v37  ;;  %20386 = vmatprep.subr.bf16.mxu0 %v21918_v1  ;;  %v16872_v6 = vcombine.low %v2628_v15, %v2631_v29  ;;  %v23337_v37 = vcombine.low %v22851_v10, %v16737_v27  ;;  %v16740_v15 = vld [vmem:[%s22490_s16 + $0x410] sm:$0xf]  ;;  %v16815_v29 = vld [vmem:[%s22490_s16 + $0x42c] sm:$0x8]  ;;  %v2672_v56 = vrot.slane %v16820_v51, 7 }
  0xb1   : > { %20434 = vmatprep.subr.bf16.mxu1 %v21919_v9  ;;  %v2650_v10 = vrot.slane %v2648_v59, 4  ;;  %v23380_v42 = vcombine.low %v22966_v8, %v16740_v15  ;;  %v21942_v8 = vld [vmem:[%s30893_s1 + $0x180] sm:$0xff]   ;;  %v16821_v62 = vld [vmem:[%s22490_s16 + $0x46c] sm:$0x8] }
  0xb2   : > { %20387 = vmatpush3.bf16.msra.mxu0 %v21918_v1  ;;  %30962 = vst [vmem:[#allocation9_spill] sm:$0xff] %v23337_v37  ;;  %v16814_v1 = vld [vmem:[%s22490_s16 + $0x414] sm:$0x7]  ;;  %v23956_v50 = vld [vmem:[%s22490_s16 + $0x40c] sm:$0x8] }
  0xb3   : > { %20435 = vmatpush3.bf16.msra.mxu1 %v21919_v9  ;;  %20388 = vmatprep.subr.bf16.mxu0 %v21922_v5  ;;  %v21934_v9 = vld [vmem:[%s30893_s1 + $0x190] sm:$0xff]   ;;  %v2658_v17 = vrot.slane %v16814_v1, 7  ;;  %v2652_v24 = vsel %vm22776_vm5, %v2650_v10, %v2651_v60  ;;  %30965 = vst [vmem:[#allocation12_spill] sm:$0xff] %v23380_v42  ;;  %v23415_v10 = vcombine.low %v23013_v39, %v16741_v54  ;;  %v16824_v60 = vld [vmem:[%s22490_s16 + $0x48c] sm:$0x8] }
  0xb4   : > { %20436 = vmatprep.subr.bf16.mxu1 %v21923_v30  ;;  %v16848_v15 = vrot.slane %v16824_v60, 11 }
  0xb5   : > { %20309 = vmatmul.mubr.bf16.gmra.mxu0 %v23305_v35  ;;  %v2659_v34 = vsel %vm22776_vm5, %v2657_v26, %v2658_v17  ;;  %30966 = vst [vmem:[#allocation13_spill] sm:$0xff] %v23415_v10  ;;  %v16828_v26 = vld [vmem:[%s22490_s16 + $0x4b0] sm:$0xf] }
  0xb6   : > { %20357 = vmatmul.mubr.bf16.gmra.mxu1 %v16871_v36  ;;  %20312 = vmatprep.mubr.bf16.mxu0 %v23308_v38  ;;  %v16817_v36 = vld [vmem:[%s22490_s16 + $0x434] sm:$0x7] }
  0xb7   : > { %20360 = vmatprep.mubr.bf16.mxu1 %v16872_v6  ;;  %20389 = vmatpush3.bf16.msra.mxu0 %v21922_v5  ;;  %v2649_v5 = vsel %vm22776_vm5, %v16843_v7, %v2648_v59  ;;  %v2669_v6 = vrot.slane %v16819_v19, 7  ;;  %v2665_v46 = vrot.slane %v16817_v36, 7  ;;  %v16822_v59 = vld [vmem:[%s22490_s16 + $0x470] sm:$0xf]  ;;  %v16847_v19 = vrot.slane %v16821_v62, 11 }
  0xb8   : > { %20437 = vmatpush3.bf16.msra.mxu1 %v21923_v30  ;;  %20390 = vmatprep.subr.bf16.mxu0 %v21926_v41  ;;  %v2662_v30 = vrot.slane %v16816_v14, 7  ;;  %v16875_v13 = vcombine.low %v2649_v5, %v2652_v24  ;;  %v2676_v1 = vrot.slane %v16822_v59, 7  ;;  %v16743_v24 = vld [vmem:[%s22490_s16 + $0x470] sm:$0xf]  ;;  %v16833_v62 = vld [vmem:[%s22490_s16 + $0x4ec] sm:$0x8] }
  0xb9   : > { %20438 = vmatprep.subr.bf16.mxu1 %v21927_v23  ;;  %v2671_v52 = vrot.slane %v2669_v6, 4  ;;  %v16834_v59 = vld [vmem:[%s22490_s16 + $0x4f0] sm:$0xf] }
  0xba   : > { %v2664_v27 = vrot.slane %v2662_v30, 4  ;;  %v2678_v20 = vrot.slane %v2676_v1, 4  ;;  %v2677_v36 = vsel %vm22776_vm5, %v16847_v19, %v2676_v1 }
  0xbb   : > { %20391 = vmatpush3.bf16.msra.mxu0 %v21926_v41  ;;  %v16845_v41 = vrot.slane %v16815_v29, 11  ;;  %v2673_v7 = vsel %vm22776_vm5, %v2671_v52, %v2672_v56  ;;  %v2686_v29 = vrot.slane %v16826_v12, 7 }
  0xbc   : > { %20439 = vmatpush3.bf16.msra.mxu1 %v21927_v23  ;;  %20392 = vmatprep.subr.bf16.mxu0 %v21930_v44  ;;  %v16876_v23 = vcombine.low %v2656_v31, %v2659_v34  ;;  %v2666_v0 = vsel %vm22776_vm5, %v2664_v27, %v2665_v46  ;;  %v16827_v31 = vld [vmem:[%s22490_s16 + $0x4ac] sm:$0x8]  ;;  %v2690_v34 = vrot.slane %v16828_v26, 7  ;;  %v16851_v26 = vrot.slane %v16833_v62, 11 }
  0xbd   : > { %20313 = vmatmul.mubr.bf16.gmra.mxu0 %v23337_v37  ;;  %20440 = vmatprep.subr.bf16.mxu1 %v21931_v4  ;;  %v2663_v63 = vsel %vm22776_vm5, %v16845_v41, %v2662_v30  ;;  %v16831_v30 = vld [vmem:[%s22490_s16 + $0x4d0] sm:$0xf]  ;;  %v16832_v41 = vld [vmem:[%s22490_s16 + $0x4d4] sm:$0x7]  ;;  %v23508_v62 = vld [vmem:[%s22490_s16 + $0x44c] sm:$0xf] }
  0xbe   : > { %20361 = vmatmul.mubr.bf16.gmra.mxu1 %v16873_v48  ;;  %20316 = vmatprep.mubr.bf16.mxu0 %v23344_v3  ;;  %v2670_v48 = vsel %vm22776_vm5, %v16846_v49, %v2669_v6  ;;  %v16877_v14 = vcombine.low %v2663_v63, %v2666_v0  ;;  %v2697_v45 = vrot.slane %v16831_v30, 7  ;;  %v16849_v49 = vrot.slane %v16827_v31, 11  ;;  %v16835_v63 = vld [vmem:[%s22490_s16 + $0x4f4] sm:$0x7]  ;;  %v16892_v0 = vld [vmem:[%s22490_s16 + $0x3c8] sm:$0xe] }
  0xbf   : > { %20364 = vmatprep.mubr.bf16.mxu1 %v16874_v11  ;;  %20393 = vmatpush3.bf16.msra.mxu0 %v21930_v44  ;;  %v16823_v44 = vld [vmem:[%s22490_s16 + $0x474] sm:$0x7]  ;;  %v23412_v11 = vld [vmem:[%s30893_s1 + $0x278] sm:$0xff]   ;;  %v16878_v17 = vcombine.low %v2670_v48, %v2673_v7  ;;  %v2692_v52 = vrot.slane %v2690_v34, 4  ;;  %v2700_v54 = vrot.slane %v16832_v41, 7  ;;  %v2707_v19 = vrot.slane %v16835_v63, 7 }
  0xc0   : > { %20441 = vmatpush3.bf16.msra.mxu1 %v21931_v4  ;;  %20394 = vmatprep.subr.bf16.mxu0 %v21934_v9  ;;  %v23403_v4 = vld [vmem:[%s30893_s1 + $0x238] sm:$0xff]   ;;  %v2679_v5 = vrot.slane %v16823_v44, 7  ;;  %v2691_v44 = vsel %vm22776_vm5, %v16849_v49, %v2690_v34  ;;  %v16746_v48 = vld [vmem:[%s22490_s16 + $0x4d0] sm:$0xf]  ;;  %v23479_v30 = vld [vmem:[%s22490_s16 + $0x40c] sm:$0xf] }
  0xc1   : > { %20442 = vmatprep.subr.bf16.mxu1 %v21935_v16  ;;  %v16996_v34 = vld [vmem:[%s22490_s16 + $0x3d0] sm:$0xf]  ;;  %v16901_v63 = vld [vmem:[%s22490_s16 + $0x428] sm:$0xe] }
  0xc2   : > { %v2680_v6 = vsel %vm22776_vm5, %v2678_v20, %v2679_v5  ;;  %v16940_v20 = vrot.slane %v16892_v0, 9  ;;  %v16900_v49 = vld [vmem:[%s22490_s16 + $0x410] sm:$0x1] }
  0xc3   : > { %20395 = vmatpush3.bf16.msra.mxu0 %v21934_v9  ;;  %v2683_v9 = vrot.slane %v16825_v32, 7  ;;  %v16879_v46 = vcombine.low %v2677_v36, %v2680_v6  ;;  %v16903_v0 = vld [vmem:[%s22490_s16 + $0x430] sm:$0x1] }
  0xc4   : > { %20443 = vmatpush3.bf16.msra.mxu1 %v21935_v16  ;;  %20396 = vmatprep.subr.bf16.mxu0 %v21938_v40  ;;  %v23420_v16 = vcombine.low %v23051_v2, %v16742_v58  ;;  %v16744_v2 = vld [vmem:[%s22490_s16 + $0x490] sm:$0xf]  ;;  %v23450_v58 = vld [vmem:[%s22490_s16 + $0x3cc] sm:$0xf] }
  0xc5   : > { %20317 = vmatmul.mubr.bf16.gmra.mxu0 %v23372_v43  ;;  %20444 = vmatprep.subr.bf16.mxu1 %v21939_v25  ;;  %v2685_v39 = vrot.slane %v2683_v9, 4  ;;  %v2684_v51 = vsel %vm22776_vm5, %v16848_v15, %v2683_v9  ;;  %v23446_v27 = vcombine.low %v23117_v57, %v16744_v2  ;;  %v2704_v57 = vrot.slane %v16834_v59, 7  ;;  %v16747_v2 = vld [vmem:[%s22490_s16 + $0x4f0] sm:$0xf] }
  0xc6   : > { %20365 = vmatmul.mubr.bf16.gmra.mxu1 %v16875_v13  ;;  %20320 = vmatprep.mubr.bf16.mxu0 %v23380_v42  ;;  %30967 = vst [vmem:[#allocation14_spill] sm:$0xff] %v23420_v16  ;;  %v16830_v13 = vld [vmem:[%s22490_s16 + $0x4cc] sm:$0x8]  ;;  %v3130_v7 = vrot.slane %v23450_v58, 5 }
  0xc7   : > { %20368 = vmatprep.mubr.bf16.mxu1 %v16876_v23  ;;  %20397 = vmatpush3.bf16.msra.mxu0 %v21938_v40  ;;  %v16829_v40 = vld [vmem:[%s22490_s16 + $0x4b4] sm:$0x7]  ;;  %v23443_v23 = vcombine.low %v23085_v28, %v16743_v24  ;;  %30969 = vst [vmem:[#allocation16_spill] sm:$0xff] %v23446_v27  ;;  %v16850_v32 = vrot.slane %v16830_v13, 11  ;;  %v16745_v28 = vld [vmem:[%s22490_s16 + $0x4b0] sm:$0xf]  ;;  %v23473_v24 = vcombine.low %v23181_v55, %v16746_v48 }
  0xc8   : > { %20445 = vmatpush3.bf16.msra.mxu1 %v21939_v25  ;;  %20398 = vmatprep.subr.bf16.mxu0 %v21942_v8  ;;  %v2687_v25 = vsel %vm22776_vm5, %v2685_v39, %v2686_v29  ;;  %v2693_v56 = vrot.slane %v16829_v40, 7  ;;  %v23465_v9 = vcombine.low %v23161_v21, %v16745_v28  ;;  %v3132_v21 = vrot.slane %v3130_v7, 4  ;;  %v23476_v29 = vld [vmem:[%s22490_s16 + $0x3ec] sm:$0xf]  ;;  %v16904_v48 = vld [vmem:[%s22490_s16 + $0x448] sm:$0xe] }
  0xc9   : > { %20446 = vmatprep.subr.bf16.mxu1 %v21943_v61  ;;  %30968 = vst [vmem:[#allocation15_spill] sm:$0xff] %v23443_v23  ;;  %v2698_v60 = vsel %vm22776_vm5, %v16850_v32, %v2697_v45  ;;  %30971 = vst [vmem:[#allocation18_spill] sm:$0xff] %v23473_v24  ;;  %v2705_v55 = vsel %vm22776_vm5, %v16851_v26, %v2704_v57  ;;  %v3137_v36 = vrot.slane %v23476_v29, 5  ;;  %v23503_v32 = vld [vmem:[%s22490_s16 + $0x42c] sm:$0xf] }
  0xca   : > { %v2694_v1 = vsel %vm22776_vm5, %v2692_v52, %v2693_v56  ;;  %30970 = vst [vmem:[#allocation17_spill] sm:$0xff] %v23465_v9  ;;  %v3131_v6 = vsel %vm22502_vm2, %v16940_v20, %v3130_v7  ;;  %v23498_v13 = vcombine.low %v23201_v22, %v16747_v2  ;;  %v3147_v22 = vrot.slane %v16900_v49, 5 }
  0xcb   : > { %20399 = vmatpush3.bf16.msra.mxu0 %v21942_v8  ;;  %v16880_v8 = vcombine.low %v2684_v51, %v2687_v25  ;;  %v16881_v5 = vcombine.low %v2691_v44, %v2694_v1  ;;  %v16897_v51 = vld [vmem:[%s22490_s16 + $0x3f0] sm:$0x1]  ;;  %v3144_v25 = vrot.slane %v23479_v30, 5  ;;  %v3139_v59 = vrot.slane %v3137_v36, 4 }
  0xcc   : > { %20447 = vmatpush3.bf16.msra.mxu1 %v21943_v61  ;;  %20480 = vmatprep.subr.bf16.mxu0 %v23403_v4  ;;  %v2699_v61 = vrot.slane %v2697_v45, 4  ;;  %v16895_v45 = vld [vmem:[%s22490_s16 + $0x3e8] sm:$0xe]  ;;  %30972 = vst [vmem:[#allocation19_spill] sm:$0xff] %v23498_v13  ;;  %v3151_v44 = vrot.slane %v23503_v32, 5  ;;  %v3158_v7 = vrot.slane %v23508_v62, 5 }
  0xcd   : > { %20321 = vmatmul.mubr.bf16.gmra.mxu0 %v23415_v10  ;;  %20528 = vmatprep.subr.bf16.mxu1 %v23412_v11  ;;  %v16941_v56 = vrot.slane %v16895_v45, 9  ;;  %v16943_v20 = vrot.slane %v16901_v63, 9  ;;  %v23857_v10 = vld [vmem:[%s22490_s16 + $0x184] sm:$0xc] }
  0xce   : > { %20369 = vmatmul.mubr.bf16.gmra.mxu1 %v16877_v14  ;;  %20324 = vmatprep.mubr.bf16.mxu0 %v23420_v16  ;;  %v2701_v12 = vsel %vm22776_vm5, %v2699_v61, %v2700_v54  ;;  %v16894_v14 = vld [vmem:[%s22490_s16 + $0x3d0] sm:$0x1]  ;;  %v17028_v61 = vcombine.low %v23450_v58, %v16996_v34  ;;  %v23531_v34 = vld [vmem:[%s22490_s16 + $0x46c] sm:$0xf] }
  0xcf   : > { %20372 = vmatprep.mubr.bf16.mxu1 %v16878_v17  ;;  %v2706_v17 = vrot.slane %v2704_v57, 4  ;;  %v16882_v15 = vcombine.low %v2698_v60, %v2701_v12  ;;  %v3133_v39 = vrot.slane %v16894_v14, 5  ;;  %v16997_v54 = vld [vmem:[%s22490_s16 + $0x3f0] sm:$0xf]  ;;  %v3146_v57 = vrot.slane %v3144_v25, 4 }
  0xd0   : > { %v3138_v1 = vsel %vm22502_vm2, %v16941_v56, %v3137_v36  ;;  %v16906_v14 = vld [vmem:[%s22490_s16 + $0x450] sm:$0x1]  ;;  %v23534_v36 = vld [vmem:[%s22490_s16 + $0x48c] sm:$0xf] }
  0xd1   : > { %v2708_v31 = vsel %vm22776_vm5, %v2706_v17, %v2707_v19  ;;  %v3134_v40 = vsel %vm22502_vm2, %v3132_v21, %v3133_v39  ;;  %v3148_v12 = vsel %vm22502_vm2, %v3146_v57, %v3147_v22  ;;  %v17029_v17 = vcombine.low %v23476_v29, %v16997_v54  ;;  %v16998_v19 = vld [vmem:[%s22490_s16 + $0x410] sm:$0xf]  ;;  %v16910_v57 = vld [vmem:[%s22490_s16 + $0x488] sm:$0xe] }
  0xd2   : > { %v16883_v41 = vcombine.low %v2705_v55, %v2708_v31  ;;  %v16972_v52 = vcombine.low %v3131_v6, %v3134_v40  ;;  %v21950_v21 = vld [vmem:[%s30893_s1 + $0x230] sm:$0xff]   ;;  %v16944_v39 = vrot.slane %v16904_v48, 9  ;;  %v3160_v55 = vrot.slane %v3158_v7, 4 }
  0xd3   : > { %v3161_v31 = vrot.slane %v16906_v14, 5  ;;  %v17030_v29 = vcombine.low %v23479_v30, %v16998_v19  ;;  %v21951_v40 = vld [vmem:[%s30893_s1 + $0x270] sm:$0xff]   ;;  %v3172_v54 = vrot.slane %v23534_v36, 5 }
  0xd4   : > { %v17000_v30 = vld [vmem:[%s22490_s16 + $0x450] sm:$0xf] }
  0xd5   : > { %20325 = vmatmul.mubr.bf16.gmra.mxu0 %v23443_v23  ;;  %v3162_v56 = vsel %vm22502_vm2, %v3160_v55, %v3161_v31  ;;  %v16912_v22 = vld [vmem:[%s22490_s16 + $0x490] sm:$0x1] }
  0xd6   : > { %20373 = vmatmul.mubr.bf16.gmra.mxu1 %v16879_v46  ;;  %20328 = vmatprep.mubr.bf16.mxu0 %v23446_v27  ;;  %v16898_v46 = vld [vmem:[%s22490_s16 + $0x408] sm:$0xe]  ;;  %v17001_v31 = vld [vmem:[%s22490_s16 + $0x470] sm:$0xf] }
  0xd7   : > { %20376 = vmatprep.mubr.bf16.mxu1 %v16880_v8  ;;  %v3140_v8 = vrot.slane %v16897_v51, 5  ;;  %v16942_v28 = vrot.slane %v16898_v46, 9  ;;  %v3152_v51 = vsel %vm22502_vm2, %v16943_v20, %v3151_v44  ;;  %v3165_v46 = vrot.slane %v23531_v34, 5 }
  0xd8   : > { %v3174_v20 = vrot.slane %v3172_v54, 4 }
  0xd9   : > { %v3141_v58 = vsel %vm22502_vm2, %v3139_v59, %v3140_v8  ;;  %v3145_v60 = vsel %vm22502_vm2, %v16942_v28, %v3144_v25  ;;  %v16907_v59 = vld [vmem:[%s22490_s16 + $0x468] sm:$0xe]  ;;  %v16909_v8 = vld [vmem:[%s22490_s16 + $0x470] sm:$0x1] }
  0xda   : > { %v16973_v26 = vcombine.low %v3138_v1, %v3141_v58  ;;  %v16974_v2 = vcombine.low %v3145_v60, %v3148_v12  ;;  %v17032_v58 = vcombine.low %v23508_v62, %v17000_v30  ;;  %v16945_v60 = vrot.slane %v16907_v59, 9 }
  0xdb   : > { %v3167_v12 = vrot.slane %v3165_v46, 4  ;;  %v3168_v14 = vrot.slane %v16909_v8, 5  ;;  %v3175_v62 = vrot.slane %v16912_v22, 5  ;;  %v23606_v22 = vld [vmem:[%s22490_s16 + $0x4ec] sm:$0xf] }
  0xdd   : > { %20329 = vmatmul.mubr.bf16.gmra.mxu0 %v23465_v9 }
  0xde   : > { %20377 = vmatmul.mubr.bf16.gmra.mxu1 %v16881_v5  ;;  %20332 = vmatprep.mubr.bf16.mxu0 %v23473_v24  ;;  %v3153_v5 = vrot.slane %v3151_v44, 4 }
  0xdf   : > { %20380 = vmatprep.mubr.bf16.mxu1 %v16882_v15  ;;  %v3154_v15 = vrot.slane %v16903_v0, 5 }
  0xe1   : > { %v3155_v25 = vsel %vm22502_vm2, %v3153_v5, %v3154_v15  ;;  %v23576_v5 = vld [vmem:[%s22490_s16 + $0x4ac] sm:$0xf]  ;;  %v21959_v15 = vld [vmem:[%s30893_s1 + $0x260] sm:$0xff]  }
  0xe2   : > { %v16975_v44 = vcombine.low %v3152_v51, %v3155_v25  ;;  %v16915_v51 = vld [vmem:[%s22490_s16 + $0x4b0] sm:$0x1]  ;;  %v3179_v25 = vrot.slane %v23576_v5, 5 }
  0xe5   : > { %20333 = vmatmul.mubr.bf16.gmra.mxu0 %v23498_v13 }
  0xe6   : > { %20381 = vmatmul.mubr.bf16.gmra.mxu1 %v16883_v41  ;;  %20400 = vmatprep.mubr.bf16.mxu0 %v16972_v52  ;;  %v16999_v41 = vld [vmem:[%s22490_s16 + $0x430] sm:$0xf] }
  0xe7   : > { %20448 = vmatprep.mubr.bf16.mxu1 %v17028_v61  ;;  %v21954_v61 = vld [vmem:[%s30893_s1 + $0x228] sm:$0xff]   ;;  %v17031_v1 = vcombine.low %v23503_v32, %v16999_v41  ;;  %v16946_v32 = vrot.slane %v16910_v57, 9  ;;  %v17002_v57 = vld [vmem:[%s22490_s16 + $0x490] sm:$0xf] }
  0xed   : > { %v20114_v6 = vpop.f32.mrf.mxu0  ;;  %20401 = vmatmul.mubr.bf16.vlgmr.msra.gmra.mxu0 %v16973_v26  ;;  %v21958_v26 = vld [vmem:[%s30893_s1 + $0x220] sm:$0xff]  }
  0xee   : > { %v20162_v45 = vpop.f32.mrf.mxu1  ;;  %20449 = vmatmul.mubr.bf16.vlgmr.msra.gmra.mxu1 %v17029_v17  ;;  %20481 = vmatpush3.bf16.msra.mxu0 %v23403_v4  ;;  %v3159_v4 = vsel %vm22502_vm2, %v16944_v39, %v3158_v7  ;;  %v23582_v39 = vld [vmem:[%s22490_s16 + $0x4cc] sm:$0xf] }
  0xef   : > { %v23548_v49 = vadd.f32 %v20162_v45, %v20114_v6  ;;  %v683_v52 = vpop.f32.mrf.mxu0  ;;  %20529 = vmatpush3.bf16.msra.mxu1 %v23412_v11  ;;  %20404 = vmatprep.mubr.bf16.mxu0 %v16974_v2  ;;  %v21955_v11 = vld [vmem:[%s30893_s1 + $0x268] sm:$0xff]   ;;  %v16976_v7 = vcombine.low %v3159_v4, %v3162_v56  ;;  %v3166_v6 = vsel %vm22502_vm2, %v16945_v60, %v3165_v46  ;;  %v16918_v56 = vld [vmem:[%s22490_s16 + $0x4d0] sm:$0x1]  ;;  %v3186_v59 = vrot.slane %v23582_v39, 5 }
  0xf0   : > { %v956_v28 = vpop.f32.mrf.mxu1  ;;  %20452 = vmatprep.mubr.bf16.mxu1 %v17030_v29  ;;  %20482 = vmatprep.subr.bf16.mxu0 %v21950_v21  ;;  %v16913_v45 = vld [vmem:[%s22490_s16 + $0x4a8] sm:$0xe]  ;;  %v3176_v46 = vsel %vm22502_vm2, %v3174_v20, %v3175_v62  ;;  %v3181_v60 = vrot.slane %v3179_v25, 4 }
  0xf1   : > { %v23566_v63 = vadd.f32 %v956_v28, %v683_v52  ;;  %v20115_v0 = vpop.f32.mrf.mxu0  ;;  %20530 = vmatprep.subr.bf16.mxu1 %v21951_v40  ;;  %v3173_v52 = vsel %vm22502_vm2, %v16946_v32, %v3172_v54  ;;  %v16916_v4 = vld [vmem:[%s22490_s16 + $0x4c8] sm:$0xe]  ;;  %v17033_v28 = vcombine.low %v23531_v34, %v17001_v31  ;;  %v21963_v34 = vld [vmem:[%s30893_s1 + $0x258] sm:$0xff]   ;;  %v23625_v32 = vld [vmem:[%s30893_s1 + $0x210] sm:$0xff]  }
  0xf2   : > { %v20163_v48 = vpop.f32.mrf.mxu1  ;;  %20483 = vmatpush3.bf16.msra.mxu0 %v21950_v21  ;;  %v16921_v31 = vld [vmem:[%s22490_s16 + $0x4f0] sm:$0x1] }
  0xf3   : > { %v23573_v17 = vadd.f32 %v20163_v48, %v20115_v0  ;;  %v686_v19 = vpop.f32.mrf.mxu0  ;;  %20531 = vmatpush3.bf16.msra.mxu1 %v21951_v40  ;;  %20484 = vmatprep.subr.bf16.mxu0 %v21954_v61  ;;  %v3169_v40 = vsel %vm22502_vm2, %v3167_v12, %v3168_v14  ;;  %v16948_v12 = vrot.slane %v16916_v4, 9  ;;  %v3189_v14 = vrot.slane %v16918_v56, 5  ;;  %v17003_v56 = vld [vmem:[%s22490_s16 + $0x4b0] sm:$0xf] }
  0xf4   : > { %v959_v21 = vpop.f32.mrf.mxu1  ;;  %20532 = vmatprep.subr.bf16.mxu1 %v21955_v11 }
  0xf5   : > { %v23584_v2 = vadd.f32 %v959_v21, %v686_v19  ;;  %v20118_v55 = vpop.f32.mrf.mxu0  ;;  %20405 = vmatmul.mubr.bf16.gmra.mxu0 %v16975_v44  ;;  %v16977_v44 = vcombine.low %v3166_v6, %v3169_v40  ;;  %v23620_v19 = vld [vmem:[%s22490_s16 + $0x4e8] sm:$0xe]  ;;  %v17034_v21 = vcombine.low %v23534_v36, %v17002_v57  ;;  %v23633_v6 = vld [vmem:[%s22490_s16 + $0x52c] sm:$0xf]  ;;  %v21967_v36 = vld [vmem:[%s30893_s1 + $0x250] sm:$0xff]  }
  0xf6   : > { %v20166_v29 = vpop.f32.mrf.mxu1  ;;  %20453 = vmatmul.mubr.bf16.gmra.mxu1 %v17031_v1  ;;  %20408 = vmatprep.mubr.bf16.mxu0 %v16976_v7  ;;  %v16947_v1 = vrot.slane %v16913_v45, 9  ;;  %v16978_v7 = vcombine.low %v3173_v52, %v3176_v46  ;;  %v23636_v45 = vld [vmem:[%s22490_s16 + $0x508] sm:$0xe]  ;;  %v16924_v46 = vld [vmem:[%s22490_s16 + $0x510] sm:$0x1]  ;;  %v16949_v57 = vrot.slane %v23620_v19, 9 }
  0xf7   : > { %v23594_v41 = vadd.f32 %v20166_v29, %v20118_v55  ;;  %v699_v30 = vpop.f32.mrf.mxu0  ;;  %20456 = vmatprep.mubr.bf16.mxu1 %v17032_v58  ;;  %20485 = vmatpush3.bf16.msra.mxu0 %v21954_v61  ;;  %v21962_v61 = vld [vmem:[%s30893_s1 + $0x218] sm:$0xff]   ;;  %v3182_v58 = vrot.slane %v16915_v51, 5  ;;  %v3188_v55 = vrot.slane %v3186_v59, 4  ;;  %v3193_v29 = vrot.slane %v23606_v22, 5 }
  0xf8   : > { %v972_v8 = vpop.f32.mrf.mxu1  ;;  %20533 = vmatpush3.bf16.msra.mxu1 %v21955_v11  ;;  %20486 = vmatprep.subr.bf16.mxu0 %v21958_v26  ;;  %v23617_v11 = vld [vmem:[%s22490_s16 + $0x50c] sm:$0xf]  ;;  %v23646_v52 = vsel %vm22502_vm2, %v16947_v1, %v3179_v25  ;;  %v30898_v25 = vrot.slane %v23633_v6, 5  ;;  %v16950_v19 = vrot.slane %v23636_v45, 9  ;;  %v30981_v37 = vrot.slane %v23633_v6, 5 }
  0xf9   : > { %v23611_v54 = vadd.f32 %v972_v8, %v699_v30  ;;  %v20119_v0 = vpop.f32.mrf.mxu0  ;;  %20534 = vmatprep.subr.bf16.mxu1 %v21959_v15  ;;  %v3200_v51 = vrot.slane %v23617_v11, 5  ;;  %v3183_v4 = vsel %vm22502_vm2, %v3181_v60, %v3182_v58  ;;  %v3187_v8 = vsel %vm22502_vm2, %v16948_v12, %v3186_v59  ;;  %v23666_v59 = vld [vmem:[%s22490_s16 + $0x528] sm:$0xe]  ;;  %v17004_v12 = vld [vmem:[%s22490_s16 + $0x4d0] sm:$0xf] }
  0xfa   : > { %v20167_v48 = vpop.f32.mrf.mxu1  ;;  %v3190_v1 = vsel %vm22502_vm2, %v3188_v55, %v3189_v14  ;;  %v3195_v58 = vrot.slane %v3193_v29, 4  ;;  %v23688_v45 = vld [vmem:[%s22490_s16 + $0x56c] sm:$0xf]  ;;  %v30982_v38 = vrot.slane %v23666_v59, 9  ;;  %v23837_v59 = vld [vmem:[%s22490_s16 + $0x3f0] sm:$0xf] }
  0xfb   : > { %v23627_v20 = vadd.f32 %v20167_v48, %v20119_v0  ;;  %v702_v62 = vpop.f32.mrf.mxu0  ;;  %20487 = vmatpush3.bf16.msra.mxu0 %v21958_v26  ;;  %v23659_v0 = vld [vmem:[%s30893_s1 + $0x208] sm:$0xff]   ;;  %v3196_v48 = vrot.slane %v16921_v31, 5  ;;  %v16979_v31 = vcombine.low %v23646_v52, %v3183_v4  ;;  %v23702_v4 = vld [vmem:[%s30893_s1 + $0x200] sm:$0xff]   ;;  %v30995_v47 = vrot.slane %v23837_v59, 7 }
  0xfc   : > { %v975_v40 = vpop.f32.mrf.mxu1  ;;  %20535 = vmatpush3.bf16.msra.mxu1 %v21959_v15  ;;  %20488 = vmatprep.subr.bf16.mxu0 %v21962_v61  ;;  %v23697_v52 = vld [vmem:[%s22490_s16 + $0x548] sm:$0xe] }
  0xfd   : > { %v23642_v26 = vadd.f32 %v975_v40, %v702_v62  ;;  %v20122_v30 = vpop.f32.mrf.mxu0  ;;  %20409 = vmatmul.mubr.bf16.gmra.mxu0 %v16977_v44  ;;  %20536 = vmatprep.subr.bf16.mxu1 %v21963_v34  ;;  %v3202_v62 = vrot.slane %v3200_v51, 4  ;;  %v17035_v40 = vcombine.low %v23576_v5, %v17003_v56  ;;  %v23713_v5 = vsel %vm22502_vm2, %v3195_v58, %v3196_v48  ;;  %v23740_v48 = vld [vmem:[%s22490_s16 + $0x570] sm:$0x1] }
  0xfe   : > { %v20170_v15 = vpop.f32.mrf.mxu1  ;;  %20457 = vmatmul.mubr.bf16.gmra.mxu1 %v17033_v28  ;;  %20412 = vmatprep.mubr.bf16.mxu0 %v16978_v7  ;;  %v23669_v7 = vld [vmem:[%s22490_s16 + $0x530] sm:$0x1]  ;;  %v3224_v16 = vrot.slane %v23740_v48, 5  ;;  %v4023_v33 = vrot.slane %v30995_v47, 4 }
  0xff   : > { %v23661_v28 = vadd.f32 %v20170_v15, %v20122_v30  ;;  %v715_v44 = vpop.f32.mrf.mxu0  ;;  %20460 = vmatprep.mubr.bf16.mxu1 %v17034_v21  ;;  %20489 = vmatpush3.bf16.msra.mxu0 %v21962_v61  ;;  %v3203_v21 = vrot.slane %v16924_v46, 5  ;;  %v21971_v61 = vld [vmem:[%s30893_s1 + $0x248] sm:$0xff]   ;;  %v23682_v30 = vld [vmem:[%s22490_s16 + $0x4f0] sm:$0xf]  ;;  %v16980_v15 = vcombine.low %v3187_v8, %v3190_v1  ;;  %v17036_v8 = vcombine.low %v23582_v39, %v17004_v12  ;;  %v23728_v39 = vld [vmem:[%s30893_s1 + $0x240] sm:$0xff]  }
 0x100   : > { %v988_v60 = vpop.f32.mrf.mxu1  ;;  %20537 = vmatpush3.bf16.msra.mxu1 %v21963_v34  ;;  %20490 = vmatprep.subr.bf16.mxu0 %v23625_v32  ;;  %v23685_v34 = vld [vmem:[%s22490_s16 + $0x54c] sm:$0xf]  ;;  %v23709_v1 = vsel %vm22502_vm2, %v16949_v57, %v3193_v29  ;;  %v23732_v57 = vsel %vm22502_vm2, %v16950_v19, %v3200_v51 }
 0x101   : > { %v23677_v14 = vadd.f32 %v988_v60, %v715_v44  ;;  %v20123_v55 = vpop.f32.mrf.mxu0  ;;  %20538 = vmatprep.subr.bf16.mxu1 %v21967_v36  ;;  %v23693_v60 = vrot.slane %v30898_v25, 4  ;;  %v23717_v44 = vld [vmem:[%s22490_s16 + $0x550] sm:$0x1]  ;;  %v23720_v25 = vld [vmem:[%s22490_s16 + $0x568] sm:$0xe]  ;;  %v3214_v58 = vrot.slane %v23685_v34, 5 }
 0x102   : > { %v20171_v46 = vpop.f32.mrf.mxu1  ;;  %v23750_v19 = vld [vmem:[%s22490_s16 + $0x5ac] sm:$0xf] }
 0x103   : > { %30973 = vst [vmem:[#allocation20_spill] sm:$0xff] %v23677_v14  ;;  %v23704_v56 = vadd.f32 %v20171_v46, %v20123_v55  ;;  %v718_v13 = vpop.f32.mrf.mxu0  ;;  %20491 = vmatpush3.bf16.msra.mxu0 %v23625_v32  ;;  %v23723_v55 = vld [vmem:[%s22490_s16 + $0x58c] sm:$0xf]  ;;  %v23736_v32 = vsel %vm22502_vm2, %v3202_v62, %v3203_v21  ;;  %v23745_v46 = vld [vmem:[%s22490_s16 + $0x588] sm:$0xe] }
 0x104   : > { %v991_v29 = vpop.f32.mrf.mxu1  ;;  %20539 = vmatpush3.bf16.msra.mxu1 %v21967_v36  ;;  %20492 = vmatprep.subr.bf16.mxu0 %v23659_v0  ;;  %v23755_v21 = vld [vmem:[%s22490_s16 + $0x510] sm:$0xf]  ;;  %v23775_v62 = vld [vmem:[%s22490_s16 + $0x5a8] sm:$0xe] }
 0x105   : > { %30974 = vst [vmem:[#allocation21_spill] sm:$0xff] %v23704_v56  ;;  %v23747_v24 = vadd.f32 %v991_v29, %v718_v13  ;;  %v20126_v51 = vpop.f32.mrf.mxu0  ;;  %20413 = vmatmul.mubr.bf16.gmra.mxu0 %v16979_v31  ;;  %20540 = vmatprep.subr.bf16.mxu1 %v21971_v61  ;;  %v16952_v13 = vrot.slane %v23697_v52, 9  ;;  %v23762_v31 = vld [vmem:[%s30893_s1 + $0x2b8] sm:$0xff]   ;;  %v23772_v52 = vld [vmem:[%s22490_s16 + $0x590] sm:$0x1]  ;;  %v17038_v3 = vcombine.low %v23617_v11, %v23755_v21 }
 0x106   : > { %v20174_v36 = vpop.f32.mrf.mxu1  ;;  %20461 = vmatmul.mubr.bf16.gmra.mxu1 %v17035_v40  ;;  %20416 = vmatprep.mubr.bf16.mxu0 %v16980_v15  ;;  %v16981_v40 = vcombine.low %v23709_v1, %v23713_v5  ;;  %v16982_v15 = vcombine.low %v23732_v57, %v23736_v32  ;;  %v23778_v29 = vld [vmem:[%s22490_s16 + $0x5b0] sm:$0x1]  ;;  %v16953_v5 = vrot.slane %v23720_v25, 9  ;;  %v30978_v32 = vrot.slane %v23688_v45, 5  ;;  %v23834_v11 = vld [vmem:[%s22490_s16 + $0x188] sm:$0xf] }
 0x107   : > { %30975 = vst [vmem:[#allocation22_spill] sm:$0xff] %v23747_v24  ;;  %v23764_v12 = vadd.f32 %v20174_v36, %v20126_v51  ;;  %v731_v9 = vpop.f32.mrf.mxu0  ;;  %20464 = vmatprep.mubr.bf16.mxu1 %v17036_v8  ;;  %20493 = vmatpush3.bf16.msra.mxu0 %v23659_v0  ;;  %v23781_v51 = vld [vmem:[%s22490_s16 + $0x530] sm:$0xf]  ;;  %v3216_v36 = vrot.slane %v3214_v58, 4  ;;  %v3217_v8 = vrot.slane %v23717_v44, 5  ;;  %v16954_v44 = vrot.slane %v23745_v46, 9 }
 0x108   : > { %v1004_v27 = vpop.f32.mrf.mxu1  ;;  %20541 = vmatpush3.bf16.msra.mxu1 %v21971_v61  ;;  %20494 = vmatprep.subr.bf16.mxu0 %v23702_v4  ;;  %v3223_v23 = vrot.slane %v30978_v32, 4  ;;  %v23795_v25 = vld [vmem:[%s22490_s16 + $0x3d0] sm:$0xf]  ;;  %v30979_v32 = vrot.slane %v23723_v55, 5  ;;  %v3231_v46 = vrot.slane %v23772_v52, 5  ;;  %v30983_v52 = vrot.slane %v23669_v7, 5 }
 0x109   : > { %30976 = vst [vmem:[#allocation23_spill] sm:$0xff] %v23764_v12  ;;  %v23787_v0 = vadd.f32 %v1004_v27, %v731_v9  ;;  %v20127_v57 = vpop.f32.mrf.mxu0  ;;  %20542 = vmatprep.subr.bf16.mxu1 %v23728_v39  ;;  %v23800_v27 = vld [vmem:[%s30893_s1 + $0x2f8] sm:$0xff]   ;;  %v23803_v61 = vld [vmem:[%s22490_s16 + $0x550] sm:$0xf]  ;;  %v30984_v7 = vrot.slane %v23750_v19, 5  ;;  %v30986_v1 = vcombine.low %v23606_v22, %v23682_v30  ;;  %v30988_v30 = vrot.slane %v23688_v45, 5 }
 0x10a   : > { %v20175_v9 = vpop.f32.mrf.mxu1  ;;  %v3230_v48 = vrot.slane %v30979_v32, 4  ;;  %v23820_v32 = vsel %vm22502_vm2, %v30982_v38, %v30981_v37  ;;  %v23841_v38 = vsel %vm22502_vm2, %v16952_v13, %v3214_v58  ;;  %v23845_v37 = vsel %vm22502_vm2, %v3216_v36, %v3217_v8  ;;  %v23865_v8 = vld [vmem:[%s22490_s16 + $0x18c] sm:$0x3]  ;;  %v24077_v24 = vld [vmem:[%s22490_s16 + $0x454] sm:$0x7] }
 0x10b   : > { %30977 = vst [vmem:[#allocation24_spill] sm:$0xff] %v23787_v0  ;;  %v23810_v42 = vadd.f32 %v20175_v9, %v20127_v57  ;;  %v734_v43 = vpop.f32.mrf.mxu0  ;;  %v23827_v57 = vsel %vm22502_vm2, %v23693_v60, %v30983_v52  ;;  %20495 = vmatpush3.bf16.msra.mxu0 %v23702_v4  ;;  %v23831_v9 = vld [vmem:[%s22490_s16 + $0x3cc] sm:$0x8]  ;;  %v23849_v60 = vrot.slane %v30984_v7, 4  ;;  %v23853_v4 = vld [vmem:[%s22490_s16 + $0x3d4] sm:$0x7]  ;;  %v17039_v36 = vcombine.low %v23633_v6, %v23781_v51 }
 0x10c   : > { %v1007_v21 = vpop.f32.mrf.mxu1  ;;  %20543 = vmatpush3.bf16.msra.mxu1 %v23728_v39  ;;  %20576 = vmatprep.subr.bf16.mxu0 %v23762_v31  ;;  %v23868_v7 = vld [vmem:[%s22490_s16 + $0x3ec] sm:$0x8]  ;;  %v17040_v6 = vcombine.low %v23685_v34, %v23803_v61  ;;  %v23880_v51 = vld [vmem:[%s22490_s16 + $0x3f4] sm:$0x7]  ;;  %v16984_v22 = vcombine.low %v23841_v38, %v23845_v37  ;;  %v23891_v34 = vsel %vm22502_vm2, %v16953_v5, %v30988_v30  ;;  %v23901_v61 = vld [vmem:[%s22490_s16 + $0x1a8] sm:$0xf] }
 0x10d   : > { %30980 = vst [vmem:[#allocation25_spill] sm:$0xff] %v23810_v42  ;;  %v23860_v58 = vadd.f32 %v1007_v21, %v734_v43  ;;  %v20130_v13 = vpop.f32.mrf.mxu0  ;;  %20417 = vmatmul.mubr.bf16.gmra.mxu0 %v16981_v40  ;;  %20624 = vmatprep.subr.bf16.mxu1 %v23800_v27  ;;  %v16983_v43 = vcombine.low %v23820_v32, %v23827_v57  ;;  %v30929_v40 = vrot.slane %v23834_v11, 6  ;;  %v17100_v38 = vrot.slane %v23831_v9, 11  ;;  %v23919_v37 = vld [vmem:[%s22490_s16 + $0x1ac] sm:$0x3] }
 0x10e   : > { %v20178_v39 = vpop.f32.mrf.mxu1  ;;  %20465 = vmatmul.mubr.bf16.gmra.mxu1 %v30986_v1  ;;  %20420 = vmatprep.mubr.bf16.mxu0 %v16982_v15  ;;  %v23895_v15 = vsel %vm22502_vm2, %v3223_v23, %v3224_v16  ;;  %v23898_v1 = vld [vmem:[%s22490_s16 + $0x570] sm:$0xf]  ;;  %v23911_v5 = vsel %vm22502_vm2, %v3230_v48, %v3231_v46  ;;  %v4017_v16 = vrot.slane %v23853_v4, 7  ;;  %v23916_v23 = vld [vmem:[%s22490_s16 + $0x1a4] sm:$0xc]  ;;  %v17204_v48 = vrot.slane %v23857_v10, 10 }
 0x10f   : > { %30985 = vst [vmem:[#allocation26_spill] sm:$0xff] %v23860_v58  ;;  %v23883_v52 = vadd.f32 %v20178_v39, %v20130_v13  ;;  %v747_v35 = vpop.f32.mrf.mxu0  ;;  %20468 = vmatprep.mubr.bf16.mxu1 %v17038_v3  ;;  %v30989_v3 = vrot.slane %v23723_v55, 5  ;;  %v23924_v30 = vld [vmem:[%s22490_s16 + $0x590] sm:$0xf]  ;;  %v4551_v46 = vrot.slane %v23865_v8, 6  ;;  %v4024_v21 = vrot.slane %v23880_v51, 7 }
 0x110   : > { %v1020_v32 = vpop.f32.mrf.mxu1  ;;  %v23931_v4 = vld [vmem:[%s22490_s16 + $0x5b0] sm:$0xf]  ;;  %v16985_v51 = vcombine.low %v23891_v34, %v23895_v15  ;;  %v23973_v58 = vld [vmem:[%s22490_s16 + $0x1c4] sm:$0xc]  ;;  %v23979_v0 = vld [vmem:[%s22490_s16 + $0x1e8] sm:$0xf] }
 0x111   : > { %30987 = vst [vmem:[#allocation27_spill] sm:$0xff] %v23883_v52  ;;  %v23907_v57 = vsel %vm22502_vm2, %v16954_v44, %v30989_v3  ;;  %v23921_v13 = vadd.f32 %v1020_v32, %v747_v35  ;;  %v20131_v39 = vpop.f32.mrf.mxu0  ;;  %v30991_v44 = vrot.slane %v23795_v25, 7  ;;  %v4550_v35 = vrot.slane %v30929_v40, 4  ;;  %v23951_v40 = vld [vmem:[%s22490_s16 + $0x410] sm:$0xf] }
 0x112   : > { %v20179_v9 = vpop.f32.mrf.mxu1  ;;  %v17101_v32 = vrot.slane %v23868_v7, 11  ;;  %v23976_v42 = vld [vmem:[%s22490_s16 + $0x430] sm:$0xf]  ;;  %v30997_v34 = vrot.slane %v23750_v19, 5  ;;  %v30998_v15 = vrot.slane %v23775_v62, 9 }
 0x113   : > { %30990 = vst [vmem:[#allocation28_spill] sm:$0xff] %v23921_v13  ;;  %v4016_v3 = vrot.slane %v30991_v44, 4  ;;  %v23938_v44 = vadd.f32 %v20179_v9, %v20131_v39  ;;  %v750_v10 = vpop.f32.mrf.mxu0  ;;  %v23962_v13 = vld [vmem:[%s22490_s16 + $0x1c8] sm:$0xf]  ;;  %v30999_v9 = vrot.slane %v23901_v61, 6 }
 0x114   : > { %v1023_v39 = vpop.f32.mrf.mxu1  ;;  %v23997_v12 = vld [vmem:[%s22490_s16 + $0x1cc] sm:$0x3] }
 0x115   : > { %30992 = vst [vmem:[#allocation29_spill] sm:$0xff] %v23938_v44  ;;  %v23959_v44 = vld [vmem:[%s22490_s16 + $0x414] sm:$0x7]  ;;  %v23964_v52 = vadd.f32 %v1023_v39, %v750_v10  ;;  %v20134_v47 = vpop.f32.mrf.mxu0  ;;  %20421 = vmatmul.mubr.bf16.gmra.mxu0 %v16983_v43  ;;  %v16986_v43 = vcombine.low %v23907_v57, %v23911_v5  ;;  %v23989_v39 = vsel %vm22502_vm2, %v30998_v15, %v30997_v34  ;;  %v23993_v7 = vrot.slane %v30999_v9, 4  ;;  %v24011_v34 = vld [vmem:[%s22490_s16 + $0x42c] sm:$0x8] }
 0x116   : > { %v20182_v10 = vpop.f32.mrf.mxu1  ;;  %20469 = vmatmul.mubr.bf16.gmra.mxu1 %v17039_v36  ;;  %20424 = vmatprep.mubr.bf16.mxu0 %v16984_v22  ;;  %v31001_v57 = vrot.slane %v23778_v29, 5  ;;  %v17102_v5 = vrot.slane %v23956_v50, 11  ;;  %v4562_v9 = vrot.slane %v23962_v13, 6  ;;  %v31003_v29 = vrot.slane %v23834_v11, 6 }
 0x117   : > { %30996 = vst [vmem:[#allocation30_spill] sm:$0xff] %v23964_v52  ;;  %v30932_v52 = vrot.slane %v23951_v40, 7  ;;  %v23999_v36 = vadd.f32 %v20182_v10, %v20134_v47  ;;  %v763_v22 = vpop.f32.mrf.mxu0  ;;  %20472 = vmatprep.mubr.bf16.mxu1 %v17040_v6  ;;  %v31002_v47 = vrot.slane %v23795_v25, 7  ;;  %v4035_v50 = vrot.slane %v23976_v42, 7 }
 0x118   : > { %v24006_v62 = vsel %vm22502_vm2, %v23849_v60, %v31001_v57  ;;  %v1036_v15 = vpop.f32.mrf.mxu1  ;;  %v24023_v60 = vsel %vm23942_vm8, %v17204_v48, %v31003_v29  ;;  %v24031_v25 = vsel %vm22776_vm5, %v4016_v3, %v4017_v16  ;;  %v17206_v11 = vrot.slane %v23973_v58, 10  ;;  %v17063_v48 = vld [vmem:[%s22490_s16 + $0x434] sm:$0x7]  ;;  %v24051_v58 = vld [vmem:[%s22490_s16 + $0x1ec] sm:$0x3] }
 0x119   : > { %31000 = vst [vmem:[#allocation31_spill] sm:$0xff] %v23999_v36  ;;  %v24017_v6 = vsel %vm22776_vm5, %v17100_v38, %v31002_v47  ;;  %v24027_v10 = vadd.f32 %v1036_v15, %v763_v22  ;;  %v20135_v57 = vpop.f32.mrf.mxu0  ;;  %v4031_v38 = vrot.slane %v23959_v44, 7  ;;  %v17165_v47 = vld [vmem:[%s22490_s16 + $0x1e4] sm:$0xc]  ;;  %v24039_v42 = vsel %vm23942_vm8, %v4550_v35, %v4551_v46  ;;  %v24054_v44 = vld [vmem:[%s22490_s16 + $0x44c] sm:$0x8] }
 0x11a   : > { %v20183_v29 = vpop.f32.mrf.mxu1  ;;  %v31005_v22 = vrot.slane %v23837_v59, 7  ;;  %v4030_v16 = vrot.slane %v30932_v52, 4  ;;  %v4565_v3 = vrot.slane %v23997_v12, 6  ;;  %v24060_v59 = vsel %vm22776_vm5, %v4023_v33, %v4024_v21 }
 0x11b   : > { %31004 = vst [vmem:[#allocation32_spill] sm:$0xff] %v24027_v10  ;;  %v24056_v13 = vadd.f32 %v20183_v29, %v20135_v57  ;;  %v766_v18 = vpop.f32.mrf.mxu0  ;;  %v4564_v46 = vrot.slane %v4562_v9, 4  ;;  %v17103_v35 = vrot.slane %v24011_v34, 11  ;;  %v4037_v52 = vrot.slane %v4035_v50, 4 }
 0x11c   : > { %v24045_v15 = vsel %vm22776_vm5, %v17101_v32, %v31005_v22  ;;  %v24064_v32 = vld [vmem:[%s22490_s16 + $0x450] sm:$0xf]  ;;  %v24067_v22 = vld [vmem:[%s22490_s16 + $0x208] sm:$0xf]  ;;  %v1039_v12 = vpop.f32.mrf.mxu1  ;;  %v4038_v10 = vrot.slane %v17063_v48, 7  ;;  %v17207_v36 = vrot.slane %v17165_v47, 10  ;;  %v16987_v21 = vcombine.low %v23989_v39, %v24006_v62 }
 0x11d   : > { %31006 = vst [vmem:[#allocation33_spill] sm:$0xff] %v24056_v13  ;;  %v31007_v57 = vrot.slane %v23979_v0, 6  ;;  %v24071_v13 = vadd.f32 %v1039_v12, %v766_v18  ;;  %v20138_v33 = vpop.f32.mrf.mxu0  ;;  %20425 = vmatmul.mubr.bf16.gmra.mxu0 %v16985_v51  ;;  %v4572_v34 = vrot.slane %v24051_v58, 6  ;;  %v24081_v48 = vld [vmem:[%s22490_s16 + $0x470] sm:$0xf]  ;;  %v17132_v18 = vcombine.low %v24017_v6, %v24031_v25 }
 0x11e   : > { %v20186_v47 = vpop.f32.mrf.mxu1  ;;  %20428 = vmatprep.mubr.bf16.mxu0 %v16986_v43  ;;  %v17236_v51 = vcombine.low %v24023_v60, %v24039_v42  ;;  %v4042_v39 = vrot.slane %v24064_v32, 7  ;;  %v24092_v62 = vld [vmem:[%s22490_s16 + $0x204] sm:$0xc]  ;;  %v24095_v58 = vld [vmem:[%s22490_s16 + $0x20c] sm:$0x3]  ;;  %v30934_v12 = vrot.slane %v24067_v22, 6 }
 0x11f   : > { %v4571_v29 = vrot.slane %v31007_v57, 4  ;;  %31008 = vst [vmem:[#allocation34_spill] sm:$0xff] %v24071_v13  ;;  %v31009_v57 = vcombine.low %v23688_v45, %v23898_v1  ;;  %v24098_v56 = vadd.f32 %v20186_v47, %v20138_v33  ;;  %v779_v13 = vpop.f32.mrf.mxu0  ;;  %v31011_v45 = vcombine.low %v23723_v55, %v23924_v30  ;;  %v24121_v30 = vld [vmem:[%s22490_s16 + $0x228] sm:$0xf]  ;;  %v24199_v1 = vld [vmem:[%s22490_s16 + $0x48c] sm:$0x8] }
 0x120   : > { %v31012_v43 = vrot.slane %v23901_v61, 6  ;;  %v31013_v6 = vrot.slane %v23916_v23, 10  ;;  %v31014_v25 = vrot.slane %v23919_v37, 6  ;;  %v1052_v42 = vpop.f32.mrf.mxu1  ;;  %v31015_v33 = vrot.slane %v23951_v40, 7 }
 0x121   : > { %20473 = vmatmul.mubr.bf16.gmra.mxu1 %v31009_v57  ;;  %31010 = vst [vmem:[#allocation35_spill] sm:$0xff] %v24098_v56  ;;  %v24131_v23 = vsel %vm23942_vm8, %v17206_v11, %v4562_v9  ;;  %v4045_v37 = vrot.slane %v24077_v24, 7  ;;  %v24135_v47 = vadd.f32 %v1052_v42, %v779_v13  ;;  %v20139_v57 = vpop.f32.mrf.mxu0  ;;  %v24139_v40 = vsel %vm22776_vm5, %v4030_v16, %v4031_v38  ;;  %v24150_v11 = vld [vmem:[%s22490_s16 + $0x46c] sm:$0x8]  ;;  %v24153_v24 = vld [vmem:[%s22490_s16 + $0x474] sm:$0x7] }
 0x122   : > { %20476 = vmatprep.mubr.bf16.mxu1 %v31011_v45  ;;  %v24111_v60 = vsel %vm23942_vm8, %v31013_v6, %v31012_v43  ;;  %v24118_v55 = vsel %vm23942_vm8, %v23993_v7, %v31014_v25  ;;  %v24127_v61 = vsel %vm22776_vm5, %v17102_v5, %v31015_v33  ;;  %v30933_v7 = vrot.slane %v24081_v48, 7  ;;  %v24156_v45 = vld [vmem:[%s22490_s16 + $0x224] sm:$0xc]  ;;  %v20187_v13 = vpop.f32.mrf.mxu1  ;;  %v24371_v56 = vld [vmem:[%s22490_s16 + $0x4ec] sm:$0x8] }
 0x123   : > { %31016 = vst [vmem:[#allocation36_spill] sm:$0xff] %v24135_v47  ;;  %v24143_v5 = vsel %vm23942_vm8, %v4564_v46, %v4565_v3  ;;  %v24147_v9 = vsel %vm22776_vm5, %v17103_v35, %v4035_v50  ;;  %v24160_v43 = vsel %vm22776_vm5, %v4037_v52, %v4038_v10  ;;  %v31017_v38 = vrot.slane %v23979_v0, 6  ;;  %v24172_v46 = vld [vmem:[%s22490_s16 + $0x22c] sm:$0x3]  ;;  %v24175_v35 = vld [vmem:[%s22490_s16 + $0x490] sm:$0xf]  ;;  %v782_v52 = vpop.f32.mrf.mxu0 }
 0x124   : > { %v4044_v50 = vrot.slane %v4042_v39, 4  ;;  %v17208_v3 = vrot.slane %v24092_v62, 10  ;;  %v24177_v6 = vadd.f32 %v20187_v13, %v20139_v57  ;;  %v4578_v0 = vrot.slane %v30934_v12, 4  ;;  %v1055_v25 = vpop.f32.mrf.mxu1  ;;  %v24189_v13 = vld [vmem:[%s22490_s16 + $0x248] sm:$0xf] }
 0x125   : > { %v24166_v16 = vsel %vm23942_vm8, %v17207_v36, %v31017_v38  ;;  %v4579_v36 = vrot.slane %v24095_v58, 6  ;;  %v4583_v10 = vrot.slane %v24121_v30, 6  ;;  %v17105_v42 = vrot.slane %v24150_v11, 11  ;;  %v20142_v58 = vpop.f32.mrf.mxu0  ;;  %20429 = vmatmul.mubr.bf16.gmra.mxu0 %v16987_v21  ;;  %v24255_v12 = vld [vmem:[%s22490_s16 + $0x4b4] sm:$0x7] }
 0x126   : > { %31018 = vst [vmem:[#allocation37_spill] sm:$0xff] %v24177_v6  ;;  %v4051_v62 = vrot.slane %v30933_v7, 4  ;;  %v4052_v33 = vrot.slane %v24153_v24, 7  ;;  %v17209_v57 = vrot.slane %v24156_v45, 10  ;;  %v24191_v38 = vadd.f32 %v1055_v25, %v782_v52  ;;  %v24202_v24 = vld [vmem:[%s22490_s16 + $0x494] sm:$0x7]  ;;  %v20190_v7 = vpop.f32.mrf.mxu1  ;;  %20496 = vmatprep.mubr.bf16.mxu0 %v17132_v18 }
 0x127   : > { %v24195_v30 = vsel %vm23942_vm8, %v4571_v29, %v4572_v34  ;;  %v4586_v11 = vrot.slane %v24172_v46, 6  ;;  %v31020_v52 = vcombine.low %v23750_v19, %v23931_v4  ;;  %v17237_v29 = vcombine.low %v24111_v60, %v24118_v55  ;;  %v24215_v46 = vld [vmem:[%s22490_s16 + $0x244] sm:$0xc]  ;;  %v24218_v25 = vld [vmem:[%s22490_s16 + $0x24c] sm:$0x3]  ;;  %v795_v4 = vpop.f32.mrf.mxu0 }
 0x128   : > { %31019 = vst [vmem:[#allocation38_spill] sm:$0xff] %v24191_v38  ;;  %v24221_v45 = vld [vmem:[%s22490_s16 + $0x4b0] sm:$0xf]  ;;  %v24223_v19 = vadd.f32 %v20190_v7, %v20142_v58  ;;  %v4585_v60 = vrot.slane %v4583_v10, 4  ;;  %v24232_v34 = vld [vmem:[%s22490_s16 + $0x268] sm:$0xf]  ;;  %v1068_v21 = vpop.f32.mrf.mxu1  ;;  %v24246_v58 = vsel %vm22776_vm5, %v4044_v50, %v4045_v37 }
 0x129   : > { %20477 = vmatmul.mubr.bf16.gmra.mxu1 %v31020_v52  ;;  %v24229_v52 = vld [vmem:[%s22490_s16 + $0x4ac] sm:$0x8]  ;;  %v31022_v7 = vrot.slane %v24054_v44, 11  ;;  %v31023_v18 = vrot.slane %v24067_v22, 6  ;;  %v24257_v32 = vadd.f32 %v1068_v21, %v795_v4  ;;  %v20143_v44 = vpop.f32.mrf.mxu0  ;;  %v24268_v50 = vld [vmem:[%s30893_s1 + $0x2b0] sm:$0xff]  }
 0x12a   : > { %31021 = vst [vmem:[#allocation39_spill] sm:$0xff] %v24223_v19  ;;  %20544 = vmatprep.mubr.bf16.mxu1 %v17236_v51  ;;  %v24261_v19 = vsel %vm23942_vm8, %v4578_v0, %v4579_v36  ;;  %v20191_v22 = vpop.f32.mrf.mxu1  ;;  %v21979_v37 = vld [vmem:[%s30893_s1 + $0x2f0] sm:$0xff]   ;;  %v24311_v0 = vld [vmem:[%s22490_s16 + $0x4cc] sm:$0x8] }
 0x12b   : > { %v24242_v51 = vsel %vm22776_vm5, %v31022_v7, %v4042_v39  ;;  %v24252_v55 = vsel %vm23942_vm8, %v17208_v3, %v31023_v18  ;;  %31024 = vst [vmem:[#allocation40_spill] sm:$0xff] %v24257_v32  ;;  %v31025_v3 = vrot.slane %v24175_v35, 7  ;;  %v24278_v18 = vld [vmem:[%s22490_s16 + $0x4d0] sm:$0xf]  ;;  %v24280_v7 = vadd.f32 %v20191_v22, %v20143_v44  ;;  %v798_v39 = vpop.f32.mrf.mxu0  ;;  %v24294_v32 = vld [vmem:[%s22490_s16 + $0x264] sm:$0xc] }
 0x12c   : > { %v24297_v44 = vld [vmem:[%s22490_s16 + $0x26c] sm:$0x3]  ;;  %v1071_v22 = vpop.f32.mrf.mxu1  ;;  %v24314_v38 = vld [vmem:[%s22490_s16 + $0x4d4] sm:$0x7] }
 0x12d   : > { %v24272_v21 = vrot.slane %v31025_v3, 4  ;;  %31026 = vst [vmem:[#allocation41_spill] sm:$0xff] %v24280_v7  ;;  %v31027_v3 = vrot.slane %v24081_v48, 7  ;;  %v24301_v7 = vsel %vm22776_vm5, %v4051_v62, %v4052_v33  ;;  %v24305_v48 = vsel %vm23942_vm8, %v17209_v57, %v4583_v10  ;;  %v20210_v47 = vpop.f32.mrf.mxu0  ;;  %v24328_v33 = vld [vmem:[%s30893_s1 + $0x2a8] sm:$0xff]  }
 0x12e   : > { %v24316_v6 = vadd.f32 %v1071_v22, %v798_v39  ;;  %v31030_v62 = vcombine.low %v24045_v15, %v24060_v59  ;;  %v24323_v10 = vsel %vm23942_vm8, %v4585_v60, %v4586_v11  ;;  %v31031_v57 = vrot.slane %v24221_v45, 7  ;;  %v24336_v22 = vld [vmem:[%s22490_s16 + $0x284] sm:$0xc]  ;;  %v24339_v15 = vld [vmem:[%s22490_s16 + $0x288] sm:$0xf]  ;;  %v20258_v11 = vpop.f32.mrf.mxu1 }
 0x12f   : > { %v24289_v4 = vsel %vm22776_vm5, %v17105_v42, %v31027_v3  ;;  %v31028_v42 = vrot.slane %v24189_v13, 6  ;;  %v1586_v59 = vadd.f32 %v20210_v47, %v23548_v49  ;;  %v24346_v60 = vld [vmem:[%s30893_s1 + $0x2e8] sm:$0xff]   ;;  %v24355_v49 = vld [vmem:[%s22490_s16 + $0x4f0] sm:$0xf]  ;;  %v1457_v47 = vpop.f32.mrf.mxu0 }
 0x130   : > { %31029 = vst [vmem:[#allocation42_spill] sm:$0xff] %v24316_v6  ;;  %20497 = vmatmul.mubr.bf16.vlgmr.msra.gmra.mxu0 %v31030_v62  ;;  %v17240_v62 = vcombine.low %v24252_v55, %v24261_v19  ;;  %v24368_v6 = vld [vmem:[%s22490_s16 + $0x28c] sm:$0x3]  ;;  %v30935_v55 = vrot.slane %v24339_v15, 6  ;;  %v31036_v19 = vrot.slane %v24175_v35, 7  ;;  %v31039_v35 = vrot.slane %v24189_v13, 6 }
 0x131   : > { %v4592_v3 = vrot.slane %v31028_v42, 4  ;;  %v24332_v42 = vrot.slane %v31031_v57, 4  ;;  %20545 = vmatmul.mubr.bf16.vlgmr.msra.gmra.mxu1 %v17237_v29  ;;  %20577 = vmatpush3.bf16.msra.mxu0 %v23762_v31  ;;  %v31032_v57 = vrot.slane %v24232_v34, 6  ;;  %v31033_v31 = vcombine.low %v24127_v61, %v24139_v40  ;;  %v1988_v61 = vpop.f32.mrf.mxu1  ;;  %v24478_v39 = vld [vmem:[%s22490_s16 + $0x50c] sm:$0x8] }
 0x132   : > { %20625 = vmatpush3.bf16.msra.mxu1 %v23800_v27  ;;  %v17136_v29 = vcombine.low %v24242_v51, %v24246_v58  ;;  %v24373_v14 = vadd.f32 %v20258_v11, %v1586_v59  ;;  %v1584_v27 = vadd.f32 %v1457_v47, %v23566_v63  ;;  %v31034_v40 = vcombine.low %v24131_v23, %v24143_v5  ;;  %v24383_v51 = vld [vmem:[%s22490_s16 + $0x4f4] sm:$0x7]  ;;  %v20211_v58 = vpop.f32.mrf.mxu0 }
 0x133   : > { %v24351_v36 = vrot.slane %v31032_v57, 4  ;;  %20500 = vmatprep.mubr.bf16.mxu0 %v31033_v31  ;;  %v17108_v57 = vrot.slane %v24311_v0, 11  ;;  %20578 = vmatprep.subr.bf16.mxu0 %v24268_v50  ;;  %v31035_v23 = vrot.slane %v24278_v18, 7  ;;  %v4077_v11 = vrot.slane %v24355_v49, 7  ;;  %v31057_v49 = vld [vmem:[#allocation20_spill] sm:$0xff] }
 0x134   : > { %20548 = vmatprep.mubr.bf16.mxu1 %v31034_v40  ;;  %20626 = vmatprep.subr.bf16.mxu1 %v21979_v37  ;;  %v24394_v47 = vadd.f32 %v1988_v61, %v1584_v27  ;;  %v1587_v31 = vadd.f32 %v20211_v58, %v23573_v17  ;;  %v20259_v40 = vpop.f32.mrf.mxu1  ;;  %v31037_v59 = vrot.slane %v24199_v1, 11  ;;  %v24416_v17 = vld [vmem:[%s30893_s1 + $0x2a0] sm:$0xff]   ;;  %v1460_v1 = vpop.f32.mrf.mxu0  ;;  %v31041_v61 = vrot.slane %v24218_v25, 6 }
 0x135   : > { %v24391_v5 = vrot.slane %v31035_v23, 4  ;;  %20579 = vmatpush3.bf16.msra.mxu0 %v24268_v50  ;;  %v31038_v23 = vrot.slane %v24202_v24, 7  ;;  %v24419_v50 = vld [vmem:[%s22490_s16 + $0x2a8] sm:$0xf]  ;;  %v31040_v24 = vrot.slane %v24215_v46, 10  ;;  %v4607_v58 = vrot.slane %v24368_v6, 6 }
 0x136   : > { %v24404_v63 = vsel %vm22776_vm5, %v31037_v59, %v31036_v19  ;;  %20627 = vmatpush3.bf16.msra.mxu1 %v21979_v37  ;;  %20580 = vmatprep.subr.bf16.mxu0 %v24328_v33  ;;  %v24434_v19 = vsel %vm23942_vm8, %v4592_v3, %v31041_v61  ;;  %v24439_v37 = vld [vmem:[%s30893_s1 + $0x2e0] sm:$0xff]   ;;  %v24446_v59 = vadd.f32 %v20259_v40, %v1587_v31  ;;  %v4606_v3 = vrot.slane %v30935_v55, 4  ;;  %v24457_v6 = vld [vmem:[%s22490_s16 + $0x510] sm:$0xf]  ;;  %v20214_v61 = vpop.f32.mrf.mxu0 }
 0x137   : > { %v24411_v27 = vsel %vm22776_vm5, %v24272_v21, %v31038_v23  ;;  %v24428_v21 = vsel %vm23942_vm8, %v31040_v24, %v31039_v35  ;;  %v24444_v46 = vld [vmem:[%s22490_s16 + $0x2a4] sm:$0xc]  ;;  %v1585_v25 = vadd.f32 %v1460_v1, %v23584_v2  ;;  %v1991_v23 = vpop.f32.mrf.mxu1  ;;  %20628 = vmatprep.subr.bf16.mxu1 %v24346_v60  ;;  %v24454_v24 = vld [vmem:[%s22490_s16 + $0x2ac] sm:$0x3]  ;;  %v31042_v31 = vcombine.low %v24147_v9, %v24160_v43 }
 0x138   : > { %v17138_v2 = vcombine.low %v24404_v63, %v24411_v27  ;;  %v31043_v40 = vrot.slane %v24221_v45, 7  ;;  %v31044_v1 = vrot.slane %v24229_v52, 11  ;;  %v24474_v13 = vrot.slane %v4077_v11, 4 }
 0x139   : > { %20501 = vmatmul.mubr.bf16.gmra.mxu0 %v31042_v31  ;;  %v4611_v55 = vrot.slane %v24419_v50, 6  ;;  %v24480_v9 = vadd.f32 %v1991_v23, %v1585_v25  ;;  %v1590_v43 = vadd.f32 %v20214_v61, %v23594_v41  ;;  %v20262_v45 = vpop.f32.mrf.mxu1  ;;  %v31045_v52 = vcombine.low %v24166_v16, %v24195_v30  ;;  %v24497_v25 = vld [vmem:[%s22490_s16 + $0x2c8] sm:$0xf]  ;;  %v1473_v41 = vpop.f32.mrf.mxu0 }
 0x13a   : > { %v24470_v35 = vsel %vm22776_vm5, %v31044_v1, %v31043_v40  ;;  %20504 = vmatprep.mubr.bf16.mxu0 %v17136_v29  ;;  %v17242_v31 = vcombine.low %v24428_v21, %v24434_v19  ;;  %v24491_v40 = vld [vmem:[%s30893_s1 + $0x298] sm:$0xff]   ;;  %v24494_v1 = vld [vmem:[%s22490_s16 + $0x514] sm:$0x7]  ;;  %20581 = vmatpush3.bf16.msra.mxu0 %v24328_v33  ;;  %v31046_v16 = vrot.slane %v24255_v12, 7  ;;  %v31047_v29 = vrot.slane %v24232_v34, 6  ;;  %v24666_v19 = vld [vmem:[%s30893_s1 + $0x2c8] sm:$0xff]  }
 0x13b   : > { %20549 = vmatmul.mubr.bf16.gmra.mxu1 %v31045_v52  ;;  %v31048_v23 = vrot.slane %v24294_v32, 10  ;;  %v24519_v33 = vld [vmem:[%s30893_s1 + $0x2d8] sm:$0xff]   ;;  %v4084_v12 = vrot.slane %v24457_v6, 7  ;;  %v1588_v34 = vadd.f32 %v1473_v41, %v23611_v54  ;;  %v2004_v32 = vpop.f32.mrf.mxu1  ;;  %20582 = vmatprep.subr.bf16.mxu0 %v24416_v17  ;;  %v20215_v52 = vpop.f32.mrf.mxu0  ;;  %v31050_v54 = vrot.slane %v24278_v18, 7  ;;  %v24661_v21 = vld [vmem:[%s22490_s16 + $0x54c] sm:$0x8] }
 0x13c   : > { %20552 = vmatprep.mubr.bf16.mxu1 %v17240_v62  ;;  %v24505_v30 = vsel %vm22776_vm5, %v24332_v42, %v31046_v16  ;;  %v24523_v62 = vld [vmem:[%s22490_s16 + $0x2c4] sm:$0xc]  ;;  %v24525_v42 = vadd.f32 %v20262_v45, %v1590_v43  ;;  %20629 = vmatpush3.bf16.msra.mxu1 %v24346_v60  ;;  %v31049_v16 = vrot.slane %v24297_v44, 6  ;;  %v31051_v44 = vrot.slane %v24314_v38, 7  ;;  %v24588_v38 = vld [vmem:[%s22490_s16 + $0x530] sm:$0xf] }
 0x13d   : > { %v24513_v61 = vsel %vm23942_vm8, %v31048_v23, %v31047_v29  ;;  %v24538_v23 = vld [vmem:[%s22490_s16 + $0x2cc] sm:$0x3]  ;;  %20630 = vmatprep.subr.bf16.mxu1 %v24439_v37  ;;  %v24547_v60 = vsel %vm22776_vm5, %v17108_v57, %v31050_v54  ;;  %v4614_v43 = vrot.slane %v24454_v24, 6  ;;  %v4618_v45 = vrot.slane %v24497_v25, 6  ;;  %v20263_v41 = vpop.f32.mrf.mxu1  ;;  %v1476_v24 = vpop.f32.mrf.mxu0  ;;  %v24699_v50 = vld [vmem:[%s22490_s16 + $0x308] sm:$0xf] }
 0x13e   : > { %v24534_v29 = vsel %vm23942_vm8, %v24351_v36, %v31049_v16  ;;  %v24554_v36 = vsel %vm22776_vm5, %v24391_v5, %v31051_v44  ;;  %v24558_v18 = vadd.f32 %v2004_v32, %v1588_v34  ;;  %v1591_v0 = vadd.f32 %v20215_v52, %v23627_v20  ;;  %v24565_v16 = vld [vmem:[%s22490_s16 + $0x52c] sm:$0x8]  ;;  %v24570_v5 = vld [vmem:[%s30893_s1 + $0x290] sm:$0xff]   ;;  %20583 = vmatpush3.bf16.msra.mxu0 %v24416_v17  ;;  %v24591_v17 = vld [vmem:[%s22490_s16 + $0x2e8] sm:$0xf] }
 0x13f   : > { %v4613_v57 = vrot.slane %v4611_v55, 4  ;;  %v31052_v34 = vrot.slane %v24339_v15, 6  ;;  %v31053_v20 = vrot.slane %v24336_v22, 10  ;;  %v24583_v32 = vsel %vm23942_vm8, %v4606_v3, %v4607_v58  ;;  %v24596_v22 = vld [vmem:[%s30893_s1 + $0x2d0] sm:$0xff]   ;;  %v2007_v3 = vpop.f32.mrf.mxu1  ;;  %20584 = vmatprep.subr.bf16.mxu0 %v24491_v40 }
 0x140   : > { %v4087_v54 = vrot.slane %v24494_v1, 7  ;;  %v24598_v15 = vadd.f32 %v20263_v41, %v1591_v0  ;;  %v1589_v58 = vadd.f32 %v1476_v24, %v23642_v26  ;;  %20631 = vmatpush3.bf16.msra.mxu1 %v24439_v37  ;;  %v4086_v1 = vrot.slane %v4084_v12, 4  ;;  %v24619_v41 = vld [vmem:[%s22490_s16 + $0x534] sm:$0x7]  ;;  %v24636_v26 = vld [vmem:[%s22490_s16 + $0x2ec] sm:$0x3] }
 0x141   : > { %v24579_v52 = vsel %vm23942_vm8, %v31053_v20, %v31052_v34  ;;  %v20218_v20 = vpop.f32.mrf.mxu0  ;;  %v31054_v44 = vcombine.low %v24289_v4, %v24301_v7  ;;  %v17139_v0 = vcombine.low %v24470_v35, %v24505_v30  ;;  %20632 = vmatprep.subr.bf16.mxu1 %v24519_v33  ;;  %v24616_v37 = vrot.slane %v4618_v45, 4  ;;  %v24623_v34 = vld [vmem:[%s22490_s16 + $0x2e4] sm:$0xc]  ;;  %v20266_v35 = vpop.f32.mrf.mxu1 }
 0x142   : > { %v24625_v4 = vadd.f32 %v2007_v3, %v1589_v58  ;;  %v1594_v7 = vadd.f32 %v20218_v20, %v23661_v28  ;;  %v31055_v30 = vcombine.low %v24305_v48, %v24323_v10  ;;  %v4625_v24 = vrot.slane %v24591_v17, 6  ;;  %v24642_v58 = vld [vmem:[%s30893_s1 + $0x288] sm:$0xff]   ;;  %20585 = vmatpush3.bf16.msra.mxu0 %v24491_v40  ;;  %v31060_v3 = vld [vmem:[#allocation21_spill] sm:$0xff] }
 0x143   : > { %20505 = vmatmul.mubr.bf16.gmra.mxu0 %v31054_v44  ;;  %v4091_v44 = vrot.slane %v24588_v38, 7  ;;  %v1489_v28 = vpop.f32.mrf.mxu0  ;;  %v17140_v48 = vcombine.low %v24547_v60, %v24554_v36  ;;  %v17244_v10 = vcombine.low %v24579_v52, %v24583_v32  ;;  %v31056_v63 = vrot.slane %v24371_v56, 11  ;;  %v2020_v56 = vpop.f32.mrf.mxu1  ;;  %20586 = vmatprep.subr.bf16.mxu0 %v24570_v5  ;;  %v24696_v32 = vld [vmem:[%s22490_s16 + $0x550] sm:$0xf] }
 0x144   : > { %20553 = vmatmul.mubr.bf16.gmra.mxu1 %v31055_v30  ;;  %20508 = vmatprep.mubr.bf16.mxu0 %v17138_v2  ;;  %v24668_v2 = vadd.f32 %v20266_v35, %v1594_v7  ;;  %v31058_v60 = vrot.slane %v24383_v51, 7  ;;  %v31059_v36 = vrot.slane %v24444_v46, 10  ;;  %v24690_v51 = vsel %vm23942_vm8, %v4613_v57, %v4614_v43 }
 0x145   : > { %20556 = vmatprep.mubr.bf16.mxu1 %v17242_v31  ;;  %v24657_v27 = vsel %vm22776_vm5, %v31056_v63, %v4077_v11  ;;  %v1592_v31 = vadd.f32 %v1489_v28, %v31057_v49  ;;  %20633 = vmatpush3.bf16.msra.mxu1 %v24519_v33  ;;  %v20219_v40 = vpop.f32.mrf.mxu0  ;;  %v17215_v33 = vrot.slane %v24623_v34, 10  ;;  %v20267_v20 = vpop.f32.mrf.mxu1  ;;  %v4093_v43 = vrot.slane %v4091_v44, 4  ;;  %v24730_v49 = vld [vmem:[%s22490_s16 + $0x554] sm:$0x7] }
 0x146   : > { %v24676_v11 = vsel %vm22776_vm5, %v24474_v13, %v31058_v60  ;;  %v24686_v52 = vsel %vm23942_vm8, %v31059_v36, %v4611_v55  ;;  %v4094_v13 = vrot.slane %v24619_v41, 7  ;;  %20634 = vmatprep.subr.bf16.mxu1 %v24596_v22  ;;  %v1595_v55 = vadd.f32 %v20219_v40, %v31060_v3  ;;  %v24710_v41 = vld [vmem:[%s30893_s1 + $0x280] sm:$0xff]   ;;  %20587 = vmatpush3.bf16.msra.mxu0 %v24570_v5  ;;  %v24747_v60 = vld [vmem:[%s22490_s16 + $0x30c] sm:$0x3] }
 0x147   : > { %v24701_v46 = vadd.f32 %v2020_v56, %v1592_v31  ;;  %v4628_v57 = vrot.slane %v24636_v26, 6  ;;  %v1492_v7 = vpop.f32.mrf.mxu0  ;;  %v31061_v35 = vrot.slane %v24478_v39, 11  ;;  %v24722_v28 = vsel %vm22776_vm5, %v4086_v1, %v4087_v54  ;;  %v24736_v39 = vld [vmem:[%s30893_s1 + $0x2c0] sm:$0xff]   ;;  %v2023_v31 = vpop.f32.mrf.mxu1  ;;  %20588 = vmatprep.subr.bf16.mxu0 %v24642_v58  ;;  %v31071_v26 = vld [vmem:[#allocation27_spill] sm:$0xff] }
 0x148   : > { %v24726_v63 = vrot.slane %v4625_v24, 4  ;;  %v17112_v6 = vrot.slane %v24661_v21, 11  ;;  %v31062_v54 = vld [vmem:[#allocation22_spill] sm:$0xff]  ;;  %v4098_v5 = vrot.slane %v24696_v32, 7  ;;  %v30936_v40 = vrot.slane %v24699_v50, 6 }
 0x149   : > { %v24718_v30 = vsel %vm22776_vm5, %v31061_v35, %v4084_v12  ;;  %v24738_v12 = vadd.f32 %v20267_v20, %v1595_v55  ;;  %v1593_v1 = vadd.f32 %v1492_v7, %v31062_v54  ;;  %20635 = vmatpush3.bf16.msra.mxu1 %v24596_v22  ;;  %v24744_v56 = vld [vmem:[%s22490_s16 + $0x304] sm:$0xc]  ;;  %v20222_v36 = vpop.f32.mrf.mxu0  ;;  %v17141_v3 = vcombine.low %v24657_v27, %v24676_v11  ;;  %v24764_v7 = vld [vmem:[%s22490_s16 + $0x56c] sm:$0x8]  ;;  %v24767_v35 = vld [vmem:[%s22490_s16 + $0x570] sm:$0xf]  ;;  %v20270_v54 = vpop.f32.mrf.mxu1 }
 0x14a   : > { %v17245_v55 = vcombine.low %v24686_v52, %v24690_v51  ;;  %v31063_v22 = vrot.slane %v24523_v62, 10  ;;  %20636 = vmatprep.subr.bf16.mxu1 %v24666_v19  ;;  %v31064_v27 = vld [vmem:[#allocation23_spill] sm:$0xff]  ;;  %v31065_v25 = vcombine.low %v24513_v61, %v24534_v29  ;;  %v17142_v62 = vcombine.low %v24718_v30, %v24722_v28  ;;  %v24801_v28 = vld [vmem:[%s22490_s16 + $0x574] sm:$0x7]  ;;  %20589 = vmatpush3.bf16.msra.mxu0 %v24642_v58 }
 0x14b   : > { %20509 = vmatmul.mubr.bf16.gmra.mxu0 %v17139_v0  ;;  %v24770_v0 = vadd.f32 %v2023_v31, %v1593_v1  ;;  %v1598_v11 = vadd.f32 %v20222_v36, %v31064_v27  ;;  %v1505_v1 = vpop.f32.mrf.mxu0  ;;  %v31066_v31 = vrot.slane %v24538_v23, 6  ;;  %v31067_v29 = vrot.slane %v24565_v16, 11  ;;  %v24807_v23 = vld [vmem:[%s30893_s1 + $0x378] sm:$0xff]   ;;  %v31068_v16 = vld [vmem:[#allocation24_spill] sm:$0xff]  ;;  %20590 = vmatprep.subr.bf16.mxu0 %v24710_v41  ;;  %v17200_v32 = vld [vmem:[%s22490_s16 + $0x34c] sm:$0x3] }
 0x14c   : > { %v24761_v20 = vsel %vm23942_vm8, %v31063_v22, %v4618_v45  ;;  %20557 = vmatmul.mubr.bf16.gmra.mxu1 %v31065_v25  ;;  %20512 = vmatprep.mubr.bf16.mxu0 %v17140_v48  ;;  %v24781_v45 = vld [vmem:[%s30893_s1 + $0x338] sm:$0xff]   ;;  %v24798_v30 = vsel %vm22776_vm5, %v4093_v43, %v4094_v13  ;;  %v17216_v36 = vrot.slane %v24744_v56, 10  ;;  %v24815_v13 = vld [vmem:[%s22490_s16 + $0x324] sm:$0xc]  ;;  %v24818_v43 = vld [vmem:[%s22490_s16 + $0x328] sm:$0xf] }
 0x14d   : > { %20560 = vmatprep.mubr.bf16.mxu1 %v17244_v10  ;;  %v4622_v61 = vsel %vm23942_vm8, %v24616_v37, %v31066_v31  ;;  %v24794_v48 = vsel %vm22776_vm5, %v31067_v29, %v4091_v44  ;;  %v24809_v38 = vadd.f32 %v20270_v54, %v1598_v11  ;;  %v1596_v37 = vadd.f32 %v1505_v1, %v31068_v16  ;;  %v2036_v10 = vpop.f32.mrf.mxu1  ;;  %v20223_v58 = vpop.f32.mrf.mxu0  ;;  %v24835_v29 = vld [vmem:[%s22490_s16 + $0x590] sm:$0xf] }
 0x14e   : > { %v4101_v44 = vrot.slane %v24730_v49, 7  ;;  %20637 = vmatpush3.bf16.msra.mxu1 %v24666_v19  ;;  %v4100_v22 = vrot.slane %v4098_v5, 4  ;;  %v4634_v27 = vrot.slane %v30936_v40, 4  ;;  %v4635_v49 = vrot.slane %v24747_v60, 6  ;;  %v31069_v19 = vld [vmem:[#allocation25_spill] sm:$0xff]  ;;  %20591 = vmatpush3.bf16.msra.mxu0 %v24710_v41 }
 0x14f   : > { %v4105_v56 = vrot.slane %v24767_v35, 7  ;;  %20638 = vmatprep.subr.bf16.mxu1 %v24736_v39  ;;  %v24829_v11 = vadd.f32 %v2036_v10, %v1596_v37  ;;  %v1599_v54 = vadd.f32 %v20223_v58, %v31069_v19  ;;  %v20271_v25 = vpop.f32.mrf.mxu1  ;;  %v17113_v1 = vrot.slane %v24764_v7, 11  ;;  %v1508_v16 = vpop.f32.mrf.mxu0  ;;  %v24847_v10 = vld [vmem:[%s22490_s16 + $0x32c] sm:$0x3]  ;;  %v24852_v19 = vld [vmem:[%s22490_s16 + $0x58c] sm:$0x8]  ;;  %20672 = vmatprep.subr.bf16.mxu0 %v24781_v45 }
 0x150   : > { %v17246_v60 = vcombine.low %v24761_v20, %v4622_v61  ;;  %v24844_v37 = vsel %vm23942_vm8, %v17215_v33, %v4625_v24  ;;  %v17217_v7 = vrot.slane %v24815_v13, 10  ;;  %v4639_v58 = vrot.slane %v24818_v43, 6  ;;  %v31070_v20 = vld [vmem:[#allocation26_spill] sm:$0xff]  ;;  %v17096_v24 = vld [vmem:[%s22490_s16 + $0x594] sm:$0x7] }
 0x151   : > { %v24855_v31 = vadd.f32 %v20271_v25, %v1599_v54  ;;  %v1597_v17 = vadd.f32 %v1508_v16, %v31070_v20  ;;  %v2039_v61 = vpop.f32.mrf.mxu1  ;;  %v17143_v34 = vcombine.low %v24794_v48, %v24798_v30  ;;  %v24862_v33 = vld [vmem:[%s22490_s16 + $0x344] sm:$0xc]  ;;  %v24865_v40 = vld [vmem:[%s22490_s16 + $0x348] sm:$0xf]  ;;  %v20226_v13 = vpop.f32.mrf.mxu0  ;;  %v4629_v41 = vsel %vm23942_vm8, %v24726_v63, %v4628_v57  ;;  %v31072_v16 = vld [vmem:[#allocation28_spill] sm:$0xff] }
 0x152   : > { %20639 = vmatpush3.bf16.msra.mxu1 %v24736_v39  ;;  %v4099_v48 = vsel %vm22776_vm5, %v17112_v6, %v4098_v5  ;;  %v4107_v39 = vrot.slane %v4105_v56, 4  ;;  %v4112_v30 = vrot.slane %v24835_v29, 7  ;;  %v1602_v43 = vadd.f32 %v20226_v13, %v31071_v26 }
 0x153   : > { %20513 = vmatmul.mubr.bf16.gmra.mxu0 %v17141_v3  ;;  %20720 = vmatprep.subr.bf16.mxu1 %v24807_v23  ;;  %v24884_v3 = vadd.f32 %v2039_v61, %v1597_v17  ;;  %v20274_v54 = vpop.f32.mrf.mxu1  ;;  %v4102_v21 = vsel %vm22776_vm5, %v4100_v22, %v4101_v44  ;;  %v1521_v57 = vpop.f32.mrf.mxu0  ;;  %v4641_v63 = vrot.slane %v4639_v58, 4  ;;  %v4642_v6 = vrot.slane %v24847_v10, 6  ;;  %v24906_v22 = vld [vmem:[%s22490_s16 + $0x5b0] sm:$0xf]  ;;  %v31074_v61 = vld [vmem:[#allocation29_spill] sm:$0xff] }
 0x154   : > { %20561 = vmatmul.mubr.bf16.gmra.mxu1 %v17245_v55  ;;  %20516 = vmatprep.mubr.bf16.mxu0 %v17142_v62  ;;  %v17114_v5 = vrot.slane %v24852_v19, 11  ;;  %v4646_v25 = vrot.slane %v24865_v40, 6  ;;  %v24896_v29 = vadd.f32 %v20274_v54, %v1602_v43  ;;  %v1600_v52 = vadd.f32 %v1521_v57, %v31072_v16  ;;  %v24914_v43 = vld [vmem:[%s22490_s16 + $0x5ac] sm:$0x8]  ;;  %v17202_v57 = vld [vmem:[%s22490_s16 + $0x368] sm:$0xf] }
 0x155   : > { %20564 = vmatprep.mubr.bf16.mxu1 %v17246_v60  ;;  %v2052_v51 = vpop.f32.mrf.mxu1  ;;  %v31073_v55 = vrot.slane %v24699_v50, 6  ;;  %v4636_v44 = vsel %vm23942_vm8, %v4634_v27, %v4635_v49  ;;  %v20227_v60 = vpop.f32.mrf.mxu0  ;;  %v4114_v10 = vrot.slane %v4112_v30, 4  ;;  %v4115_v40 = vrot.slane %v17096_v24, 7  ;;  %v24917_v27 = vld [vmem:[%s22490_s16 + $0x5b4] sm:$0x7] }
 0x156   : > { %v17218_v19 = vrot.slane %v24862_v33, 10  ;;  %v4649_v20 = vrot.slane %v17200_v32, 6  ;;  %v24909_v17 = vadd.f32 %v2052_v51, %v1600_v52  ;;  %v1603_v13 = vadd.f32 %v20227_v60, %v31074_v61 }
 0x157   : > { %v4633_v62 = vsel %vm23942_vm8, %v17216_v36, %v31073_v55  ;;  %v20275_v50 = vpop.f32.mrf.mxu1  ;;  %v17247_v26 = vcombine.low %v24844_v37, %v4629_v41  ;;  %v17144_v36 = vcombine.low %v4099_v48, %v4102_v21  ;;  %v1524_v49 = vpop.f32.mrf.mxu0  ;;  %v4106_v24 = vsel %vm22776_vm5, %v17113_v1, %v4105_v56  ;;  %v31075_v37 = vld [vmem:[#allocation30_spill] sm:$0xff] }
 0x158   : > { %v17248_v54 = vcombine.low %v4633_v62, %v4636_v44  ;;  %v4648_v33 = vrot.slane %v4646_v25, 4  ;;  %v4119_v32 = vrot.slane %v24906_v22, 7  ;;  %v24925_v16 = vadd.f32 %v20275_v50, %v1603_v13  ;;  %v17333_v62 = vld [vmem:[%s22490_s16 + $0x194] sm:$0xf]  ;;  %v31077_v44 = vld [vmem:[#allocation31_spill] sm:$0xff] }
 0x159   : > { %v1601_v41 = vadd.f32 %v1524_v49, %v31075_v37  ;;  %v2055_v48 = vpop.f32.mrf.mxu1  ;;  %v31076_v21 = vrot.slane %v24801_v28, 7  ;;  %v4640_v35 = vsel %vm23942_vm8, %v17217_v7, %v4639_v58  ;;  %v20230_v56 = vpop.f32.mrf.mxu0  ;;  %v4643_v1 = vsel %vm23942_vm8, %v4641_v63, %v4642_v6  ;;  %v17203_v63 = vld [vmem:[%s22490_s16 + $0x36c] sm:$0x3]  ;;  %v31078_v13 = vld [vmem:[#allocation32_spill] sm:$0xff]  ;;  %v17334_v37 = vld [vmem:[%s22490_s16 + $0x198] sm:$0x3] }
 0x15a   : > { %v4113_v51 = vsel %vm22776_vm5, %v17114_v5, %v4112_v30  ;;  %v4116_v55 = vsel %vm22776_vm5, %v4114_v10, %v4115_v40  ;;  %v17115_v28 = vrot.slane %v24914_v43, 11  ;;  %v1606_v22 = vadd.f32 %v20230_v56, %v31077_v44  ;;  %v17332_v40 = vld [vmem:[%s22490_s16 + $0x190] sm:$0xc]  ;;  %v17336_v56 = vld [vmem:[%s22490_s16 + $0x1b4] sm:$0xf] }
 0x15b   : > { %v4109_v52 = vsel %vm22776_vm5, %v4107_v39, %v31076_v21  ;;  %20517 = vmatmul.mubr.bf16.gmra.mxu0 %v17143_v34  ;;  %v24942_v39 = vadd.f32 %v2055_v48, %v1601_v41  ;;  %v20278_v7 = vpop.f32.mrf.mxu1  ;;  %v4122_v58 = vrot.slane %v24917_v27, 7  ;;  %v17201_v34 = vld [vmem:[%s22490_s16 + $0x364] sm:$0xc]  ;;  %v4653_v6 = vrot.slane %v17202_v57, 6  ;;  %v1537_v30 = vpop.f32.mrf.mxu0 }
 0x15c   : > { %20565 = vmatmul.mubr.bf16.gmra.mxu1 %v17247_v26  ;;  %20520 = vmatprep.mubr.bf16.mxu0 %v17144_v36  ;;  %v17145_v5 = vcombine.low %v4106_v24, %v4109_v52  ;;  %v4647_v60 = vsel %vm23942_vm8, %v17218_v19, %v4646_v25  ;;  %v4650_v10 = vsel %vm23942_vm8, %v4648_v33, %v4649_v20  ;;  %v4121_v36 = vrot.slane %v4119_v32, 4  ;;  %v31079_v19 = vld [vmem:[#allocation33_spill] sm:$0xff] }
 0x15d   : > { %20568 = vmatprep.mubr.bf16.mxu1 %v17248_v54  ;;  %v24953_v61 = vadd.f32 %v20278_v7, %v1606_v22  ;;  %v1604_v50 = vadd.f32 %v1537_v30, %v31078_v13  ;;  %v2068_v26 = vpop.f32.mrf.mxu1  ;;  %v5464_v43 = vrot.slane %v17333_v62, 6  ;;  %v20231_v27 = vpop.f32.mrf.mxu0  ;;  %v17249_v49 = vcombine.low %v4640_v35, %v4643_v1  ;;  %v31080_v62 = vld [vmem:[#allocation34_spill] sm:$0xff]  ;;  %v17335_v22 = vld [vmem:[%s22490_s16 + $0x1b0] sm:$0xc] }
 0x15e   : > { %v17146_v57 = vcombine.low %v4113_v51, %v4116_v55  ;;  %v17219_v54 = vrot.slane %v17201_v34, 10  ;;  %v4656_v24 = vrot.slane %v17203_v63, 6  ;;  %v1607_v20 = vadd.f32 %v20231_v27, %v31079_v19  ;;  %v17340_v27 = vld [vmem:[%s22490_s16 + $0x1d8] sm:$0x3] }
 0x15f   : > { %v24957_v25 = vadd.f32 %v2068_v26, %v1604_v50  ;;  %v20279_v33 = vpop.f32.mrf.mxu1  ;;  %v4655_v41 = vrot.slane %v4653_v6, 4  ;;  %v17380_v48 = vrot.slane %v17332_v40, 10  ;;  %v1540_v21 = vpop.f32.mrf.mxu0  ;;  %v17250_v52 = vcombine.low %v4647_v60, %v4650_v10  ;;  %v17339_v60 = vld [vmem:[%s22490_s16 + $0x1d4] sm:$0xf]  ;;  %v31081_v40 = vld [vmem:[#allocation35_spill] sm:$0xff] }
 0x160   : > { %v24961_v44 = vadd.f32 %v20279_v33, %v1607_v20  ;;  %v1605_v35 = vadd.f32 %v1540_v21, %v31080_v62  ;;  %v5466_v51 = vrot.slane %v5464_v43, 4  ;;  %v5467_v55 = vrot.slane %v17334_v37, 6  ;;  %v31082_v37 = vld [vmem:[#allocation36_spill] sm:$0xff] }
 0x161   : > { %v2071_v1 = vpop.f32.mrf.mxu1  ;;  %v20234_v7 = vpop.f32.mrf.mxu0  ;;  %v4120_v34 = vsel %vm22776_vm5, %v17115_v28, %v4119_v32  ;;  %v4123_v63 = vsel %vm22776_vm5, %v4121_v36, %v4122_v58  ;;  %v4654_v30 = vsel %vm23942_vm8, %v17219_v54, %v4653_v6  ;;  %v17337_v32 = vld [vmem:[%s22490_s16 + $0x1b8] sm:$0x3]  ;;  %v5471_v28 = vrot.slane %v17336_v56, 6  ;;  %v17338_v36 = vld [vmem:[%s22490_s16 + $0x1d0] sm:$0xc] }
 0x162   : > { %v24972_v10 = vadd.f32 %v2071_v1, %v1605_v35  ;;  %v1610_v13 = vadd.f32 %v20234_v7, %v31081_v40  ;;  %v5465_v58 = vsel %vm23942_vm8, %v17380_v48, %v5464_v43  ;;  %v17381_v6 = vrot.slane %v17335_v22, 10  ;;  %v21992_v56 = vld [vmem:[%s22490_s16 + $0x18c] sm:$0xff]   ;;  %v17342_v40 = vld [vmem:[%s22490_s16 + $0x1f4] sm:$0xf] }
 0x163   : > { %20521 = vmatmul.mubr.bf16.gmra.mxu0 %v17145_v5  ;;  %v20282_v50 = vpop.f32.mrf.mxu1  ;;  %v4657_v5 = vsel %vm23942_vm8, %v4655_v41, %v4656_v24  ;;  %v1553_v26 = vpop.f32.mrf.mxu0  ;;  %v5478_v24 = vrot.slane %v17339_v60, 6  ;;  %v17147_v33 = vcombine.low %v4120_v34, %v4123_v63  ;;  %v5473_v62 = vrot.slane %v5471_v28, 4 }
 0x164   : > { %20569 = vmatmul.mubr.bf16.gmra.mxu1 %v17249_v49  ;;  %20524 = vmatprep.mubr.bf16.mxu0 %v17146_v57  ;;  %v24982_v54 = vadd.f32 %v20282_v50, %v1610_v13  ;;  %v1608_v19 = vadd.f32 %v1553_v26, %v31082_v37  ;;  %v5468_v57 = vsel %vm23942_vm8, %v5466_v51, %v5467_v55  ;;  %v5474_v35 = vrot.slane %v17337_v32, 6  ;;  %v31084_v51 = vld [vmem:[#allocation38_spill] sm:$0xff]  ;;  %v17345_v32 = vld [vmem:[%s22490_s16 + $0x214] sm:$0xf] }
 0x165   : > { %20572 = vmatprep.mubr.bf16.mxu1 %v17250_v52  ;;  %v2084_v49 = vpop.f32.mrf.mxu1  ;;  %v20235_v20 = vpop.f32.mrf.mxu0  ;;  %v17251_v41 = vcombine.low %v4654_v30, %v4657_v5  ;;  %v31083_v52 = vld [vmem:[#allocation37_spill] sm:$0xff]  ;;  %v17412_v22 = vcombine.low %v5465_v58, %v5468_v57  ;;  %v17382_v7 = vrot.slane %v17338_v36, 10  ;;  %v5480_v63 = vrot.slane %v5478_v24, 4  ;;  %v17341_v5 = vld [vmem:[%s22490_s16 + $0x1f0] sm:$0xc]  ;;  %v31085_v58 = vld [vmem:[#allocation39_spill] sm:$0xff] }
 0x166   : > { %v24987_v21 = vadd.f32 %v2084_v49, %v1608_v19  ;;  %v1611_v43 = vadd.f32 %v20235_v20, %v31083_v52  ;;  %v5481_v30 = vrot.slane %v17340_v27, 6  ;;  %v5472_v50 = vsel %vm23942_vm8, %v17381_v6, %v5471_v28  ;;  %v17343_v27 = vld [vmem:[%s22490_s16 + $0x1f8] sm:$0x3]  ;;  %v17344_v6 = vld [vmem:[%s22490_s16 + $0x210] sm:$0xc] }
 0x167   : > { %v20283_v48 = vpop.f32.mrf.mxu1  ;;  %v1556_v1 = vpop.f32.mrf.mxu0  ;;  %v5475_v19 = vsel %vm23942_vm8, %v5473_v62, %v5474_v35  ;;  %v5485_v49 = vrot.slane %v17342_v40, 6  ;;  %v5479_v28 = vsel %vm23942_vm8, %v17382_v7, %v5478_v24  ;;  %v21993_v62 = vld [vmem:[%s22490_s16 + $0x1ac] sm:$0xff]   ;;  %v17346_v40 = vld [vmem:[%s22490_s16 + $0x218] sm:$0x3] }
 0x168   : > { %v24992_v13 = vadd.f32 %v20283_v48, %v1611_v43  ;;  %v1609_v55 = vadd.f32 %v1556_v1, %v31084_v51  ;;  %v5492_v48 = vrot.slane %v17345_v32, 6  ;;  %v17413_v35 = vcombine.low %v5472_v50, %v5475_v19  ;;  %v31087_v7 = vld [vmem:[#allocation41_spill] sm:$0xff]  ;;  %v25026_v50 = vld [vmem:[%s22490_s16 + $0x234] sm:$0xf] }
 0x169   : > { %v2087_v34 = vpop.f32.mrf.mxu1  ;;  %v20238_v60 = vpop.f32.mrf.mxu0  ;;  %v17383_v1 = vrot.slane %v17341_v5, 10 }
 0x16a   : > { %v24999_v26 = vadd.f32 %v2087_v34, %v1609_v55  ;;  %v1614_v36 = vadd.f32 %v20238_v60, %v31085_v58  ;;  %v21996_v34 = vld [vmem:[%s22490_s16 + $0x1cc] sm:$0xff]   ;;  %v5487_v60 = vrot.slane %v5485_v49, 4 }
 0x16b   : > { %20525 = vmatmul.mubr.bf16.gmra.mxu0 %v17147_v33  ;;  %v20286_v37 = vpop.f32.mrf.mxu1  ;;  %v1569_v57 = vpop.f32.mrf.mxu0  ;;  %v31086_v33 = vld [vmem:[#allocation40_spill] sm:$0xff] }
 0x16c   : > { %20573 = vmatmul.mubr.bf16.gmra.mxu1 %v17251_v41  ;;  %20592 = vmatprep.mubr.bf16.mxu0 %v21992_v56  ;;  %v25008_v20 = vadd.f32 %v20286_v37, %v1614_v36  ;;  %v1612_v52 = vadd.f32 %v1569_v57, %v31086_v33  ;;  %v5482_v41 = vsel %vm23942_vm8, %v5480_v63, %v5481_v30  ;;  %v21998_v63 = vld [vmem:[%s30893_s1 + $0x330] sm:$0xff]   ;;  %v17384_v30 = vrot.slane %v17344_v6, 10  ;;  %v31088_v37 = vld [vmem:[#allocation42_spill] sm:$0xff] }
 0x16d   : > { %20640 = vmatprep.mubr.bf16.mxu1 %v17412_v22  ;;  %v2100_v43 = vpop.f32.mrf.mxu1  ;;  %v20239_v56 = vpop.f32.mrf.mxu0  ;;  %v5488_v22 = vrot.slane %v17343_v27, 6  ;;  %v17414_v58 = vcombine.low %v5479_v28, %v5482_v41  ;;  %v25023_v36 = vld [vmem:[%s22490_s16 + $0x230] sm:$0xc]  ;;  %v5494_v57 = vrot.slane %v5492_v48, 4  ;;  %v5495_v33 = vrot.slane %v17346_v40, 6 }
 0x16e   : > { %v25015_v24 = vadd.f32 %v2100_v43, %v1612_v52  ;;  %v1615_v51 = vadd.f32 %v20239_v56, %v31087_v7  ;;  %v5486_v6 = vsel %vm23942_vm8, %v17383_v1, %v5485_v49  ;;  %v21999_v28 = vld [vmem:[%s30893_s1 + $0x370] sm:$0xff]   ;;  %v5499_v49 = vrot.slane %v25026_v50, 6 }
 0x16f   : > { %v20287_v55 = vpop.f32.mrf.mxu1  ;;  %v1572_v32 = vpop.f32.mrf.mxu0  ;;  %v25037_v43 = vld [vmem:[%s22490_s16 + $0x254] sm:$0xf]  ;;  %v21997_v40 = vld [vmem:[%s22490_s16 + $0x1ec] sm:$0xff]  }
 0x170   : > { %v25028_v5 = vadd.f32 %v20287_v55, %v1615_v51  ;;  %v1613_v19 = vadd.f32 %v1572_v32, %v31088_v37  ;;  %v5493_v51 = vsel %vm23942_vm8, %v17384_v30, %v5492_v48  ;;  %v22003_v48 = vld [vmem:[%s30893_s1 + $0x368] sm:$0xff]   ;;  %v17350_v30 = vld [vmem:[%s22490_s16 + $0x250] sm:$0xc]  ;;  %v5506_v32 = vrot.slane %v25037_v43, 6  ;;  %v17352_v37 = vld [vmem:[%s22490_s16 + $0x258] sm:$0x3] }
 0x171   : > { %v2103_v27 = vpop.f32.mrf.mxu1  ;;  %v20306_v52 = vpop.f32.mrf.mxu0  ;;  %v17386_v43 = vrot.slane %v17350_v30, 10 }
 0x172   : > { %v25039_v41 = vadd.f32 %v2103_v27, %v1613_v19  ;;  %v2471_v56 = vadd.f32 %v20306_v52, %v24373_v14  ;;  %v17349_v14 = vld [vmem:[%s22490_s16 + $0x238] sm:$0x3]  ;;  %v5501_v27 = vrot.slane %v5499_v49, 4 }
 0x173   : > { %20593 = vmatmul.mubr.bf16.vlgmr.msra.gmra.mxu0 %v21993_v62  ;;  %v20354_v7 = vpop.f32.mrf.mxu1  ;;  %v5489_v62 = vsel %vm23942_vm8, %v5487_v60, %v5488_v22  ;;  %v2342_v1 = vpop.f32.mrf.mxu0 }
 0x174   : > { %20641 = vmatmul.mubr.bf16.vlgmr.msra.gmra.mxu1 %v17413_v35  ;;  %20673 = vmatpush3.bf16.msra.mxu0 %v24781_v45  ;;  %v17385_v35 = vrot.slane %v25023_v36, 10  ;;  %v22002_v45 = vld [vmem:[%s30893_s1 + $0x328] sm:$0xff]   ;;  %v25055_v22 = vadd.f32 %v20354_v7, %v2471_v56  ;;  %v2469_v55 = vadd.f32 %v2342_v1, %v24394_v47  ;;  %v17415_v50 = vcombine.low %v5486_v6, %v5489_v62  ;;  %v25071_v56 = vld [vmem:[%s22490_s16 + $0x274] sm:$0xf] }
 0x175   : > { %20721 = vmatpush3.bf16.msra.mxu1 %v24807_v23  ;;  %20596 = vmatprep.mubr.bf16.mxu0 %v21996_v34  ;;  %v2872_v60 = vpop.f32.mrf.mxu1  ;;  %v22000_v23 = vld [vmem:[%s22490_s16 + $0x20c] sm:$0xff]   ;;  %v5496_v34 = vsel %vm23942_vm8, %v5494_v57, %v5495_v33  ;;  %v20307_v36 = vpop.f32.mrf.mxu0  ;;  %v5502_v57 = vrot.slane %v17349_v14, 6  ;;  %v5509_v1 = vrot.slane %v17352_v37, 6  ;;  %v17355_v37 = vld [vmem:[%s22490_s16 + $0x278] sm:$0x3] }
 0x176   : > { %20644 = vmatprep.mubr.bf16.mxu1 %v17414_v58  ;;  %20674 = vmatprep.subr.bf16.mxu0 %v21998_v63  ;;  %v25067_v47 = vadd.f32 %v2872_v60, %v2469_v55  ;;  %v2472_v58 = vadd.f32 %v20307_v36, %v24446_v59  ;;  %v17416_v52 = vcombine.low %v5493_v51, %v5496_v34  ;;  %v5508_v59 = vrot.slane %v5506_v32, 4  ;;  %v17353_v51 = vld [vmem:[%s22490_s16 + $0x270] sm:$0xc]  ;;  %v22007_v55 = vld [vmem:[%s30893_s1 + $0x360] sm:$0xff]  }
 0x177   : > { %20722 = vmatprep.subr.bf16.mxu1 %v21999_v28  ;;  %v20355_v19 = vpop.f32.mrf.mxu1  ;;  %v2345_v33 = vpop.f32.mrf.mxu0  ;;  %v5507_v36 = vsel %vm23942_vm8, %v17386_v43, %v5506_v32 }
 0x178   : > { %20675 = vmatpush3.bf16.msra.mxu0 %v21998_v63  ;;  %v25073_v6 = vadd.f32 %v20355_v19, %v2472_v58  ;;  %v2470_v7 = vadd.f32 %v2345_v33, %v24480_v9  ;;  %v22006_v63 = vld [vmem:[%s30893_s1 + $0x320] sm:$0xff]   ;;  %v25086_v9 = vld [vmem:[%s22490_s16 + $0x294] sm:$0xf]  ;;  %v17356_v19 = vld [vmem:[%s22490_s16 + $0x290] sm:$0xc] }
 0x179   : > { %20723 = vmatpush3.bf16.msra.mxu1 %v21999_v28  ;;  %20676 = vmatprep.subr.bf16.mxu0 %v22002_v45  ;;  %v2875_v62 = vpop.f32.mrf.mxu1  ;;  %v20310_v14 = vpop.f32.mrf.mxu0  ;;  %v5500_v28 = vsel %vm23942_vm8, %v17385_v35, %v5499_v49  ;;  %v5513_v49 = vrot.slane %v25071_v56, 6 }
 0x17a   : > { %20724 = vmatprep.subr.bf16.mxu1 %v22003_v48  ;;  %v25088_v60 = vadd.f32 %v2875_v62, %v2470_v7  ;;  %v2475_v34 = vadd.f32 %v20310_v14, %v24525_v42  ;;  %v22004_v62 = vld [vmem:[%s22490_s16 + $0x24c] sm:$0xff]  }
 0x17b   : > { %20597 = vmatmul.mubr.bf16.gmra.mxu0 %v21997_v40  ;;  %v20358_v30 = vpop.f32.mrf.mxu1  ;;  %v5503_v40 = vsel %vm23942_vm8, %v5501_v27, %v5502_v57  ;;  %v2358_v35 = vpop.f32.mrf.mxu0  ;;  %v5520_v27 = vrot.slane %v25086_v9, 6  ;;  %v22001_v57 = vld [vmem:[%s22490_s16 + $0x22c] sm:$0xff]  }
 0x17c   : > { %20645 = vmatmul.mubr.bf16.gmra.mxu1 %v17415_v50  ;;  %20600 = vmatprep.mubr.bf16.mxu0 %v22000_v23  ;;  %v25097_v58 = vadd.f32 %v20358_v30, %v2475_v34  ;;  %v2473_v42 = vadd.f32 %v2358_v35, %v24558_v18  ;;  %v5510_v23 = vsel %vm23942_vm8, %v5508_v59, %v5509_v1  ;;  %v17358_v18 = vld [vmem:[%s22490_s16 + $0x298] sm:$0x3]  ;;  %v5515_v59 = vrot.slane %v5513_v49, 4  ;;  %v22014_v34 = vld [vmem:[%s30893_s1 + $0x310] sm:$0xff]  }
 0x17d   : > { %20648 = vmatprep.mubr.bf16.mxu1 %v17416_v52  ;;  %20677 = vmatpush3.bf16.msra.mxu0 %v22002_v45  ;;  %v2888_v50 = vpop.f32.mrf.mxu1  ;;  %v22010_v45 = vld [vmem:[%s30893_s1 + $0x318] sm:$0xff]   ;;  %v20311_v32 = vpop.f32.mrf.mxu0  ;;  %v17417_v33 = vcombine.low %v5500_v28, %v5503_v40  ;;  %v17387_v52 = vrot.slane %v17353_v51, 10  ;;  %v5516_v1 = vrot.slane %v17355_v37, 6  ;;  %v17418_v9 = vcombine.low %v5507_v36, %v5510_v23  ;;  %v25117_v51 = vld [vmem:[%s22490_s16 + $0x2b4] sm:$0xf] }
 0x17e   : > { %20725 = vmatpush3.bf16.msra.mxu1 %v22003_v48  ;;  %20678 = vmatprep.subr.bf16.mxu0 %v22006_v63  ;;  %v22011_v48 = vld [vmem:[%s30893_s1 + $0x358] sm:$0xff]   ;;  %v25112_v43 = vadd.f32 %v2888_v50, %v2473_v42  ;;  %v2476_v56 = vadd.f32 %v20311_v32, %v24598_v15  ;;  %v17388_v28 = vrot.slane %v17356_v19, 10  ;;  %v5522_v35 = vrot.slane %v5520_v27, 4  ;;  %v25128_v42 = vld [vmem:[%s22490_s16 + $0x2d4] sm:$0xf] }
 0x17f   : > { %20726 = vmatprep.subr.bf16.mxu1 %v22007_v55  ;;  %v20359_v7 = vpop.f32.mrf.mxu1  ;;  %v2361_v14 = vpop.f32.mrf.mxu0  ;;  %v5523_v37 = vrot.slane %v17358_v18, 6  ;;  %v17359_v19 = vld [vmem:[%s22490_s16 + $0x2b0] sm:$0xc]  ;;  %v5527_v32 = vrot.slane %v25117_v51, 6  ;;  %v17364_v51 = vld [vmem:[%s22490_s16 + $0x2d8] sm:$0x3] }
 0x180   : > { %v25122_v30 = vadd.f32 %v20359_v7, %v2476_v56  ;;  %v2474_v40 = vadd.f32 %v2361_v14, %v24625_v4  ;;  %v22015_v4 = vld [vmem:[%s30893_s1 + $0x350] sm:$0xff]   ;;  %v5521_v18 = vsel %vm23942_vm8, %v17388_v28, %v5520_v27  ;;  %v17361_v56 = vld [vmem:[%s22490_s16 + $0x2b8] sm:$0x3]  ;;  %v5534_v14 = vrot.slane %v25128_v42, 6  ;;  %v22018_v27 = vld [vmem:[%s30893_s1 + $0x308] sm:$0xff]  }
 0x181   : > { %20679 = vmatpush3.bf16.msra.mxu0 %v22006_v63  ;;  %v2891_v15 = vpop.f32.mrf.mxu1  ;;  %v20314_v36 = vpop.f32.mrf.mxu0  ;;  %v5514_v63 = vsel %vm23942_vm8, %v17387_v52, %v5513_v49  ;;  %v5517_v49 = vsel %vm23942_vm8, %v5515_v59, %v5516_v1  ;;  %v22005_v52 = vld [vmem:[%s22490_s16 + $0x26c] sm:$0xff]   ;;  %v5524_v59 = vsel %vm23942_vm8, %v5522_v35, %v5523_v37  ;;  %v17389_v28 = vrot.slane %v17359_v19, 10 }
 0x182   : > { %20727 = vmatpush3.bf16.msra.mxu1 %v22007_v55  ;;  %20680 = vmatprep.subr.bf16.mxu0 %v22010_v45  ;;  %v25133_v50 = vadd.f32 %v2891_v15, %v2474_v40  ;;  %v2479_v55 = vadd.f32 %v20314_v36, %v24668_v2  ;;  %v17362_v1 = vld [vmem:[%s22490_s16 + $0x2d0] sm:$0xc]  ;;  %v5529_v35 = vrot.slane %v5527_v32, 4  ;;  %v5530_v37 = vrot.slane %v17361_v56, 6 }
 0x183   : > { %20601 = vmatmul.mubr.bf16.gmra.mxu0 %v22001_v57  ;;  %20728 = vmatprep.subr.bf16.mxu1 %v22011_v48  ;;  %v20362_v23 = vpop.f32.mrf.mxu1  ;;  %v2374_v57 = vpop.f32.mrf.mxu0  ;;  %v17420_v42 = vcombine.low %v5521_v18, %v5524_v59  ;;  %v5528_v18 = vsel %vm23942_vm8, %v17389_v28, %v5527_v32 }
 0x184   : > { %20649 = vmatmul.mubr.bf16.gmra.mxu1 %v17417_v33  ;;  %20604 = vmatprep.mubr.bf16.mxu0 %v22004_v62  ;;  %v25144_v2 = vadd.f32 %v20362_v23, %v2479_v55  ;;  %v2477_v33 = vadd.f32 %v2374_v57, %v24701_v46  ;;  %v22008_v62 = vld [vmem:[%s22490_s16 + $0x28c] sm:$0xff]   ;;  %v17390_v55 = vrot.slane %v17362_v1, 10  ;;  %v5536_v57 = vrot.slane %v5534_v14, 4 }
 0x185   : > { %20652 = vmatprep.mubr.bf16.mxu1 %v17418_v9  ;;  %20681 = vmatpush3.bf16.msra.mxu0 %v22010_v45  ;;  %v2904_v7 = vpop.f32.mrf.mxu1  ;;  %v20315_v45 = vpop.f32.mrf.mxu0  ;;  %v17419_v9 = vcombine.low %v5514_v63, %v5517_v49  ;;  %v22019_v46 = vld [vmem:[%s30893_s1 + $0x348] sm:$0xff]   ;;  %v25163_v63 = vld [vmem:[%s22490_s16 + $0x2f4] sm:$0xf] }
 0x186   : > { %20729 = vmatpush3.bf16.msra.mxu1 %v22011_v48  ;;  %20682 = vmatprep.subr.bf16.mxu0 %v22014_v34  ;;  %v25159_v40 = vadd.f32 %v2904_v7, %v2477_v33  ;;  %v2480_v48 = vadd.f32 %v20315_v45, %v24738_v12  ;;  %v5537_v33 = vrot.slane %v17364_v51, 6  ;;  %v22022_v12 = vld [vmem:[%s30893_s1 + $0x300] sm:$0xff]   ;;  %v25175_v7 = vld [vmem:[%s22490_s16 + $0x314] sm:$0xf]  ;;  %v5541_v32 = vrot.slane %v25163_v63, 6 }
 0x187   : > { %20730 = vmatprep.subr.bf16.mxu1 %v22015_v4  ;;  %v20363_v15 = vpop.f32.mrf.mxu1  ;;  %v2377_v36 = vpop.f32.mrf.mxu0  ;;  %v5535_v28 = vsel %vm23942_vm8, %v17390_v55, %v5534_v14  ;;  %v17367_v51 = vld [vmem:[%s22490_s16 + $0x2f8] sm:$0x3] }
 0x188   : > { %v25165_v23 = vadd.f32 %v20363_v15, %v2480_v48  ;;  %v2478_v49 = vadd.f32 %v2377_v36, %v24770_v0  ;;  %v22023_v0 = vld [vmem:[%s30893_s1 + $0x340] sm:$0xff]   ;;  %v17368_v15 = vld [vmem:[%s22490_s16 + $0x310] sm:$0xc]  ;;  %v25199_v14 = vld [vmem:[%s30893_s1 + $0x3b8] sm:$0xff]  }
 0x189   : > { %20683 = vmatpush3.bf16.msra.mxu0 %v22014_v34  ;;  %v2907_v19 = vpop.f32.mrf.mxu1  ;;  %v20318_v56 = vpop.f32.mrf.mxu0  ;;  %v17365_v34 = vld [vmem:[%s22490_s16 + $0x2f0] sm:$0xc]  ;;  %v25206_v55 = vld [vmem:[%s30893_s1 + $0x3f8] sm:$0xff]  }
 0x18a   : > { %20731 = vmatpush3.bf16.msra.mxu1 %v22015_v4  ;;  %20684 = vmatprep.subr.bf16.mxu0 %v22018_v27  ;;  %v25180_v4 = vadd.f32 %v2907_v19, %v2478_v49  ;;  %v2483_v59 = vadd.f32 %v20318_v56, %v24809_v38  ;;  %v22012_v19 = vld [vmem:[%s22490_s16 + $0x2cc] sm:$0xff]  }
 0x18b   : > { %20605 = vmatmul.mubr.bf16.gmra.mxu0 %v22005_v52  ;;  %20732 = vmatprep.subr.bf16.mxu1 %v22019_v46  ;;  %v20366_v1 = vpop.f32.mrf.mxu1  ;;  %v5531_v52 = vsel %vm23942_vm8, %v5529_v35, %v5530_v37  ;;  %v2390_v45 = vpop.f32.mrf.mxu0  ;;  %v5548_v35 = vrot.slane %v25175_v7, 6  ;;  %v22009_v37 = vld [vmem:[%s22490_s16 + $0x2ac] sm:$0xff]  }
 0x18c   : > { %20653 = vmatmul.mubr.bf16.gmra.mxu1 %v17419_v9  ;;  %20608 = vmatprep.mubr.bf16.mxu0 %v22008_v62  ;;  %v25189_v48 = vadd.f32 %v20366_v1, %v2483_v59  ;;  %v2481_v38 = vadd.f32 %v2390_v45, %v24829_v11  ;;  %v5538_v62 = vsel %vm23942_vm8, %v5536_v57, %v5537_v33  ;;  %v17391_v11 = vrot.slane %v17365_v34, 10  ;;  %v17372_v34 = vld [vmem:[%s22490_s16 + $0x334] sm:$0xf] }
 0x18d   : > { %20656 = vmatprep.mubr.bf16.mxu1 %v17420_v42  ;;  %20685 = vmatpush3.bf16.msra.mxu0 %v22018_v27  ;;  %v2920_v9 = vpop.f32.mrf.mxu1  ;;  %v20319_v27 = vpop.f32.mrf.mxu0  ;;  %v17421_v36 = vcombine.low %v5528_v18, %v5531_v52  ;;  %v17370_v42 = vld [vmem:[%s22490_s16 + $0x318] sm:$0x3]  ;;  %v5543_v57 = vrot.slane %v5541_v32, 4  ;;  %v5544_v33 = vrot.slane %v17367_v51, 6  ;;  %v17422_v7 = vcombine.low %v5535_v28, %v5538_v62  ;;  %v17375_v51 = vld [vmem:[%s22490_s16 + $0x354] sm:$0xf] }
 0x18e   : > { %20733 = vmatpush3.bf16.msra.mxu1 %v22019_v46  ;;  %20686 = vmatprep.subr.bf16.mxu0 %v22022_v12  ;;  %v25208_v63 = vadd.f32 %v2920_v9, %v2481_v38  ;;  %v2484_v46 = vadd.f32 %v20319_v27, %v24855_v31  ;;  %v17392_v18 = vrot.slane %v17368_v15, 10  ;;  %v5550_v45 = vrot.slane %v5548_v35, 4  ;;  %v17371_v62 = vld [vmem:[%s22490_s16 + $0x330] sm:$0xc] }
 0x18f   : > { %20734 = vmatprep.subr.bf16.mxu1 %v22023_v0  ;;  %v20367_v49 = vpop.f32.mrf.mxu1  ;;  %v2393_v56 = vpop.f32.mrf.mxu0  ;;  %v5551_v38 = vrot.slane %v17370_v42, 6  ;;  %v5542_v28 = vsel %vm23942_vm8, %v17391_v11, %v5541_v32  ;;  %v5555_v15 = vrot.slane %v17372_v34, 6  ;;  %v17374_v11 = vld [vmem:[%s22490_s16 + $0x350] sm:$0xc] }
 0x190   : > { %v25213_v59 = vadd.f32 %v20367_v49, %v2484_v46  ;;  %v2482_v1 = vadd.f32 %v2393_v56, %v24884_v3  ;;  %v5549_v32 = vsel %vm23942_vm8, %v17392_v18, %v5548_v35  ;;  %v5562_v49 = vrot.slane %v17375_v51, 6 }
 0x191   : > { %20687 = vmatpush3.bf16.msra.mxu0 %v22022_v12  ;;  %v2923_v52 = vpop.f32.mrf.mxu1  ;;  %v20322_v31 = vpop.f32.mrf.mxu0  ;;  %v5552_v46 = vsel %vm23942_vm8, %v5550_v45, %v5551_v38  ;;  %v17393_v56 = vrot.slane %v17371_v62, 10  ;;  %v17378_v45 = vld [vmem:[%s22490_s16 + $0x374] sm:$0xf] }
 0x192   : > { %20735 = vmatpush3.bf16.msra.mxu1 %v22023_v0  ;;  %20768 = vmatprep.subr.bf16.mxu0 %v25199_v14  ;;  %v25221_v12 = vadd.f32 %v2923_v52, %v2482_v1  ;;  %v2487_v3 = vadd.f32 %v20322_v31, %v24896_v29  ;;  %v5545_v0 = vsel %vm23942_vm8, %v5543_v57, %v5544_v33  ;;  %v22013_v57 = vld [vmem:[%s22490_s16 + $0x2ec] sm:$0xff]   ;;  %v5557_v52 = vrot.slane %v5555_v15, 4 }
 0x193   : > { %20609 = vmatmul.mubr.bf16.gmra.mxu0 %v22009_v37  ;;  %20816 = vmatprep.subr.bf16.mxu1 %v25206_v55  ;;  %v20370_v9 = vpop.f32.mrf.mxu1  ;;  %v2406_v27 = vpop.f32.mrf.mxu0  ;;  %v17373_v37 = vld [vmem:[%s22490_s16 + $0x338] sm:$0x3]  ;;  %v17423_v33 = vcombine.low %v5542_v28, %v5545_v0  ;;  %v22016_v1 = vld [vmem:[%s22490_s16 + $0x30c] sm:$0xff]   ;;  %v5564_v0 = vrot.slane %v5562_v49, 4 }
 0x194   : > { %20657 = vmatmul.mubr.bf16.gmra.mxu1 %v17421_v36  ;;  %20612 = vmatprep.mubr.bf16.mxu0 %v22012_v19  ;;  %v25231_v42 = vadd.f32 %v20370_v9, %v2487_v3  ;;  %v2485_v29 = vadd.f32 %v2406_v27, %v24909_v17  ;;  %v5558_v17 = vrot.slane %v17373_v37, 6  ;;  %v17424_v3 = vcombine.low %v5549_v32, %v5552_v46  ;;  %v17437_v27 = vld [vmem:[%s22490_s16 + $0x308] sm:$0xf] }
 0x195   : > { %20660 = vmatprep.mubr.bf16.mxu1 %v17422_v7  ;;  %v2936_v36 = vpop.f32.mrf.mxu1  ;;  %v20323_v19 = vpop.f32.mrf.mxu0  ;;  %v17376_v7 = vld [vmem:[%s22490_s16 + $0x358] sm:$0x3]  ;;  %v17394_v9 = vrot.slane %v17374_v11, 10  ;;  %v5569_v46 = vrot.slane %v17378_v45, 6 }
 0x196   : > { %v25238_v35 = vadd.f32 %v2936_v36, %v2485_v29  ;;  %v2488_v18 = vadd.f32 %v20323_v19, %v24925_v16  ;;  %v5565_v62 = vrot.slane %v17376_v7, 6  ;;  %v5556_v16 = vsel %vm23942_vm8, %v17393_v56, %v5555_v15  ;;  %v17377_v36 = vld [vmem:[%s22490_s16 + $0x370] sm:$0xc] }
 0x197   : > { %v20371_v34 = vpop.f32.mrf.mxu1  ;;  %v2409_v31 = vpop.f32.mrf.mxu0  ;;  %v5994_v15 = vrot.slane %v17437_v27, 6  ;;  %v5571_v27 = vrot.slane %v5569_v46, 4 }
 0x198   : > { %v25243_v38 = vadd.f32 %v20371_v34, %v2488_v18  ;;  %v2486_v28 = vadd.f32 %v2409_v31, %v24942_v39  ;;  %v5559_v39 = vsel %vm23942_vm8, %v5557_v52, %v5558_v17  ;;  %v5566_v18 = vsel %vm23942_vm8, %v5564_v0, %v5565_v62  ;;  %v17436_v34 = vld [vmem:[%s22490_s16 + $0x304] sm:$0xc]  ;;  %v22017_v17 = vld [vmem:[%s22490_s16 + $0x32c] sm:$0xff]  }
 0x199   : > { %v2939_v51 = vpop.f32.mrf.mxu1  ;;  %v20326_v29 = vpop.f32.mrf.mxu0  ;;  %v17425_v31 = vcombine.low %v5556_v16, %v5559_v39  ;;  %v17484_v62 = vrot.slane %v17436_v34, 10 }
 0x19a   : > { %v25249_v37 = vadd.f32 %v2939_v51, %v2486_v28  ;;  %v2491_v32 = vadd.f32 %v20326_v29, %v24953_v61  ;;  %v22020_v51 = vld [vmem:[%s22490_s16 + $0x34c] sm:$0xff]   ;;  %v5996_v29 = vrot.slane %v5994_v15, 4 }
 0x19b   : > { %20613 = vmatmul.mubr.bf16.gmra.mxu0 %v22013_v57  ;;  %v20374_v11 = vpop.f32.mrf.mxu1  ;;  %v2422_v19 = vpop.f32.mrf.mxu0  ;;  %v17379_v57 = vld [vmem:[%s22490_s16 + $0x378] sm:$0x3] }
 0x19c   : > { %20661 = vmatmul.mubr.bf16.gmra.mxu1 %v17423_v33  ;;  %20616 = vmatprep.mubr.bf16.mxu0 %v22016_v1  ;;  %v25256_v56 = vadd.f32 %v20374_v11, %v2491_v32  ;;  %v2489_v61 = vadd.f32 %v2422_v19, %v24957_v25  ;;  %v5563_v33 = vsel %vm23942_vm8, %v17394_v9, %v5562_v49  ;;  %v17438_v1 = vld [vmem:[%s22490_s16 + $0x30c] sm:$0x3]  ;;  %v5572_v49 = vrot.slane %v17379_v57, 6  ;;  %v17440_v11 = vld [vmem:[%s22490_s16 + $0x328] sm:$0xf] }
 0x19d   : > { %20664 = vmatprep.mubr.bf16.mxu1 %v17424_v3  ;;  %v2952_v7 = vpop.f32.mrf.mxu1  ;;  %v20327_v52 = vpop.f32.mrf.mxu0  ;;  %v17395_v3 = vrot.slane %v17377_v36, 10  ;;  %v17426_v0 = vcombine.low %v5563_v33, %v5566_v18  ;;  %v5997_v32 = vrot.slane %v17438_v1, 6  ;;  %v17439_v36 = vld [vmem:[%s22490_s16 + $0x324] sm:$0xc]  ;;  %v17441_v57 = vld [vmem:[%s22490_s16 + $0x32c] sm:$0x3] }
 0x19e   : > { %v25266_v45 = vadd.f32 %v2952_v7, %v2489_v61  ;;  %v2492_v28 = vadd.f32 %v20327_v52, %v24961_v44  ;;  %v17443_v7 = vld [vmem:[%s22490_s16 + $0x348] sm:$0xf]  ;;  %v6001_v1 = vrot.slane %v17440_v11, 6 }
 0x19f   : > { %v20375_v25 = vpop.f32.mrf.mxu1  ;;  %v2425_v9 = vpop.f32.mrf.mxu0  ;;  %v5570_v61 = vsel %vm23942_vm8, %v17395_v3, %v5569_v46  ;;  %v5995_v46 = vsel %vm23942_vm8, %v17484_v62, %v5994_v15  ;;  %v5998_v3 = vsel %vm23942_vm8, %v5996_v29, %v5997_v32 }
 0x1a0   : > { %v25271_v19 = vadd.f32 %v20375_v25, %v2492_v28  ;;  %v2490_v16 = vadd.f32 %v2425_v9, %v24972_v10  ;;  %v5573_v10 = vsel %vm23942_vm8, %v5571_v27, %v5572_v49  ;;  %v17485_v28 = vrot.slane %v17439_v36, 10  ;;  %v17446_v9 = vld [vmem:[%s22490_s16 + $0x368] sm:$0xf] }
 0x1a1   : > { %v2955_v39 = vpop.f32.mrf.mxu1  ;;  %v20330_v44 = vpop.f32.mrf.mxu0  ;;  %v6004_v27 = vrot.slane %v17441_v57, 6  ;;  %v6008_v49 = vrot.slane %v17443_v7, 6  ;;  %v17516_v32 = vcombine.low %v5995_v46, %v5998_v3 }
 0x1a2   : > { %v25279_v33 = vadd.f32 %v2955_v39, %v2490_v16  ;;  %v2495_v18 = vadd.f32 %v20330_v44, %v24982_v54  ;;  %v17442_v54 = vld [vmem:[%s22490_s16 + $0x344] sm:$0xc]  ;;  %v17444_v16 = vld [vmem:[%s22490_s16 + $0x34c] sm:$0x3]  ;;  %v6003_v39 = vrot.slane %v6001_v1, 4 }
 0x1a3   : > { %20617 = vmatmul.mubr.bf16.gmra.mxu0 %v22017_v17  ;;  %v20378_v34 = vpop.f32.mrf.mxu1  ;;  %v2438_v52 = vpop.f32.mrf.mxu0  ;;  %v22021_v17 = vld [vmem:[%s22490_s16 + $0x36c] sm:$0xff]   ;;  %v17486_v44 = vrot.slane %v17442_v54, 10 }
 0x1a4   : > { %20665 = vmatmul.mubr.bf16.gmra.mxu1 %v17425_v31  ;;  %20620 = vmatprep.mubr.bf16.mxu0 %v22020_v51  ;;  %v25290_v25 = vadd.f32 %v20378_v34, %v2495_v18  ;;  %v2493_v31 = vadd.f32 %v2438_v52, %v24987_v21  ;;  %v17445_v18 = vld [vmem:[%s22490_s16 + $0x364] sm:$0xc]  ;;  %v6015_v21 = vrot.slane %v17446_v9, 6  ;;  %v17447_v52 = vld [vmem:[%s22490_s16 + $0x36c] sm:$0x3]  ;;  %v31089_v9 = vld [vmem:[#allocation4_spill] sm:$0xff] }
 0x1a5   : > { %20668 = vmatprep.mubr.bf16.mxu1 %v17426_v0  ;;  %v2968_v51 = vpop.f32.mrf.mxu1  ;;  %v20331_v11 = vpop.f32.mrf.mxu0  ;;  %v17427_v0 = vcombine.low %v5570_v61, %v5573_v10  ;;  %v6010_v61 = vrot.slane %v6008_v49, 4  ;;  %v6011_v10 = vrot.slane %v17444_v16, 6 }
 0x1a6   : > { %v25295_v15 = vadd.f32 %v2968_v51, %v2493_v31  ;;  %v2496_v62 = vadd.f32 %v20331_v11, %v24992_v13  ;;  %v6002_v13 = vsel %vm23942_vm8, %v17485_v28, %v6001_v1  ;;  %v6017_v11 = vrot.slane %v6015_v21, 4 }
 0x1a7   : > { %v20379_v29 = vpop.f32.mrf.mxu1  ;;  %v2441_v36 = vpop.f32.mrf.mxu0  ;;  %v6018_v1 = vrot.slane %v17447_v52, 6  ;;  %v6022_v28 = vrot.slane %v17449_v53, 6 }
 0x1a8   : > { %v25299_v34 = vadd.f32 %v20379_v29, %v2496_v62  ;;  %v2494_v57 = vadd.f32 %v2441_v36, %v24999_v26  ;;  %v6005_v26 = vsel %vm23942_vm8, %v6003_v39, %v6004_v27  ;;  %v6012_v27 = vsel %vm23942_vm8, %v6010_v61, %v6011_v10  ;;  %v17448_v29 = vld [vmem:[%s22490_s16 + $0x384] sm:$0xc] }
 0x1a9   : > { %v2971_v7 = vpop.f32.mrf.mxu1  ;;  %v20334_v31 = vpop.f32.mrf.mxu0  ;;  %v17517_v36 = vcombine.low %v6002_v13, %v6005_v26  ;;  %v22026_v26 = vld [vmem:[%s30893_s1 + $0x3b0] sm:$0xff]  }
 0x1aa   : > { %v25306_v46 = vadd.f32 %v2971_v7, %v2494_v57  ;;  %v2499_v3 = vadd.f32 %v20334_v31, %v25008_v20  ;;  %v6024_v31 = vrot.slane %v6022_v28, 4 }
 0x1ab   : > { %20621 = vmatmul.mubr.bf16.gmra.mxu0 %v22021_v17  ;;  %v20382_v54 = vpop.f32.mrf.mxu1  ;;  %v2454_v51 = vpop.f32.mrf.mxu0  ;;  %v17487_v17 = vrot.slane %v17445_v18, 10  ;;  %v25322_v18 = vld [vmem:[%s22490_s16 + $0x3a8] sm:$0xf] }
 0x1ac   : > { %20669 = vmatmul.mubr.bf16.gmra.mxu1 %v17427_v0  ;;  %20688 = vmatprep.mubr.bf16.mxu0 %v17516_v32  ;;  %v25312_v16 = vadd.f32 %v20382_v54, %v2499_v3  ;;  %v2497_v20 = vadd.f32 %v2454_v51, %v25015_v24  ;;  %v6009_v0 = vsel %vm23942_vm8, %v17486_v44, %v6008_v49  ;;  %v17450_v32 = vld [vmem:[%s22490_s16 + $0x38c] sm:$0x3]  ;;  %v25328_v24 = vld [vmem:[%s22490_s16 + $0x3c8] sm:$0xf]  ;;  %v17488_v44 = vrot.slane %v17448_v29, 10  ;;  %v22027_v51 = vld [vmem:[%s30893_s1 + $0x3f0] sm:$0xff]  }
 0x1ad   : > { %20736 = vmatprep.mubr.bf16.mxu1 %v31089_v9  ;;  %v2984_v62 = vpop.f32.mrf.mxu1  ;;  %v20335_v39 = vpop.f32.mrf.mxu0  ;;  %v17518_v49 = vcombine.low %v6009_v0, %v6012_v27  ;;  %v6025_v61 = vrot.slane %v17450_v32, 6  ;;  %v6016_v54 = vsel %vm23942_vm8, %v17487_v17, %v6015_v21  ;;  %v6029_v0 = vrot.slane %v25322_v18, 6  ;;  %v31090_v27 = vld [vmem:[#allocation5_spill] sm:$0xff]  ;;  %v17454_v29 = vld [vmem:[%s22490_s16 + $0x3c4] sm:$0xc] }
 0x1ae   : > { %v25324_v57 = vadd.f32 %v2984_v62, %v2497_v20  ;;  %v2500_v53 = vadd.f32 %v20335_v39, %v25028_v5  ;;  %v6019_v5 = vsel %vm23942_vm8, %v6017_v11, %v6018_v1  ;;  %v17453_v62 = vld [vmem:[%s22490_s16 + $0x3ac] sm:$0x3]  ;;  %v6036_v21 = vrot.slane %v25328_v24, 6 }
 0x1af   : > { %v20383_v7 = vpop.f32.mrf.mxu1  ;;  %v2457_v52 = vpop.f32.mrf.mxu0  ;;  %v17456_v32 = vld [vmem:[%s22490_s16 + $0x3cc] sm:$0x3]  ;;  %v6023_v18 = vsel %vm23942_vm8, %v17488_v44, %v6022_v28  ;;  %v25370_v44 = vld [vmem:[%s22490_s16 + $0x3e8] sm:$0xf] }
 0x1b0   : > { %v25330_v10 = vadd.f32 %v20383_v7, %v2500_v53  ;;  %v2498_v13 = vadd.f32 %v2457_v52, %v25039_v41  ;;  %v17451_v41 = vld [vmem:[%s22490_s16 + $0x3a4] sm:$0xc]  ;;  %v6026_v53 = vsel %vm23942_vm8, %v6024_v31, %v6025_v61  ;;  %v22029_v28 = vld [vmem:[%s30893_s1 + $0x3e8] sm:$0xff]   ;;  %v6031_v61 = vrot.slane %v6029_v0, 4 }
 0x1b1   : > { %v2987_v3 = vpop.f32.mrf.mxu1  ;;  %v20402_v20 = vpop.f32.mrf.mxu0  ;;  %v31091_v52 = vld [vmem:[#allocation6_spill] sm:$0xff]  ;;  %v31096_v9 = vrot.slane %v25370_v44, 6 }
 0x1b2   : > { %v25347_v17 = vadd.f32 %v2987_v3, %v2498_v13  ;;  %v3532_v11 = vadd.f32 %v20402_v20, %v25055_v22  ;;  %v22028_v22 = vld [vmem:[%s30893_s1 + $0x3a8] sm:$0xff]   ;;  %v17490_v13 = vrot.slane %v17454_v29, 10  ;;  %v6038_v3 = vrot.slane %v6036_v21, 4 }
 0x1b3   : > { %20689 = vmatmul.mubr.bf16.vlgmr.msra.gmra.mxu0 %v17517_v36  ;;  %v20450_v1 = vpop.f32.mrf.mxu1  ;;  %v3403_v39 = vpop.f32.mrf.mxu0  ;;  %v17519_v36 = vcombine.low %v6016_v54, %v6019_v5 }
 0x1b4   : > { %20737 = vmatmul.mubr.bf16.vlgmr.msra.gmra.mxu1 %v31090_v27  ;;  %20769 = vmatpush3.bf16.msra.mxu0 %v25199_v14  ;;  %v25362_v7 = vadd.f32 %v20450_v1, %v3532_v11  ;;  %v3530_v14 = vadd.f32 %v3403_v39, %v25067_v47  ;;  %v6039_v47 = vrot.slane %v17456_v32, 6  ;;  %v30939_v11 = vrot.slane %v25370_v44, 6  ;;  %v25377_v1 = vld [vmem:[%s22490_s16 + $0x408] sm:$0xf] }
 0x1b5   : > { %20817 = vmatpush3.bf16.msra.mxu1 %v25206_v55  ;;  %20692 = vmatprep.mubr.bf16.mxu0 %v17518_v49  ;;  %v3757_v24 = vpop.f32.mrf.mxu1  ;;  %v17489_v55 = vrot.slane %v17451_v41, 10  ;;  %v6032_v49 = vrot.slane %v17453_v62, 6  ;;  %v20403_v31 = vpop.f32.mrf.mxu0  ;;  %v17520_v41 = vcombine.low %v6023_v18, %v6026_v53  ;;  %v25394_v53 = vsel %vm23942_vm8, %v17490_v13, %v6036_v21 }
 0x1b6   : > { %20740 = vmatprep.mubr.bf16.mxu1 %v31091_v52  ;;  %20770 = vmatprep.subr.bf16.mxu0 %v22026_v26  ;;  %v25372_v54 = vadd.f32 %v3757_v24, %v3530_v14  ;;  %v3533_v5 = vadd.f32 %v20403_v31, %v25073_v6  ;;  %v25383_v14 = vld [vmem:[%s22490_s16 + $0x3e4] sm:$0xc]  ;;  %v6050_v21 = vrot.slane %v25377_v1, 6  ;;  %v25432_v52 = vld [vmem:[%s22490_s16 + $0x42c] sm:$0x3] }
 0x1b7   : > { %20818 = vmatprep.subr.bf16.mxu1 %v22027_v51  ;;  %v20451_v20 = vpop.f32.mrf.mxu1  ;;  %v3406_v62 = vpop.f32.mrf.mxu0  ;;  %v22030_v6 = vld [vmem:[%s30893_s1 + $0x3a0] sm:$0xff]   ;;  %v6033_v18 = vsel %vm23942_vm8, %v6031_v61, %v6032_v49  ;;  %v31093_v61 = vld [vmem:[#allocation8_spill] sm:$0xff]  ;;  %v17491_v13 = vrot.slane %v25383_v14, 10 }
 0x1b8   : > { %20771 = vmatpush3.bf16.msra.mxu0 %v22026_v26  ;;  %v25379_v29 = vadd.f32 %v20451_v20, %v3533_v5  ;;  %v3531_v32 = vadd.f32 %v3406_v62, %v25088_v60  ;;  %v17459_v60 = vld [vmem:[%s22490_s16 + $0x3ec] sm:$0x3]  ;;  %v22031_v24 = vld [vmem:[%s30893_s1 + $0x3e0] sm:$0xff]  }
 0x1b9   : > { %20819 = vmatpush3.bf16.msra.mxu1 %v22027_v51  ;;  %20772 = vmatprep.subr.bf16.mxu0 %v22028_v22  ;;  %v3760_v39 = vpop.f32.mrf.mxu1  ;;  %v20406_v26 = vpop.f32.mrf.mxu0  ;;  %v6030_v51 = vsel %vm23942_vm8, %v17489_v55, %v6029_v0  ;;  %v17460_v31 = vld [vmem:[%s22490_s16 + $0x404] sm:$0xc]  ;;  %v31092_v0 = vld [vmem:[#allocation7_spill] sm:$0xff]  ;;  %v6040_v55 = vsel %vm23942_vm8, %v6038_v3, %v6039_v47  ;;  %v25419_v3 = vld [vmem:[%s30893_s1 + $0x3d8] sm:$0xff]  }
 0x1ba   : > { %20820 = vmatprep.subr.bf16.mxu1 %v22029_v28  ;;  %v25401_v5 = vadd.f32 %v3760_v39, %v3531_v32  ;;  %v17462_v62 = vld [vmem:[%s22490_s16 + $0x40c] sm:$0x3]  ;;  %v6046_v32 = vrot.slane %v17459_v60, 6  ;;  %v17492_v39 = vrot.slane %v17460_v31, 10  ;;  %v25425_v14 = vld [vmem:[%s22490_s16 + $0x424] sm:$0xc] }
 0x1bb   : > { %20693 = vmatmul.mubr.bf16.gmra.mxu0 %v17519_v36  ;;  %v3536_v36 = vadd.f32 %v20406_v26, %v25097_v58  ;;  %v20454_v20 = vpop.f32.mrf.mxu1  ;;  %v3419_v49 = vpop.f32.mrf.mxu0  ;;  %v6045_v58 = vrot.slane %v30939_v11, 4  ;;  %v25428_v26 = vld [vmem:[%s22490_s16 + $0x428] sm:$0xf] }
 0x1bc   : > { %20741 = vmatmul.mubr.bf16.gmra.mxu1 %v31092_v0  ;;  %20696 = vmatprep.mubr.bf16.mxu0 %v17520_v41  ;;  %v22032_v41 = vld [vmem:[%s30893_s1 + $0x398] sm:$0xff]   ;;  %v17522_v0 = vcombine.low %v25394_v53, %v6040_v55  ;;  %v22034_v53 = vld [vmem:[%s30893_s1 + $0x390] sm:$0xff]  }
 0x1bd   : > { %20744 = vmatprep.mubr.bf16.mxu1 %v31093_v61  ;;  %20773 = vmatpush3.bf16.msra.mxu0 %v22028_v22  ;;  %v25421_v47 = vadd.f32 %v20454_v20, %v3536_v36  ;;  %v3534_v22 = vadd.f32 %v3419_v49, %v25112_v43  ;;  %v3773_v1 = vpop.f32.mrf.mxu1  ;;  %v20407_v11 = vpop.f32.mrf.mxu0  ;;  %v17521_v61 = vcombine.low %v6030_v51, %v6033_v18  ;;  %v25435_v36 = vld [vmem:[%s22490_s16 + $0x448] sm:$0xf]  ;;  %v6052_v20 = vrot.slane %v6050_v21, 4  ;;  %v25445_v18 = vld [vmem:[%s22490_s16 + $0x444] sm:$0xc] }
 0x1be   : > { %20821 = vmatpush3.bf16.msra.mxu1 %v22029_v28  ;;  %20774 = vmatprep.subr.bf16.mxu0 %v22030_v6  ;;  %v25438_v43 = vld [vmem:[%s22490_s16 + $0x468] sm:$0xf]  ;;  %v3537_v60 = vadd.f32 %v20407_v11, %v25122_v30  ;;  %v6053_v49 = vrot.slane %v17462_v62, 6  ;;  %v6057_v51 = vrot.slane %v25428_v26, 6  ;;  %v25454_v30 = vld [vmem:[%s22490_s16 + $0x44c] sm:$0x3] }
 0x1bf   : > { %20822 = vmatprep.subr.bf16.mxu1 %v22031_v24  ;;  %v25440_v28 = vadd.f32 %v3773_v1, %v3534_v22  ;;  %v20455_v31 = vpop.f32.mrf.mxu1  ;;  %v3422_v27 = vpop.f32.mrf.mxu0  ;;  %v6064_v11 = vrot.slane %v25435_v36, 6  ;;  %v6071_v62 = vrot.slane %v25438_v43, 6  ;;  %v31099_v43 = vld [vmem:[#allocation10_spill] sm:$0xff] }
 0x1c0   : > { %v25450_v55 = vadd.f32 %v20455_v31, %v3537_v60  ;;  %v3535_v22 = vadd.f32 %v3422_v27, %v25133_v50  ;;  %v6044_v60 = vsel %vm23942_vm8, %v17491_v13, %v31096_v9  ;;  %v6047_v50 = vsel %vm23942_vm8, %v6045_v58, %v6046_v32  ;;  %v31098_v13 = vld [vmem:[#allocation9_spill] sm:$0xff]  ;;  %v17471_v32 = vld [vmem:[%s22490_s16 + $0x46c] sm:$0x3] }
 0x1c1   : > { %31094 = vst [vmem:[#allocation20_spill] sm:$0xff] %v25440_v28  ;;  %20775 = vmatpush3.bf16.msra.mxu0 %v22030_v6  ;;  %v3776_v1 = vpop.f32.mrf.mxu1  ;;  %v17469_v6 = vld [vmem:[%s22490_s16 + $0x464] sm:$0xc]  ;;  %v20410_v26 = vpop.f32.mrf.mxu0  ;;  %v25467_v27 = vsel %vm23942_vm8, %v17492_v39, %v6050_v21  ;;  %v25480_v21 = vsel %vm23942_vm8, %v6052_v20, %v6053_v49  ;;  %v6060_v58 = vrot.slane %v25432_v52, 6  ;;  %v25485_v39 = vld [vmem:[%s22490_s16 + $0x488] sm:$0xf] }
 0x1c2   : > { %31095 = vst [vmem:[#allocation21_spill] sm:$0xff] %v25450_v55  ;;  %20823 = vmatpush3.bf16.msra.mxu1 %v22031_v24  ;;  %20776 = vmatprep.subr.bf16.mxu0 %v22032_v41  ;;  %v17493_v24 = vrot.slane %v25425_v14, 10  ;;  %v25474_v36 = vadd.f32 %v3776_v1, %v3535_v22  ;;  %v3540_v44 = vadd.f32 %v20410_v26, %v25144_v2  ;;  %v6059_v31 = vrot.slane %v6057_v51, 4  ;;  %v22036_v52 = vld [vmem:[%s30893_s1 + $0x388] sm:$0xff]  }
 0x1c3   : > { %20697 = vmatmul.mubr.bf16.gmra.mxu0 %v17521_v61  ;;  %20824 = vmatprep.subr.bf16.mxu1 %v25419_v3  ;;  %v22035_v61 = vld [vmem:[%s30893_s1 + $0x3d0] sm:$0xff]   ;;  %v20458_v9 = vpop.f32.mrf.mxu1  ;;  %v3435_v14 = vpop.f32.mrf.mxu0  ;;  %v17494_v2 = vrot.slane %v25445_v18, 10  ;;  %v17495_v22 = vrot.slane %v17469_v6, 10  ;;  %v25496_v20 = vld [vmem:[%s30893_s1 + $0x3c8] sm:$0xff]   ;;  %v6066_v18 = vrot.slane %v6064_v11, 4 }
 0x1c4   : > { %31097 = vst [vmem:[#allocation22_spill] sm:$0xff] %v25474_v36  ;;  %20745 = vmatmul.mubr.bf16.gmra.mxu1 %v31098_v13  ;;  %20700 = vmatprep.mubr.bf16.mxu0 %v17522_v0  ;;  %v6067_v0 = vrot.slane %v25454_v30, 6  ;;  %v25498_v49 = vadd.f32 %v20458_v9, %v3540_v44  ;;  %v6073_v30 = vrot.slane %v6071_v62, 4  ;;  %v25503_v6 = vld [vmem:[%s22490_s16 + $0x484] sm:$0xc]  ;;  %v17523_v13 = vcombine.low %v6044_v60, %v6047_v50 }
 0x1c5   : > { %20748 = vmatprep.mubr.bf16.mxu1 %v31099_v43  ;;  %20777 = vmatpush3.bf16.msra.mxu0 %v22032_v41  ;;  %v3538_v41 = vadd.f32 %v3435_v14, %v25159_v40  ;;  %v3789_v1 = vpop.f32.mrf.mxu1  ;;  %v25506_v26 = vld [vmem:[%s22490_s16 + $0x4a8] sm:$0xf]  ;;  %v20411_v43 = vpop.f32.mrf.mxu0  ;;  %v6074_v36 = vrot.slane %v17471_v32, 6  ;;  %v25509_v55 = vld [vmem:[%s22490_s16 + $0x48c] sm:$0x3]  ;;  %v30940_v44 = vrot.slane %v25485_v39, 6  ;;  %v25525_v50 = vsel %vm23942_vm8, %v17493_v24, %v6057_v51 }
 0x1c6   : > { %31100 = vst [vmem:[#allocation23_spill] sm:$0xff] %v25498_v49  ;;  %20825 = vmatpush3.bf16.msra.mxu1 %v25419_v3  ;;  %20778 = vmatprep.subr.bf16.mxu0 %v22034_v53  ;;  %v25513_v40 = vld [vmem:[%s22490_s16 + $0x4a4] sm:$0xc]  ;;  %v3541_v3 = vadd.f32 %v20411_v43, %v25165_v23  ;;  %v17524_v49 = vcombine.low %v25467_v27, %v25480_v21  ;;  %v25521_v28 = vld [vmem:[%s22490_s16 + $0x4ac] sm:$0x3]  ;;  %v6085_v23 = vrot.slane %v25506_v26, 6 }
 0x1c7   : > { %20826 = vmatprep.subr.bf16.mxu1 %v22035_v61  ;;  %v25515_v9 = vadd.f32 %v3789_v1, %v3538_v41  ;;  %v20459_v14 = vpop.f32.mrf.mxu1  ;;  %v3438_v60 = vpop.f32.mrf.mxu0  ;;  %v25529_v32 = vsel %vm23942_vm8, %v6059_v31, %v6060_v58  ;;  %v25533_v41 = vsel %vm23942_vm8, %v17494_v2, %v6064_v11  ;;  %v25541_v51 = vsel %vm23942_vm8, %v17495_v22, %v6071_v62  ;;  %v25545_v11 = vld [vmem:[%s22490_s16 + $0x4c4] sm:$0xc]  ;;  %v25566_v22 = vld [vmem:[%s22490_s16 + $0x4c8] sm:$0xf] }
 0x1c8   : > { %v25536_v43 = vadd.f32 %v20459_v14, %v3541_v3  ;;  %v3539_v27 = vadd.f32 %v3438_v60, %v25180_v4  ;;  %v17496_v24 = vrot.slane %v25503_v6, 10  ;;  %v22039_v4 = vld [vmem:[%s30893_s1 + $0x3c0] sm:$0xff]   ;;  %v25555_v62 = vsel %vm23942_vm8, %v6066_v18, %v6067_v0  ;;  %v25580_v6 = vld [vmem:[%s30893_s1 + $0x438] sm:$0xff]   ;;  %v31103_v3 = vld [vmem:[#allocation12_spill] sm:$0xff] }
 0x1c9   : > { %20779 = vmatpush3.bf16.msra.mxu0 %v22034_v53  ;;  %v3792_v21 = vpop.f32.mrf.mxu1  ;;  %v22038_v53 = vld [vmem:[%s30893_s1 + $0x380] sm:$0xff]   ;;  %v20414_v58 = vpop.f32.mrf.mxu0  ;;  %v6080_v31 = vrot.slane %v30940_v44, 4  ;;  %v6081_v2 = vrot.slane %v25509_v55, 6  ;;  %v6088_v55 = vrot.slane %v25521_v28, 6  ;;  %v6087_v14 = vrot.slane %v6085_v23, 4  ;;  %v25593_v28 = vld [vmem:[%s30893_s1 + $0x478] sm:$0xff]  }
 0x1ca   : > { %20827 = vmatpush3.bf16.msra.mxu1 %v22035_v61  ;;  %20780 = vmatprep.subr.bf16.mxu0 %v22036_v52  ;;  %v25559_v61 = vsel %vm23942_vm8, %v6073_v30, %v6074_v36  ;;  %v25571_v1 = vadd.f32 %v3792_v21, %v3539_v27  ;;  %v3544_v0 = vadd.f32 %v20414_v58, %v25189_v48  ;;  %v31102_v36 = vld [vmem:[#allocation11_spill] sm:$0xff]  ;;  %v17497_v30 = vrot.slane %v25513_v40, 10  ;;  %v25588_v60 = vld [vmem:[%s22490_s16 + $0x4e4] sm:$0xc]  ;;  %v25605_v44 = vld [vmem:[%s22490_s16 + $0x314] sm:$0xf] }
 0x1cb   : > { %20701 = vmatmul.mubr.bf16.gmra.mxu0 %v17523_v13  ;;  %20828 = vmatprep.subr.bf16.mxu1 %v25496_v20  ;;  %v25569_v13 = vld [vmem:[%s22490_s16 + $0x4e8] sm:$0xf]  ;;  %v20462_v18 = vpop.f32.mrf.mxu1  ;;  %v3451_v26 = vpop.f32.mrf.mxu0  ;;  %v25584_v48 = vld [vmem:[%s22490_s16 + $0x4cc] sm:$0x3] }
 0x1cc   : > { %31101 = vst [vmem:[#allocation24_spill] sm:$0xff] %v25571_v1  ;;  %20749 = vmatmul.mubr.bf16.gmra.mxu1 %v31102_v36  ;;  %20704 = vmatprep.mubr.bf16.mxu0 %v17524_v49  ;;  %v25595_v40 = vadd.f32 %v20462_v18, %v3544_v0  ;;  %v3542_v27 = vadd.f32 %v3451_v26, %v25208_v63  ;;  %v25601_v58 = vld [vmem:[%s22490_s16 + $0x4ec] sm:$0x3]  ;;  %v25614_v18 = vld [vmem:[%s22490_s16 + $0x310] sm:$0xc] }
 0x1cd   : > { %20752 = vmatprep.mubr.bf16.mxu1 %v31103_v3  ;;  %20781 = vmatpush3.bf16.msra.mxu0 %v22036_v52  ;;  %v3805_v21 = vpop.f32.mrf.mxu1  ;;  %v20415_v3 = vpop.f32.mrf.mxu0  ;;  %v17525_v0 = vcombine.low %v25525_v50, %v25529_v32  ;;  %v17526_v63 = vcombine.low %v25533_v41, %v25555_v62  ;;  %v25617_v26 = vld [vmem:[%s22490_s16 + $0x318] sm:$0x3]  ;;  %v25620_v49 = vld [vmem:[%s22490_s16 + $0x488] sm:$0xf]  ;;  %v31106_v50 = vrot.slane %v25485_v39, 6  ;;  %v25633_v41 = vsel %vm23942_vm8, %v6080_v31, %v6081_v2 }
 0x1ce   : > { %31104 = vst [vmem:[#allocation25_spill] sm:$0xff] %v25595_v40  ;;  %20829 = vmatpush3.bf16.msra.mxu1 %v25496_v20  ;;  %20782 = vmatprep.subr.bf16.mxu0 %v22038_v53  ;;  %v25622_v52 = vadd.f32 %v3805_v21, %v3542_v27  ;;  %v3545_v36 = vadd.f32 %v20415_v3, %v25213_v59  ;;  %v25636_v62 = vld [vmem:[%s22490_s16 + $0x484] sm:$0xc]  ;;  %v6095_v39 = vrot.slane %v25584_v48, 6  ;;  %v17499_v21 = vrot.slane %v25588_v60, 10 }
 0x1cf   : > { %20830 = vmatprep.subr.bf16.mxu1 %v22039_v4  ;;  %v20463_v40 = vpop.f32.mrf.mxu1  ;;  %v25629_v32 = vsel %vm23942_vm8, %v17496_v24, %v31106_v50  ;;  %v3454_v20 = vpop.f32.mrf.mxu0  ;;  %v25640_v27 = vsel %vm23942_vm8, %v17497_v30, %v6085_v23  ;;  %v25644_v59 = vsel %vm23942_vm8, %v6087_v14, %v6088_v55  ;;  %v7313_v23 = vrot.slane %v25620_v49, 6  ;;  %v25654_v30 = vld [vmem:[%s22490_s16 + $0x334] sm:$0xf]  ;;  %v17670_v60 = vld [vmem:[%s22490_s16 + $0x48c] sm:$0x3]  ;;  %v31112_v24 = vld [vmem:[#allocation14_spill] sm:$0xff] }
 0x1d0   : > { %31105 = vst [vmem:[#allocation26_spill] sm:$0xff] %v25622_v52  ;;  %v25648_v3 = vadd.f32 %v20463_v40, %v3545_v36  ;;  %v3543_v31 = vadd.f32 %v3454_v20, %v25221_v12  ;;  %v31109_v14 = vrot.slane %v25569_v13, 6  ;;  %v6102_v48 = vrot.slane %v25601_v58, 6  ;;  %v31111_v20 = vld [vmem:[#allocation13_spill] sm:$0xff]  ;;  %v25672_v58 = vld [vmem:[%s22490_s16 + $0x330] sm:$0xc] }
 0x1d1   : > { %20783 = vmatpush3.bf16.msra.mxu0 %v22038_v53  ;;  %v3808_v2 = vpop.f32.mrf.mxu1  ;;  %v20418_v55 = vpop.f32.mrf.mxu0  ;;  %v31108_v53 = vrot.slane %v25566_v22, 6  ;;  %v6785_v50 = vrot.slane %v25617_v26, 6  ;;  %v31116_v52 = vrot.slane %v25545_v11, 10 }
 0x1d2   : > { %31107 = vst [vmem:[#allocation27_spill] sm:$0xff] %v25648_v3  ;;  %20831 = vmatpush3.bf16.msra.mxu1 %v22039_v4  ;;  %20864 = vmatprep.subr.bf16.mxu0 %v25580_v6  ;;  %v6101_v12 = vrot.slane %v31109_v14, 4  ;;  %v17612_v4 = vrot.slane %v25614_v18, 10  ;;  %v25665_v49 = vadd.f32 %v3808_v2, %v3543_v31  ;;  %v3548_v40 = vadd.f32 %v20418_v55, %v25231_v42  ;;  %v25675_v18 = vld [vmem:[%s22490_s16 + $0x338] sm:$0x3] }
 0x1d3   : > { %20705 = vmatmul.mubr.bf16.gmra.mxu0 %v17525_v0  ;;  %v6094_v36 = vrot.slane %v31108_v53, 4  ;;  %20912 = vmatprep.subr.bf16.mxu1 %v25593_v28  ;;  %v20466_v0 = vpop.f32.mrf.mxu1  ;;  %v17716_v53 = vrot.slane %v25636_v62, 10  ;;  %v3467_v14 = vpop.f32.mrf.mxu0  ;;  %v17528_v31 = vcombine.low %v25629_v32, %v25633_v41  ;;  %v25686_v2 = vld [vmem:[%s22490_s16 + $0x4a4] sm:$0xc]  ;;  %v25689_v55 = vld [vmem:[%s22490_s16 + $0x4a8] sm:$0xf] }
 0x1d4   : > { %31110 = vst [vmem:[#allocation28_spill] sm:$0xff] %v25665_v49  ;;  %20753 = vmatmul.mubr.bf16.gmra.mxu1 %v31111_v20  ;;  %20708 = vmatprep.mubr.bf16.mxu0 %v17526_v63  ;;  %v31113_v63 = vrot.slane %v25605_v44, 6  ;;  %v25691_v20 = vadd.f32 %v20466_v0, %v3548_v40  ;;  %v7315_v32 = vrot.slane %v7313_v23, 4  ;;  %v7316_v41 = vrot.slane %v17670_v60, 6  ;;  %v25695_v42 = vld [vmem:[%s22490_s16 + $0x354] sm:$0xf] }
 0x1d5   : > { %20756 = vmatprep.mubr.bf16.mxu1 %v31112_v24  ;;  %v3546_v24 = vadd.f32 %v3467_v14, %v25238_v35  ;;  %v3821_v49 = vpop.f32.mrf.mxu1  ;;  %v20419_v3 = vpop.f32.mrf.mxu0  ;;  %v25707_v40 = vsel %vm23942_vm8, %v6094_v36, %v6095_v39  ;;  %v17613_v35 = vrot.slane %v25672_v58, 10  ;;  %v25712_v0 = vld [vmem:[%s22490_s16 + $0x4ac] sm:$0x3]  ;;  %v25715_v14 = vld [vmem:[%s22490_s16 + $0x350] sm:$0xc]  ;;  %v31118_v58 = vrot.slane %v25569_v13, 6 }
 0x1d6   : > { %v6784_v26 = vrot.slane %v31113_v63, 4  ;;  %31114 = vst [vmem:[#allocation29_spill] sm:$0xff] %v25691_v20  ;;  %v31115_v63 = vrot.slane %v25566_v22, 6  ;;  %v3549_v11 = vadd.f32 %v20419_v3, %v25243_v38  ;;  %v7320_v20 = vrot.slane %v25689_v55, 6  ;;  %v25723_v39 = vld [vmem:[%s22490_s16 + $0x4c8] sm:$0xf] }
 0x1d7   : > { %v25717_v22 = vadd.f32 %v3821_v49, %v3546_v24  ;;  %v3470_v36 = vpop.f32.mrf.mxu0  ;;  %v25729_v60 = vsel %vm23942_vm8, %v17499_v21, %v31118_v58  ;;  %v25733_v24 = vsel %vm23942_vm8, %v6101_v12, %v6102_v48  ;;  %v31119_v38 = vrot.slane %v25654_v30, 6  ;;  %v17572_v49 = vld [vmem:[%s22490_s16 + $0x358] sm:$0x3]  ;;  %v17674_v48 = vld [vmem:[%s22490_s16 + $0x4c4] sm:$0xc] }
 0x1d8   : > { %v25703_v62 = vsel %vm23942_vm8, %v31116_v52, %v31115_v63  ;;  %v20467_v52 = vpop.f32.mrf.mxu1  ;;  %v17717_v63 = vrot.slane %v25686_v2, 10  ;;  %v6796_v2 = vrot.slane %v25695_v42, 6  ;;  %v31120_v13 = vrot.slane %v25605_v44, 6 }
 0x1d9   : > { %31117 = vst [vmem:[#allocation30_spill] sm:$0xff] %v25717_v22  ;;  %v6791_v3 = vrot.slane %v31119_v38, 4  ;;  %v25739_v55 = vadd.f32 %v20467_v52, %v3549_v11  ;;  %v3547_v22 = vadd.f32 %v3470_v36, %v25249_v37  ;;  %v25750_v12 = vsel %vm23942_vm8, %v17716_v53, %v7313_v23  ;;  %v20422_v58 = vpop.f32.mrf.mxu0 }
 0x1da   : > { %v3824_v1 = vpop.f32.mrf.mxu1  ;;  %v25746_v21 = vsel %vm23942_vm8, %v17612_v4, %v31120_v13  ;;  %v31121_v42 = vcombine.low %v25541_v51, %v25559_v61  ;;  %v25758_v37 = vsel %vm23942_vm8, %v6784_v26, %v6785_v50  ;;  %v25762_v44 = vsel %vm23942_vm8, %v7315_v32, %v7316_v41  ;;  %v31122_v51 = vld [vmem:[#allocation15_spill] sm:$0xff]  ;;  %v25773_v32 = vld [vmem:[%s22490_s16 + $0x374] sm:$0xf] }
 0x1db   : > { %v7323_v4 = vrot.slane %v25712_v0, 6  ;;  %v7327_v23 = vrot.slane %v25723_v39, 6  ;;  %v25766_v53 = vadd.f32 %v3824_v1, %v3547_v22  ;;  %v3552_v11 = vadd.f32 %v20422_v58, %v25256_v56  ;;  %v17676_v26 = vld [vmem:[%s22490_s16 + $0x4cc] sm:$0x3]  ;;  %v3483_v41 = vpop.f32.mrf.mxu0  ;;  %v31123_v0 = vld [vmem:[#allocation16_spill] sm:$0xff] }
 0x1dc   : > { %20709 = vmatmul.mubr.bf16.gmra.mxu0 %v31121_v42  ;;  %v20470_v52 = vpop.f32.mrf.mxu1  ;;  %20757 = vmatmul.mubr.bf16.gmra.mxu1 %v31122_v51  ;;  %v7322_v61 = vrot.slane %v7320_v20, 4  ;;  %v17614_v50 = vrot.slane %v25715_v14, 10  ;;  %v17530_v1 = vcombine.low %v25703_v62, %v25707_v40  ;;  %v6798_v22 = vrot.slane %v6796_v2, 4  ;;  %v25781_v39 = vld [vmem:[%s22490_s16 + $0x4e8] sm:$0xf] }
 0x1dd   : > { %20712 = vmatprep.mubr.bf16.mxu0 %v17528_v31  ;;  %20760 = vmatprep.mubr.bf16.mxu1 %v31123_v0  ;;  %v6799_v31 = vrot.slane %v17572_v49, 6  ;;  %v25783_v36 = vadd.f32 %v20470_v52, %v3552_v11  ;;  %v3550_v14 = vadd.f32 %v3483_v41, %v25266_v45  ;;  %v17573_v62 = vld [vmem:[%s22490_s16 + $0x370] sm:$0xc]  ;;  %v17575_v40 = vld [vmem:[%s22490_s16 + $0x378] sm:$0x3]  ;;  %v20423_v42 = vpop.f32.mrf.mxu0  ;;  %v17718_v56 = vrot.slane %v17674_v48, 10 }
 0x1de   : > { %v3837_v38 = vpop.f32.mrf.mxu1  ;;  %v7329_v0 = vrot.slane %v7327_v23, 4  ;;  %v7330_v49 = vrot.slane %v17676_v26, 6  ;;  %v6803_v51 = vrot.slane %v25773_v32, 6  ;;  %v25794_v11 = vld [vmem:[%s22490_s16 + $0x4e4] sm:$0xc]  ;;  %v3553_v45 = vadd.f32 %v20423_v42, %v25271_v19 }
 0x1df   : > { %31124 = vst [vmem:[#allocation31_spill] sm:$0xff] %v25783_v36  ;;  %v25796_v52 = vadd.f32 %v3837_v38, %v3550_v14  ;;  %v31125_v13 = vrot.slane %v25654_v30, 6  ;;  %v7334_v48 = vrot.slane %v25781_v39, 6  ;;  %v3486_v36 = vpop.f32.mrf.mxu0  ;;  %v31126_v26 = vrot.slane %v25675_v18, 6 }
 0x1e0   : > { %v20471_v41 = vpop.f32.mrf.mxu1  ;;  %v25814_v14 = vsel %vm23942_vm8, %v17717_v63, %v7320_v20  ;;  %v25818_v19 = vsel %vm23942_vm8, %v7322_v61, %v7323_v4  ;;  %v17615_v30 = vrot.slane %v17573_v62, 10  ;;  %v3551_v18 = vadd.f32 %v3486_v36, %v25279_v33  ;;  %v25833_v63 = vld [vmem:[%s22490_s16 + $0x394] sm:$0xf]  ;;  %v25848_v36 = vld [vmem:[%s22490_s16 + $0x398] sm:$0x3] }
 0x1e1   : > { %v25803_v58 = vsel %vm23942_vm8, %v17613_v35, %v31125_v13  ;;  %v25810_v32 = vsel %vm23942_vm8, %v6791_v3, %v31126_v26  ;;  %v17679_v35 = vld [vmem:[%s22490_s16 + $0x4ec] sm:$0x3]  ;;  %v25821_v39 = vadd.f32 %v20471_v41, %v3553_v45  ;;  %v25826_v3 = vsel %vm23942_vm8, %v17614_v50, %v6796_v2  ;;  %v20426_v4 = vpop.f32.mrf.mxu0  ;;  %v31128_v62 = vld [vmem:[#allocation17_spill] sm:$0xff]  ;;  %v25868_v41 = vld [vmem:[%s22490_s16 + $0x3b4] sm:$0xf] }
 0x1e2   : > { %v3840_v38 = vpop.f32.mrf.mxu1  ;;  %v25830_v20 = vsel %vm23942_vm8, %v6798_v22, %v6799_v31  ;;  %v31127_v61 = vcombine.low %v25640_v27, %v25644_v59  ;;  %v25840_v33 = vsel %vm23942_vm8, %v17718_v56, %v7327_v23  ;;  %v25844_v2 = vsel %vm23942_vm8, %v7329_v0, %v7330_v49  ;;  %v17576_v31 = vld [vmem:[%s22490_s16 + $0x390] sm:$0xc]  ;;  %v25856_v0 = vld [vmem:[%s22490_s16 + $0x504] sm:$0xc] }
 0x1e3   : > { %v6805_v50 = vrot.slane %v6803_v51, 4  ;;  %v6806_v22 = vrot.slane %v17575_v40, 6  ;;  %v25850_v13 = vadd.f32 %v3840_v38, %v3551_v18  ;;  %v3556_v27 = vadd.f32 %v20426_v4, %v25290_v25  ;;  %v25859_v40 = vld [vmem:[%s22490_s16 + $0x508] sm:$0xf]  ;;  %v3499_v42 = vpop.f32.mrf.mxu0  ;;  %v31129_v49 = vld [vmem:[#allocation18_spill] sm:$0xff] }
 0x1e4   : > { %20713 = vmatmul.mubr.bf16.gmra.mxu0 %v31127_v61  ;;  %v20474_v59 = vpop.f32.mrf.mxu1  ;;  %20761 = vmatmul.mubr.bf16.gmra.mxu1 %v31128_v62  ;;  %v17719_v23 = vrot.slane %v25794_v11, 10  ;;  %v7336_v56 = vrot.slane %v7334_v48, 4  ;;  %v6810_v11 = vrot.slane %v25833_v63, 6  ;;  %v3554_v18 = vadd.f32 %v3499_v42, %v25295_v15  ;;  %v25878_v25 = vld [vmem:[%s22490_s16 + $0x50c] sm:$0x3] }
 0x1e5   : > { %20716 = vmatprep.mubr.bf16.mxu0 %v17530_v1  ;;  %20764 = vmatprep.mubr.bf16.mxu1 %v31129_v49  ;;  %v7337_v1 = vrot.slane %v17679_v35, 6  ;;  %v25870_v26 = vadd.f32 %v20474_v59, %v3556_v27  ;;  %v17579_v35 = vld [vmem:[%s22490_s16 + $0x3b0] sm:$0xc]  ;;  %v20427_v45 = vpop.f32.mrf.mxu0  ;;  %v25883_v63 = vsel %vm23942_vm8, %v17615_v30, %v6803_v51  ;;  %v25887_v27 = vsel %vm23942_vm8, %v6805_v50, %v6806_v22  ;;  %v25891_v42 = vld [vmem:[%s22490_s16 + $0x3b8] sm:$0x3] }
 0x1e6   : > { %v3853_v38 = vpop.f32.mrf.mxu1  ;;  %v17616_v15 = vrot.slane %v17576_v31, 10  ;;  %v7341_v59 = vrot.slane %v25859_v40, 6  ;;  %v25894_v4 = vld [vmem:[%s22490_s16 + $0x528] sm:$0xf]  ;;  %v3557_v49 = vadd.f32 %v20427_v45, %v25299_v34  ;;  %v6813_v51 = vrot.slane %v25848_v36, 6 }
 0x1e7   : > { %31130 = vst [vmem:[#allocation32_spill] sm:$0xff] %v25870_v26  ;;  %v25896_v61 = vadd.f32 %v3853_v38, %v3554_v18  ;;  %v6817_v30 = vrot.slane %v25868_v41, 6  ;;  %v25902_v50 = vld [vmem:[%s22490_s16 + $0x524] sm:$0xc]  ;;  %v3502_v22 = vpop.f32.mrf.mxu0  ;;  %v25906_v31 = vsel %vm23942_vm8, %v17719_v23, %v7334_v48  ;;  %v25910_v40 = vsel %vm23942_vm8, %v7336_v56, %v7337_v1  ;;  %v25918_v26 = vld [vmem:[%s22490_s16 + $0x52c] sm:$0x3] }
 0x1e8   : > { %v20475_v62 = vpop.f32.mrf.mxu1  ;;  %v6812_v18 = vrot.slane %v6810_v11, 4  ;;  %v17720_v34 = vrot.slane %v25856_v0, 10  ;;  %v3555_v36 = vadd.f32 %v3502_v22, %v25306_v46  ;;  %v7344_v38 = vrot.slane %v25878_v25, 6  ;;  %v25921_v48 = vld [vmem:[%s22490_s16 + $0x3d4] sm:$0xf] }
 0x1e9   : > { %31131 = vst [vmem:[#allocation33_spill] sm:$0xff] %v25896_v61  ;;  %v25913_v45 = vadd.f32 %v20475_v62, %v3557_v49  ;;  %v17617_v61 = vrot.slane %v17579_v35, 10  ;;  %v25924_v23 = vld [vmem:[%s22490_s16 + $0x548] sm:$0xf]  ;;  %v20430_v56 = vpop.f32.mrf.mxu0  ;;  %v31133_v0 = vcombine.low %v25729_v60, %v25733_v24  ;;  %v25933_v62 = vsel %vm23942_vm8, %v17616_v15, %v6810_v11  ;;  %v25937_v1 = vld [vmem:[%s22490_s16 + $0x3d0] sm:$0xc] }
 0x1ea   : > { %v3856_v41 = vpop.f32.mrf.mxu1  ;;  %v7343_v49 = vrot.slane %v7341_v59, 4  ;;  %v7348_v25 = vrot.slane %v25894_v4, 6  ;;  %v3560_v22 = vadd.f32 %v20430_v56, %v25312_v16  ;;  %v31135_v24 = vld [vmem:[#allocation19_spill] sm:$0xff]  ;;  %v6819_v46 = vrot.slane %v6817_v30, 4  ;;  %v25948_v15 = vld [vmem:[%s22490_s16 + $0x3d8] sm:$0x3] }
 0x1eb   : > { %31132 = vst [vmem:[#allocation34_spill] sm:$0xff] %v25913_v45  ;;  %v25939_v35 = vadd.f32 %v3856_v41, %v3555_v36  ;;  %v6820_v11 = vrot.slane %v25891_v42, 6  ;;  %v25951_v4 = vld [vmem:[%s22490_s16 + $0x544] sm:$0xc]  ;;  %v25954_v45 = vld [vmem:[%s22490_s16 + $0x3f4] sm:$0xf]  ;;  %v3515_v36 = vpop.f32.mrf.mxu0  ;;  %v31137_v16 = vcombine.low %v25750_v12, %v25762_v44  ;;  %v25961_v41 = vsel %vm23942_vm8, %v6812_v18, %v6813_v51 }
 0x1ec   : > { %20717 = vmatmul.mubr.bf16.gmra.mxu0 %v31133_v0  ;;  %v20478_v60 = vpop.f32.mrf.mxu1  ;;  %20765 = vmatmul.mubr.bf16.gmra.mxu1 %v31135_v24  ;;  %v31136_v0 = vcombine.low %v25746_v21, %v25758_v37  ;;  %v17721_v21 = vrot.slane %v25902_v50, 10  ;;  %v6824_v37 = vrot.slane %v25921_v48, 6  ;;  %v25966_v42 = vld [vmem:[%s22490_s16 + $0x54c] sm:$0x3]  ;;  %v30941_v56 = vrot.slane %v25924_v23, 6 }
 0x1ed   : > { %31134 = vst [vmem:[#allocation35_spill] sm:$0xff] %v25939_v35  ;;  %20832 = vmatprep.mubr.bf16.mxu1 %v31137_v16  ;;  %v3558_v24 = vadd.f32 %v3515_v36, %v25324_v57  ;;  %v25974_v12 = vsel %vm23942_vm8, %v17720_v34, %v7341_v59  ;;  %v25978_v44 = vsel %vm23942_vm8, %v17617_v61, %v6817_v30  ;;  %v25981_v51 = vld [vmem:[%s22490_s16 + $0x3f0] sm:$0xc]  ;;  %v20431_v50 = vpop.f32.mrf.mxu0  ;;  %v7350_v18 = vrot.slane %v7348_v25, 4 }
 0x1ee   : > { %20784 = vmatprep.mubr.bf16.mxu0 %v31136_v0  ;;  %v25969_v0 = vadd.f32 %v20478_v60, %v3560_v22  ;;  %v3869_v35 = vpop.f32.mrf.mxu1  ;;  %v7351_v48 = vrot.slane %v25918_v26, 6  ;;  %v17618_v22 = vrot.slane %v25937_v1, 10  ;;  %v6831_v57 = vrot.slane %v25954_v45, 6  ;;  %v22042_v61 = vld [vmem:[%s30893_s1 + $0x430] sm:$0xff]  }
 0x1ef   : > { %v25986_v60 = vadd.f32 %v3869_v35, %v3558_v24  ;;  %v3561_v59 = vadd.f32 %v20431_v50, %v25330_v10  ;;  %v25994_v30 = vsel %vm23942_vm8, %v7343_v49, %v7344_v38  ;;  %v25998_v26 = vsel %vm23942_vm8, %v6819_v46, %v6820_v11  ;;  %v3518_v45 = vpop.f32.mrf.mxu0  ;;  %v26003_v10 = vld [vmem:[%s30893_s1 + $0x470] sm:$0xff]   ;;  %v17587_v38 = vld [vmem:[%s22490_s16 + $0x3f8] sm:$0x3] }
 0x1f0   : > { %31138 = vst [vmem:[#allocation36_spill] sm:$0xff] %v25969_v0  ;;  %v20479_v34 = vpop.f32.mrf.mxu1  ;;  %v6826_v1 = vrot.slane %v6824_v37, 4  ;;  %v6827_v35 = vrot.slane %v25948_v15, 6  ;;  %v17722_v24 = vrot.slane %v25951_v4, 10  ;;  %v7357_v36 = vrot.slane %v30941_v56, 4 }
 0x1f1   : > { %31139 = vst [vmem:[#allocation37_spill] sm:$0xff] %v25986_v60  ;;  %v26010_v49 = vadd.f32 %v20479_v34, %v3561_v59  ;;  %v3559_v46 = vadd.f32 %v3518_v45, %v25347_v17  ;;  %v7358_v16 = vrot.slane %v25966_v42, 6  ;;  %v17619_v50 = vrot.slane %v25981_v51, 10  ;;  %v26016_v60 = vld [vmem:[%s22490_s16 + $0x564] sm:$0xc]  ;;  %v20498_v4 = vpop.f32.mrf.mxu0 }
 0x1f2   : > { %v3872_v11 = vpop.f32.mrf.mxu1  ;;  %v26019_v15 = vld [vmem:[%s22490_s16 + $0x568] sm:$0xf]  ;;  %v31141_v56 = vcombine.low %v25803_v58, %v25810_v32  ;;  %v26032_v51 = vsel %vm23942_vm8, %v17721_v21, %v7348_v25  ;;  %v26040_v32 = vld [vmem:[%s22490_s16 + $0x56c] sm:$0x3]  ;;  %v4416_v45 = vadd.f32 %v20498_v4, %v25362_v7  ;;  %v31142_v42 = vcombine.low %v25814_v14, %v25818_v19  ;;  %v26053_v59 = vld [vmem:[%s22490_s16 + $0x410] sm:$0xc] }
 0x1f3   : > { %31140 = vst [vmem:[#allocation38_spill] sm:$0xff] %v26010_v49  ;;  %v26037_v58 = vld [vmem:[%s30893_s1 + $0x428] sm:$0xff]   ;;  %v26045_v34 = vadd.f32 %v3872_v11, %v3559_v46  ;;  %v6833_v25 = vrot.slane %v6831_v57, 4  ;;  %v6834_v21 = vrot.slane %v17587_v38, 6  ;;  %v26056_v49 = vld [vmem:[%s22490_s16 + $0x418] sm:$0x3]  ;;  %v4287_v46 = vpop.f32.mrf.mxu0  ;;  %v31143_v7 = vcombine.low %v25826_v3, %v25830_v20 }
 0x1f4   : > { %20785 = vmatmul.mubr.bf16.vlgmr.msra.gmra.mxu0 %v31141_v56  ;;  %v26043_v56 = vld [vmem:[%s22490_s16 + $0x414] sm:$0xf]  ;;  %v20546_v17 = vpop.f32.mrf.mxu1  ;;  %20833 = vmatmul.mubr.bf16.vlgmr.msra.gmra.mxu1 %v31142_v42  ;;  %v26059_v0 = vld [vmem:[%s22490_s16 + $0x588] sm:$0xf]  ;;  %v17649_v14 = vcombine.low %v25978_v44, %v25998_v26  ;;  %v26078_v38 = vsel %vm23942_vm8, %v17618_v22, %v6824_v37  ;;  %v26082_v3 = vld [vmem:[%s22490_s16 + $0x584] sm:$0xc]  ;;  %v4414_v11 = vadd.f32 %v4287_v46, %v25372_v54 }
 0x1f5   : > { %20865 = vmatpush3.bf16.msra.mxu0 %v25580_v6  ;;  %20913 = vmatpush3.bf16.msra.mxu1 %v25593_v28  ;;  %v26069_v6 = vsel %vm23942_vm8, %v7350_v18, %v7351_v48  ;;  %v26074_v19 = vld [vmem:[%s30893_s1 + $0x468] sm:$0xff]   ;;  %v7362_v28 = vrot.slane %v26019_v15, 6  ;;  %v26084_v20 = vadd.f32 %v20546_v17, %v4416_v45  ;;  %v31144_v48 = vcombine.low %v25840_v33, %v25844_v2  ;;  %v20499_v22 = vpop.f32.mrf.mxu0 }
 0x1f6   : > { %20788 = vmatprep.mubr.bf16.mxu0 %v31143_v7  ;;  %v4821_v18 = vpop.f32.mrf.mxu1  ;;  %20866 = vmatprep.subr.bf16.mxu0 %v22042_v61  ;;  %v17723_v4 = vrot.slane %v26016_v60, 10  ;;  %v6838_v37 = vrot.slane %v26043_v56, 6  ;;  %v26095_v15 = vsel %vm23942_vm8, %v6826_v1, %v6827_v35  ;;  %v31145_v54 = vrot.slane %v25924_v23, 6  ;;  %v26112_v60 = vld [vmem:[%s22490_s16 + $0x58c] sm:$0x3]  ;;  %v31151_v56 = vld [vmem:[#allocation21_spill] sm:$0xff] }
 0x1f7   : > { %20836 = vmatprep.mubr.bf16.mxu1 %v31144_v48  ;;  %20914 = vmatprep.subr.bf16.mxu1 %v26003_v10  ;;  %v26105_v33 = vsel %vm23942_vm8, %v7357_v36, %v7358_v16  ;;  %v26109_v2 = vsel %vm23942_vm8, %v17619_v50, %v6831_v57  ;;  %v26114_v42 = vadd.f32 %v4821_v18, %v4414_v11  ;;  %v26125_v57 = vld [vmem:[%s30893_s1 + $0x420] sm:$0xff]   ;;  %v26128_v36 = vld [vmem:[%s22490_s16 + $0x434] sm:$0xf]  ;;  %v4290_v16 = vpop.f32.mrf.mxu0  ;;  %v17620_v50 = vrot.slane %v26053_v59, 10  ;;  %v26151_v59 = vld [vmem:[%s22490_s16 + $0x438] sm:$0x3] }
 0x1f8   : > { %v26101_v17 = vsel %vm23942_vm8, %v17722_v24, %v31145_v54  ;;  %v4417_v1 = vadd.f32 %v20499_v22, %v25379_v29  ;;  %v20547_v23 = vpop.f32.mrf.mxu1  ;;  %v26119_v35 = vsel %vm23942_vm8, %v6833_v25, %v6834_v21  ;;  %v7365_v24 = vrot.slane %v26040_v32, 6  ;;  %v26141_v25 = vld [vmem:[%s22490_s16 + $0x430] sm:$0xc] }
 0x1f9   : > { %20867 = vmatpush3.bf16.msra.mxu0 %v22042_v61  ;;  %20915 = vmatpush3.bf16.msra.mxu1 %v26003_v10  ;;  %v7364_v29 = vrot.slane %v7362_v28, 4  ;;  %v26135_v61 = vld [vmem:[%s30893_s1 + $0x460] sm:$0xff]   ;;  %v6841_v32 = vrot.slane %v26056_v49, 6  ;;  %v7369_v45 = vrot.slane %v26059_v0, 6  ;;  %v4415_v10 = vadd.f32 %v4290_v16, %v25401_v5  ;;  %v26154_v49 = vld [vmem:[%s22490_s16 + $0x5a8] sm:$0xf]  ;;  %v20502_v0 = vpop.f32.mrf.mxu0 }
 0x1fa   : > { %20868 = vmatprep.subr.bf16.mxu0 %v26037_v58  ;;  %v26143_v21 = vadd.f32 %v20547_v23, %v4417_v1  ;;  %v4824_v46 = vpop.f32.mrf.mxu1  ;;  %20916 = vmatprep.subr.bf16.mxu1 %v26074_v19  ;;  %v6840_v7 = vrot.slane %v6838_v37, 4  ;;  %v17724_v11 = vrot.slane %v26082_v3, 10  ;;  %v31146_v18 = vcombine.low %v25883_v63, %v25887_v27 }
 0x1fb   : > { %v17753_v5 = vcombine.low %v26032_v51, %v26069_v6  ;;  %v17650_v48 = vcombine.low %v26078_v38, %v26095_v15  ;;  %v7372_v22 = vrot.slane %v26112_v60, 6  ;;  %v6845_v3 = vrot.slane %v26128_v36, 6  ;;  %v26182_v60 = vld [vmem:[%s30893_s1 + $0x418] sm:$0xff]   ;;  %v4303_v36 = vpop.f32.mrf.mxu0 }
 0x1fc   : > { %20789 = vmatmul.mubr.bf16.gmra.mxu0 %v31146_v18  ;;  %v26165_v54 = vadd.f32 %v4824_v46, %v4415_v10  ;;  %v4420_v1 = vadd.f32 %v20502_v0, %v25421_v47  ;;  %v20550_v23 = vpop.f32.mrf.mxu1  ;;  %v31147_v16 = vcombine.low %v25906_v31, %v25910_v40  ;;  %v31148_v63 = vcombine.low %v25933_v62, %v25961_v41  ;;  %v26177_v18 = vld [vmem:[%s22490_s16 + $0x5a4] sm:$0xc]  ;;  %v26185_v47 = vld [vmem:[%s22490_s16 + $0x454] sm:$0xf]  ;;  %v26319_v15 = vld [vmem:[%s22490_s16 + $0x478] sm:$0x3] }
 0x1fd   : > { %v31149_v31 = vcombine.low %v25974_v12, %v25994_v30  ;;  %20869 = vmatpush3.bf16.msra.mxu0 %v26037_v58  ;;  %v26195_v62 = vsel %vm23942_vm8, %v17723_v4, %v7362_v28  ;;  %v7371_v41 = vrot.slane %v7369_v45, 4  ;;  %v30942_v10 = vrot.slane %v26154_v49, 6  ;;  %v31150_v0 = vld [vmem:[#allocation20_spill] sm:$0xff]  ;;  %20917 = vmatpush3.bf16.msra.mxu1 %v26074_v19  ;;  %v26209_v28 = vld [vmem:[%s22490_s16 + $0x5ac] sm:$0x3]  ;;  %v22049_v4 = vld [vmem:[%s30893_s1 + $0x458] sm:$0xff]  }
 0x1fe   : > { %20837 = vmatmul.mubr.bf16.gmra.mxu1 %v31147_v16  ;;  %20792 = vmatprep.mubr.bf16.mxu0 %v31148_v63  ;;  %v26198_v46 = vadd.f32 %v20550_v23, %v4420_v1  ;;  %v4418_v16 = vadd.f32 %v4303_v36, %v31150_v0  ;;  %v4837_v12 = vpop.f32.mrf.mxu1  ;;  %v26204_v30 = vsel %vm23942_vm8, %v7364_v29, %v7365_v24  ;;  %v17621_v58 = vrot.slane %v26141_v25, 10  ;;  %v26215_v1 = vld [vmem:[%s22490_s16 + $0x450] sm:$0xc]  ;;  %v20503_v23 = vpop.f32.mrf.mxu0  ;;  %v26230_v63 = vld [vmem:[%s22490_s16 + $0x458] sm:$0x3] }
 0x1ff   : > { %20840 = vmatprep.mubr.bf16.mxu1 %v31149_v31  ;;  %20870 = vmatprep.subr.bf16.mxu0 %v26125_v57  ;;  %v26222_v19 = vsel %vm23942_vm8, %v17620_v50, %v6838_v37  ;;  %v26226_v24 = vsel %vm23942_vm8, %v6840_v7, %v6841_v32  ;;  %v6847_v29 = vrot.slane %v6845_v3, 4  ;;  %v6848_v25 = vrot.slane %v26151_v59, 6  ;;  %v26233_v36 = vld [vmem:[%s22490_s16 + $0x5c8] sm:$0xf]  ;;  %v26244_v32 = vld [vmem:[%s22490_s16 + $0x5c4] sm:$0xc] }
 0x200   : > { %20918 = vmatprep.subr.bf16.mxu1 %v26135_v61  ;;  %v26235_v31 = vadd.f32 %v4837_v12, %v4418_v16  ;;  %v4421_v0 = vadd.f32 %v20503_v23, %v31151_v56  ;;  %v20551_v40 = vpop.f32.mrf.mxu1  ;;  %v26240_v37 = vsel %vm23942_vm8, %v17724_v11, %v7369_v45  ;;  %v6852_v50 = vrot.slane %v26185_v47, 6  ;;  %v26249_v7 = vld [vmem:[%s30893_s1 + $0x410] sm:$0xff]   ;;  %v4306_v59 = vpop.f32.mrf.mxu0  ;;  %v26261_v47 = vld [vmem:[%s22490_s16 + $0x5cc] sm:$0x3] }
 0x201   : > { %20871 = vmatpush3.bf16.msra.mxu0 %v26125_v57  ;;  %v26254_v16 = vsel %vm23942_vm8, %v7371_v41, %v7372_v22  ;;  %v17725_v12 = vrot.slane %v26177_v18, 10  ;;  %v7378_v45 = vrot.slane %v30942_v10, 4  ;;  %v7379_v11 = vrot.slane %v26209_v28, 6  ;;  %v26264_v23 = vld [vmem:[%s22490_s16 + $0x474] sm:$0xf]  ;;  %v31152_v22 = vld [vmem:[#allocation22_spill] sm:$0xff]  ;;  %20919 = vmatpush3.bf16.msra.mxu1 %v26135_v61 }
 0x202   : > { %v26269_v56 = vld [vmem:[%s30893_s1 + $0x450] sm:$0xff]   ;;  %v26271_v57 = vadd.f32 %v20551_v40, %v4421_v0  ;;  %v4419_v41 = vadd.f32 %v4306_v59, %v31152_v22  ;;  %v4840_v27 = vpop.f32.mrf.mxu1  ;;  %20872 = vmatprep.subr.bf16.mxu0 %v26182_v60  ;;  %v17622_v18 = vrot.slane %v26215_v1, 10  ;;  %v7383_v28 = vrot.slane %v26233_v36, 6  ;;  %20920 = vmatprep.subr.bf16.mxu1 %v22049_v4  ;;  %v31153_v36 = vld [vmem:[#allocation23_spill] sm:$0xff] }
 0x203   : > { %v20506_v10 = vpop.f32.mrf.mxu0  ;;  %v17755_v40 = vcombine.low %v26195_v62, %v26204_v30  ;;  %v26285_v0 = vsel %vm23942_vm8, %v17621_v58, %v6845_v3  ;;  %v26289_v61 = vsel %vm23942_vm8, %v6847_v29, %v6848_v25  ;;  %v6854_v26 = vrot.slane %v6852_v50, 4  ;;  %v26302_v3 = vld [vmem:[%s22490_s16 + $0x470] sm:$0xc]  ;;  %v26351_v22 = vld [vmem:[%s22490_s16 + $0x494] sm:$0xf] }
 0x204   : > { %20793 = vmatmul.mubr.bf16.gmra.mxu0 %v17649_v14  ;;  %v26291_v1 = vadd.f32 %v4840_v27, %v4419_v41  ;;  %v4424_v59 = vadd.f32 %v20506_v10, %v31153_v36  ;;  %v20554_v44 = vpop.f32.mrf.mxu1  ;;  %v6855_v14 = vrot.slane %v26230_v63, 6  ;;  %v26307_v27 = vld [vmem:[%s30893_s1 + $0x408] sm:$0xff]   ;;  %v31154_v58 = vcombine.low %v26101_v17, %v26105_v33  ;;  %v26368_v36 = vld [vmem:[%s22490_s16 + $0x490] sm:$0xc] }
 0x205   : > { %20796 = vmatprep.mubr.bf16.mxu0 %v17650_v48  ;;  %v4319_v10 = vpop.f32.mrf.mxu0  ;;  %v17652_v51 = vcombine.low %v26222_v19, %v26226_v24  ;;  %v17756_v6 = vcombine.low %v26240_v37, %v26254_v16  ;;  %20873 = vmatpush3.bf16.msra.mxu0 %v26182_v60  ;;  %v17726_v38 = vrot.slane %v26244_v32, 10  ;;  %v26323_v48 = vld [vmem:[%s22490_s16 + $0x5e8] sm:$0xf]  ;;  %v7385_v24 = vrot.slane %v7383_v28, 4  ;;  %v31159_v16 = vld [vmem:[#allocation26_spill] sm:$0xff] }
 0x206   : > { %20841 = vmatmul.mubr.bf16.gmra.mxu1 %v17753_v5  ;;  %v6859_v5 = vrot.slane %v26264_v23, 6  ;;  %v26325_v17 = vadd.f32 %v20554_v44, %v4424_v59  ;;  %v4422_v33 = vadd.f32 %v4319_v10, %v25515_v9  ;;  %v4853_v19 = vpop.f32.mrf.mxu1  ;;  %v7386_v60 = vrot.slane %v26261_v47, 6  ;;  %20874 = vmatprep.subr.bf16.mxu0 %v26249_v7  ;;  %v26347_v47 = vld [vmem:[%s22490_s16 + $0x5e4] sm:$0xc]  ;;  %v26371_v59 = vld [vmem:[%s22490_s16 + $0x608] sm:$0xf] }
 0x207   : > { %20844 = vmatprep.mubr.bf16.mxu1 %v31154_v58  ;;  %20921 = vmatpush3.bf16.msra.mxu1 %v22049_v4  ;;  %v20507_v29 = vpop.f32.mrf.mxu0  ;;  %v31155_v63 = vrot.slane %v26154_v49, 6  ;;  %v26340_v9 = vsel %vm23942_vm8, %v7378_v45, %v7379_v11  ;;  %v26344_v4 = vsel %vm23942_vm8, %v17622_v18, %v6852_v50  ;;  %v22053_v49 = vld [vmem:[%s30893_s1 + $0x448] sm:$0xff]   ;;  %v26361_v11 = vsel %vm23942_vm8, %v6854_v26, %v6855_v14  ;;  %v26376_v44 = vld [vmem:[%s30893_s1 + $0x400] sm:$0xff]  }
 0x208   : > { %20922 = vmatprep.subr.bf16.mxu1 %v26269_v56  ;;  %v4425_v41 = vadd.f32 %v20507_v29, %v25536_v43  ;;  %v20555_v45 = vpop.f32.mrf.mxu1  ;;  %v26364_v50 = vld [vmem:[%s22490_s16 + $0x5ec] sm:$0x3]  ;;  %v7390_v18 = vrot.slane %v26323_v48, 6  ;;  %v26380_v10 = vsel %vm23942_vm8, %v17726_v38, %v7383_v28  ;;  %v17623_v26 = vrot.slane %v26302_v3, 10  ;;  %v31156_v29 = vld [vmem:[#allocation24_spill] sm:$0xff] }
 0x209   : > { %v26336_v32 = vsel %vm23942_vm8, %v17725_v12, %v31155_v63  ;;  %v26356_v12 = vadd.f32 %v4853_v19, %v4422_v33  ;;  %v4322_v43 = vpop.f32.mrf.mxu0  ;;  %v6861_v14 = vrot.slane %v6859_v5, 4  ;;  %v6862_v58 = vrot.slane %v26319_v15, 6  ;;  %20875 = vmatpush3.bf16.msra.mxu0 %v26249_v7  ;;  %v26390_v33 = vld [vmem:[%s30893_s1 + $0x440] sm:$0xff]   ;;  %v26401_v63 = vld [vmem:[%s22490_s16 + $0x498] sm:$0x3] }
 0x20a   : > { %v26392_v19 = vadd.f32 %v20555_v45, %v4425_v41  ;;  %v4423_v28 = vadd.f32 %v4322_v43, %v31156_v29  ;;  %v4856_v38 = vpop.f32.mrf.mxu1  ;;  %v26397_v3 = vsel %vm23942_vm8, %v7385_v24, %v7386_v60  ;;  %20876 = vmatprep.subr.bf16.mxu0 %v26307_v27  ;;  %v31157_v15 = vcombine.low %v26109_v2, %v26119_v35  ;;  %v31158_v29 = vld [vmem:[#allocation25_spill] sm:$0xff] }
 0x20b   : > { %20923 = vmatpush3.bf16.msra.mxu1 %v26269_v56  ;;  %v20510_v7 = vpop.f32.mrf.mxu0  ;;  %v6866_v60 = vrot.slane %v26351_v22, 6  ;;  %v17704_v56 = vld [vmem:[%s22490_s16 + $0x604] sm:$0xc]  ;;  %v7397_v45 = vrot.slane %v26371_v59, 6  ;;  %v17727_v35 = vrot.slane %v26347_v47, 10  ;;  %v7392_v22 = vrot.slane %v7390_v18, 4 }
 0x20c   : > { %20797 = vmatmul.mubr.bf16.gmra.mxu0 %v31157_v15  ;;  %20924 = vmatprep.subr.bf16.mxu1 %v22053_v49  ;;  %v26414_v43 = vadd.f32 %v4856_v38, %v4423_v28  ;;  %v4428_v25 = vadd.f32 %v20510_v7, %v31158_v29  ;;  %v20558_v2 = vpop.f32.mrf.mxu1  ;;  %v17706_v15 = vld [vmem:[%s22490_s16 + $0x60c] sm:$0x3]  ;;  %v26425_v59 = vld [vmem:[%s22490_s16 + $0x4b4] sm:$0xf]  ;;  %v26430_v28 = vld [vmem:[%s30893_s1 + $0x4b8] sm:$0xff]   ;;  %v17758_v62 = vcombine.low %v26380_v10, %v26397_v3 }
 0x20d   : > { %20800 = vmatprep.mubr.bf16.mxu0 %v17652_v51  ;;  %v4335_v38 = vpop.f32.mrf.mxu0  ;;  %v26441_v30 = vsel %vm23942_vm8, %v17623_v26, %v6859_v5  ;;  %v17624_v51 = vrot.slane %v26368_v36, 10  ;;  %v26446_v47 = vld [vmem:[%s22490_s16 + $0x4b0] sm:$0xc]  ;;  %20877 = vmatpush3.bf16.msra.mxu0 %v26307_v27  ;;  %v26454_v23 = vsel %vm23942_vm8, %v6861_v14, %v6862_v58  ;;  %v17728_v5 = vrot.slane %v17704_v56, 10  ;;  %v26457_v26 = vld [vmem:[%s22490_s16 + $0x4b8] sm:$0x3] }
 0x20e   : > { %20845 = vmatmul.mubr.bf16.gmra.mxu1 %v17755_v40  ;;  %v7393_v40 = vrot.slane %v26364_v50, 6  ;;  %v26449_v37 = vadd.f32 %v20558_v2, %v4428_v25  ;;  %v4869_v10 = vpop.f32.mrf.mxu1  ;;  %v26460_v50 = vld [vmem:[%s22490_s16 + $0x624] sm:$0xc]  ;;  %v26463_v36 = vld [vmem:[%s22490_s16 + $0x628] sm:$0xf]  ;;  %20878 = vmatprep.subr.bf16.mxu0 %v26376_v44  ;;  %v26472_v27 = vld [vmem:[%s30893_s1 + $0x4f8] sm:$0xff]   ;;  %v26486_v24 = vsel %vm23942_vm8, %v17727_v35, %v7390_v18 }
 0x20f   : > { %20848 = vmatprep.mubr.bf16.mxu1 %v17756_v6  ;;  %v4426_v6 = vadd.f32 %v4335_v38, %v31159_v16  ;;  %20925 = vmatpush3.bf16.msra.mxu1 %v22053_v49  ;;  %v26466_v3 = vld [vmem:[%s22490_s16 + $0x4d4] sm:$0xf]  ;;  %v20511_v25 = vpop.f32.mrf.mxu0  ;;  %v6868_v14 = vrot.slane %v6866_v60, 4  ;;  %v6869_v58 = vrot.slane %v26401_v63, 6  ;;  %v7399_v7 = vrot.slane %v7397_v45, 4  ;;  %v31160_v2 = vld [vmem:[#allocation27_spill] sm:$0xff] }
 0x210   : > { %v7400_v56 = vrot.slane %v17706_v15, 6  ;;  %v26476_v29 = vld [vmem:[%s22490_s16 + $0x62c] sm:$0x3]  ;;  %20926 = vmatprep.subr.bf16.mxu1 %v26390_v33  ;;  %v4429_v38 = vadd.f32 %v20511_v25, %v31160_v2  ;;  %v20559_v16 = vpop.f32.mrf.mxu1  ;;  %v6873_v63 = vrot.slane %v26425_v59, 6  ;;  %v26491_v41 = vsel %vm23942_vm8, %v7392_v22, %v7393_v40  ;;  %v17606_v25 = vld [vmem:[%s22490_s16 + $0x4d0] sm:$0xc] }
 0x211   : > { %v26479_v49 = vadd.f32 %v4869_v10, %v4426_v6  ;;  %v4338_v15 = vpop.f32.mrf.mxu0  ;;  %v26495_v6 = vsel %vm23942_vm8, %v17624_v51, %v6866_v60  ;;  %v7404_v10 = vrot.slane %v26463_v36, 6  ;;  %v6880_v48 = vrot.slane %v26466_v3, 6  ;;  %20879 = vmatpush3.bf16.msra.mxu0 %v26376_v44  ;;  %v31161_v35 = vld [vmem:[#allocation28_spill] sm:$0xff]  ;;  %v17608_v60 = vld [vmem:[%s22490_s16 + $0x4d8] sm:$0x3] }
 0x212   : > { %v26501_v18 = vadd.f32 %v20559_v16, %v4429_v38  ;;  %v4427_v59 = vadd.f32 %v4338_v15, %v31161_v35  ;;  %v4872_v2 = vpop.f32.mrf.mxu1  ;;  %v26506_v22 = vsel %vm23942_vm8, %v17728_v5, %v7397_v45  ;;  %v17625_v40 = vrot.slane %v26446_v47, 10  ;;  %v26511_v51 = vld [vmem:[%s22490_s16 + $0x648] sm:$0xf]  ;;  %20960 = vmatprep.subr.bf16.mxu0 %v26430_v28  ;;  %v31163_v38 = vld [vmem:[#allocation29_spill] sm:$0xff] }
 0x213   : > { %20927 = vmatpush3.bf16.msra.mxu1 %v26390_v33  ;;  %v20514_v44 = vpop.f32.mrf.mxu0  ;;  %v31162_v36 = vcombine.low %v26285_v0, %v26289_v61  ;;  %v6870_v3 = vsel %vm23942_vm8, %v6868_v14, %v6869_v58  ;;  %v7401_v45 = vsel %vm23942_vm8, %v7399_v7, %v7400_v56  ;;  %v6876_v47 = vrot.slane %v26457_v26, 6  ;;  %v17710_v58 = vld [vmem:[%s22490_s16 + $0x644] sm:$0xc] }
 0x214   : > { %v17729_v5 = vrot.slane %v26460_v50, 10  ;;  %21008 = vmatprep.subr.bf16.mxu1 %v26472_v27  ;;  %v26525_v33 = vadd.f32 %v4872_v2, %v4427_v59  ;;  %v4432_v16 = vadd.f32 %v20514_v44, %v31163_v38  ;;  %v20562_v15 = vpop.f32.mrf.mxu1  ;;  %v31164_v0 = vcombine.low %v26336_v32, %v26340_v9  ;;  %v31166_v44 = vld [vmem:[#allocation30_spill] sm:$0xff]  ;;  %v17712_v38 = vld [vmem:[%s22490_s16 + $0x64c] sm:$0x3] }
 0x215   : > { %20801 = vmatmul.mubr.bf16.gmra.mxu0 %v31162_v36  ;;  %v31165_v61 = vcombine.low %v26344_v4, %v26361_v11  ;;  %v6875_v14 = vrot.slane %v6873_v63, 4  ;;  %v7407_v26 = vrot.slane %v26476_v29, 6  ;;  %v4351_v50 = vpop.f32.mrf.mxu0  ;;  %v7406_v7 = vrot.slane %v7404_v10, 4 }
 0x216   : > { %20849 = vmatmul.mubr.bf16.gmra.mxu1 %v31164_v0  ;;  %v17626_v56 = vrot.slane %v17606_v25, 10  ;;  %v6882_v35 = vrot.slane %v6880_v48, 4  ;;  %v6883_v59 = vrot.slane %v17608_v60, 6  ;;  %v26536_v2 = vadd.f32 %v20562_v15, %v4432_v16  ;;  %v4885_v9 = vpop.f32.mrf.mxu1  ;;  %v17609_v0 = vld [vmem:[%s22490_s16 + $0x4f0] sm:$0xc] }
 0x217   : > { %20804 = vmatprep.mubr.bf16.mxu0 %v31165_v61  ;;  %20852 = vmatprep.mubr.bf16.mxu1 %v17758_v62  ;;  %v4430_v32 = vadd.f32 %v4351_v50, %v31166_v44  ;;  %v17655_v4 = vcombine.low %v26441_v30, %v26454_v23  ;;  %v7411_v11 = vrot.slane %v26511_v51, 6  ;;  %v20515_v29 = vpop.f32.mrf.mxu0  ;;  %v17759_v36 = vcombine.low %v26486_v24, %v26491_v41  ;;  %v17611_v61 = vld [vmem:[%s22490_s16 + $0x4f8] sm:$0x3]  ;;  %v17715_v50 = vld [vmem:[%s22490_s16 + $0x66c] sm:$0x3] }
 0x218   : > { %v17656_v62 = vcombine.low %v26495_v6, %v6870_v3  ;;  %v17760_v25 = vcombine.low %v26506_v22, %v7401_v45  ;;  %v26548_v60 = vsel %vm23942_vm8, %v17625_v40, %v6873_v63  ;;  %v4433_v30 = vadd.f32 %v20515_v29, %v25739_v55  ;;  %v20563_v23 = vpop.f32.mrf.mxu1  ;;  %v26563_v6 = vld [vmem:[%s22490_s16 + $0x4f4] sm:$0xf]  ;;  %v17844_v44 = vld [vmem:[%s22490_s16 + $0x490] sm:$0xc] }
 0x219   : > { %v26551_v16 = vadd.f32 %v4885_v9, %v4430_v32  ;;  %v26556_v41 = vsel %vm23942_vm8, %v6875_v14, %v6876_v47  ;;  %v26560_v24 = vsel %vm23942_vm8, %v17729_v5, %v7404_v10  ;;  %v4354_v63 = vpop.f32.mrf.mxu0  ;;  %v26567_v22 = vsel %vm23942_vm8, %v7406_v7, %v7407_v26  ;;  %v17714_v10 = vld [vmem:[%s22490_s16 + $0x668] sm:$0xf]  ;;  %v17713_v14 = vld [vmem:[%s22490_s16 + $0x664] sm:$0xc]  ;;  %v17845_v7 = vld [vmem:[%s22490_s16 + $0x494] sm:$0xf] }
 0x21a   : > { %v26571_v55 = vsel %vm23942_vm8, %v17626_v56, %v6880_v48  ;;  %v26575_v40 = vsel %vm23942_vm8, %v6882_v35, %v6883_v59  ;;  %v17730_v51 = vrot.slane %v17710_v58, 10  ;;  %v26578_v3 = vadd.f32 %v20563_v23, %v4433_v30  ;;  %v4888_v47 = vpop.f32.mrf.mxu1  ;;  %v31167_v58 = vld [vmem:[#allocation31_spill] sm:$0xff]  ;;  %v17846_v23 = vld [vmem:[%s22490_s16 + $0x498] sm:$0x3] }
 0x21b   : > { %v4431_v45 = vadd.f32 %v4354_v63, %v25766_v53  ;;  %v7413_v5 = vrot.slane %v7411_v11, 4  ;;  %v7414_v15 = vrot.slane %v17712_v38, 6  ;;  %v20518_v48 = vpop.f32.mrf.mxu0  ;;  %v6887_v26 = vrot.slane %v26563_v6, 6 }
 0x21c   : > { %v4436_v35 = vadd.f32 %v20518_v48, %v31167_v58  ;;  %v20566_v59 = vpop.f32.mrf.mxu1  ;;  %v7418_v53 = vrot.slane %v17714_v10, 6  ;;  %v17657_v9 = vcombine.low %v26548_v60, %v26556_v41  ;;  %v17658_v29 = vcombine.low %v26571_v55, %v26575_v40  ;;  %v17848_v55 = vld [vmem:[%s22490_s16 + $0x4b4] sm:$0xf] }
 0x21d   : > { %20805 = vmatmul.mubr.bf16.gmra.mxu0 %v17655_v4  ;;  %v26587_v56 = vadd.f32 %v4888_v47, %v4431_v45  ;;  %v4367_v32 = vpop.f32.mrf.mxu0  ;;  %v17761_v4 = vcombine.low %v26560_v24, %v26567_v22  ;;  %v7412_v38 = vsel %vm23942_vm8, %v17730_v51, %v7411_v11  ;;  %v8229_v6 = vrot.slane %v17845_v7, 6  ;;  %v17851_v58 = vld [vmem:[%s22490_s16 + $0x4d4] sm:$0xf] }
 0x21e   : > { %20853 = vmatmul.mubr.bf16.gmra.mxu1 %v17759_v36  ;;  %20808 = vmatprep.mubr.bf16.mxu0 %v17656_v62  ;;  %v26599_v30 = vadd.f32 %v20566_v59, %v4436_v35  ;;  %v4434_v36 = vadd.f32 %v4367_v32, %v25796_v52  ;;  %v4901_v62 = vpop.f32.mrf.mxu1  ;;  %v17627_v41 = vrot.slane %v17609_v0, 10  ;;  %v6889_v63 = vrot.slane %v6887_v26, 4  ;;  %v31168_v32 = vld [vmem:[#allocation32_spill] sm:$0xff] }
 0x21f   : > { %20856 = vmatprep.mubr.bf16.mxu1 %v17760_v25  ;;  %v7415_v25 = vsel %vm23942_vm8, %v7413_v5, %v7414_v15  ;;  %v20519_v60 = vpop.f32.mrf.mxu0  ;;  %v6890_v24 = vrot.slane %v17611_v61, 6  ;;  %v17731_v22 = vrot.slane %v17713_v14, 10  ;;  %v7420_v52 = vrot.slane %v7418_v53, 4  ;;  %v17847_v14 = vld [vmem:[%s22490_s16 + $0x4b0] sm:$0xc] }
 0x220   : > { %v26606_v40 = vadd.f32 %v4901_v62, %v4434_v36  ;;  %v4437_v11 = vadd.f32 %v20519_v60, %v25821_v39  ;;  %v20567_v51 = vpop.f32.mrf.mxu1  ;;  %v7421_v10 = vrot.slane %v17715_v50, 6  ;;  %v17762_v47 = vcombine.low %v7412_v38, %v7415_v25  ;;  %v17849_v62 = vld [vmem:[%s22490_s16 + $0x4b8] sm:$0x3] }
 0x221   : > { %v4370_v45 = vpop.f32.mrf.mxu0  ;;  %v17892_v5 = vrot.slane %v17844_v44, 10  ;;  %v8231_v61 = vrot.slane %v8229_v6, 4  ;;  %v8232_v7 = vrot.slane %v17846_v23, 6  ;;  %v6888_v39 = vsel %vm23942_vm8, %v17627_v41, %v6887_v26 }
 0x222   : > { %v26609_v15 = vadd.f32 %v20567_v51, %v4437_v11  ;;  %v4435_v0 = vadd.f32 %v4370_v45, %v25850_v13  ;;  %v4904_v48 = vpop.f32.mrf.mxu1  ;;  %v6891_v50 = vsel %vm23942_vm8, %v6889_v63, %v6890_v24  ;;  %v7419_v59 = vsel %vm23942_vm8, %v17731_v22, %v7418_v53  ;;  %v31169_v53 = vld [vmem:[#allocation33_spill] sm:$0xff]  ;;  %v22056_v51 = vld [vmem:[%s22490_s16 + $0x48c] sm:$0xff]   ;;  %v31170_v45 = vld [vmem:[#allocation34_spill] sm:$0xff] }
 0x223   : > { %v20522_v35 = vpop.f32.mrf.mxu0  ;;  %v8236_v44 = vrot.slane %v17848_v55, 6  ;;  %v7422_v26 = vsel %vm23942_vm8, %v7420_v52, %v7421_v10  ;;  %v8243_v25 = vrot.slane %v17851_v58, 6  ;;  %v8230_v63 = vsel %vm23942_vm8, %v17892_v5, %v8229_v6  ;;  %v17852_v24 = vld [vmem:[%s22490_s16 + $0x4d8] sm:$0x3] }
 0x224   : > { %v26620_v13 = vadd.f32 %v4904_v48, %v4435_v0  ;;  %v4440_v38 = vadd.f32 %v20522_v35, %v31168_v32  ;;  %v20570_v36 = vpop.f32.mrf.mxu1  ;;  %v17659_v55 = vcombine.low %v6888_v39, %v6891_v50  ;;  %v17763_v11 = vcombine.low %v7419_v59, %v7422_v26  ;;  %v17854_v35 = vld [vmem:[%s22490_s16 + $0x4f4] sm:$0xf]  ;;  %v31171_v50 = vld [vmem:[#allocation35_spill] sm:$0xff] }
 0x225   : > { %20809 = vmatmul.mubr.bf16.gmra.mxu0 %v17657_v9  ;;  %v4383_v9 = vpop.f32.mrf.mxu0  ;;  %v17893_v52 = vrot.slane %v17847_v14, 10  ;;  %v8238_v48 = vrot.slane %v8236_v44, 4  ;;  %v8239_v58 = vrot.slane %v17849_v62, 6  ;;  %v17857_v26 = vld [vmem:[%s22490_s16 + $0x514] sm:$0xf] }
 0x226   : > { %20857 = vmatmul.mubr.bf16.gmra.mxu1 %v17761_v4  ;;  %20812 = vmatprep.mubr.bf16.mxu0 %v17658_v29  ;;  %v26626_v23 = vadd.f32 %v20570_v36, %v4440_v38  ;;  %v4438_v60 = vadd.f32 %v4383_v9, %v31169_v53  ;;  %v4917_v41 = vpop.f32.mrf.mxu1  ;;  %v8233_v4 = vsel %vm23942_vm8, %v8231_v61, %v8232_v7  ;;  %v17850_v29 = vld [vmem:[%s22490_s16 + $0x4d0] sm:$0xc]  ;;  %v8245_v61 = vrot.slane %v8243_v25, 4 }
 0x227   : > { %20860 = vmatprep.mubr.bf16.mxu1 %v17762_v47  ;;  %v20523_v22 = vpop.f32.mrf.mxu0  ;;  %v17924_v5 = vcombine.low %v8230_v63, %v8233_v4  ;;  %v17894_v32 = vrot.slane %v17850_v29, 10  ;;  %v8246_v7 = vrot.slane %v17852_v24, 6  ;;  %v8237_v36 = vsel %vm23942_vm8, %v17893_v52, %v8236_v44  ;;  %v31172_v62 = vld [vmem:[#allocation36_spill] sm:$0xff]  ;;  %v17855_v4 = vld [vmem:[%s22490_s16 + $0x4f8] sm:$0x3] }
 0x228   : > { %v26636_v10 = vadd.f32 %v4917_v41, %v4438_v60  ;;  %v4441_v47 = vadd.f32 %v20523_v22, %v31170_v45  ;;  %v20571_v0 = vpop.f32.mrf.mxu1  ;;  %v8240_v41 = vsel %vm23942_vm8, %v8238_v48, %v8239_v58  ;;  %v17853_v63 = vld [vmem:[%s22490_s16 + $0x4f0] sm:$0xc]  ;;  %v8250_v29 = vrot.slane %v17854_v35, 6  ;;  %v31173_v52 = vld [vmem:[#allocation37_spill] sm:$0xff] }
 0x229   : > { %v4386_v6 = vpop.f32.mrf.mxu0  ;;  %v8244_v44 = vsel %vm23942_vm8, %v17894_v32, %v8243_v25  ;;  %v17856_v22 = vld [vmem:[%s22490_s16 + $0x510] sm:$0xc]  ;;  %v17925_v58 = vcombine.low %v8237_v36, %v8240_v41  ;;  %v31174_v32 = vld [vmem:[#allocation38_spill] sm:$0xff] }
 0x22a   : > { %v26640_v39 = vadd.f32 %v20571_v0, %v4441_v47  ;;  %v4439_v14 = vadd.f32 %v4386_v6, %v31171_v50  ;;  %v4920_v59 = vpop.f32.mrf.mxu1  ;;  %v8247_v47 = vsel %vm23942_vm8, %v8245_v61, %v8246_v7  ;;  %v8257_v0 = vrot.slane %v17857_v26, 6  ;;  %v22060_v35 = vld [vmem:[%s22490_s16 + $0x4cc] sm:$0xff]   ;;  %v17858_v50 = vld [vmem:[%s22490_s16 + $0x518] sm:$0x3] }
 0x22b   : > { %v20526_v38 = vpop.f32.mrf.mxu0  ;;  %v17895_v6 = vrot.slane %v17853_v63, 10  ;;  %v17896_v61 = vrot.slane %v17856_v22, 10  ;;  %v26671_v7 = vld [vmem:[%s22490_s16 + $0x530] sm:$0xc]  ;;  %v17926_v36 = vcombine.low %v8244_v44, %v8247_v47 }
 0x22c   : > { %v26646_v9 = vadd.f32 %v4920_v59, %v4439_v14  ;;  %v4444_v53 = vadd.f32 %v20526_v38, %v31172_v62  ;;  %v20574_v60 = vpop.f32.mrf.mxu1  ;;  %v8252_v38 = vrot.slane %v8250_v29, 4  ;;  %v22062_v62 = vld [vmem:[%s30893_s1 + $0x4b0] sm:$0xff]  }
 0x22d   : > { %20813 = vmatmul.mubr.bf16.gmra.mxu0 %v17659_v55  ;;  %v4399_v24 = vpop.f32.mrf.mxu0  ;;  %v8251_v22 = vsel %vm23942_vm8, %v17895_v6, %v8250_v29  ;;  %v22063_v44 = vld [vmem:[%s30893_s1 + $0x4f0] sm:$0xff]   ;;  %v22066_v29 = vld [vmem:[%s30893_s1 + $0x4a8] sm:$0xff]  }
 0x22e   : > { %20861 = vmatmul.mubr.bf16.gmra.mxu1 %v17763_v11  ;;  %20880 = vmatprep.mubr.bf16.mxu0 %v22056_v51  ;;  %v26656_v55 = vadd.f32 %v20574_v60, %v4444_v53  ;;  %v4442_v45 = vadd.f32 %v4399_v24, %v31173_v52  ;;  %v4933_v11 = vpop.f32.mrf.mxu1  ;;  %v22057_v51 = vld [vmem:[%s22490_s16 + $0x4ac] sm:$0xff]   ;;  %v26674_v53 = vld [vmem:[%s22490_s16 + $0x534] sm:$0xf]  ;;  %v8260_v24 = vrot.slane %v17858_v50, 6  ;;  %v17897_v50 = vrot.slane %v26671_v7, 10 }
 0x22f   : > { %20928 = vmatprep.mubr.bf16.mxu1 %v17924_v5  ;;  %v20527_v48 = vpop.f32.mrf.mxu0  ;;  %v8253_v5 = vrot.slane %v17855_v4, 6  ;;  %v8259_v4 = vrot.slane %v8257_v0, 4  ;;  %v26680_v52 = vld [vmem:[%s22490_s16 + $0x554] sm:$0xf]  ;;  %v26700_v6 = vld [vmem:[%s30893_s1 + $0x4e8] sm:$0xff]  }
 0x230   : > { %v26664_v25 = vadd.f32 %v4933_v11, %v4442_v45  ;;  %v4445_v14 = vadd.f32 %v20527_v48, %v31174_v32  ;;  %v20575_v59 = vpop.f32.mrf.mxu1  ;;  %v8264_v48 = vrot.slane %v26674_v53, 6  ;;  %v17862_v32 = vld [vmem:[%s22490_s16 + $0x550] sm:$0xc] }
 0x231   : > { %v4402_v26 = vpop.f32.mrf.mxu0 }
 0x232   : > { %v26676_v60 = vadd.f32 %v20575_v59, %v4445_v14  ;;  %v4443_v41 = vadd.f32 %v4402_v26, %v26045_v34  ;;  %v4936_v63 = vpop.f32.mrf.mxu1  ;;  %v8271_v14 = vrot.slane %v26680_v52, 6 }
 0x233   : > { %v20594_v45 = vpop.f32.mrf.mxu0 }
 0x234   : > { %v26687_v11 = vadd.f32 %v4936_v63, %v4443_v41  ;;  %v5336_v34 = vadd.f32 %v20594_v45, %v26084_v20  ;;  %v20642_v47 = vpop.f32.mrf.mxu1  ;;  %v22064_v63 = vld [vmem:[%s22490_s16 + $0x50c] sm:$0xff]  }
 0x235   : > { %20881 = vmatmul.mubr.bf16.vlgmr.msra.gmra.mxu0 %v22057_v51  ;;  %v8254_v51 = vsel %vm23942_vm8, %v8252_v38, %v8253_v5  ;;  %v5207_v20 = vpop.f32.mrf.mxu0  ;;  %v17861_v5 = vld [vmem:[%s22490_s16 + $0x538] sm:$0x3] }
 0x236   : > { %20929 = vmatmul.mubr.bf16.vlgmr.msra.gmra.mxu1 %v17925_v58  ;;  %20961 = vmatpush3.bf16.msra.mxu0 %v26430_v28  ;;  %v22061_v28 = vld [vmem:[%s22490_s16 + $0x4ec] sm:$0xff]   ;;  %v8258_v58 = vsel %vm23942_vm8, %v17896_v61, %v8257_v0  ;;  %v26710_v59 = vadd.f32 %v20642_v47, %v5336_v34  ;;  %v5334_v38 = vadd.f32 %v5207_v20, %v26114_v42  ;;  %v5737_v26 = vpop.f32.mrf.mxu1  ;;  %v8266_v42 = vrot.slane %v8264_v48, 4  ;;  %v26721_v34 = vld [vmem:[%s22490_s16 + $0x574] sm:$0xf] }
 0x237   : > { %21009 = vmatpush3.bf16.msra.mxu1 %v26472_v27  ;;  %20884 = vmatprep.mubr.bf16.mxu0 %v22060_v35  ;;  %v8261_v27 = vsel %vm23942_vm8, %v8259_v4, %v8260_v24  ;;  %v17864_v35 = vld [vmem:[%s22490_s16 + $0x558] sm:$0x3]  ;;  %v20595_v53 = vpop.f32.mrf.mxu0  ;;  %v17927_v0 = vcombine.low %v8251_v22, %v8254_v51  ;;  %v8267_v52 = vrot.slane %v17861_v5, 6  ;;  %v17898_v4 = vrot.slane %v17862_v32, 10  ;;  %v17865_v5 = vld [vmem:[%s22490_s16 + $0x570] sm:$0xc] }
 0x238   : > { %20932 = vmatprep.mubr.bf16.mxu1 %v17926_v36  ;;  %20962 = vmatprep.subr.bf16.mxu0 %v22062_v62  ;;  %v26716_v61 = vadd.f32 %v5737_v26, %v5334_v38  ;;  %v5337_v7 = vadd.f32 %v20595_v53, %v26143_v21  ;;  %v20643_v41 = vpop.f32.mrf.mxu1  ;;  %v17928_v45 = vcombine.low %v8258_v58, %v8261_v27  ;;  %v8273_v24 = vrot.slane %v8271_v14, 4  ;;  %v22070_v21 = vld [vmem:[%s30893_s1 + $0x4a0] sm:$0xff]   ;;  %v26737_v32 = vld [vmem:[%s22490_s16 + $0x578] sm:$0x3]  ;;  %v22065_v53 = vld [vmem:[%s22490_s16 + $0x52c] sm:$0xff]  }
 0x239   : > { %21010 = vmatprep.subr.bf16.mxu1 %v22063_v44  ;;  %v5210_v36 = vpop.f32.mrf.mxu0  ;;  %v8274_v22 = vrot.slane %v17864_v35, 6  ;;  %v8265_v58 = vsel %vm23942_vm8, %v17897_v50, %v8264_v48  ;;  %v22071_v38 = vld [vmem:[%s30893_s1 + $0x4e0] sm:$0xff]   ;;  %v8278_v35 = vrot.slane %v26721_v34, 6  ;;  %v17868_v48 = vld [vmem:[%s22490_s16 + $0x590] sm:$0xc]  ;;  %v22075_v34 = vld [vmem:[%s30893_s1 + $0x4d8] sm:$0xff]  }
 0x23a   : > { %20963 = vmatpush3.bf16.msra.mxu0 %v22062_v62  ;;  %v26726_v62 = vadd.f32 %v20643_v41, %v5337_v7  ;;  %v5335_v47 = vadd.f32 %v5210_v36, %v26165_v54  ;;  %v5740_v51 = vpop.f32.mrf.mxu1  ;;  %v8272_v7 = vsel %vm23942_vm8, %v17898_v4, %v8271_v14  ;;  %v22068_v36 = vld [vmem:[%s22490_s16 + $0x54c] sm:$0xff]   ;;  %v17870_v4 = vld [vmem:[%s22490_s16 + $0x598] sm:$0x3] }
 0x23b   : > { %21011 = vmatpush3.bf16.msra.mxu1 %v22063_v44  ;;  %20964 = vmatprep.subr.bf16.mxu0 %v22066_v29  ;;  %v26731_v44 = vld [vmem:[%s22490_s16 + $0x594] sm:$0xf]  ;;  %v20598_v20 = vpop.f32.mrf.mxu0 }
 0x23c   : > { %21012 = vmatprep.subr.bf16.mxu1 %v26700_v6  ;;  %v26742_v54 = vadd.f32 %v5740_v51, %v5335_v47  ;;  %v5340_v26 = vadd.f32 %v20598_v20, %v26198_v46  ;;  %v20646_v27 = vpop.f32.mrf.mxu1  ;;  %v8285_v46 = vrot.slane %v26731_v44, 6  ;;  %v8280_v51 = vrot.slane %v8278_v35, 4 }
 0x23d   : > { %20885 = vmatmul.mubr.bf16.gmra.mxu0 %v22061_v28  ;;  %v8268_v28 = vsel %vm23942_vm8, %v8266_v42, %v8267_v52  ;;  %v5223_v50 = vpop.f32.mrf.mxu0 }
 0x23e   : > { %20933 = vmatmul.mubr.bf16.gmra.mxu1 %v17927_v0  ;;  %20888 = vmatprep.mubr.bf16.mxu0 %v22064_v63  ;;  %v22074_v0 = vld [vmem:[%s30893_s1 + $0x498] sm:$0xff]   ;;  %v26756_v41 = vadd.f32 %v20646_v27, %v5340_v26  ;;  %v5338_v63 = vadd.f32 %v5223_v50, %v26235_v31  ;;  %v5753_v42 = vpop.f32.mrf.mxu1  ;;  %v17929_v14 = vcombine.low %v8265_v58, %v8268_v28  ;;  %v17900_v58 = vrot.slane %v17868_v48, 10 }
 0x23f   : > { %20936 = vmatprep.mubr.bf16.mxu1 %v17928_v45  ;;  %20965 = vmatpush3.bf16.msra.mxu0 %v22066_v29  ;;  %v8275_v29 = vsel %vm23942_vm8, %v8273_v24, %v8274_v22  ;;  %v20599_v52 = vpop.f32.mrf.mxu0  ;;  %v17899_v45 = vrot.slane %v17865_v5, 10  ;;  %v8281_v24 = vrot.slane %v26737_v32, 6  ;;  %v26772_v22 = vld [vmem:[%s22490_s16 + $0x5b4] sm:$0xf]  ;;  %v8287_v28 = vrot.slane %v8285_v46, 4 }
 0x240   : > { %21013 = vmatpush3.bf16.msra.mxu1 %v26700_v6  ;;  %20966 = vmatprep.subr.bf16.mxu0 %v22070_v21  ;;  %v26767_v47 = vadd.f32 %v5753_v42, %v5338_v63  ;;  %v5341_v31 = vadd.f32 %v20599_v52, %v26271_v57  ;;  %v20647_v6 = vpop.f32.mrf.mxu1  ;;  %v17930_v20 = vcombine.low %v8272_v7, %v8275_v29  ;;  %v8288_v50 = vrot.slane %v17870_v4, 6  ;;  %v17871_v57 = vld [vmem:[%s22490_s16 + $0x5b0] sm:$0xc] }
 0x241   : > { %21014 = vmatprep.subr.bf16.mxu1 %v22071_v38  ;;  %v5226_v44 = vpop.f32.mrf.mxu0  ;;  %v22078_v32 = vld [vmem:[%s30893_s1 + $0x490] sm:$0xff]   ;;  %v8292_v48 = vrot.slane %v26772_v22, 6  ;;  %v8286_v52 = vsel %vm23942_vm8, %v17900_v58, %v8285_v46  ;;  %v22082_v46 = vld [vmem:[%s30893_s1 + $0x488] sm:$0xff]   ;;  %v17901_v22 = vrot.slane %v17871_v57, 10 }
 0x242   : > { %v26774_v5 = vadd.f32 %v20647_v6, %v5341_v31  ;;  %v5339_v26 = vadd.f32 %v5226_v44, %v26291_v1  ;;  %v5756_v27 = vpop.f32.mrf.mxu1  ;;  %v26785_v1 = vld [vmem:[%s22490_s16 + $0x5d4] sm:$0xf]  ;;  %v22083_v44 = vld [vmem:[%s30893_s1 + $0x4c8] sm:$0xff]  }
 0x243   : > { %20967 = vmatpush3.bf16.msra.mxu0 %v22070_v21  ;;  %v20602_v63 = vpop.f32.mrf.mxu0  ;;  %v8279_v21 = vsel %vm23942_vm8, %v17899_v45, %v8278_v35  ;;  %v8282_v35 = vsel %vm23942_vm8, %v8280_v51, %v8281_v24  ;;  %v17873_v45 = vld [vmem:[%s22490_s16 + $0x5b8] sm:$0x3]  ;;  %v8299_v6 = vrot.slane %v26785_v1, 6 }
 0x244   : > { %21015 = vmatpush3.bf16.msra.mxu1 %v22071_v38  ;;  %20968 = vmatprep.subr.bf16.mxu0 %v22074_v0  ;;  %v22079_v38 = vld [vmem:[%s30893_s1 + $0x4d0] sm:$0xff]   ;;  %v26790_v7 = vadd.f32 %v5756_v27, %v5339_v26  ;;  %v5344_v42 = vadd.f32 %v20602_v63, %v26325_v17  ;;  %v20650_v29 = vpop.f32.mrf.mxu1  ;;  %v17931_v24 = vcombine.low %v8279_v21, %v8282_v35  ;;  %v8294_v27 = vrot.slane %v8292_v48, 4 }
 0x245   : > { %20889 = vmatmul.mubr.bf16.gmra.mxu0 %v22065_v53  ;;  %21016 = vmatprep.subr.bf16.mxu1 %v22075_v34  ;;  %v5239_v53 = vpop.f32.mrf.mxu0  ;;  %v22072_v26 = vld [vmem:[%s22490_s16 + $0x58c] sm:$0xff]   ;;  %v26818_v21 = vld [vmem:[%s22490_s16 + $0x5f4] sm:$0xf]  ;;  %v8301_v35 = vrot.slane %v8299_v6, 4 }
 0x246   : > { %20937 = vmatmul.mubr.bf16.gmra.mxu1 %v17929_v14  ;;  %20892 = vmatprep.mubr.bf16.mxu0 %v22068_v36  ;;  %v26798_v4 = vadd.f32 %v20650_v29, %v5344_v42  ;;  %v5342_v31 = vadd.f32 %v5239_v53, %v26356_v12  ;;  %v5769_v17 = vpop.f32.mrf.mxu1  ;;  %v8289_v14 = vsel %vm23942_vm8, %v8287_v28, %v8288_v50  ;;  %v17874_v36 = vld [vmem:[%s22490_s16 + $0x5d0] sm:$0xc]  ;;  %v17876_v12 = vld [vmem:[%s22490_s16 + $0x5d8] sm:$0x3]  ;;  %v8295_v28 = vrot.slane %v17873_v45, 6 }
 0x247   : > { %20940 = vmatprep.mubr.bf16.mxu1 %v17930_v20  ;;  %20969 = vmatpush3.bf16.msra.mxu0 %v22074_v0  ;;  %v20603_v51 = vpop.f32.mrf.mxu0  ;;  %v22069_v0 = vld [vmem:[%s22490_s16 + $0x56c] sm:$0xff]   ;;  %v17932_v63 = vcombine.low %v8286_v52, %v8289_v14  ;;  %v17902_v1 = vrot.slane %v17874_v36, 10  ;;  %v8302_v53 = vrot.slane %v17876_v12, 6  ;;  %v26829_v52 = vld [vmem:[%s22490_s16 + $0x614] sm:$0xf] }
 0x248   : > { %21017 = vmatpush3.bf16.msra.mxu1 %v22075_v34  ;;  %20970 = vmatprep.subr.bf16.mxu0 %v22078_v32  ;;  %v26813_v34 = vadd.f32 %v5769_v17, %v5342_v31  ;;  %v5345_v20 = vadd.f32 %v20603_v51, %v26392_v19  ;;  %v20651_v58 = vpop.f32.mrf.mxu1  ;;  %v22086_v19 = vld [vmem:[%s30893_s1 + $0x480] sm:$0xff]   ;;  %v8296_v14 = vsel %vm23942_vm8, %v8294_v27, %v8295_v28  ;;  %v17877_v36 = vld [vmem:[%s22490_s16 + $0x5f0] sm:$0xc] }
 0x249   : > { %21018 = vmatprep.subr.bf16.mxu1 %v22079_v38  ;;  %v5242_v50 = vpop.f32.mrf.mxu0  ;;  %v22073_v27 = vld [vmem:[%s22490_s16 + $0x5ac] sm:$0xff]  }
 0x24a   : > { %v26820_v57 = vadd.f32 %v20651_v58, %v5345_v20  ;;  %v5343_v42 = vadd.f32 %v5242_v50, %v26414_v43  ;;  %v5772_v29 = vpop.f32.mrf.mxu1  ;;  %v22087_v43 = vld [vmem:[%s30893_s1 + $0x4c0] sm:$0xff]   ;;  %v8303_v20 = vsel %vm23942_vm8, %v8301_v35, %v8302_v53  ;;  %v17880_v58 = vld [vmem:[%s22490_s16 + $0x610] sm:$0xc]  ;;  %v17882_v50 = vld [vmem:[%s22490_s16 + $0x618] sm:$0x3] }
 0x24b   : > { %20971 = vmatpush3.bf16.msra.mxu0 %v22078_v32  ;;  %v20606_v45 = vpop.f32.mrf.mxu0  ;;  %v8293_v32 = vsel %vm23942_vm8, %v17901_v22, %v8292_v48  ;;  %v8306_v48 = vrot.slane %v26818_v21, 6  ;;  %v17879_v22 = vld [vmem:[%s22490_s16 + $0x5f8] sm:$0x3] }
 0x24c   : > { %21019 = vmatpush3.bf16.msra.mxu1 %v22079_v38  ;;  %20972 = vmatprep.subr.bf16.mxu0 %v22082_v46  ;;  %v26834_v31 = vadd.f32 %v5772_v29, %v5343_v42  ;;  %v5348_v38 = vadd.f32 %v20606_v45, %v26449_v37  ;;  %v20654_v17 = vpop.f32.mrf.mxu1  ;;  %v17933_v28 = vcombine.low %v8293_v32, %v8296_v14  ;;  %v22076_v42 = vld [vmem:[%s22490_s16 + $0x5cc] sm:$0xff]   ;;  %v8309_v35 = vrot.slane %v17879_v22, 6  ;;  %v17887_v22 = vld [vmem:[%s22490_s16 + $0x654] sm:$0xf] }
 0x24d   : > { %20893 = vmatmul.mubr.bf16.gmra.mxu0 %v22069_v0  ;;  %21020 = vmatprep.subr.bf16.mxu1 %v22083_v44  ;;  %v5255_v51 = vpop.f32.mrf.mxu0  ;;  %v8300_v0 = vsel %vm23942_vm8, %v17902_v1, %v8299_v6  ;;  %v26854_v6 = vld [vmem:[%s30893_s1 + $0x538] sm:$0xff]   ;;  %v8308_v29 = vrot.slane %v8306_v48, 4  ;;  %v17904_v32 = vrot.slane %v17880_v58, 10 }
 0x24e   : > { %20941 = vmatmul.mubr.bf16.gmra.mxu1 %v17931_v24  ;;  %20896 = vmatprep.mubr.bf16.mxu0 %v22072_v26  ;;  %v26844_v37 = vadd.f32 %v20654_v17, %v5348_v38  ;;  %v5346_v24 = vadd.f32 %v5255_v51, %v26479_v49  ;;  %v5785_v12 = vpop.f32.mrf.mxu1  ;;  %v8313_v26 = vrot.slane %v26829_v52, 6  ;;  %v17903_v49 = vrot.slane %v17877_v36, 10  ;;  %v17884_v52 = vld [vmem:[%s22490_s16 + $0x634] sm:$0xf] }
 0x24f   : > { %20944 = vmatprep.mubr.bf16.mxu1 %v17932_v63  ;;  %20973 = vmatpush3.bf16.msra.mxu0 %v22082_v46  ;;  %v20607_v46 = vpop.f32.mrf.mxu0  ;;  %v26861_v63 = vld [vmem:[%s30893_s1 + $0x578] sm:$0xff]   ;;  %v17934_v45 = vcombine.low %v8300_v0, %v8303_v20  ;;  %v8316_v51 = vrot.slane %v17882_v50, 6  ;;  %v8320_v20 = vrot.slane %v17884_v52, 6  ;;  %v17886_v50 = vld [vmem:[%s22490_s16 + $0x650] sm:$0xc] }
 0x250   : > { %21021 = vmatpush3.bf16.msra.mxu1 %v22083_v44  ;;  %20974 = vmatprep.subr.bf16.mxu0 %v22086_v19  ;;  %v26863_v1 = vadd.f32 %v5785_v12, %v5346_v24  ;;  %v5349_v44 = vadd.f32 %v20607_v46, %v26501_v18  ;;  %v20655_v21 = vpop.f32.mrf.mxu1  ;;  %v8315_v36 = vrot.slane %v8313_v26, 4  ;;  %v8307_v0 = vsel %vm23942_vm8, %v17903_v49, %v8306_v48  ;;  %v17883_v12 = vld [vmem:[%s22490_s16 + $0x630] sm:$0xc]  ;;  %v17885_v46 = vld [vmem:[%s22490_s16 + $0x638] sm:$0x3] }
 0x251   : > { %21022 = vmatprep.subr.bf16.mxu1 %v22087_v43  ;;  %v5258_v53 = vpop.f32.mrf.mxu0  ;;  %v8314_v48 = vsel %vm23942_vm8, %v17904_v32, %v8313_v26  ;;  %v22080_v52 = vld [vmem:[%s22490_s16 + $0x60c] sm:$0xff]  }
 0x252   : > { %v26868_v38 = vadd.f32 %v20655_v21, %v5349_v44  ;;  %v5347_v17 = vadd.f32 %v5258_v53, %v26525_v33  ;;  %v5788_v14 = vpop.f32.mrf.mxu1  ;;  %v8317_v49 = vsel %vm23942_vm8, %v8315_v36, %v8316_v51  ;;  %v8327_v44 = vrot.slane %v17887_v22, 6  ;;  %v17888_v53 = vld [vmem:[%s22490_s16 + $0x658] sm:$0x3] }
 0x253   : > { %20975 = vmatpush3.bf16.msra.mxu0 %v22086_v19  ;;  %v20610_v18 = vpop.f32.mrf.mxu0  ;;  %v17936_v36 = vcombine.low %v8314_v48, %v8317_v49  ;;  %v17906_v51 = vrot.slane %v17886_v50, 10  ;;  %v17891_v49 = vld [vmem:[%s22490_s16 + $0x678] sm:$0x3] }
 0x254   : > { %21023 = vmatpush3.bf16.msra.mxu1 %v22087_v43  ;;  %21056 = vmatprep.subr.bf16.mxu0 %v26854_v6  ;;  %v26876_v19 = vadd.f32 %v5788_v14, %v5347_v17  ;;  %v5352_v33 = vadd.f32 %v20610_v18, %v26536_v2  ;;  %v20658_v24 = vpop.f32.mrf.mxu1  ;;  %v8310_v43 = vsel %vm23942_vm8, %v8308_v29, %v8309_v35  ;;  %v17905_v35 = vrot.slane %v17883_v12, 10  ;;  %v17890_v18 = vld [vmem:[%s22490_s16 + $0x674] sm:$0xf]  ;;  %v17949_v12 = vld [vmem:[%s22490_s16 + $0xc4] sm:$0xf] }
 0x255   : > { %20897 = vmatmul.mubr.bf16.gmra.mxu0 %v22073_v27  ;;  %21104 = vmatprep.subr.bf16.mxu1 %v26861_v63  ;;  %v5271_v58 = vpop.f32.mrf.mxu0  ;;  %v17935_v29 = vcombine.low %v8307_v0, %v8310_v43  ;;  %v8323_v17 = vrot.slane %v17885_v46, 6  ;;  %v8330_v43 = vrot.slane %v17888_v53, 6  ;;  %v8334_v50 = vrot.slane %v17890_v18, 6 }
 0x256   : > { %20945 = vmatmul.mubr.bf16.gmra.mxu1 %v17933_v28  ;;  %20900 = vmatprep.mubr.bf16.mxu0 %v22076_v42  ;;  %v26885_v27 = vadd.f32 %v20658_v24, %v5352_v33  ;;  %v5350_v2 = vadd.f32 %v5271_v58, %v26551_v16  ;;  %v5801_v28 = vpop.f32.mrf.mxu1  ;;  %v22077_v42 = vld [vmem:[%s22490_s16 + $0x5ec] sm:$0xff]   ;;  %v8322_v16 = vrot.slane %v8320_v20, 4  ;;  %v8329_v24 = vrot.slane %v8327_v44, 4 }
 0x257   : > { %20948 = vmatprep.mubr.bf16.mxu1 %v17934_v45  ;;  %v20611_v21 = vpop.f32.mrf.mxu0 }
 0x258   : > { %v26893_v26 = vadd.f32 %v5801_v28, %v5350_v2  ;;  %v5353_v45 = vadd.f32 %v20611_v21, %v26578_v3  ;;  %v20659_v32 = vpop.f32.mrf.mxu1  ;;  %v8321_v3 = vsel %vm23942_vm8, %v17905_v35, %v8320_v20  ;;  %v17889_v2 = vld [vmem:[%s22490_s16 + $0x670] sm:$0xc]  ;;  %v8760_v20 = vrot.slane %v17949_v12, 7 }
 0x259   : > { %v5274_v14 = vpop.f32.mrf.mxu0 }
 0x25a   : > { %v26898_v22 = vadd.f32 %v20659_v32, %v5353_v45  ;;  %v5351_v0 = vadd.f32 %v5274_v14, %v26587_v56  ;;  %v5804_v33 = vpop.f32.mrf.mxu1  ;;  %v8324_v56 = vsel %vm23942_vm8, %v8322_v16, %v8323_v17  ;;  %v17948_v45 = vld [vmem:[%s22490_s16 + $0xc0] sm:$0x8]  ;;  %v17950_v32 = vld [vmem:[%s22490_s16 + $0xc8] sm:$0x7]  ;;  %v22081_v16 = vld [vmem:[%s22490_s16 + $0x62c] sm:$0xff]   ;;  %v17907_v14 = vrot.slane %v17889_v2, 10 }
 0x25b   : > { %v20614_v58 = vpop.f32.mrf.mxu0  ;;  %v17937_v17 = vcombine.low %v8321_v3, %v8324_v56  ;;  %v8762_v12 = vrot.slane %v8760_v20, 4 }
 0x25c   : > { %v26905_v46 = vadd.f32 %v5804_v33, %v5351_v0  ;;  %v5356_v48 = vadd.f32 %v20614_v58, %v26599_v30  ;;  %v20662_v28 = vpop.f32.mrf.mxu1  ;;  %v8328_v30 = vsel %vm23942_vm8, %v17906_v51, %v8327_v44  ;;  %v8336_v33 = vrot.slane %v8334_v50, 4 }
 0x25d   : > { %20901 = vmatmul.mubr.bf16.gmra.mxu0 %v22077_v42  ;;  %v5287_v21 = vpop.f32.mrf.mxu0  ;;  %v8337_v44 = vrot.slane %v17891_v49, 6  ;;  %v8763_v58 = vrot.slane %v17950_v32, 7  ;;  %v17955_v49 = vld [vmem:[%s22490_s16 + $0x104] sm:$0xf] }
 0x25e   : > { %20949 = vmatmul.mubr.bf16.gmra.mxu1 %v17935_v29  ;;  %20904 = vmatprep.mubr.bf16.mxu0 %v22080_v52  ;;  %v26911_v42 = vadd.f32 %v20662_v28, %v5356_v48  ;;  %v5354_v35 = vadd.f32 %v5287_v21, %v26606_v40  ;;  %v5817_v53 = vpop.f32.mrf.mxu1  ;;  %v8331_v29 = vsel %vm23942_vm8, %v8329_v24, %v8330_v43  ;;  %v22084_v40 = vld [vmem:[%s22490_s16 + $0x64c] sm:$0xff]   ;;  %v17996_v43 = vrot.slane %v17948_v45, 11  ;;  %v17952_v48 = vld [vmem:[%s22490_s16 + $0xe4] sm:$0xf]  ;;  %v17951_v21 = vld [vmem:[%s22490_s16 + $0xe0] sm:$0x8] }
 0x25f   : > { %20952 = vmatprep.mubr.bf16.mxu1 %v17936_v36  ;;  %v20615_v52 = vpop.f32.mrf.mxu0  ;;  %v17938_v24 = vcombine.low %v8328_v30, %v8331_v29  ;;  %v8767_v45 = vrot.slane %v17952_v48, 7  ;;  %v8774_v8 = vrot.slane %v17955_v49, 7 }
 0x260   : > { %v26921_v36 = vadd.f32 %v5817_v53, %v5354_v35  ;;  %v5357_v18 = vadd.f32 %v20615_v52, %v26609_v15  ;;  %v20663_v0 = vpop.f32.mrf.mxu1  ;;  %v8335_v15 = vsel %vm23942_vm8, %v17907_v14, %v8334_v50  ;;  %v17953_v35 = vld [vmem:[%s22490_s16 + $0xe8] sm:$0x7]  ;;  %v8761_v52 = vsel %vm22776_vm5, %v17996_v43, %v8760_v20 }
 0x261   : > { %v5290_v51 = vpop.f32.mrf.mxu0 }
 0x262   : > { %v26926_v28 = vadd.f32 %v20663_v0, %v5357_v18  ;;  %v5355_v3 = vadd.f32 %v5290_v51, %v26620_v13  ;;  %v5820_v2 = vpop.f32.mrf.mxu1  ;;  %v8338_v13 = vsel %vm23942_vm8, %v8336_v33, %v8337_v44  ;;  %v17954_v18 = vld [vmem:[%s22490_s16 + $0x100] sm:$0x8]  ;;  %v17997_v44 = vrot.slane %v17951_v21, 11 }
 0x263   : > { %v20618_v56 = vpop.f32.mrf.mxu0  ;;  %v17939_v33 = vcombine.low %v8335_v15, %v8338_v13  ;;  %v8770_v51 = vrot.slane %v17953_v35, 7  ;;  %v8776_v35 = vrot.slane %v8774_v8, 4 }
 0x264   : > { %v26934_v53 = vadd.f32 %v5820_v2, %v5355_v3  ;;  %v5360_v30 = vadd.f32 %v20618_v56, %v26626_v23  ;;  %v20666_v29 = vpop.f32.mrf.mxu1  ;;  %v22088_v3 = vld [vmem:[%s22490_s16 + $0xcc] sm:$0xff]   ;;  %v17998_v2 = vrot.slane %v17954_v18, 11  ;;  %v17958_v56 = vld [vmem:[%s22490_s16 + $0x124] sm:$0xf] }
 0x265   : > { %20905 = vmatmul.mubr.bf16.gmra.mxu0 %v22081_v16  ;;  %v5303_v32 = vpop.f32.mrf.mxu0  ;;  %v8764_v16 = vsel %vm22776_vm5, %v8762_v12, %v8763_v58  ;;  %v8781_v18 = vrot.slane %v17958_v56, 7 }
 0x266   : > { %20953 = vmatmul.mubr.bf16.gmra.mxu1 %v17937_v17  ;;  %20908 = vmatprep.mubr.bf16.mxu0 %v22084_v40  ;;  %v26943_v14 = vadd.f32 %v20666_v29, %v5360_v30  ;;  %v5358_v23 = vadd.f32 %v5303_v32, %v26636_v10  ;;  %v5833_v17 = vpop.f32.mrf.mxu1  ;;  %v22085_v40 = vld [vmem:[%s22490_s16 + $0x66c] sm:$0xff]   ;;  %v18028_v58 = vcombine.low %v8761_v52, %v8764_v16  ;;  %v8769_v10 = vrot.slane %v8767_v45, 4  ;;  %v26958_v29 = vld [vmem:[%s22490_s16 + $0x144] sm:$0xf]  ;;  %v17957_v32 = vld [vmem:[%s22490_s16 + $0x120] sm:$0x8] }
 0x267   : > { %20956 = vmatprep.mubr.bf16.mxu1 %v17938_v24  ;;  %v20619_v0 = vpop.f32.mrf.mxu0  ;;  %v17956_v24 = vld [vmem:[%s22490_s16 + $0x108] sm:$0x7] }
 0x268   : > { %v26949_v20 = vadd.f32 %v5833_v17, %v5358_v23  ;;  %v5361_v43 = vadd.f32 %v20619_v0, %v26640_v39  ;;  %v20667_v12 = vpop.f32.mrf.mxu1  ;;  %v8777_v30 = vrot.slane %v17956_v24, 7  ;;  %v8768_v39 = vsel %vm22776_vm5, %v17997_v44, %v8767_v45  ;;  %v17959_v17 = vld [vmem:[%s22490_s16 + $0x128] sm:$0x7]  ;;  %v17960_v24 = vld [vmem:[%s22490_s16 + $0x140] sm:$0x8] }
 0x269   : > { %v5306_v48 = vpop.f32.mrf.mxu0  ;;  %v8788_v45 = vrot.slane %v26958_v29, 7  ;;  %v22092_v29 = vld [vmem:[%s22490_s16 + $0x10c] sm:$0xff]  }
 0x26a   : > { %v26954_v49 = vadd.f32 %v20667_v12, %v5361_v43  ;;  %v5359_v15 = vadd.f32 %v5306_v48, %v26646_v9  ;;  %v5836_v21 = vpop.f32.mrf.mxu1  ;;  %v8771_v9 = vsel %vm22776_vm5, %v8769_v10, %v8770_v51  ;;  %v8778_v51 = vsel %vm22776_vm5, %v8776_v35, %v8777_v30  ;;  %v17962_v43 = vld [vmem:[%s22490_s16 + $0x148] sm:$0x7]  ;;  %v26980_v48 = vld [vmem:[%s22490_s16 + $0x164] sm:$0xf] }
 0x26b   : > { %v20622_v13 = vpop.f32.mrf.mxu0  ;;  %v17999_v10 = vrot.slane %v17957_v32, 11  ;;  %v8791_v32 = vrot.slane %v17962_v43, 7 }
 0x26c   : > { %v26963_v52 = vadd.f32 %v5836_v21, %v5359_v15  ;;  %v5364_v16 = vadd.f32 %v20622_v13, %v26656_v55  ;;  %v20670_v23 = vpop.f32.mrf.mxu1  ;;  %v22089_v15 = vld [vmem:[%s22490_s16 + $0xec] sm:$0xff]   ;;  %v26987_v21 = vld [vmem:[%s22490_s16 + $0x184] sm:$0xf]  ;;  %v18000_v13 = vrot.slane %v17960_v24, 11  ;;  %v17966_v24 = vld [vmem:[%s22490_s16 + $0x180] sm:$0x8] }
 0x26d   : > { %20909 = vmatmul.mubr.bf16.gmra.mxu0 %v22085_v40  ;;  %v5319_v0 = vpop.f32.mrf.mxu0  ;;  %v8802_v43 = vrot.slane %v26987_v21, 7 }
 0x26e   : > { %20957 = vmatmul.mubr.bf16.gmra.mxu1 %v17939_v33  ;;  %20976 = vmatprep.mubr.bf16.mxu0 %v18028_v58  ;;  %v26970_v40 = vadd.f32 %v20670_v23, %v5364_v16  ;;  %v5362_v44 = vadd.f32 %v5319_v0, %v26664_v25  ;;  %v5849_v55 = vpop.f32.mrf.mxu1  ;;  %v8775_v33 = vsel %vm22776_vm5, %v17998_v2, %v8774_v8  ;;  %v8783_v8 = vrot.slane %v8781_v18, 4  ;;  %v17963_v0 = vld [vmem:[%s22490_s16 + $0x160] sm:$0x8] }
 0x26f   : > { %21024 = vmatprep.mubr.bf16.mxu1 %v22088_v3  ;;  %v20623_v12 = vpop.f32.mrf.mxu0  ;;  %v18029_v58 = vcombine.low %v8768_v39, %v8771_v9  ;;  %v8784_v2 = vrot.slane %v17959_v17, 7  ;;  %v18030_v30 = vcombine.low %v8775_v33, %v8778_v51  ;;  %v8790_v39 = vrot.slane %v8788_v45, 4  ;;  %v22094_v9 = vld [vmem:[%s30893_s1 + $0x530] sm:$0xff]   ;;  %v17965_v17 = vld [vmem:[%s22490_s16 + $0x168] sm:$0x7] }
 0x270   : > { %v26982_v3 = vadd.f32 %v5849_v55, %v5362_v44  ;;  %v5365_v25 = vadd.f32 %v20623_v12, %v26676_v60  ;;  %v20671_v56 = vpop.f32.mrf.mxu1  ;;  %v8795_v44 = vrot.slane %v26980_v48, 7  ;;  %v8782_v33 = vsel %vm22776_vm5, %v17999_v10, %v8781_v18  ;;  %v27007_v51 = vld [vmem:[%s30893_s1 + $0x528] sm:$0xff]  }
 0x271   : > { %v5322_v35 = vpop.f32.mrf.mxu0  ;;  %v8785_v18 = vsel %vm22776_vm5, %v8783_v8, %v8784_v2  ;;  %v27020_v10 = vld [vmem:[%s30893_s1 + $0x568] sm:$0xff]   ;;  %v8798_v8 = vrot.slane %v17965_v17, 7 }
 0x272   : > { %v26990_v16 = vadd.f32 %v20671_v56, %v5365_v25  ;;  %v5363_v23 = vadd.f32 %v5322_v35, %v26687_v11  ;;  %v5852_v60 = vpop.f32.mrf.mxu1  ;;  %v22095_v11 = vld [vmem:[%s30893_s1 + $0x570] sm:$0xff]   ;;  %v17968_v25 = vld [vmem:[%s22490_s16 + $0x188] sm:$0x7]  ;;  %v27024_v56 = vld [vmem:[%s22490_s16 + $0x1a4] sm:$0xf] }
 0x273   : > { %v20690_v55 = vpop.f32.mrf.mxu0 }
 0x274   : > { %v27011_v12 = vadd.f32 %v5852_v60, %v5363_v23  ;;  %v6396_v48 = vadd.f32 %v20690_v55, %v26710_v59  ;;  %v8789_v59 = vsel %vm22776_vm5, %v18000_v13, %v8788_v45  ;;  %v8797_v60 = vrot.slane %v8795_v44, 4  ;;  %v22093_v55 = vld [vmem:[%s22490_s16 + $0x12c] sm:$0xff]  }
 0x275   : > { %20977 = vmatmul.mubr.bf16.vlgmr.msra.gmra.mxu0 %v18029_v58  ;;  %v20738_v58 = vpop.f32.mrf.mxu1  ;;  %v6267_v21 = vpop.f32.mrf.mxu0  ;;  %v18031_v13 = vcombine.low %v8782_v33, %v8785_v18  ;;  %v22096_v33 = vld [vmem:[%s22490_s16 + $0x14c] sm:$0xff]  }
 0x276   : > { %21025 = vmatmul.mubr.bf16.vlgmr.msra.gmra.mxu1 %v22089_v15  ;;  %21057 = vmatpush3.bf16.msra.mxu0 %v26854_v6  ;;  %v8792_v6 = vsel %vm22776_vm5, %v8790_v39, %v8791_v32  ;;  %v18001_v15 = vrot.slane %v17963_v0, 11  ;;  %v27031_v2 = vadd.f32 %v20738_v58, %v6396_v48  ;;  %v6394_v35 = vadd.f32 %v6267_v21, %v26716_v61  ;;  %v17969_v48 = vld [vmem:[%s22490_s16 + $0x1a0] sm:$0x8]  ;;  %v17971_v58 = vld [vmem:[%s22490_s16 + $0x1a8] sm:$0x7] }
 0x277   : > { %21105 = vmatpush3.bf16.msra.mxu1 %v26861_v63  ;;  %20980 = vmatprep.mubr.bf16.mxu0 %v18030_v30  ;;  %v6525_v23 = vpop.f32.mrf.mxu1  ;;  %v18002_v63 = vrot.slane %v17966_v24, 11  ;;  %v27035_v30 = vld [vmem:[%s22490_s16 + $0x1c4] sm:$0xf]  ;;  %v20691_v45 = vpop.f32.mrf.mxu0  ;;  %v8804_v39 = vrot.slane %v8802_v43, 4  ;;  %v8805_v32 = vrot.slane %v17968_v25, 7  ;;  %v8809_v61 = vrot.slane %v27024_v56, 7 }
 0x278   : > { %21028 = vmatprep.mubr.bf16.mxu1 %v22092_v29  ;;  %21058 = vmatprep.subr.bf16.mxu0 %v22094_v9  ;;  %v27038_v0 = vadd.f32 %v6525_v23, %v6394_v35  ;;  %v6397_v29 = vadd.f32 %v20691_v45, %v26726_v62  ;;  %v18032_v24 = vcombine.low %v8789_v59, %v8792_v6  ;;  %v17972_v25 = vld [vmem:[%s22490_s16 + $0x1c0] sm:$0x8]  ;;  %v17974_v56 = vld [vmem:[%s22490_s16 + $0x1c8] sm:$0x7]  ;;  %v8816_v62 = vrot.slane %v27035_v30, 7 }
 0x279   : > { %21106 = vmatprep.subr.bf16.mxu1 %v22095_v11  ;;  %v20739_v17 = vpop.f32.mrf.mxu1  ;;  %v6270_v21 = vpop.f32.mrf.mxu0  ;;  %v27047_v18 = vsel %vm22776_vm5, %v18001_v15, %v8795_v44  ;;  %v27058_v6 = vsel %vm22776_vm5, %v8797_v60, %v8798_v8  ;;  %v27063_v44 = vsel %vm22776_vm5, %v18002_v63, %v8802_v43  ;;  %v27069_v15 = vld [vmem:[%s22490_s16 + $0x1e4] sm:$0xf]  ;;  %v18003_v8 = vrot.slane %v17969_v48, 11 }
 0x27a   : > { %21059 = vmatpush3.bf16.msra.mxu0 %v22094_v9  ;;  %v27053_v35 = vadd.f32 %v20739_v17, %v6397_v29  ;;  %v6395_v9 = vadd.f32 %v6270_v21, %v26742_v54  ;;  %v27073_v54 = vsel %vm22776_vm5, %v8804_v39, %v8805_v32  ;;  %v8811_v60 = vrot.slane %v8809_v61, 4  ;;  %v22103_v43 = vld [vmem:[%s30893_s1 + $0x560] sm:$0xff]   ;;  %v27087_v39 = vld [vmem:[%s30893_s1 + $0x518] sm:$0xff]  }
 0x27b   : > { %21107 = vmatpush3.bf16.msra.mxu1 %v22095_v11  ;;  %21060 = vmatprep.subr.bf16.mxu0 %v27007_v51  ;;  %v6528_v59 = vpop.f32.mrf.mxu1  ;;  %v22102_v11 = vld [vmem:[%s30893_s1 + $0x520] sm:$0xff]   ;;  %v20694_v23 = vpop.f32.mrf.mxu0  ;;  %v8812_v30 = vrot.slane %v17971_v58, 7  ;;  %v8819_v17 = vrot.slane %v17974_v56, 7  ;;  %v17977_v56 = vld [vmem:[%s22490_s16 + $0x1e8] sm:$0x7] }
 0x27c   : > { %21108 = vmatprep.subr.bf16.mxu1 %v27020_v10  ;;  %v27078_v63 = vadd.f32 %v6528_v59, %v6395_v9  ;;  %v6400_v45 = vadd.f32 %v20694_v23, %v26756_v41  ;;  %v27082_v21 = vld [vmem:[%s22490_s16 + $0x1e0] sm:$0x8]  ;;  %v27090_v32 = vld [vmem:[%s22490_s16 + $0x204] sm:$0xf]  ;;  %v8818_v41 = vrot.slane %v8816_v62, 4  ;;  %v27105_v59 = vsel %vm22776_vm5, %v18003_v8, %v8809_v61  ;;  %v22100_v61 = vld [vmem:[%s22490_s16 + $0x18c] sm:$0xff]  }
 0x27d   : > { %20981 = vmatmul.mubr.bf16.gmra.mxu0 %v18031_v13  ;;  %v20742_v29 = vpop.f32.mrf.mxu1  ;;  %v18004_v13 = vrot.slane %v17972_v25, 11  ;;  %v6283_v48 = vpop.f32.mrf.mxu0  ;;  %v27112_v23 = vld [vmem:[%s22490_s16 + $0x208] sm:$0x7]  ;;  %v27122_v8 = vsel %vm22776_vm5, %v8811_v60, %v8812_v30  ;;  %v27139_v60 = vld [vmem:[%s22490_s16 + $0x220] sm:$0x8] }
 0x27e   : > { %21029 = vmatmul.mubr.bf16.gmra.mxu1 %v22093_v55  ;;  %20984 = vmatprep.mubr.bf16.mxu0 %v18032_v24  ;;  %v27094_v24 = vadd.f32 %v20742_v29, %v6400_v45  ;;  %v6398_v58 = vadd.f32 %v6283_v48, %v26767_v47  ;;  %v22107_v47 = vld [vmem:[%s30893_s1 + $0x558] sm:$0xff]   ;;  %v8830_v45 = vrot.slane %v27090_v32, 7  ;;  %v18005_v29 = vrot.slane %v27082_v21, 11  ;;  %v27126_v48 = vld [vmem:[%s22490_s16 + $0x224] sm:$0xf] }
 0x27f   : > { %21032 = vmatprep.mubr.bf16.mxu1 %v22096_v33  ;;  %21061 = vmatpush3.bf16.msra.mxu0 %v27007_v51  ;;  %v6541_v25 = vpop.f32.mrf.mxu1  ;;  %v20695_v9 = vpop.f32.mrf.mxu0  ;;  %v18033_v51 = vcombine.low %v27047_v18, %v27058_v6  ;;  %v18034_v33 = vcombine.low %v27063_v44, %v27073_v54  ;;  %v22097_v54 = vld [vmem:[%s22490_s16 + $0x16c] sm:$0xff]   ;;  %v27130_v32 = vsel %vm22776_vm5, %v18004_v13, %v8816_v62  ;;  %v27142_v30 = vld [vmem:[%s22490_s16 + $0x244] sm:$0xf] }
 0x280   : > { %31176 = vst [vmem:[#allocation39_spill] sm:$0xff] %v27094_v24  ;;  %21109 = vmatpush3.bf16.msra.mxu1 %v27020_v10  ;;  %21062 = vmatprep.subr.bf16.mxu0 %v22102_v11  ;;  %v17978_v10 = vld [vmem:[%s22490_s16 + $0x200] sm:$0x8]  ;;  %v27115_v18 = vadd.f32 %v6541_v25, %v6398_v58  ;;  %v6401_v6 = vadd.f32 %v20695_v9, %v26774_v5  ;;  %v31178_v58 = vrot.slane %v27069_v15, 7  ;;  %v8826_v9 = vrot.slane %v17977_v56, 7  ;;  %v22111_v56 = vld [vmem:[%s30893_s1 + $0x550] sm:$0xff]  }
 0x281   : > { %21110 = vmatprep.subr.bf16.mxu1 %v22103_v43  ;;  %v20743_v44 = vpop.f32.mrf.mxu1  ;;  %v6286_v55 = vpop.f32.mrf.mxu0  ;;  %v27134_v5 = vsel %vm22776_vm5, %v8818_v41, %v8819_v17  ;;  %v18006_v13 = vrot.slane %v17978_v10, 11  ;;  %v8833_v17 = vrot.slane %v27112_v23, 7  ;;  %v22110_v41 = vld [vmem:[%s30893_s1 + $0x510] sm:$0xff]   ;;  %v30943_v10 = vrot.slane %v27126_v48, 7  ;;  %v27162_v23 = vld [vmem:[%s22490_s16 + $0x240] sm:$0x8] }
 0x282   : > { %31177 = vst [vmem:[#allocation40_spill] sm:$0xff] %v27115_v18  ;;  %v8825_v25 = vrot.slane %v31178_v58, 4  ;;  %v27144_v21 = vadd.f32 %v20743_v44, %v6401_v6  ;;  %v27173_v18 = vld [vmem:[%s22490_s16 + $0x260] sm:$0x8]  ;;  %v27258_v24 = vld [vmem:[%s22490_s16 + $0x2a8] sm:$0x7] }
 0x283   : > { %21063 = vmatpush3.bf16.msra.mxu0 %v22102_v11  ;;  %v6399_v11 = vadd.f32 %v6286_v55, %v26790_v7  ;;  %v6544_v62 = vpop.f32.mrf.mxu1  ;;  %v20698_v6 = vpop.f32.mrf.mxu0  ;;  %v18035_v7 = vcombine.low %v27105_v59, %v27122_v8  ;;  %v27158_v55 = vld [vmem:[%s22490_s16 + $0x228] sm:$0x7] }
 0x284   : > { %31179 = vst [vmem:[#allocation41_spill] sm:$0xff] %v27144_v21  ;;  %21111 = vmatpush3.bf16.msra.mxu1 %v22103_v43  ;;  %21064 = vmatprep.subr.bf16.mxu0 %v27087_v39  ;;  %v8832_v43 = vrot.slane %v8830_v45, 4  ;;  %v6404_v58 = vadd.f32 %v20698_v6, %v26798_v4  ;;  %v27169_v59 = vld [vmem:[%s22490_s16 + $0x248] sm:$0x7]  ;;  %v18036_v4 = vcombine.low %v27130_v32, %v27134_v5  ;;  %v27205_v5 = vld [vmem:[%s22490_s16 + $0x284] sm:$0xf] }
 0x285   : > { %20985 = vmatmul.mubr.bf16.gmra.mxu0 %v18033_v51  ;;  %21112 = vmatprep.subr.bf16.mxu1 %v22107_v47  ;;  %v27164_v44 = vadd.f32 %v6544_v62, %v6399_v11  ;;  %v20746_v21 = vpop.f32.mrf.mxu1  ;;  %v22114_v11 = vld [vmem:[%s30893_s1 + $0x508] sm:$0xff]   ;;  %v6299_v62 = vpop.f32.mrf.mxu0  ;;  %v27188_v6 = vsel %vm22776_vm5, %v8825_v25, %v8826_v9  ;;  %v27192_v51 = vld [vmem:[%s22490_s16 + $0x264] sm:$0xf]  ;;  %v27213_v9 = vrot.slane %v30943_v10, 4  ;;  %v8858_v10 = vrot.slane %v27205_v5, 7 }
 0x286   : > { %21033 = vmatmul.mubr.bf16.gmra.mxu1 %v22097_v54  ;;  %20988 = vmatprep.mubr.bf16.mxu0 %v18034_v33  ;;  %v31181_v33 = vrot.slane %v27069_v15, 7  ;;  %v27195_v8 = vld [vmem:[%s22490_s16 + $0x268] sm:$0x7]  ;;  %v6402_v32 = vadd.f32 %v6299_v62, %v26813_v34  ;;  %v27209_v25 = vsel %vm22776_vm5, %v8832_v43, %v8833_v17  ;;  %v22101_v43 = vld [vmem:[%s22490_s16 + $0x1ac] sm:$0xff]   ;;  %v31184_v62 = vrot.slane %v27142_v30, 7  ;;  %v27243_v34 = vld [vmem:[%s30893_s1 + $0x540] sm:$0xff]  }
 0x287   : > { %31180 = vst [vmem:[#allocation42_spill] sm:$0xff] %v27164_v44  ;;  %21036 = vmatprep.mubr.bf16.mxu1 %v22100_v61  ;;  %21065 = vmatpush3.bf16.msra.mxu0 %v27087_v39  ;;  %v27197_v61 = vadd.f32 %v20746_v21, %v6404_v58  ;;  %v6557_v15 = vpop.f32.mrf.mxu1  ;;  %v20699_v39 = vpop.f32.mrf.mxu0  ;;  %v22104_v58 = vld [vmem:[%s22490_s16 + $0x1cc] sm:$0xff]   ;;  %v27255_v44 = vld [vmem:[%s22490_s16 + $0x2a4] sm:$0xf] }
 0x288   : > { %v27184_v54 = vsel %vm22776_vm5, %v18005_v29, %v31181_v33  ;;  %21113 = vmatpush3.bf16.msra.mxu1 %v22107_v47  ;;  %v27202_v29 = vsel %vm22776_vm5, %v18006_v13, %v8830_v45  ;;  %21066 = vmatprep.subr.bf16.mxu0 %v22110_v41  ;;  %v22115_v45 = vld [vmem:[%s30893_s1 + $0x548] sm:$0xff]   ;;  %v27220_v21 = vadd.f32 %v6557_v15, %v6402_v32  ;;  %v27227_v33 = vrot.slane %v31184_v62, 4  ;;  %v27233_v47 = vld [vmem:[%s30893_s1 + $0x500] sm:$0xff]  }
 0x289   : > { %31182 = vst [vmem:[#allocation20_spill] sm:$0xff] %v27197_v61  ;;  %21114 = vmatprep.subr.bf16.mxu1 %v22111_v56  ;;  %v6405_v13 = vadd.f32 %v20699_v39, %v26820_v57  ;;  %v20747_v17 = vpop.f32.mrf.mxu1  ;;  %v6302_v32 = vpop.f32.mrf.mxu0  ;;  %v18009_v57 = vrot.slane %v27173_v18, 11  ;;  %v8851_v15 = vrot.slane %v27192_v51, 7  ;;  %v8854_v39 = vrot.slane %v27195_v8, 7  ;;  %v17990_v62 = vld [vmem:[%s22490_s16 + $0x280] sm:$0x8] }
 0x28a   : > { %31183 = vst [vmem:[#allocation21_spill] sm:$0xff] %v27220_v21  ;;  %v17992_v18 = vld [vmem:[%s22490_s16 + $0x288] sm:$0x7]  ;;  %v27250_v51 = vld [vmem:[%s22490_s16 + $0x2a0] sm:$0x8]  ;;  %v18037_v5 = vcombine.low %v27184_v54, %v27188_v6  ;;  %v18010_v6 = vrot.slane %v17990_v62, 11 }
 0x28b   : > { %21067 = vmatpush3.bf16.msra.mxu0 %v22110_v41  ;;  %v27245_v21 = vadd.f32 %v20747_v17, %v6405_v13  ;;  %v6403_v41 = vadd.f32 %v6302_v32, %v26834_v31  ;;  %v6560_v61 = vpop.f32.mrf.mxu1  ;;  %v20702_v8 = vpop.f32.mrf.mxu0  ;;  %v18038_v17 = vcombine.low %v27202_v29, %v27209_v25  ;;  %v8853_v54 = vrot.slane %v8851_v15, 4 }
 0x28c   : > { %21115 = vmatpush3.bf16.msra.mxu1 %v22111_v56  ;;  %21068 = vmatprep.subr.bf16.mxu0 %v22114_v11  ;;  %v6408_v31 = vadd.f32 %v20702_v8, %v26844_v37  ;;  %v27271_v37 = vld [vmem:[%s30893_s1 + $0x5b8] sm:$0xff]   ;;  %v8865_v62 = vrot.slane %v27255_v44, 7 }
 0x28d   : > { %31185 = vst [vmem:[#allocation22_spill] sm:$0xff] %v27245_v21  ;;  %20989 = vmatmul.mubr.bf16.gmra.mxu0 %v18035_v7  ;;  %21116 = vmatprep.subr.bf16.mxu1 %v22115_v45  ;;  %v27260_v13 = vadd.f32 %v6560_v61, %v6403_v41  ;;  %v20750_v56 = vpop.f32.mrf.mxu1  ;;  %v27266_v7 = vld [vmem:[%s22490_s16 + $0xd8] sm:$0xf]  ;;  %v6315_v32 = vpop.f32.mrf.mxu0  ;;  %v8860_v61 = vrot.slane %v8858_v10, 4  ;;  %v8861_v41 = vrot.slane %v17992_v18, 7  ;;  %v31193_v21 = vrot.slane %v27169_v59, 7 }
 0x28e   : > { %21037 = vmatmul.mubr.bf16.gmra.mxu1 %v22101_v43  ;;  %20992 = vmatprep.mubr.bf16.mxu0 %v18036_v4  ;;  %v27276_v4 = vld [vmem:[%s30893_s1 + $0x5f8] sm:$0xff]   ;;  %v27278_v29 = vadd.f32 %v20750_v56, %v6408_v31  ;;  %v6406_v25 = vadd.f32 %v6315_v32, %v26863_v1  ;;  %v22105_v43 = vld [vmem:[%s22490_s16 + $0x1ec] sm:$0xff]   ;;  %v27286_v18 = vld [vmem:[%s22490_s16 + $0xd4] sm:$0xe]  ;;  %v31188_v56 = vrot.slane %v27126_v48, 7  ;;  %v31189_v1 = vrot.slane %v27139_v60, 11 }
 0x28f   : > { %31186 = vst [vmem:[#allocation23_spill] sm:$0xff] %v27260_v13  ;;  %21040 = vmatprep.mubr.bf16.mxu1 %v22104_v58  ;;  %21069 = vmatpush3.bf16.msra.mxu0 %v22114_v11  ;;  %v6573_v11 = vpop.f32.mrf.mxu1  ;;  %v18011_v58 = vrot.slane %v27250_v51, 11  ;;  %v27289_v8 = vld [vmem:[%s22490_s16 + $0xdc] sm:$0x1]  ;;  %v20703_v13 = vpop.f32.mrf.mxu0  ;;  %v22108_v31 = vld [vmem:[%s22490_s16 + $0x20c] sm:$0xff]   ;;  %v8868_v51 = vrot.slane %v27258_v24, 7  ;;  %v27332_v48 = vsel %vm22776_vm5, %v27227_v33, %v31193_v21  ;;  %v27348_v59 = vsel %vm22776_vm5, %v8860_v61, %v8861_v41 }
 0x290   : > { %31187 = vst [vmem:[#allocation24_spill] sm:$0xff] %v27278_v29  ;;  %21117 = vmatpush3.bf16.msra.mxu1 %v22115_v45  ;;  %21070 = vmatprep.subr.bf16.mxu0 %v27233_v47  ;;  %v27298_v32 = vsel %vm22776_vm5, %v31189_v1, %v31188_v56  ;;  %v31190_v45 = vrot.slane %v27158_v55, 7  ;;  %v27311_v60 = vld [vmem:[%s22490_s16 + $0x300] sm:$0x8]  ;;  %v27314_v29 = vld [vmem:[%s22490_s16 + $0x304] sm:$0xf]  ;;  %v27316_v56 = vadd.f32 %v6573_v11, %v6406_v25 }
 0x291   : > { %21118 = vmatprep.subr.bf16.mxu1 %v27243_v34  ;;  %v6409_v55 = vadd.f32 %v20703_v13, %v26868_v38  ;;  %v20751_v1 = vpop.f32.mrf.mxu1  ;;  %v6318_v25 = vpop.f32.mrf.mxu0  ;;  %v27336_v38 = vsel %vm22776_vm5, %v18009_v57, %v8851_v15  ;;  %v27352_v21 = vld [vmem:[%s22490_s16 + $0x308] sm:$0x7]  ;;  %v27355_v33 = vld [vmem:[%s22490_s16 + $0xf8] sm:$0xf]  ;;  %v8867_v13 = vrot.slane %v8865_v62, 4  ;;  %v9679_v61 = vrot.slane %v27289_v8, 5 }
 0x292   : > { %v27305_v44 = vsel %vm22776_vm5, %v27213_v9, %v31190_v45  ;;  %v31191_v9 = vrot.slane %v27142_v30, 7  ;;  %v31192_v45 = vrot.slane %v27162_v23, 11  ;;  %v27340_v30 = vsel %vm22776_vm5, %v8853_v54, %v8854_v39 }
 0x293   : > { %v27344_v23 = vsel %vm22776_vm5, %v18010_v6, %v8858_v10  ;;  %21071 = vmatpush3.bf16.msra.mxu0 %v27233_v47  ;;  %v27357_v57 = vadd.f32 %v20751_v1, %v6409_v55  ;;  %v6407_v15 = vadd.f32 %v6318_v25, %v26876_v19  ;;  %v6576_v39 = vpop.f32.mrf.mxu1  ;;  %v18172_v10 = vrot.slane %v27286_v18, 9  ;;  %v20706_v54 = vpop.f32.mrf.mxu0  ;;  %v18127_v55 = vld [vmem:[%s22490_s16 + $0xf4] sm:$0xe]  ;;  %v18129_v1 = vld [vmem:[%s22490_s16 + $0xfc] sm:$0x1] }
 0x294   : > { %v27325_v24 = vsel %vm22776_vm5, %v31192_v45, %v31191_v9  ;;  %21119 = vmatpush3.bf16.msra.mxu1 %v27243_v34  ;;  %21152 = vmatprep.subr.bf16.mxu0 %v27271_v37  ;;  %v31194_v47 = vrot.slane %v27266_v7, 5  ;;  %v18276_v41 = vrot.slane %v27311_v60, 11  ;;  %v10206_v19 = vrot.slane %v27314_v29, 7  ;;  %v27381_v9 = vld [vmem:[%s22490_s16 + $0x320] sm:$0x8] }
 0x295   : > { %20993 = vmatmul.mubr.bf16.gmra.mxu0 %v18037_v5  ;;  %21200 = vmatprep.subr.bf16.mxu1 %v27276_v4  ;;  %v27369_v34 = vadd.f32 %v6576_v39, %v6407_v15  ;;  %v6412_v11 = vadd.f32 %v20706_v54, %v26885_v27  ;;  %v20754_v18 = vpop.f32.mrf.mxu1  ;;  %v10209_v5 = vrot.slane %v27352_v21, 7  ;;  %v9683_v8 = vrot.slane %v27355_v33, 5  ;;  %v6331_v60 = vpop.f32.mrf.mxu0  ;;  %v27402_v33 = vld [vmem:[%s22490_s16 + $0x328] sm:$0x7]  ;;  %v22109_v39 = vld [vmem:[%s22490_s16 + $0x22c] sm:$0xff]  }
 0x296   : > { %v9678_v6 = vrot.slane %v31194_v47, 4  ;;  %21041 = vmatmul.mubr.bf16.gmra.mxu1 %v22105_v43  ;;  %20996 = vmatprep.mubr.bf16.mxu0 %v18038_v17  ;;  %v18039_v29 = vcombine.low %v27298_v32, %v27305_v44  ;;  %v18040_v27 = vcombine.low %v27325_v24, %v27332_v48  ;;  %v6410_v17 = vadd.f32 %v6331_v60, %v26893_v26  ;;  %v27395_v32 = vld [vmem:[%s22490_s16 + $0x324] sm:$0xf]  ;;  %v22152_v60 = vld [vmem:[%s22490_s16 + $0x54c] sm:$0xff]  }
 0x297   : > { %21044 = vmatprep.mubr.bf16.mxu1 %v22108_v31  ;;  %v27383_v43 = vadd.f32 %v20754_v18, %v6412_v11  ;;  %v6589_v45 = vpop.f32.mrf.mxu1  ;;  %v27388_v25 = vsel %vm22776_vm5, %v18011_v58, %v8865_v62  ;;  %v27392_v31 = vsel %vm22776_vm5, %v8867_v13, %v8868_v51  ;;  %v20707_v44 = vpop.f32.mrf.mxu0  ;;  %v10208_v26 = vrot.slane %v10206_v19, 4  ;;  %v27405_v58 = vld [vmem:[%s22490_s16 + $0x118] sm:$0xf]  ;;  %v22112_v13 = vld [vmem:[%s22490_s16 + $0x24c] sm:$0xff]  }
 0x298   : > { %v18173_v21 = vrot.slane %v18127_v55, 9  ;;  %v27407_v62 = vadd.f32 %v6589_v45, %v6410_v17  ;;  %v6413_v51 = vadd.f32 %v20707_v44, %v26898_v22  ;;  %v9685_v54 = vrot.slane %v9683_v8, 4  ;;  %v18130_v45 = vld [vmem:[%s22490_s16 + $0x114] sm:$0xe]  ;;  %v18132_v44 = vld [vmem:[%s22490_s16 + $0x11c] sm:$0x1] }
 0x299   : > { %v20755_v15 = vpop.f32.mrf.mxu1  ;;  %v9686_v47 = vrot.slane %v18129_v1, 5  ;;  %v6334_v11 = vpop.f32.mrf.mxu0  ;;  %v31196_v55 = vrot.slane %v27266_v7, 5  ;;  %v18277_v17 = vrot.slane %v27381_v9, 11  ;;  %v10213_v22 = vrot.slane %v27395_v32, 7 }
 0x29a   : > { %31195 = vst [vmem:[#allocation25_spill] sm:$0xff] %v27407_v62  ;;  %v27424_v48 = vadd.f32 %v20755_v15, %v6413_v51  ;;  %v6411_v1 = vadd.f32 %v6334_v11, %v26905_v46  ;;  %v10216_v18 = vrot.slane %v27402_v33, 7  ;;  %v9690_v7 = vrot.slane %v27405_v58, 5  ;;  %v27449_v58 = vld [vmem:[%s22490_s16 + $0x340] sm:$0x8] }
 0x29b   : > { %v27418_v24 = vsel %vm22502_vm2, %v18172_v10, %v31196_v55  ;;  %v6592_v62 = vpop.f32.mrf.mxu1  ;;  %v27430_v10 = vld [vmem:[%s22490_s16 + $0x344] sm:$0xf]  ;;  %v27434_v9 = vsel %vm22502_vm2, %v9678_v6, %v9679_v61  ;;  %v27438_v32 = vsel %vm22776_vm5, %v18276_v41, %v10206_v19  ;;  %v27442_v46 = vsel %vm22776_vm5, %v10208_v26, %v10209_v5  ;;  %v18236_v19 = vld [vmem:[%s22490_s16 + $0x348] sm:$0x7]  ;;  %v27460_v5 = vld [vmem:[%s22490_s16 + $0x138] sm:$0xf] }
 0x29c   : > { %v20710_v55 = vpop.f32.mrf.mxu0  ;;  %v27446_v33 = vsel %vm22502_vm2, %v18173_v21, %v9683_v8  ;;  %v27456_v41 = vsel %vm22502_vm2, %v9685_v54, %v9686_v47  ;;  %v10215_v26 = vrot.slane %v10213_v22, 4  ;;  %v18174_v21 = vrot.slane %v18130_v45, 9  ;;  %v27464_v51 = vld [vmem:[%s22490_s16 + $0x134] sm:$0xe]  ;;  %v22113_v54 = vld [vmem:[%s22490_s16 + $0x26c] sm:$0xff]  }
 0x29d   : > { %20997 = vmatmul.mubr.bf16.gmra.mxu0 %v18039_v29  ;;  %v27451_v29 = vadd.f32 %v6592_v62, %v6411_v1  ;;  %v6416_v6 = vadd.f32 %v20710_v55, %v26911_v42  ;;  %v20758_v61 = vpop.f32.mrf.mxu1  ;;  %v9693_v62 = vrot.slane %v18132_v44, 5  ;;  %v10220_v42 = vrot.slane %v27430_v10, 7  ;;  %v18135_v1 = vld [vmem:[%s22490_s16 + $0x13c] sm:$0x1]  ;;  %v27476_v45 = vld [vmem:[%s22490_s16 + $0x364] sm:$0xf] }
 0x29e   : > { %21045 = vmatmul.mubr.bf16.gmra.mxu1 %v22109_v39  ;;  %21000 = vmatprep.mubr.bf16.mxu0 %v18040_v27  ;;  %v6347_v8 = vpop.f32.mrf.mxu0  ;;  %v9692_v47 = vrot.slane %v9690_v7, 4  ;;  %v18278_v11 = vrot.slane %v27449_v58, 11  ;;  %v27493_v10 = vld [vmem:[%s22490_s16 + $0x158] sm:$0xf] }
 0x29f   : > { %31198 = vst [vmem:[#allocation26_spill] sm:$0xff] %v27451_v29  ;;  %21048 = vmatprep.mubr.bf16.mxu1 %v22112_v13  ;;  %v27466_v27 = vadd.f32 %v20758_v61, %v6416_v6  ;;  %v6414_v15 = vadd.f32 %v6347_v8, %v26921_v36  ;;  %v6605_v39 = vpop.f32.mrf.mxu1  ;;  %v27473_v13 = vld [vmem:[%s22490_s16 + $0x360] sm:$0x8]  ;;  %v10223_v36 = vrot.slane %v18236_v19, 7  ;;  %v9697_v6 = vrot.slane %v27460_v5, 5  ;;  %v22116_v19 = vld [vmem:[%s22490_s16 + $0x28c] sm:$0xff]  }
 0x2a0   : > { %v20711_v44 = vpop.f32.mrf.mxu0  ;;  %v27490_v29 = vsel %vm22776_vm5, %v18277_v17, %v10213_v22  ;;  %v27498_v5 = vsel %vm22776_vm5, %v10215_v26, %v10216_v18  ;;  %v18175_v18 = vrot.slane %v27464_v51, 9  ;;  %v18239_v26 = vld [vmem:[%s22490_s16 + $0x368] sm:$0x7] }
 0x2a1   : > { %31199 = vst [vmem:[#allocation27_spill] sm:$0xff] %v27466_v27  ;;  %v27483_v61 = vadd.f32 %v6605_v39, %v6414_v15  ;;  %v6417_v58 = vadd.f32 %v20711_v44, %v26926_v28  ;;  %v20759_v8 = vpop.f32.mrf.mxu1  ;;  %v27502_v28 = vsel %vm22502_vm2, %v18174_v21, %v9690_v7  ;;  %v10222_v15 = vrot.slane %v10220_v42, 4 }
 0x2a2   : > { %v6350_v55 = vpop.f32.mrf.mxu0  ;;  %v10227_v39 = vrot.slane %v27476_v45, 7  ;;  %v27510_v27 = vsel %vm22502_vm2, %v9692_v47, %v9693_v62  ;;  %v31202_v21 = vcombine.low %v27336_v38, %v27340_v30  ;;  %v9699_v45 = vrot.slane %v9697_v6, 4  ;;  %v27530_v30 = vld [vmem:[%s22490_s16 + $0x380] sm:$0x8] }
 0x2a3   : > { %31200 = vst [vmem:[#allocation28_spill] sm:$0xff] %v27483_v61  ;;  %v27505_v44 = vadd.f32 %v20759_v8, %v6417_v58  ;;  %v6415_v17 = vadd.f32 %v6350_v55, %v26934_v53  ;;  %v6608_v22 = vpop.f32.mrf.mxu1  ;;  %v18136_v61 = vld [vmem:[%s22490_s16 + $0x154] sm:$0xe]  ;;  %v9700_v58 = vrot.slane %v18135_v1, 5  ;;  %v18279_v53 = vrot.slane %v27473_v13, 11 }
 0x2a4   : > { %v20714_v7 = vpop.f32.mrf.mxu0  ;;  %v18138_v55 = vld [vmem:[%s22490_s16 + $0x15c] sm:$0x1]  ;;  %v9704_v8 = vrot.slane %v27493_v10, 5  ;;  %v27533_v1 = vld [vmem:[%s22490_s16 + $0x384] sm:$0xf] }
 0x2a5   : > { %31201 = vst [vmem:[#allocation29_spill] sm:$0xff] %v27505_v44  ;;  %21001 = vmatmul.mubr.bf16.gmra.mxu0 %v31202_v21  ;;  %v27521_v62 = vadd.f32 %v6608_v22, %v6415_v17  ;;  %v6420_v51 = vadd.f32 %v20714_v7, %v26943_v14  ;;  %v20762_v47 = vpop.f32.mrf.mxu1  ;;  %v31203_v44 = vcombine.low %v27344_v23, %v27348_v59  ;;  %v10229_v59 = vrot.slane %v10227_v39, 4  ;;  %v27560_v7 = vld [vmem:[%s22490_s16 + $0x388] sm:$0x7]  ;;  %v27563_v21 = vld [vmem:[%s22490_s16 + $0x174] sm:$0xe] }
 0x2a6   : > { %21049 = vmatmul.mubr.bf16.gmra.mxu1 %v22113_v54  ;;  %v6363_v13 = vpop.f32.mrf.mxu0  ;;  %v27537_v14 = vsel %vm22776_vm5, %v18278_v11, %v10220_v42  ;;  %v27541_v23 = vsel %vm22776_vm5, %v10222_v15, %v10223_v36  ;;  %v10230_v54 = vrot.slane %v18239_v26, 7  ;;  %v18176_v22 = vrot.slane %v18136_v61, 9  ;;  %v27549_v42 = vld [vmem:[%s22490_s16 + $0x178] sm:$0xf] }
 0x2a7   : > { %21004 = vmatprep.mubr.bf16.mxu0 %v31203_v44  ;;  %21052 = vmatprep.mubr.bf16.mxu1 %v22116_v19  ;;  %v27543_v10 = vadd.f32 %v20762_v47, %v6420_v51  ;;  %v6418_v44 = vadd.f32 %v6363_v13, %v26949_v20  ;;  %v6621_v17 = vpop.f32.mrf.mxu1  ;;  %v27553_v36 = vsel %vm22502_vm2, %v18175_v18, %v9697_v6  ;;  %v9706_v20 = vrot.slane %v9704_v8, 4  ;;  %v22117_v13 = vld [vmem:[%s22490_s16 + $0x2ac] sm:$0xff]   ;;  %v27595_v6 = vld [vmem:[%s22490_s16 + $0x3c4] sm:$0xf] }
 0x2a8   : > { %v20715_v11 = vpop.f32.mrf.mxu0  ;;  %v27557_v15 = vsel %vm22502_vm2, %v9699_v45, %v9700_v58  ;;  %v9707_v26 = vrot.slane %v18138_v55, 5  ;;  %v18280_v18 = vrot.slane %v27530_v30, 11  ;;  %v27573_v45 = vld [vmem:[%s22490_s16 + $0x17c] sm:$0x1]  ;;  %v27576_v58 = vld [vmem:[%s22490_s16 + $0x3a4] sm:$0xf] }
 0x2a9   : > { %31204 = vst [vmem:[#allocation30_spill] sm:$0xff] %v27543_v10  ;;  %v27565_v61 = vadd.f32 %v6621_v17, %v6418_v44  ;;  %v6421_v51 = vadd.f32 %v20715_v11, %v26954_v49  ;;  %v20763_v47 = vpop.f32.mrf.mxu1  ;;  %v27579_v55 = vld [vmem:[%s22490_s16 + $0x198] sm:$0xf]  ;;  %v27583_v44 = vsel %vm22776_vm5, %v18279_v53, %v10227_v39  ;;  %v27587_v49 = vsel %vm22776_vm5, %v10229_v59, %v10230_v54  ;;  %v27592_v11 = vld [vmem:[%s22490_s16 + $0x3a0] sm:$0x8] }
 0x2aa   : > { %v6366_v19 = vpop.f32.mrf.mxu0  ;;  %v10234_v17 = vrot.slane %v27533_v1, 7  ;;  %v9711_v30 = vrot.slane %v27549_v42, 5  ;;  %v27604_v53 = vsel %vm22502_vm2, %v18176_v22, %v9704_v8  ;;  %v31206_v59 = vcombine.low %v27388_v25, %v27392_v31  ;;  %v18248_v31 = vld [vmem:[%s22490_s16 + $0x3c8] sm:$0x7] }
 0x2ab   : > { %31205 = vst [vmem:[#allocation31_spill] sm:$0xff] %v27565_v61  ;;  %v27597_v38 = vadd.f32 %v20763_v47, %v6421_v51  ;;  %v6419_v61 = vadd.f32 %v6366_v19, %v26963_v52  ;;  %v6624_v10 = vpop.f32.mrf.mxu1  ;;  %v27611_v54 = vsel %vm22502_vm2, %v9706_v20, %v9707_v26  ;;  %v10237_v52 = vrot.slane %v27560_v7, 7  ;;  %v18245_v19 = vld [vmem:[%s22490_s16 + $0x3a8] sm:$0x7]  ;;  %v18142_v26 = vld [vmem:[%s22490_s16 + $0x194] sm:$0xe] }
 0x2ac   : > { %v20718_v1 = vpop.f32.mrf.mxu0  ;;  %v10241_v42 = vrot.slane %v27576_v58, 7  ;;  %v9718_v51 = vrot.slane %v27579_v55, 5  ;;  %v31208_v25 = vcombine.low %v27418_v24, %v27434_v9  ;;  %v18177_v20 = vrot.slane %v27563_v21, 9  ;;  %v18144_v7 = vld [vmem:[%s22490_s16 + $0x19c] sm:$0x1] }
 0x2ad   : > { %21005 = vmatmul.mubr.bf16.gmra.mxu0 %v31206_v59  ;;  %v27617_v8 = vadd.f32 %v6624_v10, %v6419_v61  ;;  %v6424_v22 = vadd.f32 %v20718_v1, %v26970_v40  ;;  %v20766_v47 = vpop.f32.mrf.mxu1  ;;  %v31209_v10 = vcombine.low %v27438_v32, %v27442_v46  ;;  %v10236_v40 = vrot.slane %v10234_v17, 4  ;;  %v18246_v55 = vld [vmem:[%s22490_s16 + $0x3c0] sm:$0x8] }
 0x2ae   : > { %21053 = vmatmul.mubr.bf16.gmra.mxu1 %v22117_v13  ;;  %21072 = vmatprep.mubr.bf16.mxu0 %v31208_v25  ;;  %v6379_v58 = vpop.f32.mrf.mxu0  ;;  %v9713_v61 = vrot.slane %v9711_v30, 4  ;;  %v9714_v13 = vrot.slane %v27573_v45, 5  ;;  %v10248_v24 = vrot.slane %v27595_v6, 7  ;;  %v18281_v59 = vrot.slane %v27592_v11, 11 }
 0x2af   : > { %31207 = vst [vmem:[#allocation32_spill] sm:$0xff] %v27617_v8  ;;  %21120 = vmatprep.mubr.bf16.mxu1 %v31209_v10  ;;  %v27634_v9 = vadd.f32 %v20766_v47, %v6424_v22  ;;  %v6422_v1 = vadd.f32 %v6379_v58, %v26982_v3  ;;  %v6637_v21 = vpop.f32.mrf.mxu1  ;;  %v10244_v25 = vrot.slane %v18245_v19, 7  ;;  %v10243_v32 = vrot.slane %v10241_v42, 4  ;;  %v27645_v3 = vld [vmem:[%s30893_s1 + $0x5b0] sm:$0xff]  }
 0x2b0   : > { %v20719_v39 = vpop.f32.mrf.mxu0  ;;  %v18178_v46 = vrot.slane %v18142_v26, 9  ;;  %v9720_v10 = vrot.slane %v9718_v51, 4  ;;  %v9721_v8 = vrot.slane %v18144_v7, 5  ;;  %v27651_v19 = vsel %vm22776_vm5, %v18280_v18, %v10234_v17  ;;  %v27654_v47 = vld [vmem:[%s22490_s16 + $0x1b4] sm:$0xe] }
 0x2b1   : > { %31210 = vst [vmem:[#allocation33_spill] sm:$0xff] %v27634_v9  ;;  %v27639_v45 = vadd.f32 %v6637_v21, %v6422_v1  ;;  %v6425_v6 = vadd.f32 %v20719_v39, %v26990_v16  ;;  %v20767_v22 = vpop.f32.mrf.mxu1  ;;  %v27659_v16 = vld [vmem:[%s30893_s1 + $0x5f0] sm:$0xff]   ;;  %v27663_v39 = vsel %vm22502_vm2, %v18177_v20, %v9711_v30  ;;  %v18282_v7 = vrot.slane %v18246_v55, 11  ;;  %v27666_v21 = vld [vmem:[%s22490_s16 + $0x1b8] sm:$0xf] }
 0x2b2   : > { %v6382_v26 = vpop.f32.mrf.mxu0  ;;  %v10250_v58 = vrot.slane %v10248_v24, 4  ;;  %v10251_v1 = vrot.slane %v18248_v31, 7  ;;  %v27677_v9 = vsel %vm22502_vm2, %v9713_v61, %v9714_v13  ;;  %v27680_v30 = vld [vmem:[%s22490_s16 + $0x1bc] sm:$0x1]  ;;  %v27683_v20 = vld [vmem:[%s22490_s16 + $0x3e4] sm:$0xf]  ;;  %v31212_v55 = vcombine.low %v27446_v33, %v27456_v41 }
 0x2b3   : > { %31211 = vst [vmem:[#allocation34_spill] sm:$0xff] %v27639_v45  ;;  %v27668_v18 = vadd.f32 %v20767_v22, %v6425_v6  ;;  %v6423_v17 = vadd.f32 %v6382_v26, %v27011_v12  ;;  %v6640_v11 = vpop.f32.mrf.mxu1  ;;  %v27673_v45 = vsel %vm22776_vm5, %v10236_v40, %v10237_v52  ;;  %v27690_v12 = vsel %vm22776_vm5, %v18281_v59, %v10241_v42  ;;  %v27699_v40 = vld [vmem:[%s30893_s1 + $0x5a8] sm:$0xff]   ;;  %v27710_v42 = vld [vmem:[%s22490_s16 + $0x3e0] sm:$0x8]  ;;  %v27750_v26 = vld [vmem:[%s22490_s16 + $0x1d4] sm:$0xe] }
 0x2b4   : > { %v20786_v31 = vpop.f32.mrf.mxu0  ;;  %v27694_v52 = vsel %vm22776_vm5, %v10243_v32, %v10244_v25  ;;  %v27703_v33 = vsel %vm22502_vm2, %v18178_v46, %v9718_v51  ;;  %v27707_v41 = vsel %vm22502_vm2, %v9720_v10, %v9721_v8  ;;  %v31213_v25 = vcombine.low %v27490_v29, %v27498_v5  ;;  %v27722_v51 = vld [vmem:[%s30893_s1 + $0x5e8] sm:$0xff]   ;;  %v27733_v10 = vld [vmem:[%s22490_s16 + $0x404] sm:$0xf] }
 0x2b5   : > { %21073 = vmatmul.mubr.bf16.vlgmr.msra.gmra.mxu0 %v31212_v55  ;;  %v27712_v61 = vadd.f32 %v6640_v11, %v6423_v17  ;;  %v7184_v13 = vadd.f32 %v20786_v31, %v27031_v2  ;;  %v20834_v59 = vpop.f32.mrf.mxu1  ;;  %v30945_v32 = vrot.slane %v27666_v21, 5  ;;  %v27727_v46 = vld [vmem:[%s22490_s16 + $0x3e8] sm:$0x7]  ;;  %v27730_v2 = vld [vmem:[%s22490_s16 + $0x1d8] sm:$0xf]  ;;  %v27741_v5 = vsel %vm22776_vm5, %v18282_v7, %v10248_v24 }
 0x2b6   : > { %21121 = vmatmul.mubr.bf16.vlgmr.msra.gmra.mxu1 %v31213_v25  ;;  %21153 = vmatpush3.bf16.msra.mxu0 %v27271_v37  ;;  %v7055_v29 = vpop.f32.mrf.mxu0  ;;  %v31214_v37 = vcombine.low %v27502_v28, %v27510_v27  ;;  %v27745_v6 = vsel %vm22776_vm5, %v10250_v58, %v10251_v1  ;;  %v30944_v11 = vrot.slane %v27683_v20, 7  ;;  %v31215_v24 = vcombine.low %v27537_v14, %v27541_v23  ;;  %v27762_v58 = vld [vmem:[%s22490_s16 + $0x1dc] sm:$0x1]  ;;  %v27765_v1 = vld [vmem:[%s22490_s16 + $0x400] sm:$0x8] }
 0x2b7   : > { %21201 = vmatpush3.bf16.msra.mxu1 %v27276_v4  ;;  %v27752_v4 = vadd.f32 %v20834_v59, %v7184_v13  ;;  %v7182_v27 = vadd.f32 %v7055_v29, %v27038_v0  ;;  %v7586_v28 = vpop.f32.mrf.mxu1  ;;  %21154 = vmatprep.subr.bf16.mxu0 %v27645_v3  ;;  %v18312_v7 = vcombine.low %v27651_v19, %v27673_v45  ;;  %v27768_v17 = vld [vmem:[%s22490_s16 + $0x1f8] sm:$0xf]  ;;  %v18283_v23 = vrot.slane %v27710_v42, 11  ;;  %v27778_v19 = vld [vmem:[%s22490_s16 + $0x408] sm:$0x7]  ;;  %v27791_v42 = vld [vmem:[%s30893_s1 + $0x5a0] sm:$0xff]  }
 0x2b8   : > { %21076 = vmatprep.mubr.bf16.mxu0 %v31214_v37  ;;  %21124 = vmatprep.mubr.bf16.mxu1 %v31215_v24  ;;  %v20787_v31 = vpop.f32.mrf.mxu0  ;;  %v9732_v45 = vrot.slane %v27730_v2, 5  ;;  %v27794_v37 = vld [vmem:[%s22490_s16 + $0x1f4] sm:$0xe]  ;;  %v10257_v24 = vrot.slane %v30944_v11, 4  ;;  %v27812_v29 = vld [vmem:[%s30893_s1 + $0x5e0] sm:$0xff]   ;;  %v10262_v25 = vrot.slane %v27733_v10, 7 }
 0x2b9   : > { %21202 = vmatprep.subr.bf16.mxu1 %v27659_v16  ;;  %v27780_v55 = vadd.f32 %v7586_v28, %v7182_v27  ;;  %v7185_v13 = vadd.f32 %v20787_v31, %v27053_v35  ;;  %v20835_v59 = vpop.f32.mrf.mxu1  ;;  %v27797_v27 = vld [vmem:[%s22490_s16 + $0x1fc] sm:$0x1]  ;;  %v27800_v35 = vld [vmem:[%s22490_s16 + $0x424] sm:$0xf]  ;;  %v10258_v31 = vrot.slane %v27727_v46, 7  ;;  %v18180_v11 = vrot.slane %v27750_v26, 9 }
 0x2ba   : > { %21155 = vmatpush3.bf16.msra.mxu0 %v27645_v3  ;;  %v7058_v28 = vpop.f32.mrf.mxu0  ;;  %v9727_v3 = vrot.slane %v30945_v32, 4  ;;  %v27816_v14 = vld [vmem:[%s22490_s16 + $0x420] sm:$0x8]  ;;  %v9739_v46 = vrot.slane %v27768_v17, 5  ;;  %v31218_v32 = vcombine.low %v27553_v36, %v27557_v15  ;;  %v9734_v10 = vrot.slane %v9732_v45, 4  ;;  %v31219_v26 = vld [vmem:[#allocation39_spill] sm:$0xff] }
 0x2bb   : > { %31216 = vst [vmem:[#allocation35_spill] sm:$0xff] %v27780_v55  ;;  %21203 = vmatpush3.bf16.msra.mxu1 %v27659_v16  ;;  %21156 = vmatprep.subr.bf16.mxu0 %v27699_v40  ;;  %v27818_v16 = vadd.f32 %v20835_v59, %v7185_v13  ;;  %v7183_v0 = vadd.f32 %v7058_v28, %v27078_v63  ;;  %v7589_v22 = vpop.f32.mrf.mxu1  ;;  %v9735_v13 = vrot.slane %v27762_v58, 5  ;;  %v18284_v63 = vrot.slane %v27765_v1, 11  ;;  %v18257_v59 = vld [vmem:[%s22490_s16 + $0x428] sm:$0x7] }
 0x2bc   : > { %21204 = vmatprep.subr.bf16.mxu1 %v27722_v51  ;;  %v20790_v8 = vpop.f32.mrf.mxu0  ;;  %v10269_v28 = vrot.slane %v27800_v35, 7  ;;  %v31220_v36 = vcombine.low %v27583_v44, %v27587_v49  ;;  %v31221_v15 = vcombine.low %v27604_v53, %v27611_v54  ;;  %v18181_v58 = vrot.slane %v27794_v37, 9 }
 0x2bd   : > { %31217 = vst [vmem:[#allocation36_spill] sm:$0xff] %v27818_v16  ;;  %21077 = vmatmul.mubr.bf16.gmra.mxu0 %v31218_v32  ;;  %v27833_v16 = vadd.f32 %v7589_v22, %v7183_v0  ;;  %v7188_v17 = vadd.f32 %v20790_v8, %v31219_v26  ;;  %v10265_v32 = vrot.slane %v27778_v19, 7  ;;  %v27847_v22 = vld [vmem:[%s30893_s1 + $0x598] sm:$0xff]   ;;  %v31222_v44 = vrot.slane %v27666_v21, 5  ;;  %v27874_v21 = vld [vmem:[%s22490_s16 + $0x444] sm:$0xf] }
 0x2be   : > { %v20838_v55 = vpop.f32.mrf.mxu1  ;;  %21125 = vmatmul.mubr.bf16.gmra.mxu1 %v31220_v36  ;;  %21080 = vmatprep.mubr.bf16.mxu0 %v31221_v15  ;;  %v27850_v8 = vld [vmem:[%s22490_s16 + $0x218] sm:$0xf]  ;;  %v7071_v1 = vpop.f32.mrf.mxu0  ;;  %v31223_v49 = vrot.slane %v27654_v47, 9  ;;  %v31224_v54 = vrot.slane %v27680_v30, 5  ;;  %v10264_v19 = vrot.slane %v10262_v25, 4  ;;  %v9742_v37 = vrot.slane %v27797_v27, 5 }
 0x2bf   : > { %21128 = vmatprep.mubr.bf16.mxu1 %v18312_v7  ;;  %21157 = vmatpush3.bf16.msra.mxu0 %v27699_v40  ;;  %v27871_v40 = vld [vmem:[%s30893_s1 + $0x5d8] sm:$0xff]   ;;  %v27876_v47 = vadd.f32 %v20838_v55, %v7188_v17  ;;  %v31225_v7 = vld [vmem:[#allocation40_spill] sm:$0xff]  ;;  %v9741_v30 = vrot.slane %v9739_v46, 4  ;;  %v18285_v27 = vrot.slane %v27816_v14, 11  ;;  %v31226_v36 = vrot.slane %v27683_v20, 7 }
 0x2c0   : > { %v27859_v53 = vsel %vm22502_vm2, %v31223_v49, %v31222_v44  ;;  %v27865_v0 = vsel %vm22502_vm2, %v9727_v3, %v31224_v54  ;;  %v7186_v35 = vadd.f32 %v7071_v1, %v31225_v7  ;;  %v7602_v26 = vpop.f32.mrf.mxu1  ;;  %21205 = vmatpush3.bf16.msra.mxu1 %v27722_v51  ;;  %21158 = vmatprep.subr.bf16.mxu0 %v27791_v42  ;;  %v20791_v3 = vpop.f32.mrf.mxu0  ;;  %v10271_v51 = vrot.slane %v10269_v28, 4  ;;  %v31227_v44 = vld [vmem:[#allocation41_spill] sm:$0xff] }
 0x2c1   : > { %v27886_v15 = vsel %vm22776_vm5, %v18283_v23, %v31226_v36  ;;  %v27890_v55 = vsel %vm22776_vm5, %v10257_v24, %v10258_v31  ;;  %21206 = vmatprep.subr.bf16.mxu1 %v27812_v29  ;;  %v10272_v17 = vrot.slane %v18257_v59, 7  ;;  %v7189_v14 = vadd.f32 %v20791_v3, %v31227_v44  ;;  %v27905_v24 = vld [vmem:[%s22490_s16 + $0x214] sm:$0xe]  ;;  %v27908_v31 = vld [vmem:[%s22490_s16 + $0x21c] sm:$0x1] }
 0x2c2   : > { %v27893_v1 = vadd.f32 %v7602_v26, %v7186_v35  ;;  %v20839_v49 = vpop.f32.mrf.mxu1  ;;  %v18211_v20 = vcombine.low %v27859_v53, %v27865_v0  ;;  %v27902_v23 = vsel %vm22502_vm2, %v18180_v11, %v9732_v45  ;;  %v7074_v59 = vpop.f32.mrf.mxu0  ;;  %v27913_v54 = vsel %vm22502_vm2, %v9734_v10, %v9735_v13  ;;  %v18258_v45 = vld [vmem:[%s22490_s16 + $0x440] sm:$0x8]  ;;  %v27936_v10 = vld [vmem:[%s22490_s16 + $0x238] sm:$0xf]  ;;  %v22130_v13 = vld [vmem:[%s30893_s1 + $0x590] sm:$0xff]  }
 0x2c3   : > { %21159 = vmatpush3.bf16.msra.mxu0 %v27791_v42  ;;  %v27917_v7 = vsel %vm22776_vm5, %v18284_v63, %v10262_v25  ;;  %v27921_v2 = vsel %vm22502_vm2, %v18181_v58, %v9739_v46  ;;  %v9746_v11 = vrot.slane %v27850_v8, 5  ;;  %v27925_v35 = vadd.f32 %v20839_v49, %v7189_v14  ;;  %v31228_v26 = vld [vmem:[#allocation42_spill] sm:$0xff]  ;;  %v27976_v14 = vld [vmem:[%s22490_s16 + $0x234] sm:$0xe]  ;;  %v27979_v49 = vld [vmem:[%s22490_s16 + $0x23c] sm:$0x1] }
 0x2c4   : > { %v7187_v42 = vadd.f32 %v7074_v59, %v31228_v26  ;;  %v7605_v3 = vpop.f32.mrf.mxu1  ;;  %21207 = vmatpush3.bf16.msra.mxu1 %v27812_v29  ;;  %v27931_v25 = vsel %vm22776_vm5, %v10264_v19, %v10265_v32  ;;  %21160 = vmatprep.subr.bf16.mxu0 %v27847_v22  ;;  %v10276_v46 = vrot.slane %v27874_v21, 7  ;;  %v20794_v63 = vpop.f32.mrf.mxu0  ;;  %v31229_v58 = vcombine.low %v27663_v39, %v27677_v9  ;;  %v18260_v9 = vld [vmem:[%s22490_s16 + $0x448] sm:$0x7]  ;;  %v27960_v39 = vld [vmem:[%s22490_s16 + $0x464] sm:$0xf] }
 0x2c5   : > { %v27946_v29 = vsel %vm22502_vm2, %v9741_v30, %v9742_v37  ;;  %v27950_v32 = vsel %vm22776_vm5, %v18285_v27, %v10269_v28  ;;  %v27954_v8 = vsel %vm22776_vm5, %v10271_v51, %v10272_v17  ;;  %21208 = vmatprep.subr.bf16.mxu1 %v27871_v40  ;;  %v18182_v19 = vrot.slane %v27905_v24, 9  ;;  %v22131_v37 = vld [vmem:[%s30893_s1 + $0x5d0] sm:$0xff]   ;;  %v27984_v24 = vld [vmem:[%s30893_s1 + $0x588] sm:$0xff]  }
 0x2c6   : > { %21081 = vmatmul.mubr.bf16.gmra.mxu0 %v31229_v58  ;;  %v27965_v21 = vadd.f32 %v7605_v3, %v7187_v42  ;;  %v31230_v30 = vld [vmem:[#allocation20_spill] sm:$0xff]  ;;  %v20842_v27 = vpop.f32.mrf.mxu1  ;;  %v31231_v36 = vcombine.low %v27690_v12, %v27694_v52  ;;  %v31232_v51 = vcombine.low %v27703_v33, %v27707_v41  ;;  %v9749_v17 = vrot.slane %v27908_v31, 5  ;;  %v7087_v59 = vpop.f32.mrf.mxu0  ;;  %v31234_v42 = vld [vmem:[#allocation21_spill] sm:$0xff]  ;;  %v22133_v58 = vld [vmem:[%s30893_s1 + $0x5c8] sm:$0xff]  }
 0x2c7   : > { %v7192_v28 = vadd.f32 %v20794_v63, %v31230_v30  ;;  %v18286_v44 = vrot.slane %v18258_v45, 11  ;;  %v31233_v12 = vcombine.low %v27741_v5, %v27745_v6  ;;  %v18315_v52 = vcombine.low %v27886_v15, %v27890_v55  ;;  %21161 = vmatpush3.bf16.msra.mxu0 %v27847_v22  ;;  %v27996_v45 = vld [vmem:[%s22490_s16 + $0x460] sm:$0x8] }
 0x2c8   : > { %21129 = vmatmul.mubr.bf16.gmra.mxu1 %v31231_v36  ;;  %21084 = vmatprep.mubr.bf16.mxu0 %v31232_v51  ;;  %v18212_v33 = vcombine.low %v27902_v23, %v27913_v54  ;;  %v9748_v41 = vrot.slane %v9746_v11, 4  ;;  %v9753_v31 = vrot.slane %v27936_v10, 5  ;;  %v7190_v5 = vadd.f32 %v7087_v59, %v31234_v42  ;;  %v7618_v6 = vpop.f32.mrf.mxu1  ;;  %v20795_v23 = vpop.f32.mrf.mxu0  ;;  %v28009_v10 = vld [vmem:[%s22490_s16 + $0x468] sm:$0x7] }
 0x2c9   : > { %21132 = vmatprep.mubr.bf16.mxu1 %v31233_v12  ;;  %v27998_v26 = vadd.f32 %v20842_v27, %v7192_v28  ;;  %21209 = vmatpush3.bf16.msra.mxu1 %v27871_v40  ;;  %v10278_v15 = vrot.slane %v10276_v46, 4  ;;  %v10279_v55 = vrot.slane %v18260_v9, 7  ;;  %v18316_v22 = vcombine.low %v27917_v7, %v27931_v25  ;;  %v28013_v40 = vld [vmem:[%s22490_s16 + $0x258] sm:$0xf]  ;;  %v31235_v7 = vld [vmem:[#allocation22_spill] sm:$0xff] }
 0x2ca   : > { %21162 = vmatprep.subr.bf16.mxu0 %v22130_v13  ;;  %v18213_v54 = vcombine.low %v27921_v2, %v27946_v29  ;;  %v18317_v3 = vcombine.low %v27950_v32, %v27954_v8  ;;  %v10283_v63 = vrot.slane %v27960_v39, 7  ;;  %21210 = vmatprep.subr.bf16.mxu1 %v22131_v37  ;;  %v28018_v9 = vadd.f32 %v7618_v6, %v7190_v5  ;;  %v20843_v30 = vpop.f32.mrf.mxu1  ;;  %v28030_v27 = vld [vmem:[%s22490_s16 + $0x484] sm:$0xf]  ;;  %v7090_v36 = vpop.f32.mrf.mxu0 }
 0x2cb   : > { %v7193_v25 = vadd.f32 %v20795_v23, %v31235_v7  ;;  %v28023_v28 = vsel %vm22502_vm2, %v18182_v19, %v9746_v11  ;;  %v28027_v39 = vsel %vm22776_vm5, %v18286_v44, %v10276_v46  ;;  %v28034_v51 = vsel %vm22502_vm2, %v9748_v41, %v9749_v17  ;;  %21163 = vmatpush3.bf16.msra.mxu0 %v22130_v13  ;;  %v18160_v11 = vld [vmem:[%s22490_s16 + $0x254] sm:$0xe]  ;;  %v22134_v46 = vld [vmem:[%s30893_s1 + $0x580] sm:$0xff]   ;;  %v31236_v44 = vld [vmem:[#allocation23_spill] sm:$0xff] }
 0x2cc   : > { %v18183_v59 = vrot.slane %v27976_v14, 9  ;;  %v9755_v12 = vrot.slane %v9753_v31, 4  ;;  %v9756_v42 = vrot.slane %v27979_v49, 5  ;;  %v7191_v5 = vadd.f32 %v7090_v36, %v31236_v44  ;;  %v7621_v6 = vpop.f32.mrf.mxu1  ;;  %v28051_v49 = vld [vmem:[%s22490_s16 + $0x25c] sm:$0x1]  ;;  %21164 = vmatprep.subr.bf16.mxu0 %v27984_v24  ;;  %v22135_v41 = vld [vmem:[%s30893_s1 + $0x5c0] sm:$0xff]   ;;  %v20798_v23 = vpop.f32.mrf.mxu0 }
 0x2cd   : > { %v28042_v19 = vadd.f32 %v20843_v30, %v7193_v25  ;;  %v28047_v17 = vsel %vm22776_vm5, %v10278_v15, %v10279_v55  ;;  %v18287_v14 = vrot.slane %v27996_v45, 11  ;;  %21211 = vmatpush3.bf16.msra.mxu1 %v22131_v37  ;;  %v28054_v13 = vld [vmem:[%s22490_s16 + $0x480] sm:$0x8]  ;;  %v10285_v15 = vrot.slane %v10283_v63, 4  ;;  %v28066_v45 = vld [vmem:[%s22490_s16 + $0x488] sm:$0x7] }
 0x2ce   : > { %21085 = vmatmul.mubr.bf16.gmra.mxu0 %v18211_v20  ;;  %v10286_v55 = vrot.slane %v28009_v10, 7  ;;  %v9760_v37 = vrot.slane %v28013_v40, 5  ;;  %v10290_v7 = vrot.slane %v28030_v27, 7  ;;  %21212 = vmatprep.subr.bf16.mxu1 %v22133_v58  ;;  %v28069_v25 = vadd.f32 %v7621_v6, %v7191_v5  ;;  %v31237_v30 = vld [vmem:[#allocation24_spill] sm:$0xff]  ;;  %v20846_v44 = vpop.f32.mrf.mxu1  ;;  %v7103_v0 = vpop.f32.mrf.mxu0 }
 0x2cf   : > { %v7196_v36 = vadd.f32 %v20798_v23, %v31237_v30  ;;  %21088 = vmatprep.mubr.bf16.mxu0 %v18212_v33  ;;  %v18214_v53 = vcombine.low %v28023_v28, %v28034_v51  ;;  %v18318_v20 = vcombine.low %v28027_v39, %v28047_v17  ;;  %v28078_v10 = vsel %vm22502_vm2, %v18183_v59, %v9753_v31  ;;  %v28088_v33 = vld [vmem:[%s30893_s1 + $0x638] sm:$0xff]   ;;  %v28098_v27 = vld [vmem:[%s22490_s16 + $0x274] sm:$0xe]  ;;  %v18267_v23 = vld [vmem:[%s22490_s16 + $0x4a0] sm:$0x8] }
 0x2d0   : > { %21133 = vmatmul.mubr.bf16.gmra.mxu1 %v18315_v52  ;;  %v28082_v40 = vsel %vm22502_vm2, %v9755_v12, %v9756_v42  ;;  %v18184_v52 = vrot.slane %v18160_v11, 9  ;;  %21165 = vmatpush3.bf16.msra.mxu0 %v27984_v24  ;;  %v7194_v28 = vadd.f32 %v7103_v0, %v27316_v56  ;;  %v7634_v39 = vpop.f32.mrf.mxu1  ;;  %v28095_v31 = vsel %vm22776_vm5, %v18287_v14, %v10283_v63  ;;  %v28101_v51 = vld [vmem:[%s22490_s16 + $0x278] sm:$0xf]  ;;  %v28104_v24 = vld [vmem:[%s22490_s16 + $0x4a4] sm:$0xf]  ;;  %v20799_v59 = vpop.f32.mrf.mxu0 }
 0x2d1   : > { %21136 = vmatprep.mubr.bf16.mxu1 %v18316_v22  ;;  %v28090_v22 = vadd.f32 %v20846_v44, %v7196_v36  ;;  %21213 = vmatpush3.bf16.msra.mxu1 %v22133_v58  ;;  %v28108_v12 = vsel %vm22776_vm5, %v10285_v15, %v10286_v55  ;;  %v9762_v56 = vrot.slane %v9760_v37, 4  ;;  %v9763_v63 = vrot.slane %v28051_v49, 5  ;;  %v28115_v11 = vld [vmem:[%s30893_s1 + $0x678] sm:$0xff]   ;;  %v18269_v36 = vld [vmem:[%s22490_s16 + $0x4a8] sm:$0x7] }
 0x2d2   : > { %21166 = vmatprep.subr.bf16.mxu0 %v22134_v46  ;;  %v18288_v42 = vrot.slane %v28054_v13, 11  ;;  %21214 = vmatprep.subr.bf16.mxu1 %v22135_v41  ;;  %v28117_v58 = vadd.f32 %v7634_v39, %v7194_v28  ;;  %v7197_v5 = vadd.f32 %v20799_v59, %v27357_v57  ;;  %v20847_v6 = vpop.f32.mrf.mxu1  ;;  %v10292_v17 = vrot.slane %v10290_v7, 4  ;;  %v18165_v49 = vld [vmem:[%s22490_s16 + $0x27c] sm:$0x1]  ;;  %v7106_v13 = vpop.f32.mrf.mxu0  ;;  %v28133_v44 = vld [vmem:[%s22490_s16 + $0x298] sm:$0xf] }
 0x2d3   : > { %v10293_v14 = vrot.slane %v28066_v45, 7  ;;  %v18215_v15 = vcombine.low %v28078_v10, %v28082_v40  ;;  %v28127_v55 = vsel %vm22502_vm2, %v18184_v52, %v9760_v37  ;;  %v9767_v30 = vrot.slane %v28101_v51, 5  ;;  %v18166_v59 = vld [vmem:[%s22490_s16 + $0x294] sm:$0xe]  ;;  %v28142_v37 = vld [vmem:[%s22490_s16 + $0x4c4] sm:$0xf] }
 0x2d4   : > { %v10297_v57 = vrot.slane %v28104_v24, 7  ;;  %21167 = vmatpush3.bf16.msra.mxu0 %v22134_v46  ;;  %v28135_v45 = vadd.f32 %v20847_v6, %v7197_v5  ;;  %v7195_v0 = vadd.f32 %v7106_v13, %v27369_v34  ;;  %v7637_v28 = vpop.f32.mrf.mxu1  ;;  %v9764_v46 = vsel %vm22502_vm2, %v9762_v56, %v9763_v63  ;;  %v18168_v5 = vld [vmem:[%s22490_s16 + $0x29c] sm:$0x1] }
 0x2d5   : > { %21215 = vmatpush3.bf16.msra.mxu1 %v22135_v41  ;;  %21248 = vmatprep.subr.bf16.mxu0 %v28088_v33  ;;  %v20802_v52 = vpop.f32.mrf.mxu0  ;;  %v10291_v34 = vsel %vm22776_vm5, %v18288_v42, %v10290_v7  ;;  %v18185_v51 = vrot.slane %v28098_v27, 9  ;;  %v18289_v24 = vrot.slane %v18267_v23, 11  ;;  %v10294_v2 = vsel %vm22776_vm5, %v10292_v17, %v10293_v14 }
 0x2d6   : > { %21089 = vmatmul.mubr.bf16.gmra.mxu0 %v18213_v54  ;;  %21296 = vmatprep.subr.bf16.mxu1 %v28115_v11  ;;  %v28155_v41 = vadd.f32 %v7637_v28, %v7195_v0  ;;  %v7200_v6 = vadd.f32 %v20802_v52, %v27383_v43  ;;  %v20850_v13 = vpop.f32.mrf.mxu1  ;;  %v9774_v29 = vrot.slane %v28133_v44, 5  ;;  %v18270_v54 = vld [vmem:[%s22490_s16 + $0x4c0] sm:$0x8]  ;;  %v9769_v27 = vrot.slane %v9767_v30, 4  ;;  %v18272_v43 = vld [vmem:[%s22490_s16 + $0x4c8] sm:$0x7] }
 0x2d7   : > { %21092 = vmatprep.mubr.bf16.mxu0 %v18214_v53  ;;  %v7119_v7 = vpop.f32.mrf.mxu0  ;;  %v9770_v56 = vrot.slane %v18165_v49, 5  ;;  %v10299_v63 = vrot.slane %v10297_v57, 4  ;;  %v10300_v42 = vrot.slane %v18269_v36, 7  ;;  %v31238_v0 = vld [vmem:[#allocation25_spill] sm:$0xff]  ;;  %v10304_v53 = vrot.slane %v28142_v37, 7 }
 0x2d8   : > { %21137 = vmatmul.mubr.bf16.gmra.mxu1 %v18317_v3  ;;  %v28166_v23 = vadd.f32 %v20850_v13, %v7200_v6  ;;  %v7198_v32 = vadd.f32 %v7119_v7, %v31238_v0  ;;  %v7650_v8 = vpop.f32.mrf.mxu1  ;;  %v18216_v3 = vcombine.low %v28127_v55, %v9764_v46  ;;  %v18320_v14 = vcombine.low %v10291_v34, %v10294_v2  ;;  %v28180_v44 = vld [vmem:[%s22490_s16 + $0x2b8] sm:$0xf]  ;;  %v18169_v34 = vld [vmem:[%s22490_s16 + $0x2b4] sm:$0xe]  ;;  %v31239_v2 = vld [vmem:[#allocation26_spill] sm:$0xff] }
 0x2d9   : > { %21140 = vmatprep.mubr.bf16.mxu1 %v18318_v20  ;;  %v20803_v17 = vpop.f32.mrf.mxu0  ;;  %v28173_v20 = vsel %vm22502_vm2, %v18185_v51, %v9767_v30  ;;  %v28177_v49 = vsel %vm22776_vm5, %v18289_v24, %v10297_v57  ;;  %v18186_v36 = vrot.slane %v18166_v59, 9  ;;  %v9776_v52 = vrot.slane %v9774_v29, 4  ;;  %v28187_v30 = vld [vmem:[%s22490_s16 + $0x4e4] sm:$0xf]  ;;  %v28196_v13 = vld [vmem:[%s22490_s16 + $0x318] sm:$0xf] }
 0x2da   : > { %v28182_v28 = vadd.f32 %v7650_v8, %v7198_v32  ;;  %v7201_v55 = vadd.f32 %v20803_v17, %v27424_v48  ;;  %v20851_v37 = vpop.f32.mrf.mxu1  ;;  %v9777_v46 = vrot.slane %v18168_v5, 5  ;;  %v9771_v57 = vsel %vm22502_vm2, %v9769_v27, %v9770_v56  ;;  %v18171_v32 = vld [vmem:[%s22490_s16 + $0x2bc] sm:$0x1]  ;;  %v18273_v17 = vld [vmem:[%s22490_s16 + $0x4e0] sm:$0x8]  ;;  %v31240_v56 = vld [vmem:[#allocation27_spill] sm:$0xff] }
 0x2db   : > { %v7122_v51 = vpop.f32.mrf.mxu0  ;;  %v28193_v59 = vsel %vm22776_vm5, %v10299_v63, %v10300_v42  ;;  %v18290_v24 = vrot.slane %v18270_v54, 11  ;;  %v10307_v6 = vrot.slane %v18272_v43, 7  ;;  %v10306_v0 = vrot.slane %v10304_v53, 4 }
 0x2dc   : > { %v28198_v48 = vadd.f32 %v20851_v37, %v7201_v55  ;;  %v7199_v7 = vadd.f32 %v7122_v51, %v31239_v2  ;;  %v7653_v5 = vpop.f32.mrf.mxu1  ;;  %v9781_v8 = vrot.slane %v28180_v44, 5  ;;  %v9775_v54 = vsel %vm22502_vm2, %v18186_v36, %v9774_v29  ;;  %v18275_v36 = vld [vmem:[%s22490_s16 + $0x4e8] sm:$0x7] }
 0x2dd   : > { %v20806_v39 = vpop.f32.mrf.mxu0  ;;  %v31241_v43 = vcombine.low %v28095_v31, %v28108_v12  ;;  %v9778_v10 = vsel %vm22502_vm2, %v9776_v52, %v9777_v46  ;;  %v10311_v40 = vrot.slane %v28187_v30, 7  ;;  %v18217_v29 = vcombine.low %v28173_v20, %v9771_v57  ;;  %v18358_v46 = vld [vmem:[%s22490_s16 + $0x31c] sm:$0x1] }
 0x2de   : > { %21093 = vmatmul.mubr.bf16.gmra.mxu0 %v18215_v15  ;;  %v28209_v27 = vadd.f32 %v7653_v5, %v7199_v7  ;;  %v7204_v63 = vadd.f32 %v20806_v39, %v31240_v56  ;;  %v20854_v42 = vpop.f32.mrf.mxu1  ;;  %v18321_v39 = vcombine.low %v28177_v49, %v28193_v59  ;;  %v10305_v31 = vsel %vm22776_vm5, %v18290_v24, %v10304_v53  ;;  %v18360_v53 = vld [vmem:[%s22490_s16 + $0x338] sm:$0xf] }
 0x2df   : > { %21096 = vmatprep.mubr.bf16.mxu0 %v18216_v3  ;;  %v7135_v15 = vpop.f32.mrf.mxu0  ;;  %v18187_v12 = vrot.slane %v18169_v34, 9  ;;  %v31242_v3 = vld [vmem:[#allocation28_spill] sm:$0xff]  ;;  %v10308_v52 = vsel %vm22776_vm5, %v10306_v0, %v10307_v6  ;;  %v10994_v20 = vrot.slane %v28196_v13, 5  ;;  %v18218_v49 = vcombine.low %v9775_v54, %v9778_v10  ;;  %v31243_v24 = vld [vmem:[#allocation29_spill] sm:$0xff] }
 0x2e0   : > { %21141 = vmatmul.mubr.bf16.gmra.mxu1 %v31241_v43  ;;  %v28224_v44 = vadd.f32 %v20854_v42, %v7204_v63  ;;  %v7202_v55 = vadd.f32 %v7135_v15, %v31242_v3  ;;  %v7666_v37 = vpop.f32.mrf.mxu1  ;;  %v9783_v51 = vrot.slane %v9781_v8, 4  ;;  %v9784_v57 = vrot.slane %v18171_v32, 5 }
 0x2e1   : > { %21144 = vmatprep.mubr.bf16.mxu1 %v18320_v14  ;;  %v18356_v14 = vld [vmem:[%s22490_s16 + $0x314] sm:$0xe]  ;;  %v20807_v30 = vpop.f32.mrf.mxu0  ;;  %v18291_v59 = vrot.slane %v18273_v17, 11  ;;  %v10313_v5 = vrot.slane %v10311_v40, 4  ;;  %v10314_v56 = vrot.slane %v18275_v36, 7  ;;  %v18322_v6 = vcombine.low %v10305_v31, %v10308_v52 }
 0x2e2   : > { %v28233_v34 = vadd.f32 %v7666_v37, %v7202_v55  ;;  %v7205_v2 = vadd.f32 %v20807_v30, %v31243_v24  ;;  %v20855_v7 = vpop.f32.mrf.mxu1  ;;  %v18404_v0 = vrot.slane %v18356_v14, 9  ;;  %v10996_v32 = vrot.slane %v10994_v20, 4  ;;  %v18359_v36 = vld [vmem:[%s22490_s16 + $0x334] sm:$0xe]  ;;  %v18361_v14 = vld [vmem:[%s22490_s16 + $0x33c] sm:$0x1] }
 0x2e3   : > { %v7138_v63 = vpop.f32.mrf.mxu0  ;;  %v10997_v17 = vrot.slane %v18358_v46, 5  ;;  %v9782_v10 = vsel %vm22502_vm2, %v18187_v12, %v9781_v8  ;;  %v9785_v15 = vsel %vm22502_vm2, %v9783_v51, %v9784_v57  ;;  %v10312_v31 = vsel %vm22776_vm5, %v18291_v59, %v10311_v40  ;;  %v18363_v12 = vld [vmem:[%s22490_s16 + $0x358] sm:$0xf]  ;;  %v31245_v40 = vld [vmem:[#allocation31_spill] sm:$0xff] }
 0x2e4   : > { %v28236_v42 = vadd.f32 %v20855_v7, %v7205_v2  ;;  %v7203_v13 = vadd.f32 %v7138_v63, %v27521_v62  ;;  %v7669_v54 = vpop.f32.mrf.mxu1  ;;  %v31244_v62 = vld [vmem:[#allocation30_spill] sm:$0xff]  ;;  %v11001_v8 = vrot.slane %v18360_v53, 5  ;;  %v18219_v59 = vcombine.low %v9782_v10, %v9785_v15  ;;  %v18362_v2 = vld [vmem:[%s22490_s16 + $0x354] sm:$0xe]  ;;  %v18364_v7 = vld [vmem:[%s22490_s16 + $0x35c] sm:$0x1] }
 0x2e5   : > { %v20810_v43 = vpop.f32.mrf.mxu0  ;;  %v18405_v24 = vrot.slane %v18359_v36, 9  ;;  %v31246_v10 = vld [vmem:[#allocation32_spill] sm:$0xff]  ;;  %v18406_v36 = vrot.slane %v18362_v2, 9 }
 0x2e6   : > { %21097 = vmatmul.mubr.bf16.gmra.mxu0 %v18217_v29  ;;  %v28246_v3 = vadd.f32 %v7669_v54, %v7203_v13  ;;  %v7208_v55 = vadd.f32 %v20810_v43, %v31244_v62  ;;  %v20858_v37 = vpop.f32.mrf.mxu1  ;;  %v10315_v29 = vsel %vm22776_vm5, %v10313_v5, %v10314_v56  ;;  %v11008_v5 = vrot.slane %v18363_v12, 5  ;;  %v28266_v43 = vld [vmem:[%s22490_s16 + $0x378] sm:$0xf] }
 0x2e7   : > { %21100 = vmatprep.mubr.bf16.mxu0 %v18218_v49  ;;  %v7151_v52 = vpop.f32.mrf.mxu0  ;;  %v10998_v49 = vsel %vm22502_vm2, %v10996_v32, %v10997_v17  ;;  %v18323_v53 = vcombine.low %v10312_v31, %v10315_v29  ;;  %v11003_v13 = vrot.slane %v11001_v8, 4  ;;  %v11004_v54 = vrot.slane %v18361_v14, 5  ;;  %v28269_v32 = vld [vmem:[%s22490_s16 + $0x398] sm:$0xf] }
 0x2e8   : > { %21145 = vmatmul.mubr.bf16.gmra.mxu1 %v18321_v39  ;;  %v28253_v46 = vadd.f32 %v20858_v37, %v7208_v55  ;;  %v7206_v30 = vadd.f32 %v7151_v52, %v31245_v40  ;;  %v7682_v51 = vpop.f32.mrf.mxu1  ;;  %v10995_v39 = vsel %vm22502_vm2, %v18404_v0, %v10994_v20  ;;  %v11010_v55 = vrot.slane %v11008_v5, 4  ;;  %v31247_v12 = vld [vmem:[#allocation33_spill] sm:$0xff]  ;;  %v31248_v40 = vld [vmem:[#allocation4_spill] sm:$0xff] }
 0x2e9   : > { %21148 = vmatprep.mubr.bf16.mxu1 %v18322_v6  ;;  %v20811_v57 = vpop.f32.mrf.mxu0  ;;  %v18436_v0 = vcombine.low %v10995_v39, %v10998_v49  ;;  %v11011_v37 = vrot.slane %v18364_v7, 5  ;;  %v18367_v49 = vld [vmem:[%s22490_s16 + $0x37c] sm:$0x1] }
 0x2ea   : > { %v28262_v56 = vadd.f32 %v7682_v51, %v7206_v30  ;;  %v7209_v63 = vadd.f32 %v20811_v57, %v27597_v38  ;;  %v20859_v6 = vpop.f32.mrf.mxu1  ;;  %v11002_v38 = vsel %vm22502_vm2, %v18405_v24, %v11001_v8  ;;  %v11005_v30 = vsel %vm22502_vm2, %v11003_v13, %v11004_v54  ;;  %v18365_v51 = vld [vmem:[%s22490_s16 + $0x374] sm:$0xe]  ;;  %v31249_v24 = vld [vmem:[#allocation34_spill] sm:$0xff] }
 0x2eb   : > { %v7154_v20 = vpop.f32.mrf.mxu0  ;;  %v11015_v8 = vrot.slane %v28266_v43, 5  ;;  %v18368_v57 = vld [vmem:[%s22490_s16 + $0x394] sm:$0xe]  ;;  %v11009_v13 = vsel %vm22502_vm2, %v18406_v36, %v11008_v5  ;;  %v11012_v54 = vsel %vm22502_vm2, %v11010_v55, %v11011_v37 }
 0x2ec   : > { %v28271_v17 = vadd.f32 %v20859_v6, %v7209_v63  ;;  %v7207_v15 = vadd.f32 %v7154_v20, %v31246_v10  ;;  %v7685_v31 = vpop.f32.mrf.mxu1  ;;  %v18370_v63 = vld [vmem:[%s22490_s16 + $0x39c] sm:$0x1]  ;;  %v18437_v20 = vcombine.low %v11002_v38, %v11005_v30  ;;  %v28296_v10 = vld [vmem:[%s22490_s16 + $0x3b8] sm:$0xf]  ;;  %v18408_v38 = vrot.slane %v18368_v57, 9 }
 0x2ed   : > { %v20814_v62 = vpop.f32.mrf.mxu0  ;;  %v11017_v5 = vrot.slane %v11015_v8, 4  ;;  %v11025_v36 = vrot.slane %v18370_v63, 5 }
 0x2ee   : > { %21101 = vmatmul.mubr.bf16.gmra.mxu0 %v18219_v59  ;;  %v28276_v29 = vadd.f32 %v7685_v31, %v7207_v15  ;;  %v7212_v52 = vadd.f32 %v20814_v62, %v31247_v12  ;;  %v20862_v14 = vpop.f32.mrf.mxu1  ;;  %v11018_v62 = vrot.slane %v18367_v49, 5  ;;  %v28312_v49 = vld [vmem:[%s22490_s16 + $0x3d8] sm:$0xf] }
 0x2ef   : > { %21168 = vmatprep.mubr.bf16.mxu0 %v31248_v40  ;;  %v7167_v39 = vpop.f32.mrf.mxu0  ;;  %v31256_v40 = vld [vmem:[#allocation9_spill] sm:$0xff] }
 0x2f0   : > { %21149 = vmatmul.mubr.bf16.gmra.mxu1 %v18323_v53  ;;  %v28286_v59 = vadd.f32 %v20862_v14, %v7212_v52  ;;  %v7210_v2 = vadd.f32 %v7167_v39, %v31249_v24  ;;  %v7698_v7 = vpop.f32.mrf.mxu1  ;;  %v11022_v53 = vrot.slane %v28269_v32, 5  ;;  %v22138_v32 = vld [vmem:[%s30893_s1 + $0x630] sm:$0xff]   ;;  %v18438_v14 = vcombine.low %v11009_v13, %v11012_v54  ;;  %v31250_v39 = vld [vmem:[#allocation5_spill] sm:$0xff] }
 0x2f1   : > { %21216 = vmatprep.mubr.bf16.mxu1 %v18436_v0  ;;  %v20815_v6 = vpop.f32.mrf.mxu0  ;;  %v18407_v0 = vrot.slane %v18365_v51, 9 }
 0x2f2   : > { %v28298_v43 = vadd.f32 %v7698_v7, %v7210_v2  ;;  %v7213_v15 = vadd.f32 %v20815_v6, %v27668_v18  ;;  %v20863_v31 = vpop.f32.mrf.mxu1  ;;  %v22139_v18 = vld [vmem:[%s30893_s1 + $0x670] sm:$0xff]   ;;  %v11024_v30 = vrot.slane %v11022_v53, 4  ;;  %v11029_v7 = vrot.slane %v28296_v10, 5  ;;  %v31251_v6 = vld [vmem:[#allocation6_spill] sm:$0xff] }
 0x2f3   : > { %v7170_v12 = vpop.f32.mrf.mxu0  ;;  %v11016_v13 = vsel %vm22502_vm2, %v18407_v0, %v11015_v8  ;;  %v18373_v0 = vld [vmem:[%s22490_s16 + $0x3bc] sm:$0x1] }
 0x2f4   : > { %v28304_v55 = vadd.f32 %v20863_v31, %v7213_v15  ;;  %v7211_v37 = vadd.f32 %v7170_v12, %v27712_v61  ;;  %v7701_v52 = vpop.f32.mrf.mxu1  ;;  %v18371_v61 = vld [vmem:[%s22490_s16 + $0x3b4] sm:$0xe]  ;;  %v11026_v8 = vsel %vm22502_vm2, %v11024_v30, %v11025_v36  ;;  %v11031_v30 = vrot.slane %v11029_v7, 4 }
 0x2f5   : > { %v20882_v51 = vpop.f32.mrf.mxu0  ;;  %v18374_v31 = vld [vmem:[%s22490_s16 + $0x3d4] sm:$0xe]  ;;  %v18409_v12 = vrot.slane %v18371_v61, 9  ;;  %v11032_v61 = vrot.slane %v18373_v0, 5 }
 0x2f6   : > { %21169 = vmatmul.mubr.bf16.vlgmr.msra.gmra.mxu0 %v31250_v39  ;;  %v28314_v57 = vadd.f32 %v7701_v52, %v7211_v37  ;;  %v8101_v24 = vadd.f32 %v20882_v51, %v27752_v4  ;;  %v20930_v2 = vpop.f32.mrf.mxu1  ;;  %v11019_v4 = vsel %vm22502_vm2, %v11017_v5, %v11018_v62  ;;  %v11036_v62 = vrot.slane %v28312_v49, 5  ;;  %v18376_v5 = vld [vmem:[%s22490_s16 + $0x3dc] sm:$0x1]  ;;  %v28344_v37 = vld [vmem:[%s22490_s16 + $0x3f8] sm:$0xf] }
 0x2f7   : > { %21249 = vmatpush3.bf16.msra.mxu0 %v28088_v33  ;;  %v7972_v63 = vpop.f32.mrf.mxu0  ;;  %21172 = vmatprep.mubr.bf16.mxu0 %v31251_v6  ;;  %v11023_v33 = vsel %vm22502_vm2, %v18408_v38, %v11022_v53  ;;  %v22141_v53 = vld [vmem:[%s30893_s1 + $0x668] sm:$0xff]   ;;  %v18439_v36 = vcombine.low %v11016_v13, %v11019_v4  ;;  %v28402_v39 = vld [vmem:[%s22490_s16 + $0x434] sm:$0xe] }
 0x2f8   : > { %21217 = vmatmul.mubr.bf16.vlgmr.msra.gmra.mxu1 %v18437_v20  ;;  %v22140_v20 = vld [vmem:[%s30893_s1 + $0x628] sm:$0xff]   ;;  %v28331_v54 = vadd.f32 %v20930_v2, %v8101_v24  ;;  %v8502_v15 = vpop.f32.mrf.mxu1  ;;  %21250 = vmatprep.subr.bf16.mxu0 %v22138_v32  ;;  %v22142_v2 = vld [vmem:[%s30893_s1 + $0x620] sm:$0xff]   ;;  %v11038_v4 = vrot.slane %v11036_v62, 4 }
 0x2f9   : > { %21297 = vmatpush3.bf16.msra.mxu1 %v28115_v11  ;;  %v31252_v11 = vld [vmem:[#allocation35_spill] sm:$0xff]  ;;  %21220 = vmatprep.mubr.bf16.mxu1 %v18438_v14  ;;  %v20883_v38 = vpop.f32.mrf.mxu0  ;;  %v31253_v14 = vld [vmem:[#allocation36_spill] sm:$0xff] }
 0x2fa   : > { %v8099_v10 = vadd.f32 %v7972_v63, %v31252_v11  ;;  %21298 = vmatprep.subr.bf16.mxu1 %v22139_v18  ;;  %v8102_v51 = vadd.f32 %v20883_v38, %v31253_v14  ;;  %v20931_v24 = vpop.f32.mrf.mxu1  ;;  %v18440_v63 = vcombine.low %v11023_v33, %v11026_v8  ;;  %v18410_v11 = vrot.slane %v18374_v31, 9  ;;  %v31254_v6 = vld [vmem:[#allocation7_spill] sm:$0xff]  ;;  %v31255_v31 = vld [vmem:[#allocation8_spill] sm:$0xff] }
 0x2fb   : > { %21251 = vmatpush3.bf16.msra.mxu0 %v22138_v32  ;;  %v7975_v49 = vpop.f32.mrf.mxu0  ;;  %v11039_v38 = vrot.slane %v18376_v5, 5  ;;  %v11030_v5 = vsel %vm22502_vm2, %v18409_v12, %v11029_v7  ;;  %v18380_v7 = vld [vmem:[%s22490_s16 + $0x414] sm:$0xe] }
 0x2fc   : > { %v28346_v52 = vadd.f32 %v8502_v15, %v8099_v10  ;;  %21252 = vmatprep.subr.bf16.mxu0 %v22140_v20  ;;  %v22143_v10 = vld [vmem:[%s30893_s1 + $0x660] sm:$0xff]   ;;  %v28355_v15 = vadd.f32 %v20931_v24, %v8102_v51  ;;  %v8100_v32 = vadd.f32 %v7975_v49, %v27833_v16  ;;  %v8505_v13 = vpop.f32.mrf.mxu1  ;;  %v18377_v16 = vld [vmem:[%s22490_s16 + $0x3f4] sm:$0xe]  ;;  %v11043_v51 = vrot.slane %v28344_v37, 5 }
 0x2fd   : > { %21299 = vmatpush3.bf16.msra.mxu1 %v22139_v18  ;;  %v20886_v14 = vpop.f32.mrf.mxu0  ;;  %v28360_v18 = vld [vmem:[%s22490_s16 + $0x418] sm:$0xf]  ;;  %v11033_v49 = vsel %vm22502_vm2, %v11031_v30, %v11032_v61  ;;  %v11040_v37 = vsel %vm22502_vm2, %v11038_v4, %v11039_v38  ;;  %v18411_v30 = vrot.slane %v18377_v16, 9 }
 0x2fe   : > { %21300 = vmatprep.subr.bf16.mxu1 %v22141_v53  ;;  %21173 = vmatmul.mubr.bf16.gmra.mxu0 %v31254_v6  ;;  %v28362_v33 = vadd.f32 %v8505_v13, %v8100_v32  ;;  %v8105_v8 = vadd.f32 %v20886_v14, %v27876_v47  ;;  %v20934_v0 = vpop.f32.mrf.mxu1  ;;  %v11037_v47 = vsel %vm22502_vm2, %v18410_v11, %v11036_v62  ;;  %v11050_v12 = vrot.slane %v28360_v18, 5  ;;  %v28387_v61 = vld [vmem:[%s22490_s16 + $0x438] sm:$0xf] }
 0x2ff   : > { %21176 = vmatprep.mubr.bf16.mxu0 %v31255_v31  ;;  %v7988_v24 = vpop.f32.mrf.mxu0  ;;  %21253 = vmatpush3.bf16.msra.mxu0 %v22140_v20  ;;  %v22144_v20 = vld [vmem:[%s30893_s1 + $0x618] sm:$0xff]   ;;  %v18441_v14 = vcombine.low %v11030_v5, %v11033_v49  ;;  %v11045_v18 = vrot.slane %v11043_v51, 4  ;;  %v18412_v6 = vrot.slane %v18380_v7, 9 }
 0x300   : > { %21221 = vmatmul.mubr.bf16.gmra.mxu1 %v18439_v36  ;;  %v28374_v36 = vadd.f32 %v20934_v0, %v8105_v8  ;;  %v8103_v32 = vadd.f32 %v7988_v24, %v27893_v1  ;;  %v8518_v13 = vpop.f32.mrf.mxu1  ;;  %21254 = vmatprep.subr.bf16.mxu0 %v22142_v2  ;;  %v18382_v1 = vld [vmem:[%s22490_s16 + $0x41c] sm:$0x1]  ;;  %v28396_v8 = vld [vmem:[%s22490_s16 + $0x458] sm:$0xf]  ;;  %v22146_v0 = vld [vmem:[%s30893_s1 + $0x610] sm:$0xff]   ;;  %v18442_v24 = vcombine.low %v11037_v47, %v11040_v37  ;;  %v11052_v49 = vrot.slane %v11050_v12, 4 }
 0x301   : > { %21224 = vmatprep.mubr.bf16.mxu1 %v18440_v63  ;;  %21301 = vmatpush3.bf16.msra.mxu1 %v22141_v53  ;;  %v18379_v63 = vld [vmem:[%s22490_s16 + $0x3fc] sm:$0x1]  ;;  %v20887_v62 = vpop.f32.mrf.mxu0  ;;  %v11057_v47 = vrot.slane %v28387_v61, 5  ;;  %v11044_v61 = vsel %vm22502_vm2, %v18411_v30, %v11043_v51  ;;  %v18413_v51 = vrot.slane %v28402_v39, 9  ;;  %v28435_v30 = vld [vmem:[%s22490_s16 + $0x478] sm:$0xf] }
 0x302   : > { %21302 = vmatprep.subr.bf16.mxu1 %v22143_v10  ;;  %v22145_v53 = vld [vmem:[%s30893_s1 + $0x658] sm:$0xff]   ;;  %v28392_v11 = vadd.f32 %v8518_v13, %v8103_v32  ;;  %v8106_v4 = vadd.f32 %v20887_v62, %v27925_v35  ;;  %v20935_v38 = vpop.f32.mrf.mxu1  ;;  %v11046_v31 = vrot.slane %v18379_v63, 5  ;;  %v11053_v13 = vrot.slane %v18382_v1, 5  ;;  %v28418_v1 = vld [vmem:[%s22490_s16 + $0x454] sm:$0xe]  ;;  %v22149_v39 = vld [vmem:[%s30893_s1 + $0x648] sm:$0xff]  }
 0x303   : > { %v7991_v16 = vpop.f32.mrf.mxu0  ;;  %21255 = vmatpush3.bf16.msra.mxu0 %v22142_v2  ;;  %v22147_v2 = vld [vmem:[%s30893_s1 + $0x650] sm:$0xff]   ;;  %v18385_v7 = vld [vmem:[%s22490_s16 + $0x43c] sm:$0x1] }
 0x304   : > { %v28404_v32 = vadd.f32 %v20935_v38, %v8106_v4  ;;  %v8104_v35 = vadd.f32 %v7991_v16, %v27965_v21  ;;  %v8521_v5 = vpop.f32.mrf.mxu1  ;;  %21256 = vmatprep.subr.bf16.mxu0 %v22144_v20  ;;  %v11047_v38 = vsel %vm22502_vm2, %v11045_v18, %v11046_v31  ;;  %v18388_v31 = vld [vmem:[%s22490_s16 + $0x45c] sm:$0x1]  ;;  %v18414_v18 = vrot.slane %v28418_v1, 9 }
 0x305   : > { %21303 = vmatpush3.bf16.msra.mxu1 %v22143_v10  ;;  %v20890_v62 = vpop.f32.mrf.mxu0  ;;  %v31257_v10 = vld [vmem:[#allocation10_spill] sm:$0xff] }
 0x306   : > { %21177 = vmatmul.mubr.bf16.gmra.mxu0 %v31256_v40  ;;  %21304 = vmatprep.subr.bf16.mxu1 %v22145_v53  ;;  %v28412_v37 = vadd.f32 %v8521_v5, %v8104_v35  ;;  %v8109_v21 = vadd.f32 %v20890_v62, %v27998_v26  ;;  %v20938_v63 = vpop.f32.mrf.mxu1  ;;  %v11051_v26 = vsel %vm22502_vm2, %v18412_v6, %v11050_v12  ;;  %v22148_v6 = vld [vmem:[%s30893_s1 + $0x608] sm:$0xff]   ;;  %v11067_v40 = vrot.slane %v18388_v31, 5  ;;  %v22151_v31 = vld [vmem:[%s30893_s1 + $0x640] sm:$0xff]  }
 0x307   : > { %21180 = vmatprep.mubr.bf16.mxu0 %v31257_v10  ;;  %v8004_v4 = vpop.f32.mrf.mxu0  ;;  %21257 = vmatpush3.bf16.msra.mxu0 %v22144_v20  ;;  %v11060_v20 = vrot.slane %v18385_v7, 5  ;;  %v18443_v62 = vcombine.low %v11044_v61, %v11047_v38  ;;  %v28457_v7 = vld [vmem:[%s22490_s16 + $0x4b8] sm:$0xf]  ;;  %v28464_v61 = vld [vmem:[%s22490_s16 + $0x494] sm:$0xe] }
 0x308   : > { %21225 = vmatmul.mubr.bf16.gmra.mxu1 %v18441_v14  ;;  %v11064_v14 = vrot.slane %v28396_v8, 5  ;;  %v28427_v16 = vadd.f32 %v20938_v63, %v8109_v21  ;;  %v8107_v35 = vadd.f32 %v8004_v4, %v28018_v9  ;;  %v8534_v5 = vpop.f32.mrf.mxu1  ;;  %21258 = vmatprep.subr.bf16.mxu0 %v22146_v0  ;;  %v11059_v9 = vrot.slane %v11057_v47, 4  ;;  %v28442_v8 = vld [vmem:[%s22490_s16 + $0x498] sm:$0xf]  ;;  %v28451_v21 = vld [vmem:[%s22490_s16 + $0x474] sm:$0xe] }
 0x309   : > { %21228 = vmatprep.mubr.bf16.mxu1 %v18442_v24  ;;  %v11054_v24 = vsel %vm22502_vm2, %v11052_v49, %v11053_v13  ;;  %21305 = vmatpush3.bf16.msra.mxu1 %v22145_v53  ;;  %v20891_v12 = vpop.f32.mrf.mxu0  ;;  %v28454_v63 = vld [vmem:[%s22490_s16 + $0x47c] sm:$0x1] }
 0x30a   : > { %31258 = vst [vmem:[#allocation37_spill] sm:$0xff] %v28427_v16  ;;  %21306 = vmatprep.subr.bf16.mxu1 %v22147_v2  ;;  %v28447_v53 = vadd.f32 %v8534_v5, %v8107_v35  ;;  %v8110_v49 = vadd.f32 %v20891_v12, %v28042_v19  ;;  %v20939_v13 = vpop.f32.mrf.mxu1  ;;  %v18444_v4 = vcombine.low %v11051_v26, %v11054_v24  ;;  %v11066_v10 = vrot.slane %v11064_v14, 4  ;;  %v28467_v38 = vld [vmem:[%s22490_s16 + $0x49c] sm:$0x1]  ;;  %v22150_v26 = vld [vmem:[%s30893_s1 + $0x600] sm:$0xff]  }
 0x30b   : > { %v8007_v1 = vpop.f32.mrf.mxu0  ;;  %21259 = vmatpush3.bf16.msra.mxu0 %v22146_v0  ;;  %v31260_v0 = vld [vmem:[#allocation11_spill] sm:$0xff] }
 0x30c   : > { %v28459_v16 = vadd.f32 %v20939_v13, %v8110_v49  ;;  %v8108_v35 = vadd.f32 %v8007_v1, %v28069_v25  ;;  %v8537_v19 = vpop.f32.mrf.mxu1  ;;  %21260 = vmatprep.subr.bf16.mxu0 %v22148_v6  ;;  %v28475_v25 = vsel %vm22502_vm2, %v18413_v51, %v11057_v47  ;;  %v31262_v1 = vld [vmem:[#allocation12_spill] sm:$0xff]  ;;  %v11078_v47 = vrot.slane %v28442_v8, 5 }
 0x30d   : > { %21307 = vmatpush3.bf16.msra.mxu1 %v22147_v2  ;;  %v20894_v24 = vpop.f32.mrf.mxu0  ;;  %v28479_v2 = vsel %vm22502_vm2, %v11059_v9, %v11060_v20  ;;  %v28490_v51 = vld [vmem:[%s22490_s16 + $0x4b4] sm:$0xe]  ;;  %v11068_v9 = vsel %vm22502_vm2, %v11066_v10, %v11067_v40  ;;  %v18416_v10 = vrot.slane %v28464_v61, 9 }
 0x30e   : > { %31259 = vst [vmem:[#allocation38_spill] sm:$0xff] %v28459_v16  ;;  %21181 = vmatmul.mubr.bf16.gmra.mxu0 %v31260_v0  ;;  %21308 = vmatprep.subr.bf16.mxu1 %v22149_v39  ;;  %v28484_v12 = vadd.f32 %v8537_v19, %v8108_v35  ;;  %v8113_v49 = vadd.f32 %v20894_v24, %v28090_v22  ;;  %v20942_v13 = vpop.f32.mrf.mxu1  ;;  %v18415_v19 = vrot.slane %v28451_v21, 9  ;;  %v11074_v22 = vrot.slane %v28454_v63, 5  ;;  %v28524_v63 = vld [vmem:[%s22490_s16 + $0x4f8] sm:$0xf] }
 0x30f   : > { %21184 = vmatprep.mubr.bf16.mxu0 %v31262_v1  ;;  %v8020_v20 = vpop.f32.mrf.mxu0  ;;  %v11065_v35 = vsel %vm22502_vm2, %v18414_v18, %v11064_v14  ;;  %21261 = vmatpush3.bf16.msra.mxu0 %v22148_v6  ;;  %v28508_v14 = vld [vmem:[%s22490_s16 + $0x4d4] sm:$0xe]  ;;  %v28511_v18 = vld [vmem:[%s22490_s16 + $0x4d8] sm:$0xf]  ;;  %v18445_v40 = vcombine.low %v28475_v25, %v28479_v2  ;;  %v18417_v21 = vrot.slane %v28490_v51, 9  ;;  %v11080_v61 = vrot.slane %v11078_v47, 4 }
 0x310   : > { %31261 = vst [vmem:[#allocation3_spill] sm:$0xff] %v28484_v12  ;;  %21229 = vmatmul.mubr.bf16.gmra.mxu1 %v18443_v62  ;;  %v28498_v62 = vld [vmem:[%s22490_s16 + $0x4bc] sm:$0x1]  ;;  %v28500_v8 = vadd.f32 %v20942_v13, %v8113_v49  ;;  %v8111_v24 = vadd.f32 %v8020_v20, %v28117_v58  ;;  %v8550_v5 = vpop.f32.mrf.mxu1  ;;  %21262 = vmatprep.subr.bf16.mxu0 %v22150_v26  ;;  %v28540_v51 = vld [vmem:[%s22490_s16 + $0x4f4] sm:$0xe] }
 0x311   : > { %21232 = vmatprep.mubr.bf16.mxu1 %v18444_v4  ;;  %v31264_v4 = vrot.slane %v28435_v30, 5  ;;  %21309 = vmatpush3.bf16.msra.mxu1 %v22149_v39  ;;  %v28516_v6 = vld [vmem:[%s30893_s1 + $0x6b8] sm:$0xff]   ;;  %v20895_v58 = vpop.f32.mrf.mxu0  ;;  %v11081_v39 = vrot.slane %v28467_v38, 5  ;;  %v31266_v38 = vrot.slane %v28457_v7, 5  ;;  %v28546_v16 = vld [vmem:[%s22490_s16 + $0x544] sm:$0xf] }
 0x312   : > { %31263 = vst [vmem:[#allocation39_spill] sm:$0xff] %v28500_v8  ;;  %21310 = vmatprep.subr.bf16.mxu1 %v22151_v31  ;;  %v28529_v49 = vld [vmem:[%s30893_s1 + $0x6f8] sm:$0xff]   ;;  %v28531_v13 = vadd.f32 %v8550_v5, %v8111_v24  ;;  %v8114_v25 = vadd.f32 %v20895_v58, %v28135_v45  ;;  %v20943_v2 = vpop.f32.mrf.mxu1  ;;  %v18446_v8 = vcombine.low %v11065_v35, %v11068_v9  ;;  %v11088_v58 = vrot.slane %v28498_v62, 5 }
 0x313   : > { %v11073_v1 = vrot.slane %v31264_v4, 4  ;;  %v11087_v20 = vrot.slane %v31266_v38, 4  ;;  %v28537_v4 = vld [vmem:[%s22490_s16 + $0x4dc] sm:$0x1]  ;;  %v8023_v0 = vpop.f32.mrf.mxu0  ;;  %21263 = vmatpush3.bf16.msra.mxu0 %v22150_v26  ;;  %v31269_v35 = vrot.slane %v28435_v30, 5  ;;  %v18418_v62 = vrot.slane %v28508_v14, 9 }
 0x314   : > { %31265 = vst [vmem:[#allocation40_spill] sm:$0xff] %v28531_v13  ;;  %v28543_v12 = vld [vmem:[%s22490_s16 + $0x4fc] sm:$0x1]  ;;  %v28548_v5 = vadd.f32 %v20943_v2, %v8114_v25  ;;  %v8112_v45 = vadd.f32 %v8023_v0, %v28155_v41  ;;  %v8553_v24 = vpop.f32.mrf.mxu1  ;;  %v28554_v13 = vld [vmem:[%s22490_s16 + $0x540] sm:$0x8]  ;;  %21344 = vmatprep.subr.bf16.mxu0 %v28516_v6  ;;  %v11079_v30 = vsel %vm22502_vm2, %v18416_v10, %v11078_v47 }
 0x315   : > { %21311 = vmatpush3.bf16.msra.mxu1 %v22151_v31  ;;  %v20898_v9 = vpop.f32.mrf.mxu0  ;;  %v31268_v26 = vld [vmem:[#allocation13_spill] sm:$0xff]  ;;  %v11072_v41 = vsel %vm22502_vm2, %v18415_v19, %v31269_v35  ;;  %v11075_v0 = vsel %vm22502_vm2, %v11073_v1, %v11074_v22  ;;  %v28574_v19 = vld [vmem:[%s22490_s16 + $0x548] sm:$0x7]  ;;  %v28577_v1 = vld [vmem:[%s22490_s16 + $0x560] sm:$0x8]  ;;  %v11082_v14 = vsel %vm22502_vm2, %v11080_v61, %v11081_v39  ;;  %v31274_v61 = vrot.slane %v28524_v63, 5 }
 0x316   : > { %31267 = vst [vmem:[#allocation41_spill] sm:$0xff] %v28548_v5  ;;  %21185 = vmatmul.mubr.bf16.gmra.mxu0 %v31268_v26  ;;  %21392 = vmatprep.subr.bf16.mxu1 %v28529_v49  ;;  %v28567_v25 = vadd.f32 %v8553_v24, %v8112_v45  ;;  %v8117_v2 = vadd.f32 %v20898_v9, %v28166_v23  ;;  %v20946_v38 = vpop.f32.mrf.mxu1  ;;  %v31271_v26 = vld [vmem:[#allocation14_spill] sm:$0xff]  ;;  %v11095_v23 = vrot.slane %v28537_v4, 5  ;;  %v31273_v9 = vrot.slane %v28511_v18, 5 }
 0x317   : > { %21188 = vmatprep.mubr.bf16.mxu0 %v31271_v26  ;;  %v8036_v22 = vpop.f32.mrf.mxu0  ;;  %v28591_v31 = vld [vmem:[%s22490_s16 + $0x564] sm:$0xf]  ;;  %v28595_v4 = vrot.slane %v31274_v61, 4  ;;  %v18447_v45 = vcombine.low %v11072_v41, %v11075_v0  ;;  %v31276_v26 = vrot.slane %v28457_v7, 5  ;;  %v28626_v7 = vld [vmem:[%s22490_s16 + $0x580] sm:$0x8] }
 0x318   : > { %31270 = vst [vmem:[#allocation42_spill] sm:$0xff] %v28567_v25  ;;  %21233 = vmatmul.mubr.bf16.gmra.mxu1 %v18445_v40  ;;  %v28584_v24 = vadd.f32 %v20946_v38, %v8117_v2  ;;  %v8115_v47 = vadd.f32 %v8036_v22, %v28182_v28  ;;  %v8566_v10 = vpop.f32.mrf.mxu1  ;;  %v28601_v22 = vld [vmem:[%s22490_s16 + $0x584] sm:$0xf]  ;;  %v28613_v38 = vld [vmem:[%s22490_s16 + $0x568] sm:$0x7]  ;;  %v31289_v5 = vrot.slane %v28524_v63, 5 }
 0x319   : > { %21236 = vmatprep.mubr.bf16.mxu1 %v18446_v8  ;;  %v11094_v8 = vrot.slane %v31273_v9, 4  ;;  %v20899_v39 = vpop.f32.mrf.mxu0  ;;  %v28610_v61 = vsel %vm22502_vm2, %v18417_v21, %v31276_v26  ;;  %v28616_v28 = vld [vmem:[%s22490_s16 + $0x5a4] sm:$0xf]  ;;  %v31294_v63 = vrot.slane %v28574_v19, 7 }
 0x31a   : > { %31272 = vst [vmem:[#allocation20_spill] sm:$0xff] %v28584_v24  ;;  %v28603_v40 = vadd.f32 %v8566_v10, %v8115_v47  ;;  %v8118_v9 = vadd.f32 %v20899_v39, %v28198_v48  ;;  %v20947_v35 = vpop.f32.mrf.mxu1  ;;  %v18448_v24 = vcombine.low %v11079_v30, %v11082_v14  ;;  %v28620_v47 = vsel %vm22502_vm2, %v11087_v20, %v11088_v58  ;;  %v28632_v39 = vld [vmem:[%s22490_s16 + $0x588] sm:$0x7]  ;;  %v28699_v25 = vld [vmem:[%s22490_s16 + $0x604] sm:$0xf] }
 0x31b   : > { %v8039_v2 = vpop.f32.mrf.mxu0  ;;  %v31277_v48 = vrot.slane %v28546_v16, 7  ;;  %v31279_v14 = vld [vmem:[#allocation15_spill] sm:$0xff]  ;;  %v31282_v58 = vrot.slane %v28511_v18, 5 }
 0x31c   : > { %31275 = vst [vmem:[#allocation21_spill] sm:$0xff] %v28603_v40  ;;  %v28628_v21 = vadd.f32 %v20947_v35, %v8118_v9  ;;  %v8116_v26 = vadd.f32 %v8039_v2, %v28209_v27  ;;  %v8569_v0 = vpop.f32.mrf.mxu1  ;;  %v31281_v9 = vld [vmem:[#allocation16_spill] sm:$0xff]  ;;  %v18449_v27 = vcombine.low %v28610_v61, %v28620_v47  ;;  %v28644_v2 = vld [vmem:[%s22490_s16 + $0x5a0] sm:$0x8]  ;;  %v28661_v47 = vld [vmem:[%s22490_s16 + $0x5c4] sm:$0xf] }
 0x31d   : > { %v11527_v10 = vrot.slane %v31277_v48, 4  ;;  %v20902_v30 = vpop.f32.mrf.mxu0 }
 0x31e   : > { %31278 = vst [vmem:[#allocation22_spill] sm:$0xff] %v28628_v21  ;;  %21189 = vmatmul.mubr.bf16.gmra.mxu0 %v31279_v14  ;;  %v28637_v48 = vadd.f32 %v8569_v0, %v8116_v26  ;;  %v8121_v41 = vadd.f32 %v20902_v30, %v28224_v44  ;;  %v20950_v35 = vpop.f32.mrf.mxu1  ;;  %v28647_v14 = vld [vmem:[%s22490_s16 + $0x5a8] sm:$0x7]  ;;  %v11093_v26 = vsel %vm22502_vm2, %v18418_v62, %v31282_v58  ;;  %v28664_v30 = vld [vmem:[%s22490_s16 + $0x5e4] sm:$0xf] }
 0x31f   : > { %21192 = vmatprep.mubr.bf16.mxu0 %v31281_v9  ;;  %v8052_v20 = vpop.f32.mrf.mxu0  ;;  %v11096_v44 = vsel %vm22502_vm2, %v11094_v8, %v11095_v23  ;;  %v28692_v21 = vld [vmem:[%s22490_s16 + $0x5e0] sm:$0x8] }
 0x320   : > { %31280 = vst [vmem:[#allocation23_spill] sm:$0xff] %v28637_v48  ;;  %21237 = vmatmul.mubr.bf16.gmra.mxu1 %v18447_v45  ;;  %v31283_v45 = vrot.slane %v28591_v31, 7  ;;  %v8119_v18 = vadd.f32 %v8052_v20, %v28233_v34  ;;  %v8582_v62 = vpop.f32.mrf.mxu1  ;;  %v28682_v20 = vld [vmem:[%s22490_s16 + $0x5c0] sm:$0x8]  ;;  %v28688_v48 = vld [vmem:[%s22490_s16 + $0x5c8] sm:$0x7]  ;;  %v18450_v40 = vcombine.low %v11093_v26, %v11096_v44 }
 0x321   : > { %21240 = vmatprep.mubr.bf16.mxu1 %v18448_v24  ;;  %v28666_v24 = vadd.f32 %v20950_v35, %v8121_v41  ;;  %v20903_v8 = vpop.f32.mrf.mxu0  ;;  %v31286_v41 = vrot.slane %v28616_v28, 7  ;;  %v28696_v34 = vld [vmem:[%s22490_s16 + $0x5e8] sm:$0x7]  ;;  %v31291_v44 = vrot.slane %v28543_v12, 5 }
 0x322   : > { %v28657_v0 = vrot.slane %v31283_v45, 4  ;;  %v31285_v45 = vrot.slane %v28601_v22, 7  ;;  %v28684_v58 = vadd.f32 %v8582_v62, %v8119_v18  ;;  %v8122_v23 = vadd.f32 %v20903_v8, %v28236_v42  ;;  %v28705_v8 = vld [vmem:[%s22490_s16 + $0x624] sm:$0xf] }
 0x323   : > { %31284 = vst [vmem:[#allocation24_spill] sm:$0xff] %v28666_v24  ;;  %v28678_v35 = vrot.slane %v31286_v41, 4  ;;  %v20951_v24 = vpop.f32.mrf.mxu1  ;;  %v8055_v9 = vpop.f32.mrf.mxu0  ;;  %v31290_v41 = vrot.slane %v28540_v51, 9  ;;  %v11529_v51 = vsel %vm22776_vm5, %v11527_v10, %v31294_v63  ;;  %v31297_v10 = vrot.slane %v28661_v47, 7 }
 0x324   : > { %v28673_v61 = vrot.slane %v31285_v45, 4  ;;  %31287 = vst [vmem:[#allocation25_spill] sm:$0xff] %v28684_v58  ;;  %v28701_v18 = vadd.f32 %v20951_v24, %v8122_v23  ;;  %v8120_v42 = vadd.f32 %v8055_v9, %v28246_v3  ;;  %v31288_v58 = vld [vmem:[#allocation17_spill] sm:$0xff]  ;;  %v11103_v3 = vsel %vm22502_vm2, %v28595_v4, %v31291_v44  ;;  %v28738_v44 = vld [vmem:[%s22490_s16 + $0x608] sm:$0x7] }
 0x325   : > { %v8585_v62 = vpop.f32.mrf.mxu1  ;;  %v20906_v45 = vpop.f32.mrf.mxu0  ;;  %v11100_v26 = vsel %vm22502_vm2, %v31290_v41, %v31289_v5  ;;  %v31292_v9 = vrot.slane %v28546_v16, 7  ;;  %v31293_v24 = vrot.slane %v28554_v13, 11  ;;  %v28730_v5 = vld [vmem:[%s22490_s16 + $0x600] sm:$0x8] }
 0x326   : > { %21193 = vmatmul.mubr.bf16.gmra.mxu0 %v31288_v58  ;;  %v28732_v12 = vadd.f32 %v8585_v62, %v8120_v42  ;;  %v8125_v41 = vadd.f32 %v20906_v45, %v28253_v46  ;;  %v31296_v16 = vld [vmem:[#allocation18_spill] sm:$0xff]  ;;  %v28743_v42 = vrot.slane %v31297_v10, 4  ;;  %v28760_v46 = vld [vmem:[%s22490_s16 + $0x628] sm:$0x7]  ;;  %v31301_v10 = vrot.slane %v28699_v25, 7 }
 0x327   : > { %v11526_v23 = vsel %vm22776_vm5, %v31293_v24, %v31292_v9  ;;  %v20954_v4 = vpop.f32.mrf.mxu1  ;;  %21196 = vmatprep.mubr.bf16.mxu0 %v31296_v16  ;;  %v8068_v9 = vpop.f32.mrf.mxu0  ;;  %v28748_v45 = vld [vmem:[%s22490_s16 + $0x620] sm:$0x8] }
 0x328   : > { %31295 = vst [vmem:[#allocation26_spill] sm:$0xff] %v28732_v12  ;;  %21241 = vmatmul.mubr.bf16.gmra.mxu1 %v18449_v27  ;;  %v28751_v24 = vadd.f32 %v20954_v4, %v8125_v41  ;;  %v8123_v63 = vadd.f32 %v8068_v9, %v28262_v56  ;;  %v18451_v27 = vcombine.low %v11100_v26, %v11103_v3  ;;  %v28766_v4 = vld [vmem:[%s22490_s16 + $0x640] sm:$0x8]  ;;  %v28769_v56 = vld [vmem:[%s22490_s16 + $0x644] sm:$0xf]  ;;  %v31303_v12 = vld [vmem:[#allocation19_spill] sm:$0xff] }
 0x329   : > { %21244 = vmatprep.mubr.bf16.mxu1 %v18450_v40  ;;  %v8598_v13 = vpop.f32.mrf.mxu1  ;;  %v31299_v40 = vrot.slane %v28664_v30, 7  ;;  %v20907_v16 = vpop.f32.mrf.mxu0  ;;  %v18540_v58 = vcombine.low %v11526_v23, %v11529_v51  ;;  %v31302_v23 = vrot.slane %v28705_v8, 7 }
 0x32a   : > { %31298 = vst [vmem:[#allocation27_spill] sm:$0xff] %v28751_v24  ;;  %v28771_v9 = vadd.f32 %v8598_v13, %v8123_v63  ;;  %v28776_v24 = vrot.slane %v31301_v10, 4  ;;  %v28808_v63 = vld [vmem:[%s22490_s16 + $0x660] sm:$0x8] }
 0x32b   : > { %v28756_v19 = vrot.slane %v31299_v40, 4  ;;  %v8126_v40 = vadd.f32 %v20907_v16, %v28271_v17  ;;  %v20955_v62 = vpop.f32.mrf.mxu1  ;;  %v8071_v3 = vpop.f32.mrf.mxu0  ;;  %v28781_v51 = vrot.slane %v31302_v23, 4  ;;  %v31304_v23 = vrot.slane %v28591_v31, 7 }
 0x32c   : > { %31300 = vst [vmem:[#allocation28_spill] sm:$0xff] %v28771_v9  ;;  %v8124_v17 = vadd.f32 %v8071_v3, %v28276_v29  ;;  %v31305_v9 = vrot.slane %v28577_v1, 11  ;;  %v31307_v3 = vrot.slane %v28613_v38, 7  ;;  %v28805_v1 = vld [vmem:[%s22490_s16 + $0x648] sm:$0x7] }
 0x32d   : > { %v28784_v13 = vadd.f32 %v20955_v62, %v8126_v40  ;;  %v8601_v16 = vpop.f32.mrf.mxu1  ;;  %v20910_v26 = vpop.f32.mrf.mxu0 }
 0x32e   : > { %21197 = vmatmul.mubr.bf16.gmra.mxu0 %v31303_v12  ;;  %v11533_v41 = vsel %vm22776_vm5, %v31305_v9, %v31304_v23  ;;  %v28796_v62 = vadd.f32 %v8601_v16, %v8124_v17  ;;  %v8129_v29 = vadd.f32 %v20910_v26, %v28286_v59  ;;  %v11536_v31 = vsel %vm22776_vm5, %v28657_v0, %v31307_v3  ;;  %v28811_v9 = vld [vmem:[%s22490_s16 + $0x664] sm:$0xf]  ;;  %v22153_v3 = vld [vmem:[%s22490_s16 + $0x56c] sm:$0xff]  }
 0x32f   : > { %v20958_v40 = vpop.f32.mrf.mxu1  ;;  %21264 = vmatprep.mubr.bf16.mxu0 %v18540_v58  ;;  %v8084_v17 = vpop.f32.mrf.mxu0  ;;  %v31308_v59 = vrot.slane %v28601_v22, 7  ;;  %v31310_v58 = vrot.slane %v28632_v39, 7  ;;  %v28832_v22 = vld [vmem:[%s22490_s16 + $0x684] sm:$0xf]  ;;  %v18541_v10 = vcombine.low %v11533_v41, %v11536_v31 }
 0x330   : > { %31306 = vst [vmem:[#allocation29_spill] sm:$0xff] %v28796_v62  ;;  %21245 = vmatmul.mubr.bf16.gmra.mxu1 %v18451_v27  ;;  %v31309_v27 = vrot.slane %v28626_v7, 11  ;;  %v28824_v26 = vadd.f32 %v20958_v40, %v8129_v29  ;;  %v8127_v16 = vadd.f32 %v8084_v17, %v28298_v43  ;;  %v22156_v62 = vld [vmem:[%s22490_s16 + $0x58c] sm:$0xff]   ;;  %v31311_v29 = vrot.slane %v28769_v56, 7 }
 0x331   : > { %21312 = vmatprep.mubr.bf16.mxu1 %v22152_v60  ;;  %v11543_v0 = vsel %vm22776_vm5, %v28673_v61, %v31310_v58  ;;  %v8614_v23 = vpop.f32.mrf.mxu1  ;;  %v28829_v60 = vld [vmem:[%s22490_s16 + $0x668] sm:$0x7]  ;;  %v20911_v7 = vpop.f32.mrf.mxu0  ;;  %v31316_v17 = vrot.slane %v28682_v20, 11 }
 0x332   : > { %v11540_v38 = vsel %vm22776_vm5, %v31309_v27, %v31308_v59  ;;  %v28834_v12 = vadd.f32 %v8614_v23, %v8127_v16  ;;  %v8130_v39 = vadd.f32 %v20911_v7, %v28304_v55  ;;  %v28840_v40 = vrot.slane %v31311_v29, 4  ;;  %v22160_v23 = vld [vmem:[%s22490_s16 + $0x5cc] sm:$0xff]  }
 0x333   : > { %v20959_v59 = vpop.f32.mrf.mxu1  ;;  %v18542_v27 = vcombine.low %v11540_v38, %v11543_v0  ;;  %v8087_v61 = vpop.f32.mrf.mxu0  ;;  %v22158_v38 = vld [vmem:[%s30893_s1 + $0x6b0] sm:$0xff]   ;;  %v31315_v16 = vrot.slane %v28661_v47, 7  ;;  %v31317_v47 = vrot.slane %v28688_v48, 7  ;;  %v28906_v48 = vld [vmem:[%s22490_s16 + $0x6a8] sm:$0x7] }
 0x334   : > { %v28845_v41 = vadd.f32 %v20959_v59, %v8130_v39  ;;  %v8128_v31 = vadd.f32 %v8087_v61, %v28314_v57  ;;  %v22159_v0 = vld [vmem:[%s30893_s1 + $0x6f0] sm:$0xff]   ;;  %v31312_v57 = vrot.slane %v28616_v28, 7  ;;  %v31313_v39 = vrot.slane %v28644_v2, 11  ;;  %v28876_v28 = vld [vmem:[%s30893_s1 + $0x6a8] sm:$0xff]   ;;  %v28879_v2 = vld [vmem:[%s22490_s16 + $0x680] sm:$0x8] }
 0x335   : > { %v8617_v55 = vpop.f32.mrf.mxu1  ;;  %v20978_v7 = vpop.f32.mrf.mxu0  ;;  %v31314_v61 = vrot.slane %v28647_v14, 7  ;;  %v11557_v20 = vsel %vm22776_vm5, %v28743_v42, %v31317_v47 }
 0x336   : > { %21265 = vmatmul.mubr.bf16.vlgmr.msra.gmra.mxu0 %v18541_v10  ;;  %v11547_v59 = vsel %vm22776_vm5, %v31313_v39, %v31312_v57  ;;  %v11554_v10 = vsel %vm22776_vm5, %v31316_v17, %v31315_v16  ;;  %v28881_v14 = vadd.f32 %v8617_v55, %v8128_v31  ;;  %v9162_v57 = vadd.f32 %v20978_v7, %v28331_v54  ;;  %v28893_v17 = vld [vmem:[%s30893_s1 + $0x6e8] sm:$0xff]   ;;  %v28899_v54 = vld [vmem:[%s22490_s16 + $0x6a0] sm:$0x8]  ;;  %v28902_v55 = vld [vmem:[%s22490_s16 + $0x6a4] sm:$0xf] }
 0x337   : > { %v11550_v29 = vsel %vm22776_vm5, %v28678_v35, %v31314_v61  ;;  %v21026_v35 = vpop.f32.mrf.mxu1  ;;  %21345 = vmatpush3.bf16.msra.mxu0 %v28516_v6  ;;  %v28896_v31 = vld [vmem:[%s22490_s16 + $0x688] sm:$0x7]  ;;  %v9033_v6 = vpop.f32.mrf.mxu0  ;;  %21268 = vmatprep.mubr.bf16.mxu0 %v18542_v27  ;;  %v22157_v7 = vld [vmem:[%s22490_s16 + $0x5ac] sm:$0xff]   ;;  %v28913_v39 = vld [vmem:[%s22490_s16 + $0x6c4] sm:$0xf]  ;;  %v18544_v43 = vcombine.low %v11554_v10, %v11557_v20  ;;  %v31324_v10 = vrot.slane %v28730_v5, 11 }
 0x338   : > { %21313 = vmatmul.mubr.bf16.vlgmr.msra.gmra.mxu1 %v22153_v3  ;;  %v28908_v3 = vadd.f32 %v21026_v35, %v9162_v57  ;;  %v9160_v42 = vadd.f32 %v9033_v6, %v28346_v52  ;;  %21346 = vmatprep.subr.bf16.mxu0 %v22158_v38  ;;  %v18543_v47 = vcombine.low %v11547_v59, %v11550_v29  ;;  %v31318_v57 = vrot.slane %v28811_v9, 7  ;;  %v22170_v5 = vld [vmem:[%s30893_s1 + $0x698] sm:$0xff]  }
 0x339   : > { %21393 = vmatpush3.bf16.msra.mxu1 %v28529_v49  ;;  %v9419_v16 = vpop.f32.mrf.mxu1  ;;  %21316 = vmatprep.mubr.bf16.mxu1 %v22156_v62  ;;  %v20979_v61 = vpop.f32.mrf.mxu0  ;;  %v31319_v59 = vrot.slane %v28832_v22, 7 }
 0x33a   : > { %21394 = vmatprep.subr.bf16.mxu1 %v22159_v0  ;;  %v28916_v58 = vadd.f32 %v9419_v16, %v9160_v42  ;;  %v9163_v49 = vadd.f32 %v20979_v61, %v28355_v15  ;;  %v28921_v52 = vrot.slane %v31318_v57, 4  ;;  %v22167_v16 = vld [vmem:[%s30893_s1 + $0x6e0] sm:$0xff]   ;;  %v31321_v57 = vrot.slane %v28692_v21, 11 }
 0x33b   : > { %v21027_v27 = vpop.f32.mrf.mxu1  ;;  %21347 = vmatpush3.bf16.msra.mxu0 %v22158_v38  ;;  %v9036_v35 = vpop.f32.mrf.mxu0  ;;  %v28927_v29 = vrot.slane %v31319_v59, 4  ;;  %v30947_v38 = vrot.slane %v28902_v55, 7  ;;  %v31322_v59 = vrot.slane %v28696_v34, 7  ;;  %v31323_v61 = vrot.slane %v28699_v25, 7 }
 0x33c   : > { %21348 = vmatprep.subr.bf16.mxu0 %v28876_v28  ;;  %v28932_v20 = vadd.f32 %v21027_v27, %v9163_v49  ;;  %v9161_v6 = vadd.f32 %v9036_v35, %v28362_v33  ;;  %v31320_v33 = vrot.slane %v28664_v30, 7  ;;  %v28962_v30 = vld [vmem:[%s22490_s16 + $0x6c0] sm:$0x8]  ;;  %v31325_v34 = vrot.slane %v28738_v44, 7  ;;  %v22171_v44 = vld [vmem:[%s30893_s1 + $0x6d8] sm:$0xff]  }
 0x33d   : > { %21395 = vmatpush3.bf16.msra.mxu1 %v22159_v0  ;;  %v9422_v42 = vpop.f32.mrf.mxu1  ;;  %v22166_v0 = vld [vmem:[%s30893_s1 + $0x6a0] sm:$0xff]   ;;  %v20982_v27 = vpop.f32.mrf.mxu0  ;;  %v11564_v15 = vsel %vm22776_vm5, %v28756_v19, %v31322_v59  ;;  %v28976_v19 = vld [vmem:[%s22490_s16 + $0x6c8] sm:$0x7] }
 0x33e   : > { %21396 = vmatprep.subr.bf16.mxu1 %v28893_v17  ;;  %21269 = vmatmul.mubr.bf16.gmra.mxu0 %v18543_v47  ;;  %v11561_v35 = vsel %vm22776_vm5, %v31321_v57, %v31320_v33  ;;  %v11568_v47 = vsel %vm22776_vm5, %v31324_v10, %v31323_v61  ;;  %v28964_v21 = vadd.f32 %v9422_v42, %v9161_v6  ;;  %v28979_v10 = vld [vmem:[%s22490_s16 + $0x6e0] sm:$0x8]  ;;  %v22161_v61 = vld [vmem:[%s22490_s16 + $0x5ec] sm:$0xff]  }
 0x33f   : > { %v9166_v33 = vadd.f32 %v20982_v27, %v28374_v36  ;;  %v21030_v57 = vpop.f32.mrf.mxu1  ;;  %21272 = vmatprep.mubr.bf16.mxu0 %v18544_v43  ;;  %v11571_v25 = vsel %vm22776_vm5, %v28776_v24, %v31325_v34  ;;  %v28982_v36 = vld [vmem:[%s22490_s16 + $0x6e4] sm:$0xf]  ;;  %21349 = vmatpush3.bf16.msra.mxu0 %v28876_v28  ;;  %v28989_v24 = vld [vmem:[%s22490_s16 + $0x6e8] sm:$0x7]  ;;  %v18545_v59 = vcombine.low %v11561_v35, %v11564_v15  ;;  %v22164_v34 = vld [vmem:[%s22490_s16 + $0x60c] sm:$0xff]   ;;  %v31332_v15 = vrot.slane %v28766_v4, 11 }
 0x340   : > { %21317 = vmatmul.mubr.bf16.gmra.mxu1 %v22157_v7  ;;  %v9049_v7 = vpop.f32.mrf.mxu0  ;;  %21350 = vmatprep.subr.bf16.mxu0 %v22166_v0  ;;  %v28997_v27 = vld [vmem:[%s22490_s16 + $0x704] sm:$0xf]  ;;  %v18546_v28 = vcombine.low %v11568_v47, %v11571_v25  ;;  %v30949_v47 = vrot.slane %v28982_v36, 7 }
 0x341   : > { %21320 = vmatprep.mubr.bf16.mxu1 %v22160_v23  ;;  %v28991_v43 = vadd.f32 %v21030_v57, %v9166_v33  ;;  %v9164_v6 = vadd.f32 %v9049_v7, %v28392_v11  ;;  %v9435_v42 = vpop.f32.mrf.mxu1  ;;  %21397 = vmatpush3.bf16.msra.mxu1 %v28893_v17  ;;  %v29005_v11 = vrot.slane %v30947_v38, 4  ;;  %v31327_v7 = vrot.slane %v28913_v39, 7  ;;  %v31336_v57 = vld [vmem:[#allocation38_spill] sm:$0xff] }
 0x342   : > { %v20983_v23 = vpop.f32.mrf.mxu0  ;;  %21398 = vmatprep.subr.bf16.mxu1 %v22167_v16 }
 0x343   : > { %31326 = vst [vmem:[#allocation30_spill] sm:$0xff] %v28991_v43  ;;  %v29000_v62 = vadd.f32 %v9435_v42, %v9164_v6  ;;  %v9167_v49 = vadd.f32 %v20983_v23, %v28404_v32  ;;  %v21031_v33 = vpop.f32.mrf.mxu1  ;;  %21351 = vmatpush3.bf16.msra.mxu0 %v22166_v0  ;;  %v29010_v43 = vrot.slane %v31327_v7, 4  ;;  %v22174_v0 = vld [vmem:[%s30893_s1 + $0x690] sm:$0xff]   ;;  %v30948_v7 = vrot.slane %v28997_v27, 7 }
 0x344   : > { %v9052_v17 = vpop.f32.mrf.mxu0  ;;  %21352 = vmatprep.subr.bf16.mxu0 %v22170_v5  ;;  %v22175_v42 = vld [vmem:[%s30893_s1 + $0x6d0] sm:$0xff]   ;;  %v31331_v23 = vrot.slane %v28769_v56, 7  ;;  %v31334_v56 = vrot.slane %v28805_v1, 7 }
 0x345   : > { %v29015_v32 = vadd.f32 %v21031_v33, %v9167_v49  ;;  %v9165_v25 = vadd.f32 %v9052_v17, %v28412_v37  ;;  %v9438_v6 = vpop.f32.mrf.mxu1  ;;  %21399 = vmatpush3.bf16.msra.mxu1 %v22167_v16  ;;  %v31328_v37 = vrot.slane %v28705_v8, 7  ;;  %v31329_v16 = vrot.slane %v28748_v45, 11  ;;  %v29044_v8 = vld [vmem:[%s22490_s16 + $0x724] sm:$0xf] }
 0x346   : > { %v20986_v49 = vpop.f32.mrf.mxu0  ;;  %21273 = vmatmul.mubr.bf16.gmra.mxu0 %v18545_v59  ;;  %v31330_v17 = vrot.slane %v28760_v46, 7  ;;  %v11582_v59 = vsel %vm22776_vm5, %v31332_v15, %v31331_v23  ;;  %21400 = vmatprep.subr.bf16.mxu1 %v22171_v44  ;;  %v11585_v4 = vsel %vm22776_vm5, %v28840_v40, %v31334_v56  ;;  %v29058_v15 = vld [vmem:[%s22490_s16 + $0x700] sm:$0x8]  ;;  %v22165_v23 = vld [vmem:[%s22490_s16 + $0x62c] sm:$0xff]  }
 0x347   : > { %v11575_v33 = vsel %vm22776_vm5, %v31329_v16, %v31328_v37  ;;  %v29046_v45 = vadd.f32 %v9438_v6, %v9165_v25  ;;  %v31333_v37 = vld [vmem:[#allocation37_spill] sm:$0xff]  ;;  %v21034_v16 = vpop.f32.mrf.mxu1  ;;  %21276 = vmatprep.mubr.bf16.mxu0 %v18546_v28  ;;  %21353 = vmatpush3.bf16.msra.mxu0 %v22170_v5  ;;  %v29064_v28 = vld [vmem:[%s22490_s16 + $0x708] sm:$0x7]  ;;  %v18548_v5 = vcombine.low %v11582_v59, %v11585_v4 }
 0x348   : > { %v11578_v35 = vsel %vm22776_vm5, %v28781_v51, %v31330_v17  ;;  %v9170_v46 = vadd.f32 %v20986_v49, %v31333_v37  ;;  %21321 = vmatmul.mubr.bf16.gmra.mxu1 %v22161_v61  ;;  %v22178_v51 = vld [vmem:[%s30893_s1 + $0x688] sm:$0xff]   ;;  %v9065_v25 = vpop.f32.mrf.mxu0  ;;  %21354 = vmatprep.subr.bf16.mxu0 %v22174_v0  ;;  %v29071_v49 = vld [vmem:[%s22490_s16 + $0x558] sm:$0xf] }
 0x349   : > { %21324 = vmatprep.mubr.bf16.mxu1 %v22164_v34  ;;  %v22179_v61 = vld [vmem:[%s30893_s1 + $0x6c8] sm:$0xff]   ;;  %v9168_v40 = vadd.f32 %v9065_v25, %v28447_v53  ;;  %v9451_v6 = vpop.f32.mrf.mxu1  ;;  %21401 = vmatpush3.bf16.msra.mxu1 %v22171_v44  ;;  %v18547_v34 = vcombine.low %v11575_v33, %v11578_v35  ;;  %v29079_v53 = vrot.slane %v30949_v47, 4  ;;  %v29085_v35 = vrot.slane %v30948_v7, 4  ;;  %v29088_v33 = vld [vmem:[%s22490_s16 + $0x720] sm:$0x8] }
 0x34a   : > { %v29066_v1 = vadd.f32 %v21034_v16, %v9170_v46  ;;  %v20987_v17 = vpop.f32.mrf.mxu0  ;;  %v22168_v37 = vld [vmem:[%s22490_s16 + $0x64c] sm:$0xff]   ;;  %21402 = vmatprep.subr.bf16.mxu1 %v22175_v42  ;;  %v31342_v7 = vrot.slane %v28832_v22, 7  ;;  %v31343_v47 = vrot.slane %v28879_v2, 11  ;;  %v31346_v22 = vrot.slane %v28896_v31, 7  ;;  %v29144_v31 = vld [vmem:[%s22490_s16 + $0x574] sm:$0xe] }
 0x34b   : > { %v29074_v56 = vadd.f32 %v9451_v6, %v9168_v40  ;;  %v9171_v38 = vadd.f32 %v20987_v17, %v31336_v57  ;;  %v21035_v46 = vpop.f32.mrf.mxu1  ;;  %21355 = vmatpush3.bf16.msra.mxu0 %v22174_v0  ;;  %v31338_v57 = vld [vmem:[#allocation3_spill] sm:$0xff]  ;;  %v22182_v0 = vld [vmem:[%s30893_s1 + $0x680] sm:$0xff]   ;;  %v31341_v6 = vrot.slane %v28829_v60, 7 }
 0x34c   : > { %v9068_v16 = vpop.f32.mrf.mxu0  ;;  %21356 = vmatprep.subr.bf16.mxu0 %v22178_v51  ;;  %v22183_v17 = vld [vmem:[%s30893_s1 + $0x6c0] sm:$0xff]   ;;  %v11599_v2 = vsel %vm22776_vm5, %v28927_v29, %v31346_v22  ;;  %v22176_v22 = vld [vmem:[%s22490_s16 + $0x6cc] sm:$0xff]  }
 0x34d   : > { %31335 = vst [vmem:[#allocation31_spill] sm:$0xff] %v29074_v56  ;;  %v29090_v59 = vadd.f32 %v21035_v46, %v9171_v38  ;;  %v9169_v4 = vadd.f32 %v9068_v16, %v31338_v57  ;;  %v9454_v40 = vpop.f32.mrf.mxu1  ;;  %21403 = vmatpush3.bf16.msra.mxu1 %v22175_v42  ;;  %v31339_v42 = vrot.slane %v28811_v9, 7  ;;  %v31340_v16 = vrot.slane %v28808_v63, 11  ;;  %v29119_v63 = vld [vmem:[%s22490_s16 + $0x728] sm:$0x7]  ;;  %v29157_v38 = vld [vmem:[%s30893_s1 + $0x778] sm:$0xff]  }
 0x34e   : > { %v20990_v46 = vpop.f32.mrf.mxu0  ;;  %21277 = vmatmul.mubr.bf16.gmra.mxu0 %v18547_v34  ;;  %v11592_v25 = vsel %vm22776_vm5, %v28921_v52, %v31341_v6  ;;  %v11596_v34 = vsel %vm22776_vm5, %v31343_v47, %v31342_v7  ;;  %21404 = vmatprep.subr.bf16.mxu1 %v22179_v61  ;;  %v29130_v52 = vld [vmem:[%s22490_s16 + $0x554] sm:$0xe]  ;;  %v29133_v47 = vld [vmem:[%s22490_s16 + $0x55c] sm:$0x1]  ;;  %v29136_v7 = vld [vmem:[%s22490_s16 + $0x578] sm:$0xf] }
 0x34f   : > { %31337 = vst [vmem:[#allocation32_spill] sm:$0xff] %v29090_v59  ;;  %v11589_v57 = vsel %vm22776_vm5, %v31340_v16, %v31339_v42  ;;  %v29121_v9 = vadd.f32 %v9454_v40, %v9169_v4  ;;  %v31345_v42 = vld [vmem:[#allocation39_spill] sm:$0xff]  ;;  %v21038_v16 = vpop.f32.mrf.mxu1  ;;  %21280 = vmatprep.mubr.bf16.mxu0 %v18548_v5  ;;  %v29141_v4 = vld [vmem:[%s30893_s1 + $0x738] sm:$0xff]   ;;  %21357 = vmatpush3.bf16.msra.mxu0 %v22178_v51  ;;  %v31348_v5 = vld [vmem:[#allocation40_spill] sm:$0xff]  ;;  %v31391_v50 = vrot.slane %v29133_v47, 5 }
 0x350   : > { %v9174_v60 = vadd.f32 %v20990_v46, %v31345_v42  ;;  %21325 = vmatmul.mubr.bf16.gmra.mxu1 %v22165_v23  ;;  %v9081_v40 = vpop.f32.mrf.mxu0  ;;  %v29147_v23 = vld [vmem:[%s22490_s16 + $0x598] sm:$0xf]  ;;  %v22169_v42 = vld [vmem:[%s22490_s16 + $0x66c] sm:$0xff]   ;;  %21358 = vmatprep.subr.bf16.mxu0 %v22182_v0  ;;  %v18550_v44 = vcombine.low %v11596_v34, %v11599_v2  ;;  %v31355_v34 = vrot.slane %v28902_v55, 7  ;;  %v29199_v55 = vld [vmem:[%s22490_s16 + $0x57c] sm:$0x1] }
 0x351   : > { %31344 = vst [vmem:[#allocation33_spill] sm:$0xff] %v29121_v9  ;;  %21328 = vmatprep.mubr.bf16.mxu1 %v22168_v37  ;;  %v9172_v6 = vadd.f32 %v9081_v40, %v31348_v5  ;;  %v9467_v46 = vpop.f32.mrf.mxu1  ;;  %21405 = vmatpush3.bf16.msra.mxu1 %v22179_v61  ;;  %v18549_v37 = vcombine.low %v11589_v57, %v11592_v25  ;;  %v22172_v9 = vld [vmem:[%s22490_s16 + $0x68c] sm:$0xff]   ;;  %v31351_v61 = vrot.slane %v29044_v8, 7  ;;  %v31352_v25 = vrot.slane %v29071_v49, 5  ;;  %v31365_v2 = vld [vmem:[#allocation22_spill] sm:$0xff] }
 0x352   : > { %v29149_v29 = vadd.f32 %v21038_v16, %v9174_v60  ;;  %v20991_v51 = vpop.f32.mrf.mxu0  ;;  %21406 = vmatprep.subr.bf16.mxu1 %v22183_v17  ;;  %v31350_v16 = vld [vmem:[#allocation41_spill] sm:$0xff] }
 0x353   : > { %v29160_v60 = vadd.f32 %v9467_v46, %v9172_v6  ;;  %v9175_v40 = vadd.f32 %v20991_v51, %v31350_v16  ;;  %v21039_v5 = vpop.f32.mrf.mxu1  ;;  %21359 = vmatpush3.bf16.msra.mxu0 %v22182_v0  ;;  %v29171_v57 = vrot.slane %v31352_v25, 4  ;;  %v31354_v46 = vld [vmem:[#allocation42_spill] sm:$0xff] }
 0x354   : > { %31347 = vst [vmem:[#allocation34_spill] sm:$0xff] %v29149_v29  ;;  %v29165_v29 = vrot.slane %v31351_v61, 4  ;;  %v9084_v59 = vpop.f32.mrf.mxu0  ;;  %21440 = vmatprep.subr.bf16.mxu0 %v29141_v4  ;;  %v31359_v61 = vrot.slane %v28962_v30, 11 }
 0x355   : > { %31349 = vst [vmem:[#allocation35_spill] sm:$0xff] %v29160_v60  ;;  %v29175_v6 = vadd.f32 %v21039_v5, %v9175_v40  ;;  %v9173_v51 = vadd.f32 %v9084_v59, %v31354_v46  ;;  %v9470_v16 = vpop.f32.mrf.mxu1  ;;  %21407 = vmatpush3.bf16.msra.mxu1 %v22183_v17  ;;  %v31356_v40 = vrot.slane %v28899_v54, 11  ;;  %v31357_v17 = vrot.slane %v28906_v48, 7  ;;  %v31361_v48 = vld [vmem:[#allocation20_spill] sm:$0xff] }
 0x356   : > { %v20994_v25 = vpop.f32.mrf.mxu0  ;;  %21281 = vmatmul.mubr.bf16.gmra.mxu0 %v18549_v37  ;;  %v31358_v46 = vrot.slane %v28913_v39, 7  ;;  %21488 = vmatprep.subr.bf16.mxu1 %v29157_v38  ;;  %v31362_v39 = vrot.slane %v28976_v19, 7 }
 0x357   : > { %31353 = vst [vmem:[#allocation36_spill] sm:$0xff] %v29175_v6  ;;  %v11603_v59 = vsel %vm22776_vm5, %v31356_v40, %v31355_v34  ;;  %v11606_v5 = vsel %vm22776_vm5, %v29005_v11, %v31357_v17  ;;  %v29202_v54 = vadd.f32 %v9470_v16, %v9173_v51  ;;  %v9178_v34 = vadd.f32 %v20994_v25, %v31361_v48  ;;  %v21042_v40 = vpop.f32.mrf.mxu1  ;;  %v29211_v11 = vld [vmem:[%s22490_s16 + $0x594] sm:$0xe]  ;;  %v29217_v17 = vld [vmem:[%s22490_s16 + $0x5b8] sm:$0xf] }
 0x358   : > { %v11610_v37 = vsel %vm22776_vm5, %v31359_v61, %v31358_v46  ;;  %21329 = vmatmul.mubr.bf16.gmra.mxu1 %v22169_v42  ;;  %21284 = vmatprep.mubr.bf16.mxu0 %v18550_v44  ;;  %v11613_v30 = vsel %vm22776_vm5, %v29010_v43, %v31362_v39  ;;  %v29214_v61 = vld [vmem:[%s22490_s16 + $0x59c] sm:$0x1]  ;;  %v9097_v51 = vpop.f32.mrf.mxu0  ;;  %v29220_v16 = vld [vmem:[%s22490_s16 + $0x5b4] sm:$0xe]  ;;  %v22173_v46 = vld [vmem:[%s22490_s16 + $0x6ac] sm:$0xff]   ;;  %v18551_v43 = vcombine.low %v11603_v59, %v11606_v5  ;;  %v31371_v5 = vrot.slane %v28979_v10, 11 }
 0x359   : > { %31360 = vst [vmem:[#allocation37_spill] sm:$0xff] %v29202_v54  ;;  %21332 = vmatprep.mubr.bf16.mxu1 %v22172_v9  ;;  %v29222_v25 = vadd.f32 %v21042_v40, %v9178_v34  ;;  %v31363_v44 = vld [vmem:[#allocation21_spill] sm:$0xff]  ;;  %v9483_v19 = vpop.f32.mrf.mxu1  ;;  %v18552_v39 = vcombine.low %v11610_v37, %v11613_v30  ;;  %v31366_v9 = vrot.slane %v29136_v7, 5  ;;  %v31376_v34 = vld [vmem:[#allocation24_spill] sm:$0xff] }
 0x35a   : > { %v9176_v42 = vadd.f32 %v9097_v51, %v31363_v44  ;;  %v29227_v48 = vld [vmem:[%s22490_s16 + $0x5d8] sm:$0xf]  ;;  %v20995_v56 = vpop.f32.mrf.mxu0  ;;  %v31367_v44 = vrot.slane %v29147_v23, 5 }
 0x35b   : > { %v9179_v54 = vadd.f32 %v20995_v56, %v31365_v2  ;;  %v21043_v6 = vpop.f32.mrf.mxu1  ;;  %v29235_v60 = vrot.slane %v31366_v9, 4  ;;  %v31369_v2 = vld [vmem:[#allocation23_spill] sm:$0xff] }
 0x35c   : > { %v29230_v0 = vadd.f32 %v9483_v19, %v9176_v42  ;;  %v9100_v40 = vpop.f32.mrf.mxu0  ;;  %v29241_v59 = vrot.slane %v31367_v44, 4  ;;  %v31370_v44 = vrot.slane %v28982_v36, 7  ;;  %v31374_v19 = vrot.slane %v29058_v15, 11  ;;  %v29268_v36 = vld [vmem:[%s22490_s16 + $0x5bc] sm:$0x1]  ;;  %v22180_v9 = vld [vmem:[%s22490_s16 + $0x70c] sm:$0xff]  }
 0x35d   : > { %v29245_v56 = vadd.f32 %v21043_v6, %v9179_v54  ;;  %v9177_v30 = vadd.f32 %v9100_v40, %v31369_v2  ;;  %v9486_v42 = vpop.f32.mrf.mxu1  ;;  %v31372_v54 = vrot.slane %v28989_v24, 7  ;;  %v31373_v2 = vrot.slane %v28997_v27, 7  ;;  %v29279_v15 = vld [vmem:[%s22490_s16 + $0x5d4] sm:$0xe] }
 0x35e   : > { %31364 = vst [vmem:[#allocation38_spill] sm:$0xff] %v29230_v0  ;;  %v20998_v51 = vpop.f32.mrf.mxu0  ;;  %21285 = vmatmul.mubr.bf16.gmra.mxu0 %v18551_v43  ;;  %v11617_v6 = vsel %vm22776_vm5, %v31371_v5, %v31370_v44  ;;  %v29285_v44 = vld [vmem:[%s22490_s16 + $0x5f8] sm:$0xf] }
 0x35f   : > { %31368 = vst [vmem:[#allocation3_spill] sm:$0xff] %v29245_v56  ;;  %v11620_v40 = vsel %vm22776_vm5, %v29079_v53, %v31372_v54  ;;  %v11624_v43 = vsel %vm22776_vm5, %v31374_v19, %v31373_v2  ;;  %v29270_v10 = vadd.f32 %v9486_v42, %v9177_v30  ;;  %v9182_v5 = vadd.f32 %v20998_v51, %v31376_v34  ;;  %v21046_v24 = vpop.f32.mrf.mxu1  ;;  %v29282_v19 = vld [vmem:[%s22490_s16 + $0x5dc] sm:$0x1]  ;;  %v29288_v42 = vld [vmem:[%s22490_s16 + $0x618] sm:$0xf]  ;;  %v22177_v51 = vld [vmem:[%s22490_s16 + $0x6ec] sm:$0xff]  }
 0x360   : > { %21333 = vmatmul.mubr.bf16.gmra.mxu1 %v22173_v46  ;;  %21288 = vmatprep.mubr.bf16.mxu0 %v18552_v39  ;;  %v31377_v53 = vrot.slane %v29064_v28, 7  ;;  %v9113_v30 = vpop.f32.mrf.mxu0  ;;  %v31378_v46 = vld [vmem:[#allocation25_spill] sm:$0xff] }
 0x361   : > { %31375 = vst [vmem:[#allocation39_spill] sm:$0xff] %v29270_v10  ;;  %21336 = vmatprep.mubr.bf16.mxu1 %v22176_v22  ;;  %v29290_v34 = vadd.f32 %v21046_v24, %v9182_v5  ;;  %v9180_v39 = vadd.f32 %v9113_v30, %v31378_v46  ;;  %v9499_v28 = vpop.f32.mrf.mxu1  ;;  %v29295_v54 = vld [vmem:[%s22490_s16 + $0x638] sm:$0xf]  ;;  %v31379_v22 = vrot.slane %v29217_v17, 5  ;;  %v31380_v46 = vrot.slane %v29227_v48, 5 }
 0x362   : > { %v11627_v27 = vsel %vm22776_vm5, %v29085_v35, %v31377_v53  ;;  %v20999_v2 = vpop.f32.mrf.mxu0  ;;  %v18553_v35 = vcombine.low %v11617_v6, %v11620_v40  ;;  %v31384_v40 = vrot.slane %v29088_v33, 11  ;;  %v31387_v5 = vrot.slane %v29130_v52, 9  ;;  %v29347_v52 = vld [vmem:[%s22490_s16 + $0x5fc] sm:$0x1] }
 0x363   : > { %v18554_v53 = vcombine.low %v11624_v43, %v11627_v27  ;;  %v29298_v37 = vadd.f32 %v9499_v28, %v9180_v39  ;;  %v9183_v10 = vadd.f32 %v20999_v2, %v28701_v18  ;;  %v21047_v56 = vpop.f32.mrf.mxu1  ;;  %v29303_v0 = vrot.slane %v31379_v22, 4  ;;  %v31382_v27 = vld [vmem:[#allocation26_spill] sm:$0xff] }
 0x364   : > { %v9116_v24 = vpop.f32.mrf.mxu0  ;;  %v29309_v6 = vrot.slane %v31380_v46, 4  ;;  %v31383_v46 = vrot.slane %v29044_v8, 7  ;;  %v29336_v8 = vld [vmem:[%s22490_s16 + $0x5f4] sm:$0xe] }
 0x365   : > { %v29313_v18 = vadd.f32 %v21047_v56, %v9183_v10  ;;  %v9181_v39 = vadd.f32 %v9116_v24, %v31382_v27  ;;  %v9502_v28 = vpop.f32.mrf.mxu1  ;;  %v31385_v10 = vrot.slane %v29119_v63, 7  ;;  %v31386_v27 = vrot.slane %v29071_v49, 5 }
 0x366   : > { %v21002_v30 = vpop.f32.mrf.mxu0  ;;  %21289 = vmatmul.mubr.bf16.gmra.mxu0 %v18553_v35  ;;  %v11631_v56 = vsel %vm22776_vm5, %v31384_v40, %v31383_v46  ;;  %v31390_v40 = vld [vmem:[#allocation27_spill] sm:$0xff]  ;;  %v12445_v49 = vsel %vm22502_vm2, %v29171_v57, %v31391_v50  ;;  %v22184_v57 = vld [vmem:[%s22490_s16] sm:$0xff]  }
 0x367   : > { %31381 = vst [vmem:[#allocation40_spill] sm:$0xff] %v29313_v18  ;;  %v11634_v24 = vsel %vm22776_vm5, %v29165_v29, %v31385_v10  ;;  %v12442_v35 = vsel %vm22502_vm2, %v31387_v5, %v31386_v27  ;;  %v29338_v33 = vadd.f32 %v9502_v28, %v9181_v39  ;;  %v9186_v46 = vadd.f32 %v21002_v30, %v31390_v40  ;;  %v21050_v63 = vpop.f32.mrf.mxu1  ;;  %v29350_v29 = vld [vmem:[%s22490_s16 + $0x614] sm:$0xe]  ;;  %v29353_v5 = vld [vmem:[%s22490_s16 + $0x61c] sm:$0x1] }
 0x368   : > { %21337 = vmatmul.mubr.bf16.gmra.mxu1 %v22177_v51  ;;  %21292 = vmatprep.mubr.bf16.mxu0 %v18554_v53  ;;  %v9129_v39 = vpop.f32.mrf.mxu0  ;;  %v31392_v30 = vld [vmem:[#allocation28_spill] sm:$0xff]  ;;  %v18555_v40 = vcombine.low %v11631_v56, %v11634_v24  ;;  %v18716_v2 = vcombine.low %v12442_v35, %v12445_v49  ;;  %v31394_v56 = vrot.slane %v29288_v42, 5  ;;  %v12486_v35 = vrot.slane %v29353_v5, 5  ;;  %v31395_v49 = vld [vmem:[#allocation29_spill] sm:$0xff]  ;;  %v22193_v5 = vld [vmem:[%s22490_s16 + $0xa0] sm:$0xff]  }
 0x369   : > { %31389 = vst [vmem:[#allocation41_spill] sm:$0xff] %v29338_v33  ;;  %21340 = vmatprep.mubr.bf16.mxu1 %v22180_v9  ;;  %v29355_v28 = vadd.f32 %v21050_v63, %v9186_v46  ;;  %v9184_v51 = vadd.f32 %v9129_v39, %v31392_v30  ;;  %v9515_v10 = vpop.f32.mrf.mxu1  ;;  %v22181_v53 = vld [vmem:[%s22490_s16 + $0x72c] sm:$0xff]   ;;  %v29360_v27 = vld [vmem:[%s22490_s16 + $0x634] sm:$0xe]  ;;  %v31393_v9 = vrot.slane %v29285_v44, 5  ;;  %v31398_v18 = vrot.slane %v29144_v31, 9 }
 0x36a   : > { %v21003_v47 = vpop.f32.mrf.mxu0  ;;  %v29375_v24 = vrot.slane %v31394_v56, 4  ;;  %v31397_v56 = vrot.slane %v29136_v7, 5  ;;  %v29404_v31 = vld [vmem:[%s22490_s16 + $0x658] sm:$0xf] }
 0x36b   : > { %v29363_v50 = vadd.f32 %v9515_v10, %v9184_v51  ;;  %v9187_v43 = vadd.f32 %v21003_v47, %v28784_v13  ;;  %v21051_v33 = vpop.f32.mrf.mxu1  ;;  %v29369_v46 = vrot.slane %v31393_v9, 4  ;;  %v31396_v9 = vrot.slane %v29295_v54, 5 }
 0x36c   : > { %v9132_v63 = vpop.f32.mrf.mxu0 }
 0x36d   : > { %v29378_v13 = vadd.f32 %v21051_v33, %v9187_v43  ;;  %v9185_v51 = vadd.f32 %v9132_v63, %v31395_v49  ;;  %v9518_v10 = vpop.f32.mrf.mxu1  ;;  %v29384_v39 = vrot.slane %v31396_v9, 4  ;;  %v12449_v43 = vsel %vm22502_vm2, %v31398_v18, %v31397_v56 }
 0x36e   : > { %v21006_v30 = vpop.f32.mrf.mxu0  ;;  %21293 = vmatmul.mubr.bf16.gmra.mxu0 %v18555_v40  ;;  %v31399_v9 = vrot.slane %v29199_v55, 5  ;;  %v29401_v40 = vld [vmem:[%s22490_s16 + $0x63c] sm:$0x1]  ;;  %v31401_v55 = vrot.slane %v29211_v11, 9 }
 0x36f   : > { %v29392_v33 = vadd.f32 %v9518_v10, %v9185_v51  ;;  %v9190_v63 = vadd.f32 %v21006_v30, %v28824_v26  ;;  %v21054_v49 = vpop.f32.mrf.mxu1  ;;  %21360 = vmatprep.mubr.bf16.mxu0 %v18716_v2  ;;  %v31400_v2 = vrot.slane %v29147_v23, 5  ;;  %v31402_v10 = vrot.slane %v29214_v61, 5  ;;  %v22190_v61 = vld [vmem:[%s30893_s1 + $0x730] sm:$0xff]  }
 0x370   : > { %21341 = vmatmul.mubr.bf16.gmra.mxu1 %v22181_v53  ;;  %v12452_v7 = vsel %vm22502_vm2, %v29235_v60, %v31399_v9  ;;  %v9145_v18 = vpop.f32.mrf.mxu0  ;;  %v22185_v53 = vld [vmem:[%s22490_s16 + $0x20] sm:$0xff]  }
 0x371   : > { %21408 = vmatprep.mubr.bf16.mxu1 %v22184_v57  ;;  %v29406_v51 = vadd.f32 %v21054_v49, %v9190_v63  ;;  %v9188_v26 = vadd.f32 %v9145_v18, %v28834_v12  ;;  %v9531_v30 = vpop.f32.mrf.mxu1  ;;  %v12456_v60 = vsel %vm22502_vm2, %v31401_v55, %v31400_v2  ;;  %v12459_v56 = vsel %vm22502_vm2, %v29241_v59, %v31402_v10  ;;  %v29422_v57 = vld [vmem:[%s22490_s16 + $0x654] sm:$0xe]  ;;  %v29425_v63 = vld [vmem:[%s22490_s16 + $0x678] sm:$0xf]  ;;  %v22188_v18 = vld [vmem:[%s22490_s16 + $0x40] sm:$0xff]  }
 0x372   : > { %v21007_v12 = vpop.f32.mrf.mxu0  ;;  %v18717_v49 = vcombine.low %v12449_v43, %v12452_v7  ;;  %v18718_v55 = vcombine.low %v12456_v60, %v12459_v56  ;;  %v22191_v59 = vld [vmem:[%s30893_s1 + $0x770] sm:$0xff]   ;;  %v12497_v43 = vrot.slane %v29404_v31, 5  ;;  %v31403_v60 = vrot.slane %v29217_v17, 5  ;;  %v22194_v17 = vld [vmem:[%s30893_s1 + $0x728] sm:$0xff]   ;;  %v29614_v31 = vld [vmem:[%s22490_s16 + $0x6d8] sm:$0xf] }
 0x373   : > { %v29427_v9 = vadd.f32 %v9531_v30, %v9188_v26  ;;  %v9191_v23 = vadd.f32 %v21007_v12, %v28845_v41  ;;  %v21055_v11 = vpop.f32.mrf.mxu1  ;;  %v18692_v30 = vrot.slane %v29422_v57, 9  ;;  %v30950_v12 = vrot.slane %v29425_v63, 5  ;;  %v22210_v57 = vld [vmem:[%s30893_s1 + $0x708] sm:$0xff]  }
 0x374   : > { %v9148_v2 = vpop.f32.mrf.mxu0  ;;  %v31404_v56 = vrot.slane %v29220_v16, 9  ;;  %v29465_v16 = vld [vmem:[%s22490_s16 + $0x65c] sm:$0x1] }
 0x375   : > { %v29439_v7 = vadd.f32 %v21055_v11, %v9191_v23  ;;  %v9189_v41 = vadd.f32 %v9148_v2, %v28881_v14  ;;  %v9534_v26 = vpop.f32.mrf.mxu1  ;;  %v31405_v23 = vrot.slane %v29268_v36, 5  ;;  %v31406_v11 = vrot.slane %v29227_v48, 5 }
 0x376   : > { %v21074_v47 = vpop.f32.mrf.mxu0  ;;  %21361 = vmatmul.mubr.bf16.vlgmr.msra.gmra.mxu0 %v18717_v49  ;;  %v12463_v10 = vsel %vm22502_vm2, %v31404_v56, %v31403_v60  ;;  %v31407_v2 = vrot.slane %v29279_v15, 9  ;;  %v31408_v48 = vrot.slane %v29282_v19, 5  ;;  %v22195_v56 = vld [vmem:[%s30893_s1 + $0x768] sm:$0xff]  }
 0x377   : > { %v12466_v14 = vsel %vm22502_vm2, %v29303_v0, %v31405_v23  ;;  %v29467_v60 = vadd.f32 %v9534_v26, %v9189_v41  ;;  %v10078_v36 = vadd.f32 %v21074_v47, %v28908_v3  ;;  %v21122_v0 = vpop.f32.mrf.mxu1  ;;  %21441 = vmatpush3.bf16.msra.mxu0 %v29141_v4  ;;  %v29480_v41 = vld [vmem:[%s22490_s16 + $0x674] sm:$0xe]  ;;  %21364 = vmatprep.mubr.bf16.mxu0 %v18718_v55  ;;  %v22189_v47 = vld [vmem:[%s22490_s16 + $0x60] sm:$0xff]  }
 0x378   : > { %v12470_v49 = vsel %vm22502_vm2, %v31407_v2, %v31406_v11  ;;  %21409 = vmatmul.mubr.bf16.vlgmr.msra.gmra.mxu1 %v22185_v53  ;;  %v12473_v15 = vsel %vm22502_vm2, %v29309_v6, %v31408_v48  ;;  %v9949_v26 = vpop.f32.mrf.mxu0  ;;  %21442 = vmatprep.subr.bf16.mxu0 %v22190_v61  ;;  %v29488_v6 = vld [vmem:[%s22490_s16 + $0x698] sm:$0xf]  ;;  %v18719_v23 = vcombine.low %v12463_v10, %v12466_v14  ;;  %v22192_v2 = vld [vmem:[%s22490_s16 + $0x80] sm:$0xff]   ;;  %v29503_v14 = vld [vmem:[%s22490_s16 + $0x67c] sm:$0x1] }
 0x379   : > { %21489 = vmatpush3.bf16.msra.mxu1 %v29157_v38  ;;  %v29483_v3 = vadd.f32 %v21122_v0, %v10078_v36  ;;  %v10076_v4 = vadd.f32 %v9949_v26, %v28916_v58  ;;  %v10479_v19 = vpop.f32.mrf.mxu1  ;;  %21412 = vmatprep.mubr.bf16.mxu1 %v22188_v18  ;;  %v18720_v11 = vcombine.low %v12470_v49, %v12473_v15  ;;  %v22198_v58 = vld [vmem:[%s30893_s1 + $0x720] sm:$0xff]   ;;  %v29499_v18 = vrot.slane %v12497_v43, 4 }
 0x37a   : > { %v21075_v53 = vpop.f32.mrf.mxu0  ;;  %21490 = vmatprep.subr.bf16.mxu1 %v22191_v59  ;;  %v12500_v36 = vrot.slane %v29465_v16, 5  ;;  %v12511_v26 = vrot.slane %v29488_v6, 5 }
 0x37b   : > { %v29491_v48 = vadd.f32 %v10479_v19, %v10076_v4  ;;  %v10079_v38 = vadd.f32 %v21075_v53, %v28932_v20  ;;  %v21123_v55 = vpop.f32.mrf.mxu1  ;;  %21443 = vmatpush3.bf16.msra.mxu0 %v22190_v61  ;;  %v29508_v61 = vrot.slane %v30950_v12, 4  ;;  %v31409_v19 = vrot.slane %v29285_v44, 5  ;;  %v29535_v44 = vld [vmem:[%s22490_s16 + $0x694] sm:$0xe] }
 0x37c   : > { %v9952_v10 = vpop.f32.mrf.mxu0  ;;  %21444 = vmatprep.subr.bf16.mxu0 %v22194_v17  ;;  %v31410_v53 = vrot.slane %v29336_v8, 9  ;;  %v31413_v20 = vrot.slane %v29350_v29, 9  ;;  %v29538_v8 = vld [vmem:[%s22490_s16 + $0x6b8] sm:$0xf] }
 0x37d   : > { %21491 = vmatpush3.bf16.msra.mxu1 %v22191_v59  ;;  %v29510_v49 = vadd.f32 %v21123_v55, %v10079_v38  ;;  %v10077_v0 = vadd.f32 %v9952_v10, %v28964_v21  ;;  %v10482_v15 = vpop.f32.mrf.mxu1  ;;  %v22199_v59 = vld [vmem:[%s30893_s1 + $0x760] sm:$0xff]   ;;  %v31411_v21 = vrot.slane %v29347_v52, 5  ;;  %v31412_v10 = vrot.slane %v29288_v42, 5  ;;  %v22202_v29 = vld [vmem:[%s30893_s1 + $0x718] sm:$0xff]  }
 0x37e   : > { %21492 = vmatprep.subr.bf16.mxu1 %v22195_v56  ;;  %v21078_v4 = vpop.f32.mrf.mxu0  ;;  %21365 = vmatmul.mubr.bf16.gmra.mxu0 %v18719_v23  ;;  %v12477_v38 = vsel %vm22502_vm2, %v31410_v53, %v31409_v19  ;;  %v31414_v19 = vld [vmem:[#allocation30_spill] sm:$0xff]  ;;  %v12487_v42 = vsel %vm22502_vm2, %v29375_v24, %v12486_v35  ;;  %v12507_v24 = vrot.slane %v29503_v14, 5  ;;  %v22203_v35 = vld [vmem:[%s30893_s1 + $0x758] sm:$0xff]  }
 0x37f   : > { %v12480_v55 = vsel %vm22502_vm2, %v29369_v46, %v31411_v21  ;;  %v12484_v23 = vsel %vm22502_vm2, %v31413_v20, %v31412_v10  ;;  %v29540_v12 = vadd.f32 %v10482_v15, %v10077_v0  ;;  %v10082_v52 = vadd.f32 %v21078_v4, %v31414_v19  ;;  %v21126_v53 = vpop.f32.mrf.mxu1  ;;  %21368 = vmatprep.mubr.bf16.mxu0 %v18720_v11  ;;  %v29552_v20 = vld [vmem:[%s22490_s16 + $0x69c] sm:$0x1]  ;;  %v22196_v4 = vld [vmem:[%s22490_s16 + $0xc0] sm:$0xff]  }
 0x380   : > { %21413 = vmatmul.mubr.bf16.gmra.mxu1 %v22189_v47  ;;  %v9965_v46 = vpop.f32.mrf.mxu0  ;;  %21445 = vmatpush3.bf16.msra.mxu0 %v22194_v17  ;;  %v18722_v17 = vcombine.low %v12484_v23, %v12487_v42  ;;  %v12518_v19 = vrot.slane %v29538_v8, 5  ;;  %v29735_v8 = vld [vmem:[%s22490_s16 + $0x738] sm:$0xf] }
 0x381   : > { %21416 = vmatprep.mubr.bf16.mxu1 %v22192_v2  ;;  %v29554_v0 = vadd.f32 %v21126_v53, %v10082_v52  ;;  %v10080_v47 = vadd.f32 %v9965_v46, %v29000_v62  ;;  %v10495_v11 = vpop.f32.mrf.mxu1  ;;  %21493 = vmatpush3.bf16.msra.mxu1 %v22195_v56  ;;  %v18721_v2 = vcombine.low %v12477_v38, %v12480_v55  ;;  %v18694_v56 = vrot.slane %v29535_v44, 9  ;;  %v29573_v38 = vld [vmem:[%s22490_s16 + $0x6b4] sm:$0xe] }
 0x382   : > { %21446 = vmatprep.subr.bf16.mxu0 %v22198_v58  ;;  %v21079_v15 = vpop.f32.mrf.mxu0  ;;  %21494 = vmatprep.subr.bf16.mxu1 %v22199_v59  ;;  %v29570_v53 = vrot.slane %v12511_v26, 4  ;;  %v22206_v55 = vld [vmem:[%s30893_s1 + $0x710] sm:$0xff]  }
 0x383   : > { %v29563_v21 = vadd.f32 %v10495_v11, %v10080_v47  ;;  %v10083_v62 = vadd.f32 %v21079_v15, %v29015_v32  ;;  %v21127_v10 = vpop.f32.mrf.mxu1  ;;  %v22207_v46 = vld [vmem:[%s30893_s1 + $0x750] sm:$0xff]   ;;  %v31415_v11 = vrot.slane %v29295_v54, 5  ;;  %v31416_v15 = vrot.slane %v29360_v27, 9  ;;  %v29603_v54 = vld [vmem:[%s22490_s16 + $0x6bc] sm:$0x1] }
 0x384   : > { %v9968_v52 = vpop.f32.mrf.mxu0  ;;  %21447 = vmatpush3.bf16.msra.mxu0 %v22198_v58  ;;  %v12514_v58 = vrot.slane %v29552_v20, 5 }
 0x385   : > { %v29578_v23 = vadd.f32 %v21127_v10, %v10083_v62  ;;  %v10081_v32 = vadd.f32 %v9968_v52, %v29046_v45  ;;  %v10498_v42 = vpop.f32.mrf.mxu1  ;;  %21495 = vmatpush3.bf16.msra.mxu1 %v22199_v59  ;;  %21448 = vmatprep.subr.bf16.mxu0 %v22202_v29  ;;  %v12491_v62 = vsel %vm22502_vm2, %v31416_v15, %v31415_v11  ;;  %v31417_v45 = vrot.slane %v29401_v40, 5  ;;  %v22197_v52 = vld [vmem:[%s22490_s16 + $0xe0] sm:$0xff]   ;;  %v31419_v11 = vld [vmem:[#allocation32_spill] sm:$0xff] }
 0x386   : > { %v21082_v47 = vpop.f32.mrf.mxu0  ;;  %21369 = vmatmul.mubr.bf16.gmra.mxu0 %v18721_v2  ;;  %v12498_v2 = vsel %vm22502_vm2, %v18692_v30, %v12497_v43  ;;  %21496 = vmatprep.subr.bf16.mxu1 %v22203_v35  ;;  %v12515_v6 = vsel %vm22502_vm2, %v29570_v53, %v12514_v58  ;;  %v22201_v58 = vld [vmem:[%s22490_s16 + $0x120] sm:$0xff]  }
 0x387   : > { %v12494_v59 = vsel %vm22502_vm2, %v29384_v39, %v31417_v45  ;;  %v29605_v27 = vadd.f32 %v10498_v42, %v10081_v32  ;;  %v10086_v40 = vadd.f32 %v21082_v47, %v29066_v1  ;;  %21372 = vmatprep.mubr.bf16.mxu0 %v18722_v17  ;;  %v12501_v39 = vsel %vm22502_vm2, %v29499_v18, %v12500_v36  ;;  %v29620_v1 = vld [vmem:[%s22490_s16 + $0x6f8] sm:$0xf]  ;;  %v22211_v36 = vld [vmem:[%s30893_s1 + $0x748] sm:$0xff]   ;;  %v22200_v42 = vld [vmem:[%s22490_s16 + $0x100] sm:$0xff]  }
 0x388   : > { %v21130_v10 = vpop.f32.mrf.mxu1  ;;  %21417 = vmatmul.mubr.bf16.gmra.mxu1 %v22193_v5  ;;  %v9981_v43 = vpop.f32.mrf.mxu0  ;;  %21449 = vmatpush3.bf16.msra.mxu0 %v22202_v29  ;;  %v31418_v5 = vld [vmem:[#allocation31_spill] sm:$0xff]  ;;  %v18695_v18 = vrot.slane %v29573_v38, 9  ;;  %v18724_v29 = vcombine.low %v12498_v2, %v12501_v39  ;;  %v31420_v39 = vld [vmem:[#allocation33_spill] sm:$0xff] }
 0x389   : > { %21420 = vmatprep.mubr.bf16.mxu1 %v22196_v4  ;;  %v29622_v30 = vadd.f32 %v21130_v10, %v10086_v40  ;;  %v10084_v16 = vadd.f32 %v9981_v43, %v31418_v5  ;;  %21497 = vmatpush3.bf16.msra.mxu1 %v22203_v35  ;;  %v18723_v4 = vcombine.low %v12491_v62, %v12494_v59  ;;  %v29636_v35 = vrot.slane %v12518_v19, 4  ;;  %v29640_v43 = vld [vmem:[%s22490_s16 + $0x6d4] sm:$0xe]  ;;  %v22214_v59 = vld [vmem:[%s30893_s1 + $0x700] sm:$0xff]  }
 0x38a   : > { %v10511_v17 = vpop.f32.mrf.mxu1  ;;  %21450 = vmatprep.subr.bf16.mxu0 %v22206_v55  ;;  %v21083_v32 = vpop.f32.mrf.mxu0  ;;  %21498 = vmatprep.subr.bf16.mxu1 %v22207_v46  ;;  %v12525_v62 = vrot.slane %v29614_v31, 5  ;;  %v31422_v40 = vrot.slane %v29480_v41, 9 }
 0x38b   : > { %v29631_v47 = vadd.f32 %v10511_v17, %v10084_v16  ;;  %v10087_v15 = vadd.f32 %v21083_v32, %v31419_v11  ;;  %v12532_v17 = vrot.slane %v29620_v1, 5  ;;  %v31421_v11 = vrot.slane %v29425_v63, 5 }
 0x38c   : > { %v21131_v45 = vpop.f32.mrf.mxu1  ;;  %v9984_v10 = vpop.f32.mrf.mxu0  ;;  %21451 = vmatpush3.bf16.msra.mxu0 %v22206_v55  ;;  %v22215_v55 = vld [vmem:[%s30893_s1 + $0x740] sm:$0xff]   ;;  %v12512_v63 = vsel %vm22502_vm2, %v18694_v56, %v12511_v26  ;;  %v29685_v26 = vld [vmem:[%s30893_s1 + $0x7b8] sm:$0xff]  }
 0x38d   : > { %v29646_v2 = vadd.f32 %v21131_v45, %v10087_v15  ;;  %v10085_v5 = vadd.f32 %v9984_v10, %v31420_v39  ;;  %21499 = vmatpush3.bf16.msra.mxu1 %v22207_v46  ;;  %21452 = vmatprep.subr.bf16.mxu0 %v22210_v57  ;;  %v12505_v15 = vsel %vm22502_vm2, %v31422_v40, %v31421_v11  ;;  %v31423_v45 = vld [vmem:[#allocation34_spill] sm:$0xff]  ;;  %v29691_v56 = vld [vmem:[%s22490_s16 + $0x718] sm:$0xf]  ;;  %v18696_v10 = vrot.slane %v29640_v43, 9  ;;  %v31425_v11 = vld [vmem:[#allocation36_spill] sm:$0xff] }
 0x38e   : > { %v10514_v16 = vpop.f32.mrf.mxu1  ;;  %v21086_v32 = vpop.f32.mrf.mxu0  ;;  %21373 = vmatmul.mubr.bf16.gmra.mxu0 %v18723_v4  ;;  %v12508_v46 = vsel %vm22502_vm2, %v29508_v61, %v12507_v24  ;;  %v18674_v4 = vld [vmem:[%s22490_s16 + $0x6dc] sm:$0x1]  ;;  %21500 = vmatprep.subr.bf16.mxu1 %v22211_v36  ;;  %v29680_v61 = vld [vmem:[%s22490_s16 + $0x6f4] sm:$0xe]  ;;  %v12527_v43 = vrot.slane %v12525_v62, 4 }
 0x38f   : > { %v29671_v41 = vadd.f32 %v10514_v16, %v10085_v5  ;;  %v10090_v40 = vadd.f32 %v21086_v32, %v31423_v45  ;;  %21376 = vmatprep.mubr.bf16.mxu0 %v18724_v29  ;;  %v29688_v24 = vld [vmem:[%s22490_s16 + $0x6fc] sm:$0x1]  ;;  %v18725_v5 = vcombine.low %v12505_v15, %v12508_v46  ;;  %v22204_v16 = vld [vmem:[%s22490_s16 + $0x140] sm:$0xff]   ;;  %v12534_v15 = vrot.slane %v12532_v17, 4 }
 0x390   : > { %v21134_v14 = vpop.f32.mrf.mxu1  ;;  %21421 = vmatmul.mubr.bf16.gmra.mxu1 %v22197_v52  ;;  %v9997_v44 = vpop.f32.mrf.mxu0  ;;  %21453 = vmatpush3.bf16.msra.mxu0 %v22210_v57  ;;  %v31424_v52 = vld [vmem:[#allocation35_spill] sm:$0xff]  ;;  %v29701_v39 = vld [vmem:[%s30893_s1 + $0x7f8] sm:$0xff]   ;;  %v18726_v57 = vcombine.low %v12512_v63, %v12515_v6 }
 0x391   : > { %21424 = vmatprep.mubr.bf16.mxu1 %v22200_v42  ;;  %v29693_v20 = vadd.f32 %v21134_v14, %v10090_v40  ;;  %v10088_v29 = vadd.f32 %v9997_v44, %v31424_v52  ;;  %21501 = vmatpush3.bf16.msra.mxu1 %v22211_v36  ;;  %v12528_v36 = vrot.slane %v18674_v4, 5  ;;  %v18697_v44 = vrot.slane %v29680_v61, 9  ;;  %v31426_v63 = vld [vmem:[#allocation37_spill] sm:$0xff] }
 0x392   : > { %v10527_v53 = vpop.f32.mrf.mxu1  ;;  %21454 = vmatprep.subr.bf16.mxu0 %v22214_v59  ;;  %v21087_v42 = vpop.f32.mrf.mxu0  ;;  %21502 = vmatprep.subr.bf16.mxu1 %v22215_v55  ;;  %v31427_v61 = vrot.slane %v29603_v54, 5 }
 0x393   : > { %v29704_v32 = vadd.f32 %v10527_v53, %v10088_v29  ;;  %v10091_v45 = vadd.f32 %v21087_v42, %v31425_v11  ;;  %v12535_v29 = vrot.slane %v29688_v24, 5  ;;  %v12539_v53 = vrot.slane %v29691_v56, 5  ;;  %v18678_v56 = vld [vmem:[%s22490_s16 + $0x714] sm:$0xe]  ;;  %v18680_v11 = vld [vmem:[%s22490_s16 + $0x71c] sm:$0x1] }
 0x394   : > { %v21135_v40 = vpop.f32.mrf.mxu1  ;;  %v10000_v14 = vpop.f32.mrf.mxu0  ;;  %21455 = vmatpush3.bf16.msra.mxu0 %v22214_v59  ;;  %v12519_v59 = vsel %vm22502_vm2, %v18695_v18, %v12518_v19  ;;  %v12522_v24 = vsel %vm22502_vm2, %v29636_v35, %v31427_v61  ;;  %v12529_v31 = vsel %vm22502_vm2, %v12527_v43, %v12528_v36  ;;  %v18698_v36 = vrot.slane %v18678_v56, 9 }
 0x395   : > { %v29712_v46 = vadd.f32 %v21135_v40, %v10091_v45  ;;  %v10089_v6 = vadd.f32 %v10000_v14, %v31426_v63  ;;  %21503 = vmatpush3.bf16.msra.mxu1 %v22215_v55  ;;  %21536 = vmatprep.subr.bf16.mxu0 %v29685_v26  ;;  %v12526_v55 = vsel %vm22502_vm2, %v18696_v10, %v12525_v62  ;;  %v31428_v62 = vld [vmem:[#allocation38_spill] sm:$0xff] }
 0x396   : > { %v10530_v52 = vpop.f32.mrf.mxu1  ;;  %v21090_v4 = vpop.f32.mrf.mxu0  ;;  %21377 = vmatmul.mubr.bf16.gmra.mxu0 %v18725_v5  ;;  %21584 = vmatprep.subr.bf16.mxu1 %v29701_v39  ;;  %v22205_v5 = vld [vmem:[%s22490_s16 + $0x160] sm:$0xff]   ;;  %v18727_v40 = vcombine.low %v12519_v59, %v12522_v24  ;;  %v18728_v14 = vcombine.low %v12526_v55, %v12529_v31  ;;  %v18681_v59 = vld [vmem:[%s22490_s16 + $0x734] sm:$0xe]  ;;  %v12533_v55 = vsel %vm22502_vm2, %v18697_v44, %v12532_v17  ;;  %v18683_v31 = vld [vmem:[%s22490_s16 + $0x73c] sm:$0x1] }
 0x397   : > { %v29738_v38 = vadd.f32 %v10530_v52, %v10089_v6  ;;  %v10094_v19 = vadd.f32 %v21090_v4, %v29222_v25  ;;  %21380 = vmatprep.mubr.bf16.mxu0 %v18726_v57  ;;  %v22208_v25 = vld [vmem:[%s22490_s16 + $0x180] sm:$0xff]   ;;  %v31429_v57 = vld [vmem:[#allocation3_spill] sm:$0xff]  ;;  %v12541_v52 = vrot.slane %v12539_v53, 4  ;;  %v12542_v4 = vrot.slane %v18680_v11, 5 }
 0x398   : > { %v21138_v54 = vpop.f32.mrf.mxu1  ;;  %21425 = vmatmul.mubr.bf16.gmra.mxu1 %v22201_v58  ;;  %v10013_v18 = vpop.f32.mrf.mxu0  ;;  %v12540_v1 = vsel %vm22502_vm2, %v18698_v36, %v12539_v53 }
 0x399   : > { %21428 = vmatprep.mubr.bf16.mxu1 %v22204_v16  ;;  %v29743_v35 = vadd.f32 %v21138_v54, %v10094_v19  ;;  %v10092_v10 = vadd.f32 %v10013_v18, %v31428_v62  ;;  %v12546_v16 = vrot.slane %v29735_v8, 5  ;;  %v31430_v19 = vld [vmem:[#allocation39_spill] sm:$0xff]  ;;  %v12543_v17 = vsel %vm22502_vm2, %v12541_v52, %v12542_v4  ;;  %v31432_v4 = vld [vmem:[#allocation41_spill] sm:$0xff] }
 0x39a   : > { %v10543_v42 = vpop.f32.mrf.mxu1  ;;  %v21091_v45 = vpop.f32.mrf.mxu0  ;;  %v18730_v53 = vcombine.low %v12540_v1, %v12543_v17 }
 0x39b   : > { %v29749_v58 = vadd.f32 %v10543_v42, %v10092_v10  ;;  %v10095_v63 = vadd.f32 %v21091_v45, %v31429_v57  ;;  %v12536_v10 = vsel %vm22502_vm2, %v12534_v15, %v12535_v29  ;;  %v12548_v45 = vrot.slane %v12546_v16, 4  ;;  %v31431_v15 = vld [vmem:[#allocation40_spill] sm:$0xff] }
 0x39c   : > { %v21139_v43 = vpop.f32.mrf.mxu1  ;;  %v10016_v6 = vpop.f32.mrf.mxu0 }
 0x39d   : > { %v29753_v61 = vadd.f32 %v21139_v43, %v10095_v63  ;;  %v10093_v54 = vadd.f32 %v10016_v6, %v31430_v19  ;;  %v22209_v63 = vld [vmem:[%s22490_s16 + $0x1a0] sm:$0xff]   ;;  %v12549_v43 = vrot.slane %v18683_v31, 5 }
 0x39e   : > { %v10546_v18 = vpop.f32.mrf.mxu1  ;;  %v21094_v24 = vpop.f32.mrf.mxu0  ;;  %21381 = vmatmul.mubr.bf16.gmra.mxu0 %v18727_v40  ;;  %v22212_v6 = vld [vmem:[%s22490_s16 + $0x1c0] sm:$0xff]  }
 0x39f   : > { %v29762_v56 = vadd.f32 %v10546_v18, %v10093_v54  ;;  %v10098_v8 = vadd.f32 %v21094_v24, %v29290_v34  ;;  %21384 = vmatprep.mubr.bf16.mxu0 %v18728_v14  ;;  %v18729_v14 = vcombine.low %v12533_v55, %v12536_v10  ;;  %v12550_v31 = vsel %vm22502_vm2, %v12548_v45, %v12549_v43 }
 0x3a0   : > { %v21142_v62 = vpop.f32.mrf.mxu1  ;;  %21429 = vmatmul.mubr.bf16.gmra.mxu1 %v22205_v5  ;;  %v10029_v42 = vpop.f32.mrf.mxu0  ;;  %v18699_v5 = vrot.slane %v18681_v59, 9 }
 0x3a1   : > { %21432 = vmatprep.mubr.bf16.mxu1 %v22208_v25  ;;  %v29771_v44 = vadd.f32 %v21142_v62, %v10098_v8  ;;  %v10096_v34 = vadd.f32 %v10029_v42, %v29298_v37 }
 0x3a2   : > { %v10559_v11 = vpop.f32.mrf.mxu1  ;;  %v21095_v40 = vpop.f32.mrf.mxu0  ;;  %v12547_v18 = vsel %vm22502_vm2, %v18699_v5, %v12546_v16  ;;  %v22216_v5 = vld [vmem:[%s22490_s16 + $0xc] sm:$0xff]  }
 0x3a3   : > { %v29774_v57 = vadd.f32 %v10559_v11, %v10096_v34  ;;  %v10099_v29 = vadd.f32 %v21095_v40, %v31431_v15  ;;  %v18731_v1 = vcombine.low %v12547_v18, %v12550_v31  ;;  %v22213_v11 = vld [vmem:[%s22490_s16 + $0x1e0] sm:$0xff]   ;;  %v22222_v18 = vld [vmem:[%s22490_s16 + $0x4c] sm:$0xff]  }
 0x3a4   : > { %v21143_v25 = vpop.f32.mrf.mxu1  ;;  %v10032_v36 = vpop.f32.mrf.mxu0 }
 0x3a5   : > { %v29779_v52 = vadd.f32 %v21143_v25, %v10099_v29  ;;  %v10097_v19 = vadd.f32 %v10032_v36, %v31432_v4 }
 0x3a6   : > { %v10562_v37 = vpop.f32.mrf.mxu1  ;;  %v21098_v54 = vpop.f32.mrf.mxu0  ;;  %21385 = vmatmul.mubr.bf16.gmra.mxu0 %v18729_v14  ;;  %v22217_v14 = vld [vmem:[%s22490_s16 + $0x18] sm:$0xff]  }
 0x3a7   : > { %v29784_v59 = vadd.f32 %v10562_v37, %v10097_v19  ;;  %v10102_v24 = vadd.f32 %v21098_v54, %v29355_v28  ;;  %21388 = vmatprep.mubr.bf16.mxu0 %v18730_v53 }
 0x3a8   : > { %v21146_v55 = vpop.f32.mrf.mxu1  ;;  %21433 = vmatmul.mubr.bf16.gmra.mxu1 %v22209_v63  ;;  %v10045_v8 = vpop.f32.mrf.mxu0 }
 0x3a9   : > { %21436 = vmatprep.mubr.bf16.mxu1 %v22212_v6  ;;  %v29789_v62 = vadd.f32 %v21146_v55, %v10102_v24  ;;  %v10100_v10 = vadd.f32 %v10045_v8, %v29363_v50  ;;  %v22218_v6 = vld [vmem:[%s22490_s16 + $0x2c] sm:$0xff]   ;;  %v22223_v8 = vld [vmem:[%s22490_s16 + $0x58] sm:$0xff]  }
 0x3aa   : > { %v10575_v16 = vpop.f32.mrf.mxu1  ;;  %v21099_v42 = vpop.f32.mrf.mxu0 }
 0x3ab   : > { %v29792_v17 = vadd.f32 %v10575_v16, %v10100_v10  ;;  %v10103_v28 = vadd.f32 %v21099_v42, %v29378_v13 }
 0x3ac   : > { %v21147_v34 = vpop.f32.mrf.mxu1  ;;  %v10048_v40 = vpop.f32.mrf.mxu0 }
 0x3ad   : > { %v29798_v22 = vadd.f32 %v21147_v34, %v10103_v28  ;;  %v10101_v45 = vadd.f32 %v10048_v40, %v29392_v33  ;;  %v22232_v28 = vld [vmem:[%s30893_s1 + $0x7a8] sm:$0xff]  }
 0x3ae   : > { %v10578_v15 = vpop.f32.mrf.mxu1  ;;  %v21102_v29 = vpop.f32.mrf.mxu0  ;;  %21389 = vmatmul.mubr.bf16.gmra.mxu0 %v18731_v1 }
 0x3af   : > { %v29801_v50 = vadd.f32 %v10578_v15, %v10101_v45  ;;  %v10106_v25 = vadd.f32 %v21102_v29, %v29406_v51  ;;  %21456 = vmatprep.mubr.bf16.mxu0 %v22216_v5  ;;  %v22219_v51 = vld [vmem:[%s22490_s16 + $0x38] sm:$0xff]   ;;  %v22228_v29 = vld [vmem:[%s22490_s16 + $0x8c] sm:$0xff]  }
 0x3b0   : > { %v21150_v13 = vpop.f32.mrf.mxu1  ;;  %21437 = vmatmul.mubr.bf16.gmra.mxu1 %v22213_v11  ;;  %v10061_v63 = vpop.f32.mrf.mxu0  ;;  %v22225_v15 = vld [vmem:[%s22490_s16 + $0x78] sm:$0xff]  }
 0x3b1   : > { %21504 = vmatprep.mubr.bf16.mxu1 %v22217_v14  ;;  %v29804_v53 = vadd.f32 %v21150_v13, %v10106_v25  ;;  %v10104_v43 = vadd.f32 %v10061_v63, %v29427_v9  ;;  %v22226_v9 = vld [vmem:[%s30893_s1 + $0x7b0] sm:$0xff]   ;;  %v22229_v25 = vld [vmem:[%s22490_s16 + $0x98] sm:$0xff]  }
 0x3b2   : > { %v10591_v33 = vpop.f32.mrf.mxu1  ;;  %v21103_v36 = vpop.f32.mrf.mxu0 }
 0x3b3   : > { %v29808_v4 = vadd.f32 %v10591_v33, %v10104_v43  ;;  %v10107_v19 = vadd.f32 %v21103_v36, %v29439_v7  ;;  %v22227_v7 = vld [vmem:[%s30893_s1 + $0x7f0] sm:$0xff]   ;;  %v22238_v33 = vld [vmem:[%s30893_s1 + $0x7a0] sm:$0xff]  }
 0x3b4   : > { %v21151_v37 = vpop.f32.mrf.mxu1  ;;  %v10064_v54 = vpop.f32.mrf.mxu0 }
 0x3b5   : > { %v29813_v24 = vadd.f32 %v21151_v37, %v10107_v19  ;;  %v10105_v55 = vadd.f32 %v10064_v54, %v29467_v60 }
 0x3b6   : > { %v10594_v31 = vpop.f32.mrf.mxu1  ;;  %v21170_v10 = vpop.f32.mrf.mxu0  ;;  %21457 = vmatmul.mubr.bf16.vlgmr.msra.gmra.mxu0 %v22218_v6 }
 0x3b7   : > { %v29823_v16 = vadd.f32 %v10594_v31, %v10105_v55  ;;  %v10866_v42 = vadd.f32 %v21170_v10, %v29483_v3  ;;  %21537 = vmatpush3.bf16.msra.mxu0 %v29685_v26  ;;  %21460 = vmatprep.mubr.bf16.mxu0 %v22222_v18  ;;  %v22233_v26 = vld [vmem:[%s30893_s1 + $0x7e8] sm:$0xff]  }
 0x3b8   : > { %v21218_v1 = vpop.f32.mrf.mxu1  ;;  %21505 = vmatmul.mubr.bf16.vlgmr.msra.gmra.mxu1 %v22219_v51  ;;  %v10737_v60 = vpop.f32.mrf.mxu0  ;;  %21538 = vmatprep.subr.bf16.mxu0 %v22226_v9  ;;  %v22230_v31 = vld [vmem:[%s22490_s16 + $0xac] sm:$0xff]  }
 0x3b9   : > { %21585 = vmatpush3.bf16.msra.mxu1 %v29701_v39  ;;  %v29831_v34 = vadd.f32 %v21218_v1, %v10866_v42  ;;  %v10864_v11 = vadd.f32 %v10737_v60, %v29491_v48  ;;  %21508 = vmatprep.mubr.bf16.mxu1 %v22223_v8  ;;  %v22224_v39 = vld [vmem:[%s22490_s16 + $0x6c] sm:$0xff]   ;;  %v22245_v8 = vld [vmem:[%s30893_s1 + $0x7d8] sm:$0xff]  }
 0x3ba   : > { %v11267_v3 = vpop.f32.mrf.mxu1  ;;  %v21171_v5 = vpop.f32.mrf.mxu0  ;;  %21586 = vmatprep.subr.bf16.mxu1 %v22227_v7  ;;  %v22234_v42 = vld [vmem:[%s22490_s16 + $0xcc] sm:$0xff]   ;;  %v22235_v60 = vld [vmem:[%s22490_s16 + $0xd8] sm:$0xff]  }
 0x3bb   : > { %v29838_v40 = vadd.f32 %v11267_v3, %v10864_v11  ;;  %v10867_v14 = vadd.f32 %v21171_v5, %v29510_v49  ;;  %21539 = vmatpush3.bf16.msra.mxu0 %v22226_v9  ;;  %v22239_v49 = vld [vmem:[%s30893_s1 + $0x7e0] sm:$0xff]  }
 0x3bc   : > { %v21219_v45 = vpop.f32.mrf.mxu1  ;;  %v10740_v48 = vpop.f32.mrf.mxu0  ;;  %21540 = vmatprep.subr.bf16.mxu0 %v22232_v28 }
 0x3bd   : > { %21587 = vmatpush3.bf16.msra.mxu1 %v22227_v7  ;;  %v29844_v13 = vadd.f32 %v21219_v45, %v10867_v14  ;;  %v10865_v63 = vadd.f32 %v10740_v48, %v29540_v12 }
 0x3be   : > { %v11270_v43 = vpop.f32.mrf.mxu1  ;;  %21588 = vmatprep.subr.bf16.mxu1 %v22233_v26  ;;  %v21174_v36 = vpop.f32.mrf.mxu0  ;;  %21461 = vmatmul.mubr.bf16.gmra.mxu0 %v22224_v39 }
 0x3bf   : > { %v29853_v6 = vadd.f32 %v11270_v43, %v10865_v63  ;;  %v10870_v19 = vadd.f32 %v21174_v36, %v29554_v0  ;;  %21464 = vmatprep.mubr.bf16.mxu0 %v22228_v29  ;;  %21541 = vmatpush3.bf16.msra.mxu0 %v22232_v28  ;;  %v22244_v0 = vld [vmem:[%s30893_s1 + $0x798] sm:$0xff]   ;;  %v22236_v63 = vld [vmem:[%s22490_s16 + $0xec] sm:$0xff]  }
 0x3c0   : > { %v21222_v37 = vpop.f32.mrf.mxu1  ;;  %21509 = vmatmul.mubr.bf16.gmra.mxu1 %v22225_v15  ;;  %v10753_v12 = vpop.f32.mrf.mxu0  ;;  %21542 = vmatprep.subr.bf16.mxu0 %v22238_v33  ;;  %v22257_v43 = vld [vmem:[%s30893_s1 + $0x7c8] sm:$0xff]  }
 0x3c1   : > { %21512 = vmatprep.mubr.bf16.mxu1 %v22229_v25  ;;  %v29856_v51 = vadd.f32 %v21222_v37, %v10870_v19  ;;  %v10868_v54 = vadd.f32 %v10753_v12, %v29563_v21  ;;  %21589 = vmatpush3.bf16.msra.mxu1 %v22233_v26  ;;  %v22231_v21 = vld [vmem:[%s22490_s16 + $0xb8] sm:$0xff]   ;;  %v22250_v26 = vld [vmem:[%s30893_s1 + $0x790] sm:$0xff]  }
 0x3c2   : > { %v11283_v18 = vpop.f32.mrf.mxu1  ;;  %v21175_v55 = vpop.f32.mrf.mxu0  ;;  %21590 = vmatprep.subr.bf16.mxu1 %v22239_v49  ;;  %v22240_v19 = vld [vmem:[%s22490_s16 + $0x10c] sm:$0xff]   ;;  %v22241_v12 = vld [vmem:[%s22490_s16 + $0x118] sm:$0xff]  }
 0x3c3   : > { %v29866_v9 = vadd.f32 %v11283_v18, %v10868_v54  ;;  %v10871_v10 = vadd.f32 %v21175_v55, %v29578_v23  ;;  %21543 = vmatpush3.bf16.msra.mxu0 %v22238_v33  ;;  %v22251_v23 = vld [vmem:[%s30893_s1 + $0x7d0] sm:$0xff]   ;;  %v22262_v55 = vld [vmem:[%s30893_s1 + $0x780] sm:$0xff]  }
 0x3c4   : > { %v21223_v7 = vpop.f32.mrf.mxu1  ;;  %v10756_v1 = vpop.f32.mrf.mxu0  ;;  %21544 = vmatprep.subr.bf16.mxu0 %v22244_v0 }
 0x3c5   : > { %v29872_v28 = vadd.f32 %v21223_v7, %v10871_v10  ;;  %v10869_v11 = vadd.f32 %v10756_v1, %v29605_v27  ;;  %21591 = vmatpush3.bf16.msra.mxu1 %v22239_v49 }
 0x3c6   : > { %v11286_v3 = vpop.f32.mrf.mxu1  ;;  %v21178_v5 = vpop.f32.mrf.mxu0  ;;  %21465 = vmatmul.mubr.bf16.gmra.mxu0 %v22230_v31  ;;  %21592 = vmatprep.subr.bf16.mxu1 %v22245_v8 }
 0x3c7   : > { %v29881_v39 = vadd.f32 %v11286_v3, %v10869_v11  ;;  %v10874_v14 = vadd.f32 %v21178_v5, %v29622_v30  ;;  %21468 = vmatprep.mubr.bf16.mxu0 %v22234_v42  ;;  %21545 = vmatpush3.bf16.msra.mxu0 %v22244_v0  ;;  %v22256_v30 = vld [vmem:[%s30893_s1 + $0x788] sm:$0xff]   ;;  %v29924_v3 = vld [vmem:[%s30893_s1 + $0x878] sm:$0xff]  }
 0x3c8   : > { %v21226_v27 = vpop.f32.mrf.mxu1  ;;  %21513 = vmatmul.mubr.bf16.gmra.mxu1 %v22231_v21  ;;  %v10769_v45 = vpop.f32.mrf.mxu0  ;;  %21546 = vmatprep.subr.bf16.mxu0 %v22250_v26  ;;  %v22242_v11 = vld [vmem:[%s22490_s16 + $0x12c] sm:$0xff]  }
 0x3c9   : > { %21516 = vmatprep.mubr.bf16.mxu1 %v22235_v60  ;;  %v29884_v15 = vadd.f32 %v21226_v27, %v10874_v14  ;;  %v10872_v29 = vadd.f32 %v10769_v45, %v29631_v47  ;;  %21593 = vmatpush3.bf16.msra.mxu1 %v22245_v8  ;;  %v22237_v47 = vld [vmem:[%s22490_s16 + $0xf8] sm:$0xff]   ;;  %v22246_v14 = vld [vmem:[%s22490_s16 + $0x14c] sm:$0xff]  }
 0x3ca   : > { %v11299_v48 = vpop.f32.mrf.mxu1  ;;  %v21179_v25 = vpop.f32.mrf.mxu0  ;;  %21594 = vmatprep.subr.bf16.mxu1 %v22251_v23  ;;  %v22247_v45 = vld [vmem:[%s22490_s16 + $0x158] sm:$0xff]  }
 0x3cb   : > { %v29894_v33 = vadd.f32 %v11299_v48, %v10872_v29  ;;  %v10875_v36 = vadd.f32 %v21179_v25, %v29646_v2  ;;  %21547 = vmatpush3.bf16.msra.mxu0 %v22250_v26  ;;  %v22263_v2 = vld [vmem:[%s30893_s1 + $0x7c0] sm:$0xff]  }
 0x3cc   : > { %v21227_v49 = vpop.f32.mrf.mxu1  ;;  %v10772_v37 = vpop.f32.mrf.mxu0  ;;  %21548 = vmatprep.subr.bf16.mxu0 %v22256_v30 }
 0x3cd   : > { %v29900_v54 = vadd.f32 %v21227_v49, %v10875_v36  ;;  %v10873_v18 = vadd.f32 %v10772_v37, %v29671_v41  ;;  %21595 = vmatpush3.bf16.msra.mxu1 %v22251_v23  ;;  %v22243_v23 = vld [vmem:[%s22490_s16 + $0x138] sm:$0xff]   ;;  %v22248_v37 = vld [vmem:[%s22490_s16 + $0x16c] sm:$0xff]  }
 0x3ce   : > { %v11302_v0 = vpop.f32.mrf.mxu1  ;;  %v21182_v31 = vpop.f32.mrf.mxu0  ;;  %21469 = vmatmul.mubr.bf16.gmra.mxu0 %v22236_v63  ;;  %21596 = vmatprep.subr.bf16.mxu1 %v22257_v43 }
 0x3cf   : > { %v29909_v8 = vadd.f32 %v11302_v0, %v10873_v18  ;;  %v10878_v10 = vadd.f32 %v21182_v31, %v29693_v20  ;;  %21472 = vmatprep.mubr.bf16.mxu0 %v22240_v19  ;;  %21549 = vmatpush3.bf16.msra.mxu0 %v22256_v30  ;;  %v29918_v20 = vld [vmem:[%s30893_s1 + $0x838] sm:$0xff]  }
 0x3d0   : > { %v21230_v41 = vpop.f32.mrf.mxu1  ;;  %21517 = vmatmul.mubr.bf16.gmra.mxu1 %v22237_v47  ;;  %v10785_v7 = vpop.f32.mrf.mxu0  ;;  %21550 = vmatprep.subr.bf16.mxu0 %v22262_v55 }
 0x3d1   : > { %21520 = vmatprep.mubr.bf16.mxu1 %v22241_v12  ;;  %v29912_v21 = vadd.f32 %v21230_v41, %v10878_v10  ;;  %v10876_v42 = vadd.f32 %v10785_v7, %v29704_v32  ;;  %21597 = vmatpush3.bf16.msra.mxu1 %v22257_v43 }
 0x3d2   : > { %v11315_v1 = vpop.f32.mrf.mxu1  ;;  %v21183_v60 = vpop.f32.mrf.mxu0  ;;  %21598 = vmatprep.subr.bf16.mxu1 %v22263_v2 }
 0x3d3   : > { %v29926_v26 = vadd.f32 %v11315_v1, %v10876_v42  ;;  %v10879_v32 = vadd.f32 %v21183_v60, %v29712_v46  ;;  %21551 = vmatpush3.bf16.msra.mxu0 %v22262_v55  ;;  %v22249_v55 = vld [vmem:[%s22490_s16 + $0x178] sm:$0xff]  }
 0x3d4   : > { %v21231_v5 = vpop.f32.mrf.mxu1  ;;  %v10788_v27 = vpop.f32.mrf.mxu0  ;;  %21632 = vmatprep.subr.bf16.mxu0 %v29918_v20 }
 0x3d5   : > { %v29932_v29 = vadd.f32 %v21231_v5, %v10879_v32  ;;  %v10877_v48 = vadd.f32 %v10788_v27, %v29738_v38  ;;  %21599 = vmatpush3.bf16.msra.mxu1 %v22263_v2  ;;  %v22253_v2 = vld [vmem:[%s22490_s16 + $0x198] sm:$0xff]  }
 0x3d6   : > { %v11318_v30 = vpop.f32.mrf.mxu1  ;;  %v21186_v25 = vpop.f32.mrf.mxu0  ;;  %21473 = vmatmul.mubr.bf16.gmra.mxu0 %v22242_v11  ;;  %21680 = vmatprep.subr.bf16.mxu1 %v29924_v3 }
 0x3d7   : > { %v29937_v46 = vadd.f32 %v11318_v30, %v10877_v48  ;;  %v10882_v63 = vadd.f32 %v21186_v25, %v29743_v35  ;;  %21476 = vmatprep.mubr.bf16.mxu0 %v22246_v14  ;;  %v22252_v35 = vld [vmem:[%s22490_s16 + $0x18c] sm:$0xff]   ;;  %v22255_v48 = vld [vmem:[%s22490_s16 + $0x1b8] sm:$0xff]  }
 0x3d8   : > { %v21234_v43 = vpop.f32.mrf.mxu1  ;;  %21521 = vmatmul.mubr.bf16.gmra.mxu1 %v22243_v23  ;;  %v10801_v38 = vpop.f32.mrf.mxu0  ;;  %v22254_v23 = vld [vmem:[%s22490_s16 + $0x1ac] sm:$0xff]   ;;  %v22259_v25 = vld [vmem:[%s22490_s16 + $0x1d8] sm:$0xff]  }
 0x3d9   : > { %21524 = vmatprep.mubr.bf16.mxu1 %v22247_v45  ;;  %v29940_v36 = vadd.f32 %v21234_v43, %v10882_v63  ;;  %v10880_v49 = vadd.f32 %v10801_v38, %v29749_v58 }
 0x3da   : > { %v11331_v47 = vpop.f32.mrf.mxu1  ;;  %v21187_v19 = vpop.f32.mrf.mxu0 }
 0x3db   : > { %v29944_v12 = vadd.f32 %v11331_v47, %v10880_v49  ;;  %v10883_v18 = vadd.f32 %v21187_v19, %v29753_v61 }
 0x3dc   : > { %v21235_v0 = vpop.f32.mrf.mxu1  ;;  %v10804_v31 = vpop.f32.mrf.mxu0 }
 0x3dd   : > { %v29950_v10 = vadd.f32 %v21235_v0, %v10883_v18  ;;  %v10881_v41 = vadd.f32 %v10804_v31, %v29762_v56 }
 0x3de   : > { %v11334_v7 = vpop.f32.mrf.mxu1  ;;  %v21190_v42 = vpop.f32.mrf.mxu0  ;;  %21477 = vmatmul.mubr.bf16.gmra.mxu0 %v22248_v37 }
 0x3df   : > { %v29953_v58 = vadd.f32 %v11334_v7, %v10881_v41  ;;  %v10886_v1 = vadd.f32 %v21190_v42, %v29771_v44  ;;  %21480 = vmatprep.mubr.bf16.mxu0 %v22252_v35  ;;  %v22258_v44 = vld [vmem:[%s22490_s16 + $0x1cc] sm:$0xff]   ;;  %v22261_v41 = vld [vmem:[%s22490_s16 + $0x1f8] sm:$0xff]   ;;  %v22264_v7 = vld [vmem:[%s22490_s16 + $0x300] sm:$0xff]  }
 0x3e0   : > { %v21238_v61 = vpop.f32.mrf.mxu1  ;;  %21525 = vmatmul.mubr.bf16.gmra.mxu1 %v22249_v55  ;;  %v10817_v60 = vpop.f32.mrf.mxu0  ;;  %v22260_v55 = vld [vmem:[%s22490_s16 + $0x1ec] sm:$0xff]  }
 0x3e1   : > { %21528 = vmatprep.mubr.bf16.mxu1 %v22253_v2  ;;  %v29956_v11 = vadd.f32 %v21238_v61, %v10886_v1  ;;  %v10884_v32 = vadd.f32 %v10817_v60, %v29774_v57 }
 0x3e2   : > { %v11347_v56 = vpop.f32.mrf.mxu1  ;;  %v21191_v5 = vpop.f32.mrf.mxu0 }
 0x3e3   : > { %v29960_v14 = vadd.f32 %v11347_v56, %v10884_v32  ;;  %v10887_v27 = vadd.f32 %v21191_v5, %v29779_v52  ;;  %v31433_v5 = vld [vmem:[#allocation4_spill] sm:$0xff] }
 0x3e4   : > { %v21239_v45 = vpop.f32.mrf.mxu1  ;;  %v10820_v30 = vpop.f32.mrf.mxu0 }
 0x3e5   : > { %v29966_v63 = vadd.f32 %v21239_v45, %v10887_v27  ;;  %v10885_v43 = vadd.f32 %v10820_v30, %v29784_v59 }
 0x3e6   : > { %v11350_v38 = vpop.f32.mrf.mxu1  ;;  %v21194_v49 = vpop.f32.mrf.mxu0  ;;  %21481 = vmatmul.mubr.bf16.gmra.mxu0 %v22254_v23 }
 0x3e7   : > { %v29969_v57 = vadd.f32 %v11350_v38, %v10885_v43  ;;  %v10890_v47 = vadd.f32 %v21194_v49, %v29789_v62  ;;  %21484 = vmatprep.mubr.bf16.mxu0 %v22258_v44 }
 0x3e8   : > { %v21242_v52 = vpop.f32.mrf.mxu1  ;;  %21529 = vmatmul.mubr.bf16.gmra.mxu1 %v22255_v48  ;;  %v10833_v19 = vpop.f32.mrf.mxu0  ;;  %v22265_v48 = vld [vmem:[%s22490_s16 + $0x320] sm:$0xff]  }
 0x3e9   : > { %21532 = vmatprep.mubr.bf16.mxu1 %v22259_v25  ;;  %v29972_v37 = vadd.f32 %v21242_v52, %v10890_v47  ;;  %v10888_v18 = vadd.f32 %v10833_v19, %v29792_v17  ;;  %v22270_v52 = vld [vmem:[%s30893_s1 + $0x830] sm:$0xff]  }
 0x3ea   : > { %v11363_v0 = vpop.f32.mrf.mxu1  ;;  %v21195_v59 = vpop.f32.mrf.mxu0  ;;  %v22271_v19 = vld [vmem:[%s30893_s1 + $0x870] sm:$0xff]  }
 0x3eb   : > { %v29976_v35 = vadd.f32 %v11363_v0, %v10888_v18  ;;  %v10891_v31 = vadd.f32 %v21195_v59, %v29798_v22  ;;  %v31434_v59 = vld [vmem:[#allocation5_spill] sm:$0xff] }
 0x3ec   : > { %v21243_v2 = vpop.f32.mrf.mxu1  ;;  %v10836_v62 = vpop.f32.mrf.mxu0 }
 0x3ed   : > { %v29981_v42 = vadd.f32 %v21243_v2, %v10891_v31  ;;  %v10889_v1 = vadd.f32 %v10836_v62, %v29801_v50 }
 0x3ee   : > { %v11366_v61 = vpop.f32.mrf.mxu1  ;;  %v21198_v60 = vpop.f32.mrf.mxu0  ;;  %21485 = vmatmul.mubr.bf16.gmra.mxu0 %v22260_v55  ;;  %v22274_v55 = vld [vmem:[%s30893_s1 + $0x828] sm:$0xff]  }
 0x3ef   : > { %v29984_v17 = vadd.f32 %v11366_v61, %v10889_v1  ;;  %v10894_v32 = vadd.f32 %v21198_v60, %v29804_v53  ;;  %21552 = vmatprep.mubr.bf16.mxu0 %v22264_v7  ;;  %v22268_v53 = vld [vmem:[%s22490_s16 + $0x340] sm:$0xff]  }
 0x3f0   : > { %v21246_v56 = vpop.f32.mrf.mxu1  ;;  %21533 = vmatmul.mubr.bf16.gmra.mxu1 %v22261_v41  ;;  %v10849_v22 = vpop.f32.mrf.mxu0  ;;  %v22272_v60 = vld [vmem:[%s22490_s16 + $0x380] sm:$0xff]  }
 0x3f1   : > { %21600 = vmatprep.mubr.bf16.mxu1 %v31433_v5  ;;  %v29988_v23 = vadd.f32 %v21246_v56, %v10894_v32  ;;  %v10892_v27 = vadd.f32 %v10849_v22, %v29808_v4  ;;  %v22278_v5 = vld [vmem:[%s30893_s1 + $0x820] sm:$0xff]  }
 0x3f2   : > { %v11379_v45 = vpop.f32.mrf.mxu1  ;;  %v21199_v50 = vpop.f32.mrf.mxu0 }
 0x3f3   : > { %v29992_v44 = vadd.f32 %v11379_v45, %v10892_v27  ;;  %v10895_v30 = vadd.f32 %v21199_v50, %v29813_v24 }
 0x3f4   : > { %v21247_v25 = vpop.f32.mrf.mxu1  ;;  %v10852_v43 = vpop.f32.mrf.mxu0 }
 0x3f5   : > { %v29996_v38 = vadd.f32 %v21247_v25, %v10895_v30  ;;  %v10893_v49 = vadd.f32 %v10852_v43, %v29823_v16  ;;  %v31436_v30 = vld [vmem:[#allocation7_spill] sm:$0xff]  ;;  %v31437_v25 = vld [vmem:[#allocation8_spill] sm:$0xff] }
 0x3f6   : > { %v11382_v47 = vpop.f32.mrf.mxu1  ;;  %v21266_v4 = vpop.f32.mrf.mxu0  ;;  %21553 = vmatmul.mubr.bf16.vlgmr.msra.gmra.mxu0 %v22265_v48 }
 0x3f7   : > { %v30005_v18 = vadd.f32 %v11382_v47, %v10893_v49  ;;  %v11927_v24 = vadd.f32 %v21266_v4, %v29831_v34  ;;  %21633 = vmatpush3.bf16.msra.mxu0 %v29918_v20  ;;  %21556 = vmatprep.mubr.bf16.mxu0 %v22268_v53  ;;  %v31435_v34 = vld [vmem:[#allocation6_spill] sm:$0xff]  ;;  %v22275_v20 = vld [vmem:[%s30893_s1 + $0x868] sm:$0xff]   ;;  %v22283_v4 = vld [vmem:[%s30893_s1 + $0x858] sm:$0xff]  }
 0x3f8   : > { %v21314_v0 = vpop.f32.mrf.mxu1  ;;  %21601 = vmatmul.mubr.bf16.vlgmr.msra.gmra.mxu1 %v31434_v59  ;;  %v11798_v16 = vpop.f32.mrf.mxu0  ;;  %21634 = vmatprep.subr.bf16.mxu0 %v22270_v52 }
 0x3f9   : > { %21681 = vmatpush3.bf16.msra.mxu1 %v29924_v3  ;;  %v30014_v31 = vadd.f32 %v21314_v0, %v11927_v24  ;;  %v11925_v2 = vadd.f32 %v11798_v16, %v29838_v40  ;;  %21604 = vmatprep.mubr.bf16.mxu1 %v31435_v34  ;;  %v22269_v3 = vld [vmem:[%s22490_s16 + $0x360] sm:$0xff]  }
 0x3fa   : > { %v12184_v41 = vpop.f32.mrf.mxu1  ;;  %v21267_v7 = vpop.f32.mrf.mxu0  ;;  %21682 = vmatprep.subr.bf16.mxu1 %v22271_v19 }
 0x3fb   : > { %v30022_v62 = vadd.f32 %v12184_v41, %v11925_v2  ;;  %v11928_v1 = vadd.f32 %v21267_v7, %v29844_v13  ;;  %21635 = vmatpush3.bf16.msra.mxu0 %v22270_v52  ;;  %v22279_v13 = vld [vmem:[%s30893_s1 + $0x860] sm:$0xff]   ;;  %v22286_v41 = vld [vmem:[%s30893_s1 + $0x810] sm:$0xff]  }
 0x3fc   : > { %v21315_v61 = vpop.f32.mrf.mxu1  ;;  %v11801_v32 = vpop.f32.mrf.mxu0  ;;  %21636 = vmatprep.subr.bf16.mxu0 %v22274_v55  ;;  %v22273_v52 = vld [vmem:[%s22490_s16 + $0x3a0] sm:$0xff]  }
 0x3fd   : > { %21683 = vmatpush3.bf16.msra.mxu1 %v22271_v19  ;;  %v30026_v40 = vadd.f32 %v21315_v61, %v11928_v1  ;;  %v11926_v56 = vadd.f32 %v11801_v32, %v29853_v6  ;;  %v31439_v61 = vld [vmem:[#allocation10_spill] sm:$0xff] }
 0x3fe   : > { %v12187_v22 = vpop.f32.mrf.mxu1  ;;  %21684 = vmatprep.subr.bf16.mxu1 %v22275_v20  ;;  %v21270_v27 = vpop.f32.mrf.mxu0  ;;  %21557 = vmatmul.mubr.bf16.gmra.mxu0 %v22269_v3  ;;  %v31438_v3 = vld [vmem:[#allocation9_spill] sm:$0xff] }
 0x3ff   : > { %v30035_v45 = vadd.f32 %v12187_v22, %v11926_v56  ;;  %v11931_v50 = vadd.f32 %v21270_v27, %v29856_v51  ;;  %21560 = vmatprep.mubr.bf16.mxu0 %v22272_v60  ;;  %21637 = vmatpush3.bf16.msra.mxu0 %v22274_v55  ;;  %v22282_v51 = vld [vmem:[%s30893_s1 + $0x818] sm:$0xff]   ;;  %v22291_v27 = vld [vmem:[%s30893_s1 + $0x848] sm:$0xff]  }
 0x400   : > { %v21318_v48 = vpop.f32.mrf.mxu1  ;;  %21605 = vmatmul.mubr.bf16.gmra.mxu1 %v31436_v30  ;;  %v11814_v6 = vpop.f32.mrf.mxu0  ;;  %21638 = vmatprep.subr.bf16.mxu0 %v22278_v5 }
 0x401   : > { %21608 = vmatprep.mubr.bf16.mxu1 %v31437_v25  ;;  %v30040_v43 = vadd.f32 %v21318_v48, %v11931_v50  ;;  %v11929_v53 = vadd.f32 %v11814_v6, %v29866_v9  ;;  %21685 = vmatpush3.bf16.msra.mxu1 %v22275_v20  ;;  %v22276_v9 = vld [vmem:[%s22490_s16 + $0x3c0] sm:$0xff]  }
 0x402   : > { %v12200_v49 = vpop.f32.mrf.mxu1  ;;  %v21271_v47 = vpop.f32.mrf.mxu0  ;;  %21686 = vmatprep.subr.bf16.mxu1 %v22279_v13 }
 0x403   : > { %v30050_v19 = vadd.f32 %v12200_v49, %v11929_v53  ;;  %v11932_v24 = vadd.f32 %v21271_v47, %v29872_v28  ;;  %21639 = vmatpush3.bf16.msra.mxu0 %v22278_v5  ;;  %v22287_v28 = vld [vmem:[%s30893_s1 + $0x850] sm:$0xff]   ;;  %v22277_v5 = vld [vmem:[%s22490_s16 + $0x3e0] sm:$0xff]  }
 0x404   : > { %v21319_v0 = vpop.f32.mrf.mxu1  ;;  %v11817_v59 = vpop.f32.mrf.mxu0  ;;  %21640 = vmatprep.subr.bf16.mxu0 %v22282_v51  ;;  %v22294_v49 = vld [vmem:[%s30893_s1 + $0x800] sm:$0xff]  }
 0x405   : > { %v30054_v16 = vadd.f32 %v21319_v0, %v11932_v24  ;;  %v11930_v55 = vadd.f32 %v11817_v59, %v29881_v39  ;;  %21687 = vmatpush3.bf16.msra.mxu1 %v22279_v13  ;;  %v31441_v0 = vld [vmem:[#allocation12_spill] sm:$0xff] }
 0x406   : > { %v12203_v2 = vpop.f32.mrf.mxu1  ;;  %v21274_v34 = vpop.f32.mrf.mxu0  ;;  %21561 = vmatmul.mubr.bf16.gmra.mxu0 %v22273_v52  ;;  %21688 = vmatprep.subr.bf16.mxu1 %v22283_v4 }
 0x407   : > { %v30063_v20 = vadd.f32 %v12203_v2, %v11930_v55  ;;  %v11935_v7 = vadd.f32 %v21274_v34, %v29884_v15  ;;  %21564 = vmatprep.mubr.bf16.mxu0 %v22276_v9  ;;  %21641 = vmatpush3.bf16.msra.mxu0 %v22282_v51  ;;  %v22290_v15 = vld [vmem:[%s30893_s1 + $0x808] sm:$0xff]   ;;  %v30108_v34 = vld [vmem:[%s30893_s1 + $0x8f8] sm:$0xff]  }
 0x408   : > { %v21322_v39 = vpop.f32.mrf.mxu1  ;;  %21609 = vmatmul.mubr.bf16.gmra.mxu1 %v31438_v3  ;;  %v11830_v1 = vpop.f32.mrf.mxu0  ;;  %21642 = vmatprep.subr.bf16.mxu0 %v22286_v41 }
 0x409   : > { %21612 = vmatprep.mubr.bf16.mxu1 %v31439_v61  ;;  %v30068_v60 = vadd.f32 %v21322_v39, %v11935_v7  ;;  %v11933_v32 = vadd.f32 %v11830_v1, %v29894_v33  ;;  %21689 = vmatpush3.bf16.msra.mxu1 %v22283_v4  ;;  %v22280_v33 = vld [vmem:[%s22490_s16 + $0x400] sm:$0xff]   ;;  %v31440_v4 = vld [vmem:[#allocation11_spill] sm:$0xff] }
 0x40a   : > { %v12216_v56 = vpop.f32.mrf.mxu1  ;;  %v21275_v22 = vpop.f32.mrf.mxu0  ;;  %21690 = vmatprep.subr.bf16.mxu1 %v22287_v28  ;;  %v22284_v39 = vld [vmem:[%s22490_s16 + $0x440] sm:$0xff]  }
 0x40b   : > { %v30078_v13 = vadd.f32 %v12216_v56, %v11933_v32  ;;  %v11936_v50 = vadd.f32 %v21275_v22, %v29900_v54  ;;  %21643 = vmatpush3.bf16.msra.mxu0 %v22286_v41  ;;  %v22295_v54 = vld [vmem:[%s30893_s1 + $0x840] sm:$0xff]  }
 0x40c   : > { %v21323_v48 = vpop.f32.mrf.mxu1  ;;  %v11833_v30 = vpop.f32.mrf.mxu0  ;;  %21644 = vmatprep.subr.bf16.mxu0 %v22290_v15  ;;  %v22281_v41 = vld [vmem:[%s22490_s16 + $0x420] sm:$0xff]  }
 0x40d   : > { %v30082_v6 = vadd.f32 %v21323_v48, %v11936_v50  ;;  %v11934_v25 = vadd.f32 %v11833_v30, %v29909_v8  ;;  %21691 = vmatpush3.bf16.msra.mxu1 %v22287_v28 }
 0x40e   : > { %v12219_v53 = vpop.f32.mrf.mxu1  ;;  %v21278_v51 = vpop.f32.mrf.mxu0  ;;  %21565 = vmatmul.mubr.bf16.gmra.mxu0 %v22277_v5  ;;  %21692 = vmatprep.subr.bf16.mxu1 %v22291_v27  ;;  %v31442_v5 = vld [vmem:[#allocation13_spill] sm:$0xff] }
 0x40f   : > { %v30091_v47 = vadd.f32 %v12219_v53, %v11934_v25  ;;  %v11939_v52 = vadd.f32 %v21278_v51, %v29912_v21  ;;  %21568 = vmatprep.mubr.bf16.mxu0 %v22280_v33  ;;  %21645 = vmatpush3.bf16.msra.mxu0 %v22290_v15  ;;  %v30102_v21 = vld [vmem:[%s30893_s1 + $0x8b8] sm:$0xff]   ;;  %v22285_v25 = vld [vmem:[%s22490_s16 + $0x460] sm:$0xff]  }
 0x410   : > { %v21326_v8 = vpop.f32.mrf.mxu1  ;;  %21613 = vmatmul.mubr.bf16.gmra.mxu1 %v31440_v4  ;;  %v11846_v24 = vpop.f32.mrf.mxu0  ;;  %21646 = vmatprep.subr.bf16.mxu0 %v22294_v49 }
 0x411   : > { %21616 = vmatprep.mubr.bf16.mxu1 %v31441_v0  ;;  %v30096_v9 = vadd.f32 %v21326_v8, %v11939_v52  ;;  %v11937_v59 = vadd.f32 %v11846_v24, %v29926_v26  ;;  %21693 = vmatpush3.bf16.msra.mxu1 %v22291_v27 }
 0x412   : > { %v12232_v55 = vpop.f32.mrf.mxu1  ;;  %v21279_v2 = vpop.f32.mrf.mxu0  ;;  %21694 = vmatprep.subr.bf16.mxu1 %v22295_v54 }
 0x413   : > { %v30110_v28 = vadd.f32 %v12232_v55, %v11937_v59  ;;  %v11940_v26 = vadd.f32 %v21279_v2, %v29932_v29  ;;  %21647 = vmatpush3.bf16.msra.mxu0 %v22294_v49  ;;  %v31444_v55 = vld [vmem:[#allocation15_spill] sm:$0xff]  ;;  %v31445_v2 = vld [vmem:[#allocation16_spill] sm:$0xff] }
 0x414   : > { %v21327_v7 = vpop.f32.mrf.mxu1  ;;  %v11849_v3 = vpop.f32.mrf.mxu0  ;;  %21728 = vmatprep.subr.bf16.mxu0 %v30102_v21 }
 0x415   : > { %v30114_v1 = vadd.f32 %v21327_v7, %v11940_v26  ;;  %v11938_v61 = vadd.f32 %v11849_v3, %v29937_v46  ;;  %21695 = vmatpush3.bf16.msra.mxu1 %v22295_v54  ;;  %v31443_v46 = vld [vmem:[#allocation14_spill] sm:$0xff] }
 0x416   : > { %v12235_v32 = vpop.f32.mrf.mxu1  ;;  %v21282_v56 = vpop.f32.mrf.mxu0  ;;  %21569 = vmatmul.mubr.bf16.gmra.mxu0 %v22281_v41  ;;  %21776 = vmatprep.subr.bf16.mxu1 %v30108_v34 }
 0x417   : > { %v30119_v15 = vadd.f32 %v12235_v32, %v11938_v61  ;;  %v11943_v29 = vadd.f32 %v21282_v56, %v29940_v36  ;;  %21572 = vmatprep.mubr.bf16.mxu0 %v22284_v39  ;;  %v22288_v36 = vld [vmem:[%s22490_s16 + $0x480] sm:$0xff]  }
 0x418   : > { %v21330_v22 = vpop.f32.mrf.mxu1  ;;  %21617 = vmatmul.mubr.bf16.gmra.mxu1 %v31442_v5  ;;  %v11862_v27 = vpop.f32.mrf.mxu0  ;;  %v22289_v39 = vld [vmem:[%s22490_s16 + $0x4a0] sm:$0xff]  }
 0x419   : > { %21620 = vmatprep.mubr.bf16.mxu1 %v31443_v46  ;;  %v30124_v50 = vadd.f32 %v21330_v22, %v11943_v29  ;;  %v11941_v48 = vadd.f32 %v11862_v27, %v29944_v12  ;;  %v22292_v32 = vld [vmem:[%s22490_s16 + $0x4c0] sm:$0xff]  }
 0x41a   : > { %v12248_v33 = vpop.f32.mrf.mxu1  ;;  %v21283_v30 = vpop.f32.mrf.mxu0 }
 0x41b   : > { %v30128_v53 = vadd.f32 %v12248_v33, %v11941_v48  ;;  %v11944_v49 = vadd.f32 %v21283_v30, %v29950_v10  ;;  %v31446_v33 = vld [vmem:[#allocation17_spill] sm:$0xff]  ;;  %v31447_v30 = vld [vmem:[#allocation18_spill] sm:$0xff] }
 0x41c   : > { %v21331_v51 = vpop.f32.mrf.mxu1  ;;  %v11865_v54 = vpop.f32.mrf.mxu0 }
 0x41d   : > { %v30132_v52 = vadd.f32 %v21331_v51, %v11944_v49  ;;  %v11942_v8 = vadd.f32 %v11865_v54, %v29953_v58  ;;  %v22293_v54 = vld [vmem:[%s22490_s16 + $0x4e0] sm:$0xff]  }
 0x41e   : > { %v12251_v4 = vpop.f32.mrf.mxu1  ;;  %v21286_v24 = vpop.f32.mrf.mxu0  ;;  %21573 = vmatmul.mubr.bf16.gmra.mxu0 %v22285_v25  ;;  %v18956_v25 = vld [vmem:[%s22490_s16 + $0x31c] sm:$0xf] }
 0x41f   : > { %v30135_v12 = vadd.f32 %v12251_v4, %v11942_v8  ;;  %v11947_v0 = vadd.f32 %v21286_v24, %v29956_v11  ;;  %21576 = vmatprep.mubr.bf16.mxu0 %v22288_v36  ;;  %v22376_v24 = vld [vmem:[%s22490_s16 + $0x318] sm:$0xf] }
 0x420   : > { %v21334_v59 = vpop.f32.mrf.mxu1  ;;  %21621 = vmatmul.mubr.bf16.gmra.mxu1 %v31444_v55  ;;  %v11878_v10 = vpop.f32.mrf.mxu0  ;;  %v22297_v55 = vld [vmem:[%s22490_s16 + $0x600] sm:$0xff]  }
 0x421   : > { %21624 = vmatprep.mubr.bf16.mxu1 %v31445_v2  ;;  %v30140_v41 = vadd.f32 %v21334_v59, %v11947_v0  ;;  %v11945_v26 = vadd.f32 %v11878_v10, %v29960_v14  ;;  %v18988_v0 = vcombine.low %v22376_v24, %v18956_v25  ;;  %v22378_v25 = vld [vmem:[%s22490_s16 + $0x358] sm:$0xf] }
 0x422   : > { %v12264_v58 = vpop.f32.mrf.mxu1  ;;  %v21287_v7 = vpop.f32.mrf.mxu0 }
 0x423   : > { %v30144_v3 = vadd.f32 %v12264_v58, %v11945_v26  ;;  %v11948_v61 = vadd.f32 %v21287_v7, %v29966_v63 }
 0x424   : > { %v21335_v11 = vpop.f32.mrf.mxu1  ;;  %v11881_v56 = vpop.f32.mrf.mxu0 }
 0x425   : > { %v30148_v29 = vadd.f32 %v21335_v11, %v11948_v61  ;;  %v11946_v22 = vadd.f32 %v11881_v56, %v29969_v57  ;;  %v18957_v61 = vld [vmem:[%s22490_s16 + $0x33c] sm:$0xf] }
 0x426   : > { %v12267_v5 = vpop.f32.mrf.mxu1  ;;  %v21290_v27 = vpop.f32.mrf.mxu0  ;;  %21577 = vmatmul.mubr.bf16.gmra.mxu0 %v22289_v39  ;;  %v31448_v39 = vld [vmem:[#allocation19_spill] sm:$0xff] }
 0x427   : > { %v30151_v14 = vadd.f32 %v12267_v5, %v11946_v22  ;;  %v11951_v46 = vadd.f32 %v21290_v27, %v29972_v37  ;;  %21580 = vmatprep.mubr.bf16.mxu0 %v22292_v32  ;;  %v18958_v22 = vld [vmem:[%s22490_s16 + $0x35c] sm:$0xf]  ;;  %v22377_v27 = vld [vmem:[%s22490_s16 + $0x338] sm:$0xf] }
 0x428   : > { %v21338_v48 = vpop.f32.mrf.mxu1  ;;  %21625 = vmatmul.mubr.bf16.gmra.mxu1 %v31446_v33  ;;  %v11894_v63 = vpop.f32.mrf.mxu0 }
 0x429   : > { %21628 = vmatprep.mubr.bf16.mxu1 %v31447_v30  ;;  %v30157_v49 = vadd.f32 %v21338_v48, %v11951_v46  ;;  %v11949_v57 = vadd.f32 %v11894_v63, %v29976_v35  ;;  %v18989_v46 = vcombine.low %v22377_v27, %v18957_v61  ;;  %v22299_v63 = vld [vmem:[%s22490_s16 + $0x620] sm:$0xff]  }
 0x42a   : > { %v12280_v51 = vpop.f32.mrf.mxu1  ;;  %v21291_v36 = vpop.f32.mrf.mxu0  ;;  %v22309_v27 = vld [vmem:[%s22490_s16 + $0x680] sm:$0xff]  }
 0x42b   : > { %v30161_v8 = vadd.f32 %v12280_v51, %v11949_v57  ;;  %v11952_v37 = vadd.f32 %v21291_v36, %v29981_v42  ;;  %v18990_v57 = vcombine.low %v22378_v25, %v18958_v22 }
 0x42c   : > { %v21339_v4 = vpop.f32.mrf.mxu1  ;;  %v11897_v59 = vpop.f32.mrf.mxu0 }
 0x42d   : > { %v30166_v10 = vadd.f32 %v21339_v4, %v11952_v37  ;;  %v11950_v2 = vadd.f32 %v11897_v59, %v29984_v17  ;;  %v22306_v37 = vld [vmem:[%s30893_s1 + $0x8b0] sm:$0xff]  }
 0x42e   : > { %v12283_v26 = vpop.f32.mrf.mxu1  ;;  %v21294_v35 = vpop.f32.mrf.mxu0  ;;  %21581 = vmatmul.mubr.bf16.gmra.mxu0 %v22293_v54  ;;  %v22303_v54 = vld [vmem:[%s22490_s16 + $0x640] sm:$0xff]  }
 0x42f   : > { %v30169_v58 = vadd.f32 %v12283_v26, %v11950_v2  ;;  %v11955_v7 = vadd.f32 %v21294_v35, %v29988_v23  ;;  %21648 = vmatprep.mubr.bf16.mxu0 %v18988_v0  ;;  %v18960_v2 = vld [vmem:[%s22490_s16 + $0x39c] sm:$0xf]  ;;  %v22312_v26 = vld [vmem:[%s30893_s1 + $0x8a8] sm:$0xff]  }
 0x430   : > { %v21342_v42 = vpop.f32.mrf.mxu1  ;;  %21629 = vmatmul.mubr.bf16.gmra.mxu1 %v31448_v39  ;;  %v11910_v11 = vpop.f32.mrf.mxu0 }
 0x431   : > { %21696 = vmatprep.mubr.bf16.mxu1 %v22297_v55  ;;  %v30174_v32 = vadd.f32 %v21342_v42, %v11955_v7  ;;  %v11953_v17 = vadd.f32 %v11910_v11, %v29992_v44  ;;  %v22379_v42 = vld [vmem:[%s22490_s16 + $0x378] sm:$0xf] }
 0x432   : > { %v12296_v56 = vpop.f32.mrf.mxu1  ;;  %v21295_v5 = vpop.f32.mrf.mxu0 }
 0x433   : > { %v30179_v23 = vadd.f32 %v12296_v56, %v11953_v17  ;;  %v11956_v48 = vadd.f32 %v21295_v5, %v29996_v38  ;;  %v22307_v38 = vld [vmem:[%s30893_s1 + $0x8f0] sm:$0xff]   ;;  %v22305_v56 = vld [vmem:[%s22490_s16 + $0x660] sm:$0xff]  }
 0x434   : > { %v21343_v33 = vpop.f32.mrf.mxu1  ;;  %v11913_v30 = vpop.f32.mrf.mxu0 }
 0x435   : > { %v30184_v51 = vadd.f32 %v21343_v33, %v11956_v48  ;;  %v11954_v44 = vadd.f32 %v11913_v30, %v30005_v18  ;;  %v18959_v18 = vld [vmem:[%s22490_s16 + $0x37c] sm:$0xf]  ;;  %v22319_v30 = vld [vmem:[%s30893_s1 + $0x8e0] sm:$0xff]  }
 0x436   : > { %v12299_v36 = vpop.f32.mrf.mxu1  ;;  %v21362_v4 = vpop.f32.mrf.mxu0  ;;  %21649 = vmatmul.mubr.bf16.vlgmr.msra.gmra.mxu0 %v18989_v46  ;;  %v18991_v39 = vcombine.low %v22379_v42, %v18959_v18  ;;  %v22315_v42 = vld [vmem:[%s22490_s16 + $0x6c0] sm:$0xff]  }
 0x437   : > { %v30194_v24 = vadd.f32 %v12299_v36, %v11954_v44  ;;  %v12843_v0 = vadd.f32 %v21362_v4, %v30014_v31  ;;  %21729 = vmatpush3.bf16.msra.mxu0 %v30102_v21  ;;  %21652 = vmatprep.mubr.bf16.mxu0 %v18990_v57  ;;  %v22313_v21 = vld [vmem:[%s30893_s1 + $0x8e8] sm:$0xff]  }
 0x438   : > { %v21410_v59 = vpop.f32.mrf.mxu1  ;;  %21697 = vmatmul.mubr.bf16.vlgmr.msra.gmra.mxu1 %v22299_v63  ;;  %v12714_v55 = vpop.f32.mrf.mxu0  ;;  %21730 = vmatprep.subr.bf16.mxu0 %v22306_v37 }
 0x439   : > { %21777 = vmatpush3.bf16.msra.mxu1 %v30108_v34  ;;  %v30204_v35 = vadd.f32 %v21410_v59, %v12843_v0  ;;  %v12841_v31 = vadd.f32 %v12714_v55, %v30022_v62  ;;  %21700 = vmatprep.mubr.bf16.mxu1 %v22303_v54  ;;  %v22380_v62 = vld [vmem:[%s22490_s16 + $0x398] sm:$0xf]  ;;  %v18962_v54 = vld [vmem:[%s22490_s16 + $0x3dc] sm:$0xf] }
 0x43a   : > { %v13100_v7 = vpop.f32.mrf.mxu1  ;;  %v21363_v34 = vpop.f32.mrf.mxu0  ;;  %21778 = vmatprep.subr.bf16.mxu1 %v22307_v38  ;;  %v18992_v22 = vcombine.low %v22380_v62, %v18960_v2  ;;  %v22381_v59 = vld [vmem:[%s22490_s16 + $0x3b8] sm:$0xf]  ;;  %v22331_v62 = vld [vmem:[%s30893_s1 + $0x8d0] sm:$0xff]  }
 0x43b   : > { %v30211_v61 = vadd.f32 %v13100_v7, %v12841_v31  ;;  %v12844_v11 = vadd.f32 %v21363_v34, %v30026_v40  ;;  %21731 = vmatpush3.bf16.msra.mxu0 %v22306_v37  ;;  %v22318_v40 = vld [vmem:[%s30893_s1 + $0x8a0] sm:$0xff]   ;;  %v22325_v55 = vld [vmem:[%s30893_s1 + $0x8d8] sm:$0xff]  }
 0x43c   : > { %v21411_v17 = vpop.f32.mrf.mxu1  ;;  %v12717_v5 = vpop.f32.mrf.mxu0  ;;  %21732 = vmatprep.subr.bf16.mxu0 %v22312_v26  ;;  %v22311_v31 = vld [vmem:[%s22490_s16 + $0x6a0] sm:$0xff]   ;;  %v22382_v7 = vld [vmem:[%s22490_s16 + $0x3d8] sm:$0xf] }
 0x43d   : > { %21779 = vmatpush3.bf16.msra.mxu1 %v22307_v38  ;;  %v30217_v46 = vadd.f32 %v21411_v17, %v12844_v11  ;;  %v12842_v48 = vadd.f32 %v12717_v5, %v30035_v45  ;;  %v18961_v45 = vld [vmem:[%s22490_s16 + $0x3bc] sm:$0xf] }
 0x43e   : > { %v13103_v33 = vpop.f32.mrf.mxu1  ;;  %21780 = vmatprep.subr.bf16.mxu1 %v22313_v21  ;;  %v21366_v63 = vpop.f32.mrf.mxu0  ;;  %21653 = vmatmul.mubr.bf16.gmra.mxu0 %v18991_v39  ;;  %v18993_v18 = vcombine.low %v22381_v59, %v18961_v45 }
 0x43f   : > { %v30226_v25 = vadd.f32 %v13103_v33, %v12842_v48  ;;  %v12847_v57 = vadd.f32 %v21366_v63, %v30040_v43  ;;  %21656 = vmatprep.mubr.bf16.mxu0 %v18992_v22  ;;  %21733 = vmatpush3.bf16.msra.mxu0 %v22312_v26  ;;  %v22324_v43 = vld [vmem:[%s30893_s1 + $0x898] sm:$0xff]  }
 0x440   : > { %v21414_v44 = vpop.f32.mrf.mxu1  ;;  %21701 = vmatmul.mubr.bf16.gmra.mxu1 %v22305_v56  ;;  %v12730_v36 = vpop.f32.mrf.mxu0  ;;  %21734 = vmatprep.subr.bf16.mxu0 %v22318_v40  ;;  %v18964_v33 = vld [vmem:[%s22490_s16 + $0x41c] sm:$0xf] }
 0x441   : > { %21704 = vmatprep.mubr.bf16.mxu1 %v22309_v27  ;;  %v30231_v37 = vadd.f32 %v21414_v44, %v12847_v57  ;;  %v12845_v4 = vadd.f32 %v12730_v36, %v30050_v19  ;;  %21781 = vmatpush3.bf16.msra.mxu1 %v22313_v21  ;;  %v18994_v21 = vcombine.low %v22382_v7, %v18962_v54  ;;  %v18963_v27 = vld [vmem:[%s22490_s16 + $0x3fc] sm:$0xf]  ;;  %v22383_v44 = vld [vmem:[%s22490_s16 + $0x3f8] sm:$0xf]  ;;  %v22337_v36 = vld [vmem:[%s30893_s1 + $0x8c8] sm:$0xff]  }
 0x442   : > { %v13116_v38 = vpop.f32.mrf.mxu1  ;;  %v21367_v0 = vpop.f32.mrf.mxu0  ;;  %21782 = vmatprep.subr.bf16.mxu1 %v22319_v30  ;;  %v18995_v45 = vcombine.low %v22383_v44, %v18963_v27  ;;  %v22343_v7 = vld [vmem:[%s30893_s1 + $0x8c0] sm:$0xff]  }
 0x443   : > { %v30241_v2 = vadd.f32 %v13116_v38, %v12845_v4  ;;  %v12848_v19 = vadd.f32 %v21367_v0, %v30054_v16  ;;  %21735 = vmatpush3.bf16.msra.mxu0 %v22318_v40  ;;  %v22330_v16 = vld [vmem:[%s30893_s1 + $0x890] sm:$0xff]   ;;  %v22317_v38 = vld [vmem:[%s22490_s16 + $0x6e0] sm:$0xff]  }
 0x444   : > { %v21415_v26 = vpop.f32.mrf.mxu1  ;;  %v12733_v34 = vpop.f32.mrf.mxu0  ;;  %21736 = vmatprep.subr.bf16.mxu0 %v22324_v43  ;;  %v22327_v44 = vld [vmem:[%s22490_s16 + $0x740] sm:$0xff]  }
 0x445   : > { %v30247_v39 = vadd.f32 %v21415_v26, %v12848_v19  ;;  %v12846_v11 = vadd.f32 %v12733_v34, %v30063_v20  ;;  %21783 = vmatpush3.bf16.msra.mxu1 %v22319_v30 }
 0x446   : > { %v13119_v17 = vpop.f32.mrf.mxu1  ;;  %v21370_v56 = vpop.f32.mrf.mxu0  ;;  %21657 = vmatmul.mubr.bf16.gmra.mxu0 %v18993_v18  ;;  %21784 = vmatprep.subr.bf16.mxu1 %v22325_v55  ;;  %v22321_v18 = vld [vmem:[%s22490_s16 + $0x700] sm:$0xff]  }
 0x447   : > { %v30256_v22 = vadd.f32 %v13119_v17, %v12846_v11  ;;  %v12851_v5 = vadd.f32 %v21370_v56, %v30068_v60  ;;  %21660 = vmatprep.mubr.bf16.mxu0 %v18994_v21  ;;  %21737 = vmatpush3.bf16.msra.mxu0 %v22324_v43  ;;  %v22336_v60 = vld [vmem:[%s30893_s1 + $0x888] sm:$0xff]   ;;  %v22384_v43 = vld [vmem:[%s22490_s16 + $0x418] sm:$0xf]  ;;  %v18966_v17 = vld [vmem:[%s22490_s16 + $0x45c] sm:$0xf] }
 0x448   : > { %v21418_v20 = vpop.f32.mrf.mxu1  ;;  %21705 = vmatmul.mubr.bf16.gmra.mxu1 %v22311_v31  ;;  %v12746_v48 = vpop.f32.mrf.mxu0  ;;  %21738 = vmatprep.subr.bf16.mxu0 %v22330_v16  ;;  %v18996_v0 = vcombine.low %v22384_v43, %v18964_v33  ;;  %v18967_v43 = vld [vmem:[%s22490_s16 + $0x47c] sm:$0xf] }
 0x449   : > { %21708 = vmatprep.mubr.bf16.mxu1 %v22315_v42  ;;  %v30261_v40 = vadd.f32 %v21418_v20, %v12851_v5  ;;  %v12849_v63 = vadd.f32 %v12746_v48, %v30078_v13  ;;  %21785 = vmatpush3.bf16.msra.mxu1 %v22325_v55  ;;  %v18965_v42 = vld [vmem:[%s22490_s16 + $0x43c] sm:$0xf] }
 0x44a   : > { %v13132_v30 = vpop.f32.mrf.mxu1  ;;  %v21371_v57 = vpop.f32.mrf.mxu0  ;;  %21786 = vmatprep.subr.bf16.mxu1 %v22331_v62 }
 0x44b   : > { %v30271_v54 = vadd.f32 %v13132_v30, %v12849_v63  ;;  %v12852_v13 = vadd.f32 %v21371_v57, %v30082_v6  ;;  %21739 = vmatpush3.bf16.msra.mxu0 %v22330_v16  ;;  %v22342_v6 = vld [vmem:[%s30893_s1 + $0x880] sm:$0xff]   ;;  %v22386_v30 = vld [vmem:[%s22490_s16 + $0x458] sm:$0xf] }
 0x44c   : > { %v21419_v4 = vpop.f32.mrf.mxu1  ;;  %v12749_v59 = vpop.f32.mrf.mxu0  ;;  %21740 = vmatprep.subr.bf16.mxu0 %v22336_v60  ;;  %v22323_v63 = vld [vmem:[%s22490_s16 + $0x720] sm:$0xff]  }
 0x44d   : > { %v30277_v55 = vadd.f32 %v21419_v4, %v12852_v13  ;;  %v12850_v19 = vadd.f32 %v12749_v59, %v30091_v47  ;;  %21787 = vmatpush3.bf16.msra.mxu1 %v22331_v62  ;;  %v18968_v59 = vld [vmem:[%s22490_s16 + $0x49c] sm:$0xf] }
 0x44e   : > { %v13135_v26 = vpop.f32.mrf.mxu1  ;;  %v21374_v31 = vpop.f32.mrf.mxu0  ;;  %21661 = vmatmul.mubr.bf16.gmra.mxu0 %v18995_v45  ;;  %21788 = vmatprep.subr.bf16.mxu1 %v22337_v36 }
 0x44f   : > { %v30286_v21 = vadd.f32 %v13135_v26, %v12850_v19  ;;  %v12855_v47 = vadd.f32 %v21374_v31, %v30096_v9  ;;  %21664 = vmatprep.mubr.bf16.mxu0 %v18996_v0  ;;  %21741 = vmatpush3.bf16.msra.mxu0 %v22336_v60  ;;  %v22385_v9 = vld [vmem:[%s22490_s16 + $0x438] sm:$0xf]  ;;  %v18998_v60 = vcombine.low %v22386_v30, %v18966_v17  ;;  %v18970_v30 = vld [vmem:[%s22490_s16 + $0x4dc] sm:$0xf] }
 0x450   : > { %v21422_v34 = vpop.f32.mrf.mxu1  ;;  %21709 = vmatmul.mubr.bf16.gmra.mxu1 %v22317_v38  ;;  %v12762_v11 = vpop.f32.mrf.mxu0  ;;  %21742 = vmatprep.subr.bf16.mxu0 %v22342_v6  ;;  %v18997_v20 = vcombine.low %v22385_v9, %v18965_v42  ;;  %v22388_v42 = vld [vmem:[%s22490_s16 + $0x498] sm:$0xf] }
 0x451   : > { %21712 = vmatprep.mubr.bf16.mxu1 %v22321_v18  ;;  %v30291_v16 = vadd.f32 %v21422_v34, %v12855_v47  ;;  %v12853_v56 = vadd.f32 %v12762_v11, %v30110_v28  ;;  %21789 = vmatpush3.bf16.msra.mxu1 %v22337_v36  ;;  %v22329_v34 = vld [vmem:[%s22490_s16 + $0x760] sm:$0xff]   ;;  %v19000_v11 = vcombine.low %v22388_v42, %v18968_v59 }
 0x452   : > { %v13148_v62 = vpop.f32.mrf.mxu1  ;;  %v21375_v5 = vpop.f32.mrf.mxu0  ;;  %21790 = vmatprep.subr.bf16.mxu1 %v22343_v7 }
 0x453   : > { %v30295_v27 = vadd.f32 %v13148_v62, %v12853_v56  ;;  %v12856_v48 = vadd.f32 %v21375_v5, %v30114_v1  ;;  %21743 = vmatpush3.bf16.msra.mxu0 %v22342_v6  ;;  %v22387_v6 = vld [vmem:[%s22490_s16 + $0x478] sm:$0xf]  ;;  %v22333_v56 = vld [vmem:[%s22490_s16 + $0x780] sm:$0xff]  }
 0x454   : > { %v21423_v33 = vpop.f32.mrf.mxu1  ;;  %v12765_v57 = vpop.f32.mrf.mxu0  ;;  %v18999_v31 = vcombine.low %v22387_v6, %v18967_v43  ;;  %v22390_v43 = vld [vmem:[%s22490_s16 + $0x4d8] sm:$0xf] }
 0x455   : > { %v30301_v28 = vadd.f32 %v21423_v33, %v12856_v48  ;;  %v12854_v45 = vadd.f32 %v12765_v57, %v30119_v15  ;;  %21791 = vmatpush3.bf16.msra.mxu1 %v22343_v7  ;;  %v18969_v33 = vld [vmem:[%s22490_s16 + $0x4bc] sm:$0xf] }
 0x456   : > { %v13151_v36 = vpop.f32.mrf.mxu1  ;;  %v21378_v13 = vpop.f32.mrf.mxu0  ;;  %21665 = vmatmul.mubr.bf16.gmra.mxu0 %v18997_v20 }
 0x457   : > { %v30304_v4 = vadd.f32 %v13151_v36, %v12854_v45  ;;  %v12859_v1 = vadd.f32 %v21378_v13, %v30124_v50  ;;  %21668 = vmatprep.mubr.bf16.mxu0 %v18998_v60  ;;  %v22389_v45 = vld [vmem:[%s22490_s16 + $0x4b8] sm:$0xf] }
 0x458   : > { %v21426_v38 = vpop.f32.mrf.mxu1  ;;  %21713 = vmatmul.mubr.bf16.gmra.mxu1 %v22323_v63  ;;  %v12778_v0 = vpop.f32.mrf.mxu0  ;;  %v19001_v36 = vcombine.low %v22389_v45, %v18969_v33 }
 0x459   : > { %21716 = vmatprep.mubr.bf16.mxu1 %v22327_v44  ;;  %v30309_v15 = vadd.f32 %v21426_v38, %v12859_v1  ;;  %v12857_v18 = vadd.f32 %v12778_v0, %v30128_v53  ;;  %v22335_v38 = vld [vmem:[%s22490_s16 + $0x7a0] sm:$0xff]   ;;  %v19002_v0 = vcombine.low %v22390_v43, %v18970_v30  ;;  %v22346_v43 = vld [vmem:[%s22490_s16 + $0x62c] sm:$0xff]  }
 0x45a   : > { %v13164_v19 = vpop.f32.mrf.mxu1  ;;  %v21379_v26 = vpop.f32.mrf.mxu0 }
 0x45b   : > { %v30313_v7 = vadd.f32 %v13164_v19, %v12857_v18  ;;  %v12860_v50 = vadd.f32 %v21379_v26, %v30132_v52  ;;  %v22339_v18 = vld [vmem:[%s22490_s16 + $0x7c0] sm:$0xff]  }
 0x45c   : > { %v21427_v47 = vpop.f32.mrf.mxu1  ;;  %v12781_v17 = vpop.f32.mrf.mxu0 }
 0x45d   : > { %v30319_v62 = vadd.f32 %v21427_v47, %v12860_v50  ;;  %v12858_v53 = vadd.f32 %v12781_v17, %v30135_v12  ;;  %v18971_v47 = vld [vmem:[%s22490_s16 + $0x4fc] sm:$0xf] }
 0x45e   : > { %v13167_v5 = vpop.f32.mrf.mxu1  ;;  %v21382_v9 = vpop.f32.mrf.mxu0  ;;  %21669 = vmatmul.mubr.bf16.gmra.mxu0 %v18999_v31 }
 0x45f   : > { %v30322_v20 = vadd.f32 %v13167_v5, %v12858_v53  ;;  %v12863_v52 = vadd.f32 %v21382_v9, %v30140_v41  ;;  %21672 = vmatprep.mubr.bf16.mxu0 %v19000_v11 }
 0x460   : > { %v21430_v48 = vpop.f32.mrf.mxu1  ;;  %21717 = vmatmul.mubr.bf16.gmra.mxu1 %v22329_v34  ;;  %v12794_v63 = vpop.f32.mrf.mxu0 }
 0x461   : > { %21720 = vmatprep.mubr.bf16.mxu1 %v22333_v56  ;;  %v30327_v60 = vadd.f32 %v21430_v48, %v12863_v52  ;;  %v12861_v12 = vadd.f32 %v12794_v63, %v30144_v3  ;;  %v22391_v56 = vld [vmem:[%s22490_s16 + $0x4f8] sm:$0xf]  ;;  %v22341_v52 = vld [vmem:[%s22490_s16 + $0x7e0] sm:$0xff]   ;;  %v22344_v48 = vld [vmem:[%s22490_s16 + $0x60c] sm:$0xff]  }
 0x462   : > { %v13180_v57 = vpop.f32.mrf.mxu1  ;;  %v21383_v44 = vpop.f32.mrf.mxu0  ;;  %v19003_v53 = vcombine.low %v22391_v56, %v18971_v47  ;;  %v22345_v63 = vld [vmem:[%s22490_s16 + $0x618] sm:$0xff]  }
 0x463   : > { %v30331_v13 = vadd.f32 %v13180_v57, %v12861_v12  ;;  %v12864_v41 = vadd.f32 %v21383_v44, %v30148_v29 }
 0x464   : > { %v21431_v1 = vpop.f32.mrf.mxu1  ;;  %v12797_v59 = vpop.f32.mrf.mxu0 }
 0x465   : > { %v30337_v19 = vadd.f32 %v21431_v1, %v12864_v41  ;;  %v12862_v26 = vadd.f32 %v12797_v59, %v30151_v14 }
 0x466   : > { %v13183_v3 = vpop.f32.mrf.mxu1  ;;  %v21386_v6 = vpop.f32.mrf.mxu0  ;;  %21673 = vmatmul.mubr.bf16.gmra.mxu0 %v19001_v36 }
 0x467   : > { %v30340_v31 = vadd.f32 %v13183_v3, %v12862_v26  ;;  %v12867_v50 = vadd.f32 %v21386_v6, %v30157_v49  ;;  %21676 = vmatprep.mubr.bf16.mxu0 %v19002_v0  ;;  %v22347_v26 = vld [vmem:[%s22490_s16 + $0x638] sm:$0xff]  }
 0x468   : > { %v21434_v29 = vpop.f32.mrf.mxu1  ;;  %21721 = vmatmul.mubr.bf16.gmra.mxu1 %v22335_v38  ;;  %v12810_v34 = vpop.f32.mrf.mxu0  ;;  %v22349_v6 = vld [vmem:[%s22490_s16 + $0x658] sm:$0xff]  }
 0x469   : > { %21724 = vmatprep.mubr.bf16.mxu1 %v22339_v18  ;;  %v30344_v42 = vadd.f32 %v21434_v29, %v12867_v50  ;;  %v12865_v14 = vadd.f32 %v12810_v34, %v30161_v8 }
 0x46a   : > { %v13196_v11 = vpop.f32.mrf.mxu1  ;;  %v21387_v17 = vpop.f32.mrf.mxu0 }
 0x46b   : > { %v30348_v5 = vadd.f32 %v13196_v11, %v12865_v14  ;;  %v12868_v49 = vadd.f32 %v21387_v17, %v30166_v10 }
 0x46c   : > { %v21435_v9 = vpop.f32.mrf.mxu1  ;;  %v12813_v33 = vpop.f32.mrf.mxu0 }
 0x46d   : > { %v30354_v30 = vadd.f32 %v21435_v9, %v12868_v49  ;;  %v12866_v12 = vadd.f32 %v12813_v33, %v30169_v58  ;;  %v22350_v49 = vld [vmem:[%s22490_s16 + $0x66c] sm:$0xff]   ;;  %v22351_v33 = vld [vmem:[%s22490_s16 + $0x678] sm:$0xff]  }
 0x46e   : > { %v13199_v57 = vpop.f32.mrf.mxu1  ;;  %v21390_v8 = vpop.f32.mrf.mxu0  ;;  %21677 = vmatmul.mubr.bf16.gmra.mxu0 %v19003_v53 }
 0x46f   : > { %v30357_v44 = vadd.f32 %v13199_v57, %v12866_v12  ;;  %v12871_v45 = vadd.f32 %v21390_v8, %v30174_v32  ;;  %21744 = vmatprep.mubr.bf16.mxu0 %v22344_v48  ;;  %v22348_v32 = vld [vmem:[%s22490_s16 + $0x64c] sm:$0xff]   ;;  %v22353_v12 = vld [vmem:[%s22490_s16 + $0x698] sm:$0xff]  }
 0x470   : > { %v21438_v10 = vpop.f32.mrf.mxu1  ;;  %21725 = vmatmul.mubr.bf16.gmra.mxu1 %v22341_v52  ;;  %v12826_v36 = vpop.f32.mrf.mxu0 }
 0x471   : > { %21792 = vmatprep.mubr.bf16.mxu1 %v22345_v63  ;;  %v30360_v41 = vadd.f32 %v21438_v10, %v12871_v45  ;;  %v12869_v1 = vadd.f32 %v12826_v36, %v30179_v23 }
 0x472   : > { %v13212_v58 = vpop.f32.mrf.mxu1  ;;  %v21391_v38 = vpop.f32.mrf.mxu0 }
 0x473   : > { %v30364_v0 = vadd.f32 %v13212_v58, %v12869_v1  ;;  %v12872_v59 = vadd.f32 %v21391_v38, %v30184_v51 }
 0x474   : > { %v21439_v18 = vpop.f32.mrf.mxu1  ;;  %v12829_v3 = vpop.f32.mrf.mxu0 }
 0x475   : > { %v30370_v50 = vadd.f32 %v21439_v18, %v12872_v59  ;;  %v12870_v29 = vadd.f32 %v12829_v3, %v30194_v24  ;;  %v22354_v59 = vld [vmem:[%s22490_s16 + $0x6ac] sm:$0xff]   ;;  %v22355_v3 = vld [vmem:[%s22490_s16 + $0x6b8] sm:$0xff]  }
 0x476   : > { %v13215_v47 = vpop.f32.mrf.mxu1  ;;  %v21458_v34 = vpop.f32.mrf.mxu0  ;;  %21745 = vmatmul.mubr.bf16.vlgmr.msra.gmra.mxu0 %v22346_v43 }
 0x477   : > { %v30373_v23 = vadd.f32 %v13215_v47, %v12870_v29  ;;  %v13615_v14 = vadd.f32 %v21458_v34, %v30204_v35  ;;  %21748 = vmatprep.mubr.bf16.mxu0 %v22348_v32  ;;  %v22352_v35 = vld [vmem:[%s22490_s16 + $0x68c] sm:$0xff]   ;;  %v22357_v29 = vld [vmem:[%s22490_s16 + $0x6d8] sm:$0xff]  }
 0x478   : > { %v21506_v51 = vpop.f32.mrf.mxu1  ;;  %21793 = vmatmul.mubr.bf16.vlgmr.msra.gmra.mxu1 %v22347_v26  ;;  %v13486_v11 = vpop.f32.mrf.mxu0 }
 0x479   : > { %21796 = vmatprep.mubr.bf16.mxu1 %v22349_v6  ;;  %v30376_v17 = vadd.f32 %v21506_v51, %v13615_v14  ;;  %v13613_v56 = vadd.f32 %v13486_v11, %v30211_v61 }
 0x47a   : > { %v13872_v24 = vpop.f32.mrf.mxu1  ;;  %v21459_v53 = vpop.f32.mrf.mxu0 }
 0x47b   : > { %v30380_v9 = vadd.f32 %v13872_v24, %v13613_v56  ;;  %v13616_v52 = vadd.f32 %v21459_v53, %v30217_v46 }
 0x47c   : > { %v21507_v48 = vpop.f32.mrf.mxu1  ;;  %v13489_v63 = vpop.f32.mrf.mxu0 }
 0x47d   : > { %v30386_v57 = vadd.f32 %v21507_v48, %v13616_v52  ;;  %v13614_v8 = vadd.f32 %v13489_v63, %v30226_v25  ;;  %v22358_v52 = vld [vmem:[%s22490_s16 + $0x6ec] sm:$0xff]   ;;  %v22359_v63 = vld [vmem:[%s22490_s16 + $0x6f8] sm:$0xff]  }
 0x47e   : > { %v13875_v45 = vpop.f32.mrf.mxu1  ;;  %v21462_v10 = vpop.f32.mrf.mxu0  ;;  %21749 = vmatmul.mubr.bf16.gmra.mxu0 %v22350_v49 }
 0x47f   : > { %v30389_v61 = vadd.f32 %v13875_v45, %v13614_v8  ;;  %v13619_v36 = vadd.f32 %v21462_v10, %v30231_v37  ;;  %21752 = vmatprep.mubr.bf16.mxu0 %v22352_v35  ;;  %v22356_v37 = vld [vmem:[%s22490_s16 + $0x6cc] sm:$0xff]   ;;  %v22361_v8 = vld [vmem:[%s22490_s16 + $0x718] sm:$0xff]  }
 0x480   : > { %v21510_v46 = vpop.f32.mrf.mxu1  ;;  %21797 = vmatmul.mubr.bf16.gmra.mxu1 %v22351_v33  ;;  %v13502_v1 = vpop.f32.mrf.mxu0 }
 0x481   : > { %21800 = vmatprep.mubr.bf16.mxu1 %v22353_v12  ;;  %v30392_v58 = vadd.f32 %v21510_v46, %v13619_v36  ;;  %v13617_v38 = vadd.f32 %v13502_v1, %v30241_v2 }
 0x482   : > { %v13888_v25 = vpop.f32.mrf.mxu1  ;;  %v21463_v43 = vpop.f32.mrf.mxu0 }
 0x483   : > { %v30396_v18 = vadd.f32 %v13888_v25, %v13617_v38  ;;  %v13620_v26 = vadd.f32 %v21463_v43, %v30247_v39 }
 0x484   : > { %v21511_v32 = vpop.f32.mrf.mxu1  ;;  %v13505_v6 = vpop.f32.mrf.mxu0 }
 0x485   : > { %v30402_v47 = vadd.f32 %v21511_v32, %v13620_v26  ;;  %v13618_v34 = vadd.f32 %v13505_v6, %v30256_v22  ;;  %v22362_v26 = vld [vmem:[%s22490_s16 + $0x72c] sm:$0xff]   ;;  %v22363_v6 = vld [vmem:[%s22490_s16 + $0x738] sm:$0xff]  }
 0x486   : > { %v13891_v14 = vpop.f32.mrf.mxu1  ;;  %v21466_v51 = vpop.f32.mrf.mxu0  ;;  %21753 = vmatmul.mubr.bf16.gmra.mxu0 %v22354_v59 }
 0x487   : > { %v30405_v2 = vadd.f32 %v13891_v14, %v13618_v34  ;;  %v13623_v11 = vadd.f32 %v21466_v51, %v30261_v40  ;;  %21756 = vmatprep.mubr.bf16.mxu0 %v22356_v37  ;;  %v22360_v40 = vld [vmem:[%s22490_s16 + $0x70c] sm:$0xff]   ;;  %v22365_v34 = vld [vmem:[%s22490_s16 + $0x758] sm:$0xff]  }
 0x488   : > { %v21514_v39 = vpop.f32.mrf.mxu1  ;;  %21801 = vmatmul.mubr.bf16.gmra.mxu1 %v22355_v3  ;;  %v13518_v56 = vpop.f32.mrf.mxu0 }
 0x489   : > { %21804 = vmatprep.mubr.bf16.mxu1 %v22357_v29  ;;  %v30408_v24 = vadd.f32 %v21514_v39, %v13623_v11  ;;  %v13621_v53 = vadd.f32 %v13518_v56, %v30271_v54 }
 0x48a   : > { %v13904_v22 = vpop.f32.mrf.mxu1  ;;  %v21467_v49 = vpop.f32.mrf.mxu0 }
 0x48b   : > { %v30412_v48 = vadd.f32 %v13904_v22, %v13621_v53  ;;  %v13624_v33 = vadd.f32 %v21467_v49, %v30277_v55 }
 0x48c   : > { %v21515_v35 = vpop.f32.mrf.mxu1  ;;  %v13521_v12 = vpop.f32.mrf.mxu0 }
 0x48d   : > { %v30418_v45 = vadd.f32 %v21515_v35, %v13624_v33  ;;  %v13622_v10 = vadd.f32 %v13521_v12, %v30286_v21  ;;  %v22366_v33 = vld [vmem:[%s22490_s16 + $0x76c] sm:$0xff]   ;;  %v22367_v12 = vld [vmem:[%s22490_s16 + $0x778] sm:$0xff]  }
 0x48e   : > { %v13907_v36 = vpop.f32.mrf.mxu1  ;;  %v21470_v46 = vpop.f32.mrf.mxu0  ;;  %21757 = vmatmul.mubr.bf16.gmra.mxu0 %v22358_v52 }
 0x48f   : > { %v30421_v54 = vadd.f32 %v13907_v36, %v13622_v10  ;;  %v13627_v1 = vadd.f32 %v21470_v46, %v30291_v16  ;;  %21760 = vmatprep.mubr.bf16.mxu0 %v22360_v40  ;;  %v22364_v16 = vld [vmem:[%s22490_s16 + $0x74c] sm:$0xff]   ;;  %v22369_v10 = vld [vmem:[%s22490_s16 + $0x798] sm:$0xff]  }
 0x490   : > { %v21518_v55 = vpop.f32.mrf.mxu1  ;;  %21805 = vmatmul.mubr.bf16.gmra.mxu1 %v22359_v63  ;;  %v13534_v38 = vpop.f32.mrf.mxu0 }
 0x491   : > { %21808 = vmatprep.mubr.bf16.mxu1 %v22361_v8  ;;  %v30424_v25 = vadd.f32 %v21518_v55, %v13627_v1  ;;  %v13625_v43 = vadd.f32 %v13534_v38, %v30295_v27 }
 0x492   : > { %v13920_v21 = vpop.f32.mrf.mxu1  ;;  %v21471_v59 = vpop.f32.mrf.mxu0 }
 0x493   : > { %v30428_v32 = vadd.f32 %v13920_v21, %v13625_v43  ;;  %v13628_v3 = vadd.f32 %v21471_v59, %v30301_v28 }
 0x494   : > { %v21519_v37 = vpop.f32.mrf.mxu1  ;;  %v13537_v29 = vpop.f32.mrf.mxu0 }
 0x495   : > { %v30434_v14 = vadd.f32 %v21519_v37, %v13628_v3  ;;  %v13626_v51 = vadd.f32 %v13537_v29, %v30304_v4  ;;  %v22370_v3 = vld [vmem:[%s22490_s16 + $0x7ac] sm:$0xff]   ;;  %v22371_v29 = vld [vmem:[%s22490_s16 + $0x7b8] sm:$0xff]  }
 0x496   : > { %v13923_v11 = vpop.f32.mrf.mxu1  ;;  %v21474_v39 = vpop.f32.mrf.mxu0  ;;  %21761 = vmatmul.mubr.bf16.gmra.mxu0 %v22362_v26 }
 0x497   : > { %v30437_v27 = vadd.f32 %v13923_v11, %v13626_v51  ;;  %v13631_v56 = vadd.f32 %v21474_v39, %v30309_v15  ;;  %21764 = vmatprep.mubr.bf16.mxu0 %v22364_v16  ;;  %v22368_v15 = vld [vmem:[%s22490_s16 + $0x78c] sm:$0xff]   ;;  %v22373_v51 = vld [vmem:[%s22490_s16 + $0x7d8] sm:$0xff]  }
 0x498   : > { %v21522_v28 = vpop.f32.mrf.mxu1  ;;  %21809 = vmatmul.mubr.bf16.gmra.mxu1 %v22363_v6  ;;  %v13550_v53 = vpop.f32.mrf.mxu0 }
 0x499   : > { %21812 = vmatprep.mubr.bf16.mxu1 %v22365_v34  ;;  %v30440_v22 = vadd.f32 %v21522_v28, %v13631_v56  ;;  %v13629_v49 = vadd.f32 %v13550_v53, %v30313_v7 }
 0x49a   : > { %v13936_v4 = vpop.f32.mrf.mxu1  ;;  %v21475_v52 = vpop.f32.mrf.mxu0 }
 0x49b   : > { %v30444_v35 = vadd.f32 %v13936_v4, %v13629_v49  ;;  %v13632_v63 = vadd.f32 %v21475_v52, %v30319_v62 }
 0x49c   : > { %v21523_v40 = vpop.f32.mrf.mxu1  ;;  %v13553_v8 = vpop.f32.mrf.mxu0 }
 0x49d   : > { %v30450_v36 = vadd.f32 %v21523_v40, %v13632_v63  ;;  %v13630_v46 = vadd.f32 %v13553_v8, %v30322_v20  ;;  %v22375_v8 = vld [vmem:[%s22490_s16 + $0x7f8] sm:$0xff]  }
 0x49e   : > { %v13939_v1 = vpop.f32.mrf.mxu1  ;;  %v21478_v55 = vpop.f32.mrf.mxu0  ;;  %21765 = vmatmul.mubr.bf16.gmra.mxu0 %v22366_v33 }
 0x49f   : > { %v30453_v7 = vadd.f32 %v13939_v1, %v13630_v46  ;;  %v13635_v38 = vadd.f32 %v21478_v55, %v30327_v60  ;;  %21768 = vmatprep.mubr.bf16.mxu0 %v22368_v15  ;;  %v22372_v60 = vld [vmem:[%s22490_s16 + $0x7cc] sm:$0xff]  }
 0x4a0   : > { %v21526_v62 = vpop.f32.mrf.mxu1  ;;  %21813 = vmatmul.mubr.bf16.gmra.mxu1 %v22367_v12  ;;  %v13566_v43 = vpop.f32.mrf.mxu0 }
 0x4a1   : > { %21816 = vmatprep.mubr.bf16.mxu1 %v22369_v10  ;;  %v30456_v21 = vadd.f32 %v21526_v62, %v13635_v38  ;;  %v13633_v59 = vadd.f32 %v13566_v43, %v30331_v13 }
 0x4a2   : > { %v13952_v20 = vpop.f32.mrf.mxu1  ;;  %v21479_v26 = vpop.f32.mrf.mxu0 }
 0x4a3   : > { %v30460_v37 = vadd.f32 %v13952_v20, %v13633_v59  ;;  %v13636_v6 = vadd.f32 %v21479_v26, %v30337_v19 }
 0x4a4   : > { %v21527_v16 = vpop.f32.mrf.mxu1  ;;  %v13569_v34 = vpop.f32.mrf.mxu0 }
 0x4a5   : > { %v30466_v11 = vadd.f32 %v21527_v16, %v13636_v6  ;;  %v13634_v39 = vadd.f32 %v13569_v34, %v30340_v31  ;;  %v22374_v31 = vld [vmem:[%s22490_s16 + $0x7ec] sm:$0xff]   ;;  %s19231_s16 = sshll.u32 %s31532_s12, 8 }
 0x4a6   : > { %v13955_v56 = vpop.f32.mrf.mxu1  ;;  %v21482_v28 = vpop.f32.mrf.mxu0  ;;  %21769 = vmatmul.mubr.bf16.gmra.mxu0 %v22370_v3  ;;  %s30736_s26 = scalar_lea.vmem %s30895_s3, %s19231_s16 }
 0x4a7   : > { %v30469_v13 = vadd.f32 %v13955_v56, %v13634_v39  ;;  %v13639_v53 = vadd.f32 %v21482_v28, %v30344_v42  ;;  %21772 = vmatprep.mubr.bf16.mxu0 %v22372_v60 }
 0x4a8   : > { %v21530_v49 = vpop.f32.mrf.mxu1  ;;  %21817 = vmatmul.mubr.bf16.gmra.mxu1 %v22371_v29  ;;  %v13582_v19 = vpop.f32.mrf.mxu0 }
 0x4a9   : > { %21820 = vmatprep.mubr.bf16.mxu1 %v22373_v51  ;;  %v30472_v4 = vadd.f32 %v21530_v49, %v13639_v53  ;;  %v13637_v52 = vadd.f32 %v13582_v19, %v30348_v5 }
 0x4aa   : > { %v13968_v33 = vpop.f32.mrf.mxu1  ;;  %v21483_v63 = vpop.f32.mrf.mxu0 }
 0x4ab   : > { %v30476_v40 = vadd.f32 %v13968_v33, %v13637_v52  ;;  %v13640_v12 = vadd.f32 %v21483_v63, %v30354_v30 }
 0x4ac   : > { %v21531_v15 = vpop.f32.mrf.mxu1  ;;  %v13585_v10 = vpop.f32.mrf.mxu0 }
 0x4ad   : > { %v30480_v42 = vadd.f32 %v21531_v15, %v13640_v12  ;;  %v13638_v46 = vadd.f32 %v13585_v10, %v30357_v44 }
 0x4ae   : > { %v13971_v1 = vpop.f32.mrf.mxu1  ;;  %v21486_v55 = vpop.f32.mrf.mxu0  ;;  %21773 = vmatmul.mubr.bf16.gmra.mxu0 %v22374_v31 }
 0x4af   : > { %v30483_v38 = vadd.f32 %v13971_v1, %v13638_v46  ;;  %v13643_v5 = vadd.f32 %v21486_v55, %v30360_v41 }
 0x4b0   : > { %v21534_v62 = vpop.f32.mrf.mxu1  ;;  %21821 = vmatmul.mubr.bf16.gmra.mxu1 %v22375_v8  ;;  %v13598_v43 = vpop.f32.mrf.mxu0 }
 0x4b1   : > { %v30486_v59 = vadd.f32 %v21534_v62, %v13643_v5  ;;  %v13641_v30 = vadd.f32 %v13598_v43, %v30364_v0 }
 0x4b2   : > { %v13984_v20 = vpop.f32.mrf.mxu1  ;;  %v21487_v26 = vpop.f32.mrf.mxu0 }
 0x4b3   : > { %v30489_v3 = vadd.f32 %v13984_v20, %v13641_v30  ;;  %v13644_v44 = vadd.f32 %v21487_v26, %v30370_v50 }
 0x4b4   : > { %v21535_v6 = vpop.f32.mrf.mxu1  ;;  %v13601_v16 = vpop.f32.mrf.mxu0 }
 0x4b5   : > { %v30492_v29 = vadd.f32 %v21535_v6, %v13644_v44  ;;  %v13642_v60 = vadd.f32 %v13601_v16, %v30373_v23 }
 0x4b6   : > { %v13987_v41 = vpop.f32.mrf.mxu1  ;;  %v21554_v34 = vpop.f32.mrf.mxu0 }
 0x4b7   : > { %v30495_v51 = vadd.f32 %v13987_v41, %v13642_v60  ;;  %v14387_v39 = vadd.f32 %v21554_v34, %v30376_v17 }
 0x4b8   : > { %v21602_v56 = vpop.f32.mrf.mxu1  ;;  %v14258_v0 = vpop.f32.mrf.mxu0 }
 0x4b9   : > { %v30498_v28 = vadd.f32 %v21602_v56, %v14387_v39  ;;  %v14385_v53 = vadd.f32 %v14258_v0, %v30380_v9 }
 0x4ba   : > { %v14516_v49 = vpop.f32.mrf.mxu1  ;;  %v21555_v50 = vpop.f32.mrf.mxu0 }
 0x4bb   : > { %v30501_v19 = vadd.f32 %v14516_v49, %v14385_v53  ;;  %v14388_v52 = vadd.f32 %v21555_v50, %v30386_v57 }
 0x4bc   : > { %v21603_v33 = vpop.f32.mrf.mxu1  ;;  %v14261_v23 = vpop.f32.mrf.mxu0 }
 0x4bd   : > { %v30504_v63 = vadd.f32 %v21603_v33, %v14388_v52  ;;  %v14386_v31 = vadd.f32 %v14261_v23, %v30389_v61 }
 0x4be   : > { %v14519_v12 = vpop.f32.mrf.mxu1  ;;  %v21558_v17 = vpop.f32.mrf.mxu0 }
 0x4bf   : > { %v30507_v15 = vadd.f32 %v14519_v12, %v14386_v31  ;;  %v14391_v8 = vadd.f32 %v21558_v17, %v30392_v58 }
 0x4c0   : > { %v21606_v10 = vpop.f32.mrf.mxu1  ;;  %v14274_v9 = vpop.f32.mrf.mxu0 }
 0x4c1   : > { %v30510_v46 = vadd.f32 %v21606_v10, %v14391_v8  ;;  %v14389_v1 = vadd.f32 %v14274_v9, %v30396_v18 }
 0x4c2   : > { %v14532_v55 = vpop.f32.mrf.mxu1  ;;  %v21559_v57 = vpop.f32.mrf.mxu0 }
 0x4c3   : > { %v30513_v5 = vadd.f32 %v14532_v55, %v14389_v1  ;;  %v14392_v62 = vadd.f32 %v21559_v57, %v30402_v47 }
 0x4c4   : > { %v21607_v43 = vpop.f32.mrf.mxu1  ;;  %v14277_v61 = vpop.f32.mrf.mxu0 }
 0x4c5   : > { %v30516_v30 = vadd.f32 %v21607_v43, %v14392_v62  ;;  %v14390_v20 = vadd.f32 %v14277_v61, %v30405_v2 }
 0x4c6   : > { %v14535_v26 = vpop.f32.mrf.mxu1  ;;  %v21562_v58 = vpop.f32.mrf.mxu0 }
 0x4c7   : > { %v30519_v44 = vadd.f32 %v14535_v26, %v14390_v20  ;;  %v14395_v6 = vadd.f32 %v21562_v58, %v30408_v24 }
 0x4c8   : > { %v21610_v16 = vpop.f32.mrf.mxu1  ;;  %v14290_v18 = vpop.f32.mrf.mxu0 }
 0x4c9   : > { %v30522_v60 = vadd.f32 %v21610_v16, %v14395_v6  ;;  %v14393_v41 = vadd.f32 %v14290_v18, %v30412_v48 }
 0x4ca   : > { %v14548_v34 = vpop.f32.mrf.mxu1  ;;  %v21563_v47 = vpop.f32.mrf.mxu0 }
 0x4cb   : > { %v30525_v39 = vadd.f32 %v14548_v34, %v14393_v41  ;;  %v14396_v56 = vadd.f32 %v21563_v47, %v30418_v45 }
 0x4cc   : > { %v21611_v0 = vpop.f32.mrf.mxu1  ;;  %v14293_v2 = vpop.f32.mrf.mxu0 }
 0x4cd   : > { %v30528_v53 = vadd.f32 %v21611_v0, %v14396_v56  ;;  %v14394_v49 = vadd.f32 %v14293_v2, %v30421_v54 }
 0x4ce   : > { %v14551_v50 = vpop.f32.mrf.mxu1  ;;  %v21566_v24 = vpop.f32.mrf.mxu0 }
 0x4cf   : > { %v30531_v52 = vadd.f32 %v14551_v50, %v14394_v49  ;;  %v14399_v33 = vadd.f32 %v21566_v24, %v30424_v25 }
 0x4d0   : > { %v21614_v23 = vpop.f32.mrf.mxu1  ;;  %v14306_v48 = vpop.f32.mrf.mxu0 }
 0x4d1   : > { %v30534_v31 = vadd.f32 %v21614_v23, %v14399_v33  ;;  %v14397_v12 = vadd.f32 %v14306_v48, %v30428_v32 }
 0x4d2   : > { %v14564_v17 = vpop.f32.mrf.mxu1  ;;  %v21567_v45 = vpop.f32.mrf.mxu0 }
 0x4d3   : > { %v30537_v8 = vadd.f32 %v14564_v17, %v14397_v12  ;;  %v14400_v10 = vadd.f32 %v21567_v45, %v30434_v14 }
 0x4d4   : > { %v21615_v9 = vpop.f32.mrf.mxu1  ;;  %v14309_v54 = vpop.f32.mrf.mxu0 }
 0x4d5   : > { %v30540_v1 = vadd.f32 %v21615_v9, %v14400_v10  ;;  %v14398_v55 = vadd.f32 %v14309_v54, %v30437_v27 }
 0x4d6   : > { %v14567_v57 = vpop.f32.mrf.mxu1  ;;  %v21570_v25 = vpop.f32.mrf.mxu0 }
 0x4d7   : > { %v30543_v62 = vadd.f32 %v14567_v57, %v14398_v55  ;;  %v14403_v43 = vadd.f32 %v21570_v25, %v30440_v22 }
 0x4d8   : > { %v21618_v61 = vpop.f32.mrf.mxu1  ;;  %v14322_v32 = vpop.f32.mrf.mxu0 }
 0x4d9   : > { %v30546_v20 = vadd.f32 %v21618_v61, %v14403_v43  ;;  %v14401_v26 = vadd.f32 %v14322_v32, %v30444_v35 }
 0x4da   : > { %v14580_v58 = vpop.f32.mrf.mxu1  ;;  %v21571_v14 = vpop.f32.mrf.mxu0 }
 0x4db   : > { %v30549_v6 = vadd.f32 %v14580_v58, %v14401_v26  ;;  %v14404_v16 = vadd.f32 %v21571_v14, %v30450_v36 }
 0x4dc   : > { %v21619_v18 = vpop.f32.mrf.mxu1  ;;  %v14325_v27 = vpop.f32.mrf.mxu0 }
 0x4dd   : > { %v30552_v41 = vadd.f32 %v21619_v18, %v14404_v16  ;;  %v14402_v34 = vadd.f32 %v14325_v27, %v30453_v7 }
 0x4de   : > { %v14583_v47 = vpop.f32.mrf.mxu1  ;;  %v21574_v22 = vpop.f32.mrf.mxu0 }
 0x4df   : > { %31449 = vst [vmem:[#allocation42_spill] sm:$0xff] %v30552_v41  ;;  %v30555_v56 = vadd.f32 %v14583_v47, %v14402_v34  ;;  %v14407_v0 = vadd.f32 %v21574_v22, %v30456_v21 }
 0x4e0   : > { %v21622_v2 = vpop.f32.mrf.mxu1  ;;  %v14338_v35 = vpop.f32.mrf.mxu0 }
 0x4e1   : > { %31450 = vst [vmem:[#allocation20_spill] sm:$0xff] %v30555_v56  ;;  %v30558_v49 = vadd.f32 %v21622_v2, %v14407_v0  ;;  %v14405_v50 = vadd.f32 %v14338_v35, %v30460_v37 }
 0x4e2   : > { %v14596_v24 = vpop.f32.mrf.mxu1  ;;  %v21575_v36 = vpop.f32.mrf.mxu0 }
 0x4e3   : > { %31451 = vst [vmem:[#allocation21_spill] sm:$0xff] %v30558_v49  ;;  %v30561_v33 = vadd.f32 %v14596_v24, %v14405_v50  ;;  %v14408_v23 = vadd.f32 %v21575_v36, %v30466_v11 }
 0x4e4   : > { %v21623_v48 = vpop.f32.mrf.mxu1  ;;  %v14341_v7 = vpop.f32.mrf.mxu0 }
 0x4e5   : > { %31452 = vst [vmem:[#allocation22_spill] sm:$0xff] %v30561_v33  ;;  %v30564_v12 = vadd.f32 %v21623_v48, %v14408_v23  ;;  %v14406_v17 = vadd.f32 %v14341_v7, %v30469_v13 }
 0x4e6   : > { %v14599_v45 = vpop.f32.mrf.mxu1  ;;  %v21578_v21 = vpop.f32.mrf.mxu0 }
 0x4e7   : > { %31453 = vst [vmem:[#allocation23_spill] sm:$0xff] %v30564_v12  ;;  %v30567_v10 = vadd.f32 %v14599_v45, %v14406_v17  ;;  %v14411_v9 = vadd.f32 %v21578_v21, %v30472_v4 }
 0x4e8   : > { %v21626_v54 = vpop.f32.mrf.mxu1  ;;  %v14354_v37 = vpop.f32.mrf.mxu0 }
 0x4e9   : > { %31454 = vst [vmem:[#allocation24_spill] sm:$0xff] %v30567_v10  ;;  %v30570_v55 = vadd.f32 %v21626_v54, %v14411_v9  ;;  %v14409_v57 = vadd.f32 %v14354_v37, %v30476_v40 }
 0x4ea   : > { %v14612_v25 = vpop.f32.mrf.mxu1  ;;  %v21579_v11 = vpop.f32.mrf.mxu0 }
 0x4eb   : > { %31455 = vst [vmem:[#allocation25_spill] sm:$0xff] %v30570_v55  ;;  %v30573_v43 = vadd.f32 %v14612_v25, %v14409_v57  ;;  %v14412_v61 = vadd.f32 %v21579_v11, %v30480_v42 }
 0x4ec   : > { %v21627_v32 = vpop.f32.mrf.mxu1  ;;  %v14357_v13 = vpop.f32.mrf.mxu0 }
 0x4ed   : > { %31456 = vst [vmem:[#allocation26_spill] sm:$0xff] %v30573_v43  ;;  %v30576_v26 = vadd.f32 %v21627_v32, %v14412_v61  ;;  %v14410_v58 = vadd.f32 %v14357_v13, %v30483_v38 }
 0x4ee   : > { %v14615_v14 = vpop.f32.mrf.mxu1  ;;  %v21582_v4 = vpop.f32.mrf.mxu0 }
 0x4ef   : > { %31457 = vst [vmem:[#allocation2_spill] sm:$0xff] %v30576_v26  ;;  %v30579_v16 = vadd.f32 %v14615_v14, %v14410_v58  ;;  %v14415_v18 = vadd.f32 %v21582_v4, %v30486_v59 }
 0x4f0   : > { %v21630_v27 = vpop.f32.mrf.mxu1  ;;  %v14370_v40 = vpop.f32.mrf.mxu0 }
 0x4f1   : > { %31458 = vst [vmem:[#allocation27_spill] sm:$0xff] %v30579_v16  ;;  %v30582_v34 = vadd.f32 %v21630_v27, %v14415_v18  ;;  %v14413_v47 = vadd.f32 %v14370_v40, %v30489_v3 }
 0x4f2   : > { %v14628_v22 = vpop.f32.mrf.mxu1  ;;  %v21583_v42 = vpop.f32.mrf.mxu0 }
 0x4f3   : > { %31459 = vst [vmem:[#allocation28_spill] sm:$0xff] %v30582_v34  ;;  %v30585_v0 = vadd.f32 %v14628_v22, %v14413_v47  ;;  %v14416_v2 = vadd.f32 %v21583_v42, %v30492_v29 }
 0x4f4   : > { %v21631_v35 = vpop.f32.mrf.mxu1  ;;  %v14373_v38 = vpop.f32.mrf.mxu0 }
 0x4f5   : > { %31460 = vst [vmem:[#allocation29_spill] sm:$0xff] %v30585_v0  ;;  %v30588_v50 = vadd.f32 %v21631_v35, %v14416_v2  ;;  %v14414_v24 = vadd.f32 %v14373_v38, %v30495_v51 }
 0x4f6   : > { %v14631_v36 = vpop.f32.mrf.mxu1  ;;  %v21650_v59 = vpop.f32.mrf.mxu0 }
 0x4f7   : > { %31461 = vst [vmem:[#allocation30_spill] sm:$0xff] %v30588_v50  ;;  %v30591_v23 = vadd.f32 %v14631_v36, %v14414_v24 }
 0x4f8   : > { %v30593_v48 = vpop.f32.mrf.mxu1  ;;  %v14870_v7 = vpop.f32.mrf.mxu0 }
 0x4f9   : > { %31462 = vst [vmem:[#allocation31_spill] sm:$0xff] %v30591_v23 }
 0x4fa   : > { %v30595_v3 = vpop.f32.mrf.mxu1  ;;  %v21651_v17 = vpop.f32.mrf.mxu0 }
 0x4fc   : > { %v30597_v45 = vpop.f32.mrf.mxu1  ;;  %v30599_v21 = vpop.f32.mrf.mxu0 }
 0x4fe   : > { %v30601_v29 = vpop.f32.mrf.mxu1  ;;  %v30603_v9 = vpop.f32.mrf.mxu0 }
 0x500   : > { %v30605_v54 = vpop.f32.mrf.mxu1  ;;  %v30607_v51 = vpop.f32.mrf.mxu0 }
 0x502   : > { %v30609_v37 = vpop.f32.mrf.mxu1  ;;  %v30611_v57 = vpop.f32.mrf.mxu0 }
 0x504   : > { %v30613_v25 = vpop.f32.mrf.mxu1  ;;  %v30615_v11 = vpop.f32.mrf.mxu0 }
 0x506   : > { %v30617_v61 = vpop.f32.mrf.mxu1  ;;  %v30619_v32 = vpop.f32.mrf.mxu0 }
 0x508   : > { %v30621_v13 = vpop.f32.mrf.mxu1  ;;  %v30623_v58 = vpop.f32.mrf.mxu0 }
 0x50a   : > { %v30625_v14 = vpop.f32.mrf.mxu1  ;;  %v30627_v4 = vpop.f32.mrf.mxu0 }
 0x50c   : > { %v30629_v18 = vpop.f32.mrf.mxu1  ;;  %v30631_v27 = vpop.f32.mrf.mxu0 }
 0x50e   : > { %v30633_v40 = vpop.f32.mrf.mxu1  ;;  %v30635_v47 = vpop.f32.mrf.mxu0 }
 0x510   : > { %v30637_v22 = vpop.f32.mrf.mxu1  ;;  %v30639_v42 = vpop.f32.mrf.mxu0 }
 0x512   : > { %v30641_v2 = vpop.f32.mrf.mxu1  ;;  %v30643_v35 = vpop.f32.mrf.mxu0 }
 0x514   : > { %v30645_v38 = vpop.f32.mrf.mxu1  ;;  %v30647_v24 = vpop.f32.mrf.mxu0 }
 0x516   : > { %v30649_v36 = vpop.f32.mrf.mxu1  ;;  %v30651_v23 = vpop.f32.mrf.mxu0 }
 0x518   : > { %v30653_v50 = vpop.f32.mrf.mxu1  ;;  %v30655_v0 = vpop.f32.mrf.mxu0 }
 0x51a   : > { %v30657_v34 = vpop.f32.mrf.mxu1  ;;  %v30659_v16 = vpop.f32.mrf.mxu0 }
 0x51b   : > { %31463 = vst [vmem:[#allocation32_spill] sm:$0xff] %v30657_v34  ;;  %31464 = vst [vmem:[#allocation33_spill] sm:$0xff] %v30659_v16 }
 0x51c   : > { %v30661_v26 = vpop.f32.mrf.mxu1  ;;  %v30663_v43 = vpop.f32.mrf.mxu0 }
 0x51d   : > { %31465 = vst [vmem:[#allocation34_spill] sm:$0xff] %v30661_v26  ;;  %31466 = vst [vmem:[#allocation35_spill] sm:$0xff] %v30663_v43 }
 0x51e   : > { %v30665_v55 = vpop.f32.mrf.mxu1  ;;  %v30667_v10 = vpop.f32.mrf.mxu0 }
 0x51f   : > { %31467 = vst [vmem:[#allocation36_spill] sm:$0xff] %v30665_v55  ;;  %31468 = vst [vmem:[#allocation37_spill] sm:$0xff] %v30667_v10 }
 0x520   : > { %v30669_v12 = vpop.f32.mrf.mxu1  ;;  %v30671_v33 = vpop.f32.mrf.mxu0 }
 0x521   : > { %31469 = vst [vmem:[#allocation38_spill] sm:$0xff] %v30669_v12  ;;  %31470 = vst [vmem:[#allocation3_spill] sm:$0xff] %v30671_v33 }
 0x522   : > { %v30673_v49 = vpop.f32.mrf.mxu1  ;;  %v30675_v56 = vpop.f32.mrf.mxu0 }
 0x523   : > { %31471 = vst [vmem:[#allocation39_spill] sm:$0xff] %v30673_v49  ;;  %31472 = vst [vmem:[#allocation40_spill] sm:$0xff] %v30675_v56 }
 0x524   : > { %v30677_v41 = vpop.f32.mrf.mxu1  ;;  %v30679_v34 = vpop.f32.mrf.mxu0 }
 0x525   : > { %31473 = vst [vmem:[#allocation41_spill] sm:$0xff] %v30677_v41  ;;  %31474 = vst [vmem:[#allocation4_spill] sm:$0xff] %v30679_v34 }
 0x526   : > { %v30681_v16 = vpop.f32.mrf.mxu1  ;;  %v30683_v26 = vpop.f32.mrf.mxu0 }
 0x527   : > { %31475 = vst [vmem:[#allocation5_spill] sm:$0xff] %v30681_v16  ;;  %31476 = vst [vmem:[#allocation6_spill] sm:$0xff] %v30683_v26 }
 0x528   : > { %v30685_v43 = vpop.f32.mrf.mxu1  ;;  %v30687_v55 = vpop.f32.mrf.mxu0 }
 0x529   : > { %31477 = vst [vmem:[#allocation7_spill] sm:$0xff] %v30685_v43  ;;  %31478 = vst [vmem:[#allocation8_spill] sm:$0xff] %v30687_v55  ;;  %v14999_v43 = vadd.f32 %v21650_v59, %v30498_v28  ;;  %v14998_v28 = vadd.f32 %v30599_v21, %v30507_v15  ;;  %v15001_v15 = vadd.f32 %v30607_v51, %v30513_v5 }
 0x52a   : > { %v30689_v10 = vpop.f32.mrf.mxu1  ;;  %v30691_v12 = vpop.f32.mrf.mxu0  ;;  %v15004_v5 = vadd.f32 %v30611_v57, %v30516_v30  ;;  %v15007_v57 = vadd.f32 %v30619_v32, %v30522_v60 }
 0x52b   : > { %31479 = vst [vmem:[#allocation9_spill] sm:$0xff] %v30689_v10  ;;  %31480 = vst [vmem:[#allocation10_spill] sm:$0xff] %v30691_v12  ;;  %v14997_v12 = vadd.f32 %v14870_v7, %v30501_v19  ;;  %v15003_v19 = vadd.f32 %v30603_v9, %v30510_v46 }
 0x52c   : > { %v30693_v33 = vpop.f32.mrf.mxu1  ;;  %v30695_v49 = vpop.f32.mrf.mxu0 }
 0x52d   : > { %31481 = vst [vmem:[#allocation11_spill] sm:$0xff] %v30693_v33  ;;  %31482 = vst [vmem:[#allocation12_spill] sm:$0xff] %v30695_v49 }
 0x52e   : > { %v30697_v56 = vpop.f32.mrf.mxu1  ;;  %v30699_v41 = vpop.f32.mrf.mxu0 }
 0x52f   : > { %31483 = vst [vmem:[#allocation13_spill] sm:$0xff] %v30697_v56  ;;  %31484 = vst [vmem:[#allocation14_spill] sm:$0xff] %v30699_v41  ;;  %v15386_v56 = vadd.f32 %v30593_v48, %v14999_v43  ;;  %v15000_v41 = vadd.f32 %v21651_v17, %v30504_v63  ;;  %v30728_v43 = vld [vmem:[%s30894_s2] ss:$0 sm:$0xff] }
 0x530   : > { %v30701_v16 = vpop.f32.mrf.mxu1  ;;  %v30703_v26 = vpop.f32.mrf.mxu0 }
 0x531   : > { %31485 = vst [vmem:[#allocation15_spill] sm:$0xff] %v30701_v16  ;;  %31486 = vst [vmem:[#allocation16_spill] sm:$0xff] %v30703_v26  ;;  %v15384_v26 = vadd.f32 %v30595_v3, %v14997_v12  ;;  %v15387_v48 = vadd.f32 %v30597_v45, %v15000_v41 }
 0x532   : > { %v30706_v55 = vpop.f32.mrf.mxu1  ;;  %v30708_v10 = vpop.f32.mrf.mxu0 }
 0x533   : > { %31487 = vst [vmem:[#allocation17_spill] sm:$0xff] %v30706_v55 }
 0x534   : > { %v30711_v33 = vpop.f32.mrf.mxu1  ;;  %v30713_v49 = vpop.f32.mrf.mxu0 }
 0x536   : > { %v30717_v34 = vpop.f32.mrf.mxu1  ;;  %v21746_v16 = vpop.f32.mrf.mxu0 }
 0x537   : > { %v15772_v59 = vadd.f32 %v21746_v16, %v15386_v56  ;;  %v15385_v56 = vadd.f32 %v30601_v29, %v14998_v28  ;;  %v15388_v29 = vadd.f32 %v30609_v37, %v15001_v15 }
 0x538   : > { %v21794_v55 = vpop.f32.mrf.mxu1  ;;  %v15643_v63 = vpop.f32.mrf.mxu0 }
 0x539   : > { %v16158_v7 = vadd.f32 %v21794_v55, %v15772_v59  ;;  %v15770_v17 = vadd.f32 %v15643_v63, %v15384_v26  ;;  %v15390_v26 = vadd.f32 %v30605_v54, %v15003_v19  ;;  %v15002_v63 = vadd.f32 %v30615_v11, %v30519_v44 }
 0x53a   : > { %v16029_v12 = vpop.f32.mrf.mxu1  ;;  %v21747_v46 = vpop.f32.mrf.mxu0  ;;  %v15005_v11 = vadd.f32 %v30623_v58, %v30525_v39 }
 0x53b   : > { %v16222_v16 = vadd.f32 %v30728_v43, %v16158_v7  ;;  %v16156_v3 = vadd.f32 %v16029_v12, %v15770_v17  ;;  %v15773_v41 = vadd.f32 %v21747_v46, %v15387_v48  ;;  %v15391_v17 = vadd.f32 %v30613_v25, %v15004_v5 }
 0x53c   : > { %v21795_v55 = vpop.f32.mrf.mxu1  ;;  %v15646_v45 = vpop.f32.mrf.mxu0 }
 0x53d   : > { %16254 = vst [vmem:[%s30736_s26 + $0x10] sm:$0xff] %v16222_v16  ;;  %v16220_v21 = vadd.f32 %v30728_v43, %v16156_v3  ;;  %v16159_v9 = vadd.f32 %v21795_v55, %v15773_v41  ;;  %v15771_v51 = vadd.f32 %v15646_v45, %v15385_v56  ;;  %v15389_v56 = vadd.f32 %v30617_v61, %v15002_v63 }
 0x53e   : > { %v16032_v59 = vpop.f32.mrf.mxu1  ;;  %v21750_v28 = vpop.f32.mrf.mxu0  ;;  %v15394_v3 = vadd.f32 %v30621_v13, %v15007_v57  ;;  %v15008_v55 = vadd.f32 %v30627_v4, %v30528_v53  ;;  %v15392_v45 = vadd.f32 %v30625_v14, %v15005_v11  ;;  %v15011_v4 = vadd.f32 %v30635_v47, %v30534_v31 }
 0x53f   : > { %16252 = vst [vmem:[%s30736_s26] sm:$0xff] %v16220_v21  ;;  %v16223_v54 = vadd.f32 %v30728_v43, %v16159_v9  ;;  %v16157_v19 = vadd.f32 %v16032_v59, %v15771_v51  ;;  %v15776_v48 = vadd.f32 %v21750_v28, %v15390_v26  ;;  %v15006_v21 = vadd.f32 %v30631_v27, %v30531_v52 }
 0x540   : > { %v21798_v30 = vpop.f32.mrf.mxu1  ;;  %v15659_v7 = vpop.f32.mrf.mxu0  ;;  %v15009_v27 = vadd.f32 %v30639_v42, %v30537_v8 }
 0x541   : > { %16255 = vst [vmem:[%s30736_s26 + $0x18] sm:$0xff] %v16223_v54  ;;  %v16221_v37 = vadd.f32 %v30728_v43, %v16157_v19  ;;  %v16162_v12 = vadd.f32 %v21798_v30, %v15776_v48  ;;  %v15774_v15 = vadd.f32 %v15659_v7, %v15388_v29  ;;  %v15395_v29 = vadd.f32 %v30629_v18, %v15008_v55 }
 0x542   : > { %v16045_v44 = vpop.f32.mrf.mxu1  ;;  %v21751_v46 = vpop.f32.mrf.mxu0  ;;  %v15393_v19 = vadd.f32 %v30633_v40, %v15006_v21  ;;  %v15398_v30 = vadd.f32 %v30637_v22, %v15011_v4  ;;  %v15012_v7 = vadd.f32 %v30643_v35, %v30540_v1  ;;  %v15015_v35 = vadd.f32 %v30651_v23, %v30546_v20 }
 0x543   : > { %16253 = vst [vmem:[%s30736_s26 + $0x8] sm:$0xff] %v16221_v37  ;;  %v16226_v60 = vadd.f32 %v30728_v43, %v16162_v12  ;;  %v16160_v32 = vadd.f32 %v16045_v44, %v15774_v15  ;;  %v15777_v16 = vadd.f32 %v21751_v46, %v15391_v17  ;;  %v15396_v37 = vadd.f32 %v30641_v2, %v15009_v27 }
 0x544   : > { %v21799_v25 = vpop.f32.mrf.mxu1  ;;  %v15662_v41 = vpop.f32.mrf.mxu0  ;;  %v15010_v15 = vadd.f32 %v30647_v24, %v30543_v62  ;;  %v15013_v24 = vadd.f32 %v30655_v0, %v30549_v6 }
 0x545   : > { %16258 = vst [vmem:[%s30736_s26 + $0x30] sm:$0xff] %v16226_v60  ;;  %v16224_v39 = vadd.f32 %v30728_v43, %v16160_v32  ;;  %v16163_v58 = vadd.f32 %v21799_v25, %v15777_v16  ;;  %v15775_v26 = vadd.f32 %v15662_v41, %v15389_v56  ;;  %v15399_v56 = vadd.f32 %v30645_v38, %v15012_v7  ;;  %v31498_v7 = vld [vmem:[#allocation36_spill] sm:$0xff] }
 0x546   : > { %v16048_v61 = vpop.f32.mrf.mxu1  ;;  %v21754_v5 = vpop.f32.mrf.mxu0  ;;  %v15397_v25 = vadd.f32 %v30649_v36, %v15010_v15  ;;  %v15402_v41 = vadd.f32 %v30653_v50, %v15015_v35 }
 0x547   : > { %16256 = vst [vmem:[%s30736_s26 + $0x20] sm:$0xff] %v16224_v39  ;;  %v16227_v13 = vadd.f32 %v30728_v43, %v16163_v58  ;;  %v16161_v9 = vadd.f32 %v16048_v61, %v15775_v26  ;;  %v15780_v51 = vadd.f32 %v21754_v5, %v15394_v3  ;;  %v31488_v39 = vld [vmem:[#allocation42_spill] sm:$0xff]  ;;  %v31489_v58 = vld [vmem:[#allocation33_spill] sm:$0xff] }
 0x548   : > { %v21802_v53 = vpop.f32.mrf.mxu1  ;;  %v15675_v59 = vpop.f32.mrf.mxu0  ;;  %v15016_v26 = vadd.f32 %v31489_v58, %v31488_v39 }
 0x549   : > { %16259 = vst [vmem:[%s30736_s26 + $0x38] sm:$0xff] %v16227_v13  ;;  %v16225_v14 = vadd.f32 %v30728_v43, %v16161_v9  ;;  %v16166_v28 = vadd.f32 %v21802_v53, %v15780_v51  ;;  %v15778_v63 = vadd.f32 %v15675_v59, %v15392_v45  ;;  %v31490_v45 = vld [vmem:[#allocation32_spill] sm:$0xff]  ;;  %v31492_v9 = vld [vmem:[#allocation35_spill] sm:$0xff] }
 0x54a   : > { %v16061_v52 = vpop.f32.mrf.mxu1  ;;  %v21755_v54 = vpop.f32.mrf.mxu0  ;;  %v15400_v5 = vadd.f32 %v31490_v45, %v15013_v24  ;;  %v31491_v13 = vld [vmem:[#allocation20_spill] sm:$0xff] }
 0x54b   : > { %16257 = vst [vmem:[%s30736_s26 + $0x28] sm:$0xff] %v16225_v14  ;;  %v16230_v31 = vadd.f32 %v30728_v43, %v16166_v28  ;;  %v16164_v47 = vadd.f32 %v16061_v52, %v15778_v63  ;;  %v15781_v48 = vadd.f32 %v21755_v54, %v15395_v29  ;;  %v15014_v51 = vadd.f32 %v31492_v9, %v31491_v13  ;;  %v31493_v29 = vld [vmem:[#allocation21_spill] sm:$0xff]  ;;  %v31495_v52 = vld [vmem:[#allocation34_spill] sm:$0xff]  ;;  %v31503_v24 = vld [vmem:[#allocation24_spill] sm:$0xff] }
 0x54c   : > { %v21803_v18 = vpop.f32.mrf.mxu1  ;;  %v15678_v57 = vpop.f32.mrf.mxu0  ;;  %v31494_v14 = vld [vmem:[#allocation37_spill] sm:$0xff]  ;;  %v15403_v27 = vadd.f32 %v31495_v52, %v15016_v26  ;;  %v31512_v52 = vld [vmem:[#allocation2_spill] sm:$0xff] }
 0x54d   : > { %16262 = vst [vmem:[%s30736_s26 + $0x50] sm:$0xff] %v16230_v31  ;;  %v16228_v8 = vadd.f32 %v30728_v43, %v16164_v47  ;;  %v16167_v42 = vadd.f32 %v21803_v18, %v15781_v48  ;;  %v15779_v17 = vadd.f32 %v15678_v57, %v15393_v19  ;;  %v15019_v28 = vadd.f32 %v31494_v14, %v31493_v29  ;;  %v31496_v48 = vld [vmem:[#allocation22_spill] sm:$0xff]  ;;  %v31497_v18 = vld [vmem:[#allocation3_spill] sm:$0xff]  ;;  %v31507_v26 = vld [vmem:[#allocation41_spill] sm:$0xff] }
 0x54e   : > { %v16064_v40 = vpop.f32.mrf.mxu1  ;;  %v21758_v12 = vpop.f32.mrf.mxu0  ;;  %v31511_v14 = vld [vmem:[#allocation7_spill] sm:$0xff] }
 0x54f   : > { %16260 = vst [vmem:[%s30736_s26 + $0x40] sm:$0xff] %v16228_v8  ;;  %v16231_v22 = vadd.f32 %v30728_v43, %v16167_v42  ;;  %v16165_v44 = vadd.f32 %v16064_v40, %v15779_v17  ;;  %v15784_v11 = vadd.f32 %v21758_v12, %v15398_v30  ;;  %v15017_v30 = vadd.f32 %v31497_v18, %v31496_v48  ;;  %v31499_v12 = vld [vmem:[#allocation38_spill] sm:$0xff]  ;;  %v31514_v18 = vld [vmem:[#allocation9_spill] sm:$0xff] }
 0x550   : > { %v21806_v1 = vpop.f32.mrf.mxu1  ;;  %v15691_v46 = vpop.f32.mrf.mxu0  ;;  %v15401_v8 = vadd.f32 %v31498_v7, %v15014_v51  ;;  %v15406_v15 = vadd.f32 %v31499_v12, %v15019_v28  ;;  %v31510_v51 = vld [vmem:[#allocation5_spill] sm:$0xff]  ;;  %v31515_v7 = vld [vmem:[#allocation27_spill] sm:$0xff] }
 0x551   : > { %16263 = vst [vmem:[%s30736_s26 + $0x58] sm:$0xff] %v16231_v22  ;;  %v16229_v2 = vadd.f32 %v30728_v43, %v16165_v44  ;;  %v16170_v60 = vadd.f32 %v21806_v1, %v15784_v11  ;;  %v15782_v32 = vadd.f32 %v15691_v46, %v15396_v37  ;;  %v31500_v44 = vld [vmem:[#allocation23_spill] sm:$0xff]  ;;  %v31501_v11 = vld [vmem:[#allocation40_spill] sm:$0xff] }
 0x552   : > { %v16077_v62 = vpop.f32.mrf.mxu1  ;;  %v21759_v16 = vpop.f32.mrf.mxu0  ;;  %v15020_v1 = vadd.f32 %v31501_v11, %v31500_v44 }
 0x553   : > { %16261 = vst [vmem:[%s30736_s26 + $0x48] sm:$0xff] %v16229_v2  ;;  %v16234_v20 = vadd.f32 %v30728_v43, %v16170_v60  ;;  %v16168_v23 = vadd.f32 %v16077_v62, %v15782_v32  ;;  %v15785_v3 = vadd.f32 %v21759_v16, %v15399_v56  ;;  %v31502_v60 = vld [vmem:[#allocation39_spill] sm:$0xff]  ;;  %v31504_v16 = vld [vmem:[#allocation4_spill] sm:$0xff] }
 0x554   : > { %v21807_v38 = vpop.f32.mrf.mxu1  ;;  %v15694_v55 = vpop.f32.mrf.mxu0  ;;  %v15404_v32 = vadd.f32 %v31502_v60, %v15017_v30 }
 0x555   : > { %16266 = vst [vmem:[%s30736_s26 + $0x70] sm:$0xff] %v16234_v20  ;;  %v16232_v6 = vadd.f32 %v30728_v43, %v16168_v23  ;;  %v16171_v0 = vadd.f32 %v21807_v38, %v15785_v3  ;;  %v15783_v61 = vadd.f32 %v15694_v55, %v15397_v25  ;;  %v15018_v25 = vadd.f32 %v31504_v16, %v31503_v24  ;;  %v31506_v55 = vld [vmem:[#allocation6_spill] sm:$0xff] }
 0x556   : > { %v16080_v36 = vpop.f32.mrf.mxu1  ;;  %v21762_v21 = vpop.f32.mrf.mxu0 }
 0x557   : > { %16264 = vst [vmem:[%s30736_s26 + $0x60] sm:$0xff] %v16232_v6  ;;  %v16235_v50 = vadd.f32 %v30728_v43, %v16171_v0  ;;  %v16169_v53 = vadd.f32 %v16080_v36, %v15783_v61  ;;  %v15788_v4 = vadd.f32 %v21762_v21, %v15402_v41  ;;  %v31505_v41 = vld [vmem:[#allocation25_spill] sm:$0xff]  ;;  %v15407_v6 = vadd.f32 %v31507_v26, %v15020_v1  ;;  %v31509_v21 = vld [vmem:[#allocation8_spill] sm:$0xff]  ;;  %v31519_v1 = vld [vmem:[#allocation11_spill] sm:$0xff] }
 0x558   : > { %v21810_v59 = vpop.f32.mrf.mxu1  ;;  %v15707_v63 = vpop.f32.mrf.mxu0  ;;  %v15023_v39 = vadd.f32 %v31506_v55, %v31505_v41  ;;  %v31523_v55 = vld [vmem:[#allocation15_spill] sm:$0xff]  ;;  %v31524_v26 = vld [vmem:[#allocation30_spill] sm:$0xff] }
 0x559   : > { %16267 = vst [vmem:[%s30736_s26 + $0x78] sm:$0xff] %v16235_v50  ;;  %v16233_v54 = vadd.f32 %v30728_v43, %v16169_v53  ;;  %v16174_v19 = vadd.f32 %v21810_v59, %v15788_v4  ;;  %v15786_v31 = vadd.f32 %v15707_v63, %v15400_v5  ;;  %v31508_v5 = vld [vmem:[#allocation26_spill] sm:$0xff]  ;;  %v15405_v50 = vadd.f32 %v31510_v51, %v15018_v25  ;;  %v31522_v25 = vld [vmem:[#allocation13_spill] sm:$0xff] }
 0x55a   : > { %v16093_v47 = vpop.f32.mrf.mxu1  ;;  %v21763_v57 = vpop.f32.mrf.mxu0  ;;  %v15021_v13 = vadd.f32 %v31509_v21, %v31508_v5  ;;  %v15410_v28 = vadd.f32 %v31511_v14, %v15023_v39  ;;  %v31525_v5 = vld [vmem:[#allocation17_spill] sm:$0xff] }
 0x55b   : > { %16265 = vst [vmem:[%s30736_s26 + $0x68] sm:$0xff] %v16233_v54  ;;  %v16238_v42 = vadd.f32 %v30728_v43, %v16174_v19  ;;  %v16172_v17 = vadd.f32 %v16093_v47, %v15786_v31  ;;  %v15789_v40 = vadd.f32 %v21763_v57, %v15403_v27  ;;  %v31513_v27 = vld [vmem:[#allocation10_spill] sm:$0xff] }
 0x55c   : > { %v21811_v37 = vpop.f32.mrf.mxu1  ;;  %v15710_v22 = vpop.f32.mrf.mxu0  ;;  %v15024_v54 = vadd.f32 %v31513_v27, %v31512_v52  ;;  %v15408_v30 = vadd.f32 %v31514_v18, %v15021_v13 }
 0x55d   : > { %16270 = vst [vmem:[%s30736_s26 + $0x90] sm:$0xff] %v16238_v42  ;;  %v16236_v35 = vadd.f32 %v30728_v43, %v16172_v17  ;;  %v16175_v46 = vadd.f32 %v21811_v37, %v15789_v40  ;;  %v15787_v56 = vadd.f32 %v15710_v22, %v15401_v8  ;;  %v31516_v8 = vld [vmem:[#allocation12_spill] sm:$0xff]  ;;  %v31518_v22 = vld [vmem:[#allocation14_spill] sm:$0xff] }
 0x55e   : > { %v16096_v2 = vpop.f32.mrf.mxu1  ;;  %v21766_v62 = vpop.f32.mrf.mxu0  ;;  %v15022_v42 = vadd.f32 %v31516_v8, %v31515_v7 }
 0x55f   : > { %16268 = vst [vmem:[%s30736_s26 + $0x80] sm:$0xff] %v16236_v35  ;;  %v16239_v20 = vadd.f32 %v30728_v43, %v16175_v46  ;;  %v16173_v23 = vadd.f32 %v16096_v2, %v15787_v56  ;;  %v15792_v3 = vadd.f32 %v21766_v62, %v15406_v15  ;;  %v31517_v15 = vld [vmem:[#allocation28_spill] sm:$0xff]  ;;  %v15411_v35 = vadd.f32 %v31519_v1, %v15024_v54 }
 0x560   : > { %v21814_v38 = vpop.f32.mrf.mxu1  ;;  %v15723_v58 = vpop.f32.mrf.mxu0  ;;  %v15027_v44 = vadd.f32 %v31518_v22, %v31517_v15  ;;  %v31521_v62 = vld [vmem:[#allocation16_spill] sm:$0xff] }
 0x561   : > { %16271 = vst [vmem:[%s30736_s26 + $0x98] sm:$0xff] %v16239_v20  ;;  %v16237_v0 = vadd.f32 %v30728_v43, %v16173_v23  ;;  %v16178_v61 = vadd.f32 %v21814_v38, %v15792_v3  ;;  %v15790_v36 = vadd.f32 %v15723_v58, %v15404_v32  ;;  %v31520_v32 = vld [vmem:[#allocation29_spill] sm:$0xff]  ;;  %v15409_v20 = vadd.f32 %v31522_v25, %v15022_v42 }
 0x562   : > { %v16109_v45 = vpop.f32.mrf.mxu1  ;;  %v21767_v9 = vpop.f32.mrf.mxu0  ;;  %v15025_v24 = vadd.f32 %v31521_v62, %v31520_v32  ;;  %v15414_v39 = vadd.f32 %v31523_v55, %v15027_v44 }
 0x563   : > { %16269 = vst [vmem:[%s30736_s26 + $0x88] sm:$0xff] %v16237_v0  ;;  %v16242_v53 = vadd.f32 %v30728_v43, %v16178_v61  ;;  %v16176_v4 = vadd.f32 %v16109_v45, %v15790_v36  ;;  %v15793_v59 = vadd.f32 %v21767_v9, %v15407_v6  ;;  %v15028_v6 = vadd.f32 %v30708_v10, %v31524_v26  ;;  %v31526_v9 = vld [vmem:[#allocation31_spill] sm:$0xff] }
 0x564   : > { %v21815_v29 = vpop.f32.mrf.mxu1  ;;  %v15726_v63 = vpop.f32.mrf.mxu0  ;;  %v15412_v21 = vadd.f32 %v31525_v5, %v15025_v24  ;;  %v15026_v51 = vadd.f32 %v30713_v49, %v31526_v9 }
 0x565   : > { %16274 = vst [vmem:[%s30736_s26 + $0xb0] sm:$0xff] %v16242_v53  ;;  %v16240_v19 = vadd.f32 %v30728_v43, %v16176_v4  ;;  %v16179_v31 = vadd.f32 %v21815_v29, %v15793_v59  ;;  %v15791_v47 = vadd.f32 %v15726_v63, %v15405_v50  ;;  %v15415_v29 = vadd.f32 %v30711_v33, %v15028_v6 }
 0x566   : > { %v16112_v48 = vpop.f32.mrf.mxu1  ;;  %v21770_v57 = vpop.f32.mrf.mxu0  ;;  %v15413_v49 = vadd.f32 %v30717_v34, %v15026_v51 }
 0x567   : > { %16272 = vst [vmem:[%s30736_s26 + $0xa0] sm:$0xff] %v16240_v19  ;;  %v16243_v17 = vadd.f32 %v30728_v43, %v16179_v31  ;;  %v16177_v40 = vadd.f32 %v16112_v48, %v15791_v47  ;;  %v15796_v37 = vadd.f32 %v21770_v57, %v15410_v28 }
 0x568   : > { %v21818_v12 = vpop.f32.mrf.mxu1  ;;  %v15739_v11 = vpop.f32.mrf.mxu0 }
 0x569   : > { %16275 = vst [vmem:[%s30736_s26 + $0xb8] sm:$0xff] %v16243_v17  ;;  %v16241_v46 = vadd.f32 %v30728_v43, %v16177_v40  ;;  %v16182_v56 = vadd.f32 %v21818_v12, %v15796_v37  ;;  %v15794_v2 = vadd.f32 %v15739_v11, %v15408_v30 }
 0x56a   : > { %v16125_v60 = vpop.f32.mrf.mxu1  ;;  %v21771_v16 = vpop.f32.mrf.mxu0 }
 0x56b   : > { %16273 = vst [vmem:[%s30736_s26 + $0xa8] sm:$0xff] %v16241_v46  ;;  %v16246_v23 = vadd.f32 %v30728_v43, %v16182_v56  ;;  %v16180_v3 = vadd.f32 %v16125_v60, %v15794_v2  ;;  %v15797_v38 = vadd.f32 %v21771_v16, %v15411_v35 }
 0x56c   : > { %v21819_v41 = vpop.f32.mrf.mxu1  ;;  %v15742_v58 = vpop.f32.mrf.mxu0 }
 0x56d   : > { %16278 = vst [vmem:[%s30736_s26 + $0xd0] sm:$0xff] %v16246_v23  ;;  %v16244_v0 = vadd.f32 %v30728_v43, %v16180_v3  ;;  %v16183_v61 = vadd.f32 %v21819_v41, %v15797_v38  ;;  %v15795_v36 = vadd.f32 %v15742_v58, %v15409_v20 }
 0x56e   : > { %v16128_v45 = vpop.f32.mrf.mxu1  ;;  %v21774_v13 = vpop.f32.mrf.mxu0 }
 0x56f   : > { %16276 = vst [vmem:[%s30736_s26 + $0xc0] sm:$0xff] %v16244_v0  ;;  %v16247_v50 = vadd.f32 %v30728_v43, %v16183_v61  ;;  %v16181_v53 = vadd.f32 %v16128_v45, %v15795_v36  ;;  %v15800_v4 = vadd.f32 %v21774_v13, %v15414_v39 }
 0x570   : > { %v21822_v10 = vpop.f32.mrf.mxu1  ;;  %v15755_v59 = vpop.f32.mrf.mxu0 }
 0x571   : > { %16279 = vst [vmem:[%s30736_s26 + $0xd8] sm:$0xff] %v16247_v50  ;;  %v16245_v14 = vadd.f32 %v30728_v43, %v16181_v53  ;;  %v16186_v28 = vadd.f32 %v21822_v10, %v15800_v4  ;;  %v15798_v63 = vadd.f32 %v15755_v59, %v15412_v21 }
 0x572   : > { %v16141_v52 = vpop.f32.mrf.mxu1  ;;  %v21775_v27 = vpop.f32.mrf.mxu0 }
 0x573   : > { %16277 = vst [vmem:[%s30736_s26 + $0xc8] sm:$0xff] %v16245_v14  ;;  %v16250_v54 = vadd.f32 %v30728_v43, %v16186_v28  ;;  %v16184_v19 = vadd.f32 %v16141_v52, %v15798_v63  ;;  %v15801_v31 = vadd.f32 %v21775_v27, %v15415_v29 }
 0x574   : > { %v21823_v47 = vpop.f32.mrf.mxu1  ;;  %v15758_v48 = vpop.f32.mrf.mxu0 }
 0x575   : > { %16282 = vst [vmem:[%s30736_s26 + $0xf0] sm:$0xff] %v16250_v54  ;;  %v16248_v33 = vadd.f32 %v30728_v43, %v16184_v19  ;;  %v16187_v18 = vadd.f32 %v21823_v47, %v15801_v31  ;;  %v15799_v30 = vadd.f32 %v15758_v48, %v15413_v49 }
 0x576   : > { %v16144_v57 = vpop.f32.mrf.mxu1 }
 0x577   : > { %16280 = vst [vmem:[%s30736_s26 + $0xe0] sm:$0xff] %v16248_v33  ;;  %v16251_v7 = vadd.f32 %v30728_v43, %v16187_v18  ;;  %v16185_v8 = vadd.f32 %v16144_v57, %v15799_v30 }
 0x579   : > { %16283 = vst [vmem:[%s30736_s26 + $0xf8] sm:$0xff] %v16251_v7  ;;  %v16249_v34 = vadd.f32 %v30728_v43, %v16185_v8 }
 0x57b   : > { %16281 = vst [vmem:[%s30736_s26 + $0xe8] sm:$0xff] %v16249_v34 }
 0x57c PF: > { %s13_s14 = sadd.s32 1, %s22414_s14   ;;  %s31527_s12 = smov %s22410_s13 }
 0x57d   : > { %p10_p5 = scmp.ge.s32.totalorder %s13_s14, 4   ;;  %s31528_s13 = smov %s31530_s15 }
 0x57f   :  { %12 = sbr.rel (!%p10_p5) target bundleno = 2 (0x2), region = 112 }

</bundles_post_ra>
